<compile_context>
chip_gen: v5e
topology: v5e:2x2
jax: 0.10.0
libtpu: 0.0.40
codegen_flags: <defaults>
</compile_context>

<pallas_src>
import functools
import math

import numpy as np
import jax
import jax.numpy as jnp
from jax import lax
from jax.experimental import pallas as pl
from jax.experimental.pallas import tpu as pltpu

LATENT_SIDE = 10
LATENT_DIM = LATENT_SIDE * LATENT_SIDE   # 100
LATENT_PAD = 128                         # lane-dense padded latent width
ENC_FEAT = 32 * 7 * 7                    # 1568

# Per-unit grid coordinates of the (padded) SOM.  Passed to the kernel as
# [1,128] inputs (the previous version captured them as constants -> trace
# error "kernel captures constants ... pass them as inputs").
_jj = np.arange(LATENT_PAD)
_SOM_ROWS = np.where(_jj < LATENT_DIM, _jj // LATENT_SIDE, 0).astype(np.float32)[None, :]
_SOM_COLS = np.where(_jj < LATENT_DIM, _jj % LATENT_SIDE, 0).astype(np.float32)[None, :]


def _round_up(x, m):
    return ((x + m - 1) // m) * m


def _vmem_capacity_bytes():
    try:
        return int(pltpu.get_tpu_info().vmem_capacity_bytes)
    except Exception:
        return 64 * 1024 * 1024          # conservative (v7x-sized) fallback


_VMEM_CAP = _vmem_capacity_bytes()
# v7x (64 MiB physical VMEM): 32 MiB scoped limit, TM<=512.
# v5e/v6e (128 MiB): 64 MiB scoped limit, TM<=1024.
_VMEM_LIMIT = min(max(_VMEM_CAP // 2, 32 * 1024 * 1024), 96 * 1024 * 1024)
_TM_MAX = 1024 if _VMEM_CAP >= 100 * 1024 * 1024 else 512


def _choose_tm(M, tm_max):
    """Row tile for the conv GEMMs: prefer a multiple-of-8 divisor of M (no
    activation padding pass in XLA) and >=2 grid steps with >=128 rows so the
    'parallel' grid can shard across v7x's two TensorCores when M is large."""
    tm_max = max(8, min(tm_max, M))
    if M % 8 != 0:
        return _round_up(tm_max, 8)                  # ragged M: pad path
    cands = [t for t in range(8, tm_max + 1, 8) if M % t == 0]
    for t in reversed(cands):
        if t >= 128 and M // t >= 2:
            return t
    return cands[-1]


def _choose_tn(N, tn_max=4096):
    """Lane tile for the final transposed deconv GEMM: (TN, padded N)."""
    cands = [t for t in range(128, min(tn_max, N) + 1, 128) if N % t == 0]
    if cands:
        return cands[-1], N
    if N <= 8192:
        return N, N                                  # single small lane-dense block
    npad = _round_up(N, 1024)
    return 1024, npad


# ----------------------------------------------------------------------------
# Generic GEMM + bias + activation kernel (M-tiled 'parallel' grid, bf16 MXU)
# ----------------------------------------------------------------------------
def _gemm_bias_act_kernel(x_ref, w_ref, b_ref, o_ref, *, act):
    acc = jnp.dot(x_ref[...], w_ref[...], preferred_element_type=jnp.float32)
    acc = acc + b_ref[...]
    if act == "relu":
        acc = jnp.maximum(acc, 0.0)
    elif act == "sigmoid":
        acc = jax.nn.sigmoid(acc)
    o_ref[...] = acc.astype(o_ref.dtype)


def matmul_bias_act(x, w, b_row, act="none", out_dtype=jnp.float32):
    """[M,K] @ [K,N] + b with fused activation.  N is a multiple of 128
    (weights stored pre-padded with zero output columns) so every store is an
    unmasked lane-dense vst.  M is tiled over a 'parallel' grid."""
    M, K = x.shape
    K2, N = w.shape
    assert K == K2 and N % 128 == 0, (K, K2, N)
    x = x.astype(jnp.bfloat16)

    TM = _choose_tm(M, _TM_MAX)
    Mp = _round_up(M, TM)
    if Mp != M:
        x = jnp.pad(x, ((0, Mp - M), (0, 0)))

    out = pl.pallas_call(
        functools.partial(_gemm_bias_act_kernel, act=act),
        out_shape=jax.ShapeDtypeStruct((Mp, N), out_dtype),
        grid=(Mp // TM,),
        in_specs=[pl.BlockSpec((TM, K), lambda i: (i, 0)),
                  pl.BlockSpec((K, N), lambda i: (0, 0)),
                  pl.BlockSpec((1, N), lambda i: (0, 0))],
        out_specs=pl.BlockSpec((TM, N), lambda i: (i, 0)),
        compiler_params=pltpu.CompilerParams(
            dimension_semantics=("parallel",),
            vmem_limit_bytes=_VMEM_LIMIT),
    )(x, w, b_row)
    return out[:M] if Mp != M else out


# ----------------------------------------------------------------------------
# Fused latent kernel: fc1 -> TopologicalMap(SOM) -> fc2 -> fc3  (batch-tiled)
# ----------------------------------------------------------------------------
def _fused_latent_kernel(x_ref, fc1w_ref, fc1b_ref, somw_ref, wsq_ref,
                         rows_ref, cols_ref, ninv_ref,
                         fc2w_ref, fc2b_ref, fc3w_ref, fc3b_ref,
                         n2phi_ref, dec_ref, *, n_valid):
    # fc1 + relu (bf16 operands on the MXU, f32 accumulate)
    h1 = jnp.dot(x_ref[...], fc1w_ref[...], preferred_element_type=jnp.float32)
    h1 = jnp.maximum(h1 + fc1b_ref[...], 0.0)                       # [TB,256] f32

    # SOM squared distances.  Cross term kept in f32 (bf16x3 multi-pass on the
    # MXU) so n2_phi matches an f32 reference; this is ~10% of latent-stage MXU
    # work -- cost explicitly accepted per review.
    w = somw_ref[...]                                                # [256,128] f32
    xsq = jnp.sum(h1 * h1, axis=1, keepdims=True)                    # [TB,1]
    cross = jnp.dot(h1, w, preferred_element_type=jnp.float32)       # [TB,128]
    norm2 = jnp.maximum(xsq + wsq_ref[...] - 2.0 * cross, 0.0)       # clamp cancellation

    # Best-matching unit (first-index tie-break); padded units masked out.
    j_i = lax.broadcasted_iota(jnp.int32, norm2.shape, 1)
    j_f = j_i.astype(jnp.float32)
    norm2_m = jnp.where(j_i < n_valid, norm2, jnp.float32(3.4e38))
    minval = jnp.min(norm2_m, axis=1, keepdims=True)
    bmu = jnp.min(jnp.where(norm2_m <= minval, j_f, jnp.float32(LATENT_PAD)),
                  axis=1, keepdims=True)                             # [TB,1]
    at_bmu = j_f == bmu

    # Gaussian neighborhood bump centered on the BMU (grid coords are kernel
    # inputs: no captured constants, no vector int div/mod).
    r_b = jnp.sum(jnp.where(at_bmu, rows_ref[...], 0.0), axis=1, keepdims=True)
    c_b = jnp.sum(jnp.where(at_bmu, cols_ref[...], 0.0), axis=1, keepdims=True)
    d2 = (rows_ref[...] - r_b) ** 2 + (cols_ref[...] - c_b) ** 2
    phi = jnp.exp(d2 * ninv_ref[...])                                # [TB,128]

    n2phi_ref[...] = norm2 * phi                                     # lane-dense store

    # decode: fc2 + relu, fc3 + relu (padded fc2 rows are zero -> pad lanes inert)
    h2 = jnp.dot(phi.astype(jnp.bfloat16), fc2w_ref[...],
                 preferred_element_type=jnp.float32)
    h2 = jnp.maximum(h2 + fc2b_ref[...], 0.0)                        # [TB,256]
    h3 = jnp.dot(h2.astype(jnp.bfloat16), fc3w_ref[...],
                 preferred_element_type=jnp.float32)
    dec_ref[...] = jnp.maximum(h3 + fc3b_ref[...], 0.0).astype(dec_ref.dtype)


def fused_latent(h_flat, params, neighborhood_std):
    """Single batch-tiled Pallas kernel for fc1 -> TopologicalMap -> fc2 -> fc3."""
    B = h_flat.shape[0]
    # TB=128 keeps the ~6 simultaneously-live [TB,128] f32 SOM temporaries in
    # vregs (per review) and gives >=2 'parallel' steps (v7x megacore) at B>=256.
    TB = min(128, _round_up(B, 16))
    Bp = _round_up(B, TB)
    x = h_flat.astype(jnp.bfloat16)
    if Bp != B:
        x = jnp.pad(x, ((0, Bp - B), (0, 0)))

    std = jnp.asarray(neighborhood_std, jnp.float32)
    ninv = jnp.full((1, LATENT_PAD), -1.0, jnp.float32) / (2.0 * std * std)
    # Hoisted out of the per-tile body: loop-invariant across batch tiles.
    wsq = jnp.sum(params["som_w"] * params["som_w"], axis=0, keepdims=True)
    rows = jnp.asarray(_SOM_ROWS)
    cols = jnp.asarray(_SOM_COLS)

    bcast = lambda i: (0, 0)
    tile = lambda i: (i, 0)
    n2phi, dec = pl.pallas_call(
        functools.partial(_fused_latent_kernel, n_valid=LATENT_DIM),
        out_shape=(jax.ShapeDtypeStruct((Bp, LATENT_PAD), jnp.float32),
                   jax.ShapeDtypeStruct((Bp, ENC_FEAT), jnp.bfloat16)),
        grid=(Bp // TB,),
        in_specs=[pl.BlockSpec((TB, ENC_FEAT), tile),        # h_flat tile
                  pl.BlockSpec((ENC_FEAT, 256), bcast),      # fc1_w (resident)
                  pl.BlockSpec((1, 256), bcast),             # fc1_b
                  pl.BlockSpec((256, LATENT_PAD), bcast),    # som_w (f32)
                  pl.BlockSpec((1, LATENT_PAD), bcast),      # wsq
                  pl.BlockSpec((1, LATENT_PAD), bcast),      # unit rows
                  pl.BlockSpec((1, LATENT_PAD), bcast),      # unit cols
                  pl.BlockSpec((1, LATENT_PAD), bcast),      # -1/(2 std^2)
                  pl.BlockSpec((LATENT_PAD, 256), bcast),    # fc2_w
                  pl.BlockSpec((1, 256), bcast),             # fc2_b
                  pl.BlockSpec((256, ENC_FEAT), bcast),      # fc3_w
                  pl.BlockSpec((1, ENC_FEAT), bcast)],       # fc3_b
        out_specs=(pl.BlockSpec((TB, LATENT_PAD), tile),
                   pl.BlockSpec((TB, ENC_FEAT), tile)),
        compiler_params=pltpu.CompilerParams(
            dimension_semantics=("parallel",),
            vmem_limit_bytes=_VMEM_LIMIT),
    )(x, params["fc1_w"], params["fc1_b"], params["som_w"], wsq, rows, cols, ninv,
      params["fc2_w"], params["fc2_b"], params["fc3_w"], params["fc3_b"])

    if Bp != B:
        n2phi = n2phi[:B]
        dec = dec[:B]
    return n2phi[:, :LATENT_DIM], dec


# ----------------------------------------------------------------------------
# Conv / ConvTranspose glue (NHWC im2col in XLA, GEMM in Pallas)
# ----------------------------------------------------------------------------
def _im2col_nhwc(x, kh, kw, stride, pad):
    """NHWC im2col -> [B*OH*OW, kh*kw*C], built directly in (i, j, c) K-order."""
    B, H, W, C = x.shape
    xp = jnp.pad(x, ((0, 0), (pad, pad), (pad, pad), (0, 0)))
    OH = (H + 2 * pad - kh) // stride + 1
    OW = (W + 2 * pad - kw) // stride + 1
    patches = []
    for i in range(kh):
        for j in range(kw):
            patches.append(xp[:, i:i + stride * (OH - 1) + 1:stride,
                                 j:j + stride * (OW - 1) + 1:stride, :])
    cols = jnp.concatenate(patches, axis=3)           # [B, OH, OW, kh*kw*C]
    return cols.reshape(B * OH * OW, kh * kw * C), OH, OW


def _zero_dilate_nhwc(x, s):
    """Insert (s-1) zeros between elements along H and W (pad+reshape, no scatter)."""
    if s == 1:
        return x
    B, H, W, C = x.shape
    x = jnp.pad(x[:, :, :, None, :], ((0, 0), (0, 0), (0, 0), (0, s - 1), (0, 0)))
    x = x.reshape(B, H, W * s, C)[:, :, :(W - 1) * s + 1, :]
    Wd = (W - 1) * s + 1
    x = jnp.pad(x[:, :, None, :, :], ((0, 0), (0, 0), (0, s - 1), (0, 0), (0, 0)))
    x = x.reshape(B, H * s, Wd, C)[:, :(H - 1) * s + 1, :, :]
    return x


def _zero_dilate_cbhw(x, s):
    """Same zero-dilation for channel-major [C, B, H, W] input (final deconv)."""
    if s == 1:
        return x
    C, B, H, W = x.shape
    x = jnp.pad(x[..., None], ((0, 0), (0, 0), (0, 0), (0, 0), (0, s - 1)))
    x = x.reshape(C, B, H, W * s)[..., :(W - 1) * s + 1]
    Wd = (W - 1) * s + 1
    x = jnp.pad(x[:, :, :, None, :], ((0, 0), (0, 0), (0, 0), (0, s - 1), (0, 0)))
    x = x.reshape(C, B, H * s, Wd)[:, :, :(H - 1) * s + 1, :]
    return x


def conv2d_gemm(x_nhwc, w_gemm, b_row, n_out, kh, kw, stride, pad, act, out_dtype):
    """NHWC conv as XLA im2col + Pallas GEMM.  Weights are stored pre-padded to
    128 output lanes (unmasked lane-dense stores); valid channels sliced after.
    # TODO(synk): fusing the two tiny encoder convs' im2col into one Pallas
    # kernel would remove the remaining strided-slice/concat XLA glue at small B.
    """
    B = x_nhwc.shape[0]
    cols, OH, OW = _im2col_nhwc(x_nhwc, kh, kw, stride, pad)
    out = matmul_bias_act(cols, w_gemm, b_row, act=act, out_dtype=out_dtype)
    if out.shape[1] != n_out:
        out = out[:, :n_out]
    return out.reshape(B, OH, OW, n_out)


def conv_transpose2d_gemm(x_nhwc, w_gemm, b_row, n_out, kh, kw, stride, pad, act,
                          out_dtype):
    """PyTorch ConvTranspose2d == zero-dilate + stride-1 conv with the flipped,
    in/out-swapped kernel (weight already stored in that GEMM form at init)."""
    xd = _zero_dilate_nhwc(x_nhwc, stride)
    return conv2d_gemm(xd, w_gemm, b_row, n_out, kh, kw, 1, kh - 1 - pad, act,
                       out_dtype)


def _rowvec_gemm_sigmoid_kernel(w_ref, c_ref, b_ref, o_ref):
    acc = jnp.dot(w_ref[...], c_ref[...], preferred_element_type=jnp.float32)
    o_ref[...] = jax.nn.sigmoid(acc + b_ref[0])


def final_deconv_sigmoid(d_nhwc, w_row, b):
    """Last ConvTranspose2d (Cout=1) + sigmoid as a transposed GEMM producing a
    lane-dense [1, B*28*28] row, tiled over the long axis ('parallel').  The
    im2col columns are built from a channel-major view so no batch-proportional
    XLA transpose and no resident [256, B*784] VMEM blob."""
    B, H, W, C = d_nhwc.shape
    kh = kw = 4
    stride, pad_t = 2, 1
    dc = jnp.transpose(d_nhwc, (3, 0, 1, 2))            # [C,B,H,W]  (small)
    dd = _zero_dilate_cbhw(dc, stride)                  # [C,B,27,27]
    cp = kh - 1 - pad_t                                  # conv padding = 2
    dp = jnp.pad(dd, ((0, 0), (0, 0), (cp, cp), (cp, cp)))
    OH = dd.shape[2] + 2 * cp - kh + 1                   # 28
    OW = dd.shape[3] + 2 * cp - kw + 1                   # 28
    patches = [dp[:, :, i:i + OH, j:j + OW] for i in range(kh) for j in range(kw)]
    colsT = jnp.stack(patches, axis=0).reshape(kh * kw * C, B * OH * OW)
    colsT = colsT.astype(jnp.bfloat16)                   # [256, B*784]
    K, N = colsT.shape

    TN, Npad = _choose_tn(N)
    if Npad != N:
        colsT = jnp.pad(colsT, ((0, 0), (0, Npad - N)))
    b_arr = jnp.asarray(b, jnp.float32).reshape(1)

    out = pl.pallas_call(
        _rowvec_gemm_sigmoid_kernel,
        out_shape=jax.ShapeDtypeStruct((1, Npad), jnp.float32),
        grid=(Npad // TN,),
        in_specs=[pl.BlockSpec((1, K), lambda n: (0, 0)),
                  pl.BlockSpec((K, TN), lambda n: (0, n)),
                  pl.BlockSpec(memory_space=pltpu.MemorySpace.SMEM)],
        out_specs=pl.BlockSpec((1, TN), lambda n: (0, n)),
        compiler_params=pltpu.CompilerParams(
            dimension_semantics=("parallel",),
            vmem_limit_bytes=_VMEM_LIMIT),
    )(w_row.astype(jnp.bfloat16), colsT, b_arr)
    if Npad != N:
        out = out[:, :N]
    return out.reshape(B, 1, OH, OW)                     # NCHW directly


# ----------------------------------------------------------------------------
# Parameters (PyTorch layouts generated, stored pre-transformed for the kernels)
# ----------------------------------------------------------------------------
def _uniform(key, shape, fan_in):
    k = 1.0 / math.sqrt(fan_in)
    return jax.random.uniform(key, shape, jnp.float32, -k, k)


def _conv_gemm_w(w_oihw):
    """[Cout,Cin,kh,kw] -> [kh*kw*Cin, Cout], matching the im2col (i,j,c) K-order."""
    Cout, Cin, kh, kw = w_oihw.shape
    return w_oihw.transpose(2, 3, 1, 0).reshape(kh * kw * Cin, Cout)


def _pad_cols(w2d, n=128):
    return jnp.pad(w2d, ((0, 0), (0, n - w2d.shape[1])))


def _pad_bias_row(b, n=128):
    return jnp.pad(b, (0, n - b.shape[0])).reshape(1, n).astype(jnp.float32)


def init_params(key):
    ks = jax.random.split(key, 15)
    # -- PyTorch-layout raw weights --
    conv1_w = _uniform(ks[0], (16, 1, 3, 3), 9);            conv1_b = _uniform(ks[1], (16,), 9)
    conv2_w = _uniform(ks[2], (32, 16, 3, 3), 144);         conv2_b = _uniform(ks[3], (32,), 144)
    fc1_w = _uniform(ks[4], (256, ENC_FEAT), ENC_FEAT);     fc1_b = _uniform(ks[5], (256,), ENC_FEAT)
    som_w = jax.random.normal(ks[6], (256, LATENT_DIM), jnp.float32)
    fc2_w = _uniform(ks[7], (256, LATENT_DIM), LATENT_DIM); fc2_b = _uniform(ks[8], (256,), LATENT_DIM)
    fc3_w = _uniform(ks[9], (ENC_FEAT, 256), 256);          fc3_b = _uniform(ks[10], (ENC_FEAT,), 256)
    deconv1_w = _uniform(ks[11], (32, 16, 4, 4), 16 * 16);  deconv1_b = _uniform(ks[12], (16,), 16 * 16)
    deconv2_w = _uniform(ks[13], (16, 1, 4, 4), 1 * 16);    deconv2_b = _uniform(ks[14], (1,), 1 * 16)

    p = {}
    # Encoder convs: GEMM weights with Cout zero-padded to 128 lanes (bf16 MXU).
    p["conv1_wg"] = _pad_cols(_conv_gemm_w(conv1_w)).astype(jnp.bfloat16)
    p["conv1_bg"] = _pad_bias_row(conv1_b)
    p["conv2_wg"] = _pad_cols(_conv_gemm_w(conv2_w)).astype(jnp.bfloat16)
    p["conv2_bg"] = _pad_bias_row(conv2_b)
    # deconv1: ConvTranspose -> equivalent conv weight (flip spatial, swap in/out).
    dw1 = jnp.flip(deconv1_w, (2, 3)).transpose(1, 0, 2, 3)            # [16,32,4,4]
    p["deconv1_wg"] = _pad_cols(_conv_gemm_w(dw1)).astype(jnp.bfloat16)
    p["deconv1_bg"] = _pad_bias_row(deconv1_b)
    # deconv2 (Cout=1): transposed-GEMM weight row.
    dw2 = jnp.flip(deconv2_w, (2, 3)).transpose(1, 0, 2, 3)            # [1,16,4,4]
    p["deconv2_wg"] = _conv_gemm_w(dw2).reshape(1, -1).astype(jnp.bfloat16)  # [1,256]
    p["deconv2_b"] = deconv2_b.astype(jnp.float32)
    # fc1: [out,in] -> [in,out], rows permuted (c,h,w)->(h,w,c) so the NHWC
    # flatten of conv2's output feeds it without a per-forward transpose.
    p["fc1_w"] = (fc1_w.T.reshape(32, 7, 7, 256).transpose(1, 2, 0, 3)
                  .reshape(ENC_FEAT, 256).astype(jnp.bfloat16))
    p["fc1_b"] = fc1_b.reshape(1, 256).astype(jnp.float32)
    # SOM: latent units padded 100 -> 128 (zero cols; masked out of the argmin).
    p["som_w"] = jnp.pad(som_w, ((0, 0), (0, LATENT_PAD - LATENT_DIM))).astype(jnp.float32)
    # fc2: [out,in] -> [in,out]; padded latent rows are zero.
    p["fc2_w"] = jnp.pad(fc2_w.T, ((0, LATENT_PAD - LATENT_DIM), (0, 0))).astype(jnp.bfloat16)
    p["fc2_b"] = fc2_b.reshape(1, 256).astype(jnp.float32)
    # fc3: [out,in] -> [in,out], output cols permuted (c,h,w)->(h,w,c) so dec
    # reshapes straight to NHWC for deconv1.
    p["fc3_w"] = (fc3_w.T.reshape(256, 32, 7, 7).transpose(0, 2, 3, 1)
                  .reshape(256, ENC_FEAT).astype(jnp.bfloat16))
    p["fc3_b"] = (fc3_b.reshape(32, 7, 7).transpose(1, 2, 0)
                  .reshape(1, ENC_FEAT).astype(jnp.float32))
    return p


# ----------------------------------------------------------------------------
# Forward
# ----------------------------------------------------------------------------
def topological_ae_forward(params, x, neighborhood_std):
    B = x.shape[0]
    # NCHW -> NHWC is a pure reshape here because Cin == 1.
    h = x.reshape(B, 28, 28, 1)
    h = conv2d_gemm(h, params["conv1_wg"], params["conv1_bg"], 16, 3, 3, 2, 1,
                    "relu", jnp.bfloat16)                               # [B,14,14,16]
    h = conv2d_gemm(h, params["conv2_wg"], params["conv2_bg"], 32, 3, 3, 2, 1,
                    "relu", jnp.bfloat16)                               # [B,7,7,32]
    h_flat = h.reshape(B, ENC_FEAT)            # NHWC flatten (fc1_w rows permuted)

    # fused fc1 -> TopologicalMap -> fc2 -> fc3 (single batch-tiled Pallas kernel)
    n2_phi, dec = fused_latent(h_flat, params, neighborhood_std)        # [B,100],[B,1568]

    d = dec.reshape(B, 7, 7, 32)               # NHWC directly (fc3_w cols permuted)
    d = conv_transpose2d_gemm(d, params["deconv1_wg"], params["deconv1_bg"], 16,
                              4, 4, 2, 1, "relu", jnp.bfloat16)         # [B,14,14,16]
    recon_x = final_deconv_sigmoid(d, params["deconv2_wg"], params["deconv2_b"])
    return recon_x, n2_phi                                              # [B,1,28,28]


if __name__ == "__main__":
    key = jax.random.PRNGKey(0)
    kx, kp = jax.random.split(key)
    params = init_params(kp)
    # 28x28 input is required by fc1 = Linear(32*7*7, 256) after two stride-2 convs.
    x = jax.random.uniform(kx, (2, 1, 28, 28), jnp.float32)
    neighborhood_std = jnp.float32(2.0)

    fwd = jax.jit(topological_ae_forward)
    recon_x, n2_phi = fwd(params, x, neighborhood_std)
    jax.block_until_ready((recon_x, n2_phi))

    assert recon_x.shape == (2, 1, 28, 28), recon_x.shape
    assert n2_phi.shape == (2, LATENT_DIM), n2_phi.shape
    assert bool(jnp.all(jnp.isfinite(recon_x))) and bool(jnp.all(jnp.isfinite(n2_phi)))
    assert bool(jnp.all(recon_x >= 0.0)) and bool(jnp.all(recon_x <= 1.0))
    print("KERNEL_OK")
</pallas_src>

<mosaic_0001>
module attributes {stable_mosaic.version = 11 : i64} {
  func.func @_gemm_bias_act_kernel(%arg0: i32, %arg1: memref<392x9xbf16, #tpu.memory_space<vmem>>, %arg2: memref<9x128xbf16, #tpu.memory_space<vmem>>, %arg3: memref<1x128xf32, #tpu.memory_space<vmem>>, %arg4: memref<392x128xbf16, #tpu.memory_space<vmem>>) attributes {dimension_semantics = [#tpu.dimension_semantics<parallel>], iteration_bounds = array<i64: 1>, scalar_prefetch = 0 : i64, scratch_operands = 0 : i64, tpu.core_type = #tpu.core_type<tc>, window_params = [{transform_indices = @transform_0, window_bounds = array<i64: 392, 9>}, {pipeline_mode = #tpu.pipeline_mode<synchronous>, transform_indices = @transform_1, window_bounds = array<i64: 9, 128>}, {pipeline_mode = #tpu.pipeline_mode<synchronous>, transform_indices = @transform_2, window_bounds = array<i64: 1, 128>}, {transform_indices = @transform_3, window_bounds = array<i64: 392, 128>}]} {
    %c0 = arith.constant 0 : index
    %c0_0 = arith.constant 0 : index
    %0 = vector.load %arg1[%c0, %c0_0] : memref<392x9xbf16, #tpu.memory_space<vmem>>, vector<392x9xbf16>
    %c0_1 = arith.constant 0 : index
    %c0_2 = arith.constant 0 : index
    %1 = vector.load %arg2[%c0_1, %c0_2] : memref<9x128xbf16, #tpu.memory_space<vmem>>, vector<9x128xbf16>
    %cst = arith.constant dense<0.000000e+00> : vector<392x128xf32>
    %2 = tpu.matmul %0, %1, %cst {dimension_numbers = #tpu.dot_dimension_numbers<[1], [0], [0], [1], [0, 0, 1, 1], [], []>} : vector<392x9xbf16>, vector<9x128xbf16>, vector<392x128xf32> -> vector<392x128xf32>
    %c0_3 = arith.constant 0 : index
    %c0_4 = arith.constant 0 : index
    %3 = vector.load %arg3[%c0_3, %c0_4] : memref<1x128xf32, #tpu.memory_space<vmem>>, vector<1x128xf32>
    %4 = vector.broadcast %3 : vector<1x128xf32> to vector<392x128xf32>
    %5 = arith.addf %2, %4 : vector<392x128xf32>
    %cst_5 = arith.constant 0.000000e+00 : f32
    %6 = vector.broadcast %cst_5 : f32 to vector<392x128xf32>
    %7 = arith.maximumf %5, %6 : vector<392x128xf32>
    %8 = arith.truncf %7 : vector<392x128xf32> to vector<392x128xbf16>
    %c0_6 = arith.constant 0 : index
    %c0_7 = arith.constant 0 : index
    %9 = vector.load %arg4[%c0_6, %c0_7] : memref<392x128xbf16, #tpu.memory_space<vmem>>, vector<392x128xbf16>
    tpu.vector_store %arg4[%c0_6, %c0_7], %8 {strides = array<i32>} : memref<392x128xbf16, #tpu.memory_space<vmem>>, vector<392x128xbf16>,
    return
  }
  func.func @transform_0(%arg0: i32) -> (i32, i32) {
    %c0_i32 = arith.constant 0 : i32
    %c0_i32_0 = arith.constant 0 : i32
    return %arg0, %c0_i32 : i32, i32
  }
  func.func @transform_1(%arg0: i32) -> (i32, i32) {
    %c0_i32 = arith.constant 0 : i32
    %c0_i32_0 = arith.constant 0 : i32
    %c0_i32_1 = arith.constant 0 : i32
    return %c0_i32, %c0_i32_0 : i32, i32
  }
  func.func @transform_2(%arg0: i32) -> (i32, i32) {
    %c0_i32 = arith.constant 0 : i32
    %c0_i32_0 = arith.constant 0 : i32
    %c0_i32_1 = arith.constant 0 : i32
    return %c0_i32, %c0_i32_0 : i32, i32
  }
  func.func @transform_3(%arg0: i32) -> (i32, i32) {
    %c0_i32 = arith.constant 0 : i32
    %c0_i32_0 = arith.constant 0 : i32
    return %arg0, %c0_i32 : i32, i32
  }
}

module attributes {stable_mosaic.version = 11 : i64} {
  func.func @_gemm_bias_act_kernel(%arg0: i32, %arg1: memref<104x144xbf16, #tpu.memory_space<vmem>>, %arg2: memref<144x128xbf16, #tpu.memory_space<vmem>>, %arg3: memref<1x128xf32, #tpu.memory_space<vmem>>, %arg4: memref<104x128xbf16, #tpu.memory_space<vmem>>) attributes {dimension_semantics = [#tpu.dimension_semantics<parallel>], iteration_bounds = array<i64: 1>, scalar_prefetch = 0 : i64, scratch_operands = 0 : i64, tpu.core_type = #tpu.core_type<tc>, window_params = [{transform_indices = @transform_0, window_bounds = array<i64: 104, 144>}, {pipeline_mode = #tpu.pipeline_mode<synchronous>, transform_indices = @transform_1, window_bounds = array<i64: 144, 128>}, {pipeline_mode = #tpu.pipeline_mode<synchronous>, transform_indices = @transform_2, window_bounds = array<i64: 1, 128>}, {transform_indices = @transform_3, window_bounds = array<i64: 104, 128>}]} {
    %c0 = arith.constant 0 : index
    %c0_0 = arith.constant 0 : index
    %0 = vector.load %arg1[%c0, %c0_0] : memref<104x144xbf16, #tpu.memory_space<vmem>>, vector<104x144xbf16>
    %c0_1 = arith.constant 0 : index
    %c0_2 = arith.constant 0 : index
    %1 = vector.load %arg2[%c0_1, %c0_2] : memref<144x128xbf16, #tpu.memory_space<vmem>>, vector<144x128xbf16>
    %cst = arith.constant dense<0.000000e+00> : vector<104x128xf32>
    %2 = tpu.matmul %0, %1, %cst {dimension_numbers = #tpu.dot_dimension_numbers<[1], [0], [0], [1], [0, 0, 1, 1], [], []>} : vector<104x144xbf16>, vector<144x128xbf16>, vector<104x128xf32> -> vector<104x128xf32>
    %c0_3 = arith.constant 0 : index
    %c0_4 = arith.constant 0 : index
    %3 = vector.load %arg3[%c0_3, %c0_4] : memref<1x128xf32, #tpu.memory_space<vmem>>, vector<1x128xf32>
    %4 = vector.broadcast %3 : vector<1x128xf32> to vector<104x128xf32>
    %5 = arith.addf %2, %4 : vector<104x128xf32>
    %cst_5 = arith.constant 0.000000e+00 : f32
    %6 = vector.broadcast %cst_5 : f32 to vector<104x128xf32>
    %7 = arith.maximumf %5, %6 : vector<104x128xf32>
    %8 = arith.truncf %7 : vector<104x128xf32> to vector<104x128xbf16>
    %c0_6 = arith.constant 0 : index
    %c0_7 = arith.constant 0 : index
    %9 = vector.load %arg4[%c0_6, %c0_7] : memref<104x128xbf16, #tpu.memory_space<vmem>>, vector<104x128xbf16>
    tpu.vector_store %arg4[%c0_6, %c0_7], %8 {strides = array<i32>} : memref<104x128xbf16, #tpu.memory_space<vmem>>, vector<104x128xbf16>,
    return
  }
  func.func @transform_0(%arg0: i32) -> (i32, i32) {
    %c0_i32 = arith.constant 0 : i32
    %c0_i32_0 = arith.constant 0 : i32
    return %arg0, %c0_i32 : i32, i32
  }
  func.func @transform_1(%arg0: i32) -> (i32, i32) {
    %c0_i32 = arith.constant 0 : i32
    %c0_i32_0 = arith.constant 0 : i32
    %c0_i32_1 = arith.constant 0 : i32
    return %c0_i32, %c0_i32_0 : i32, i32
  }
  func.func @transform_2(%arg0: i32) -> (i32, i32) {
    %c0_i32 = arith.constant 0 : i32
    %c0_i32_0 = arith.constant 0 : i32
    %c0_i32_1 = arith.constant 0 : i32
    return %c0_i32, %c0_i32_0 : i32, i32
  }
  func.func @transform_3(%arg0: i32) -> (i32, i32) {
    %c0_i32 = arith.constant 0 : i32
    %c0_i32_0 = arith.constant 0 : i32
    return %arg0, %c0_i32 : i32, i32
  }
}

module attributes {stable_mosaic.version = 11 : i64} {
  func.func @_fused_latent_kernel(%arg0: i32, %arg1: memref<16x1568xbf16, #tpu.memory_space<vmem>>, %arg2: memref<1568x256xbf16, #tpu.memory_space<vmem>>, %arg3: memref<1x256xf32, #tpu.memory_space<vmem>>, %arg4: memref<256x128xf32, #tpu.memory_space<vmem>>, %arg5: memref<1x128xf32, #tpu.memory_space<vmem>>, %arg6: memref<1x128xf32, #tpu.memory_space<vmem>>, %arg7: memref<1x128xf32, #tpu.memory_space<vmem>>, %arg8: memref<1x128xf32, #tpu.memory_space<vmem>>, %arg9: memref<128x256xbf16, #tpu.memory_space<vmem>>, %arg10: memref<1x256xf32, #tpu.memory_space<vmem>>, %arg11: memref<256x1568xbf16, #tpu.memory_space<vmem>>, %arg12: memref<1x1568xf32, #tpu.memory_space<vmem>>, %arg13: memref<16x128xf32, #tpu.memory_space<vmem>>, %arg14: memref<16x1568xbf16, #tpu.memory_space<vmem>>) attributes {dimension_semantics = [#tpu.dimension_semantics<parallel>], iteration_bounds = array<i64: 1>, scalar_prefetch = 0 : i64, scratch_operands = 0 : i64, tpu.core_type = #tpu.core_type<tc>, window_params = [{transform_indices = @transform_0, window_bounds = array<i64: 16, 1568>}, {pipeline_mode = #tpu.pipeline_mode<synchronous>, transform_indices = @transform_1, window_bounds = array<i64: 1568, 256>}, {pipeline_mode = #tpu.pipeline_mode<synchronous>, transform_indices = @transform_2, window_bounds = array<i64: 1, 256>}, {pipeline_mode = #tpu.pipeline_mode<synchronous>, transform_indices = @transform_3, window_bounds = array<i64: 256, 128>}, {pipeline_mode = #tpu.pipeline_mode<synchronous>, transform_indices = @transform_4, window_bounds = array<i64: 1, 128>}, {pipeline_mode = #tpu.pipeline_mode<synchronous>, transform_indices = @transform_5, window_bounds = array<i64: 1, 128>}, {pipeline_mode = #tpu.pipeline_mode<synchronous>, transform_indices = @transform_6, window_bounds = array<i64: 1, 128>}, {pipeline_mode = #tpu.pipeline_mode<synchronous>, transform_indices = @transform_7, window_bounds = array<i64: 1, 128>}, {pipeline_mode = #tpu.pipeline_mode<synchronous>, transform_indices = @transform_8, window_bounds = array<i64: 128, 256>}, {pipeline_mode = #tpu.pipeline_mode<synchronous>, transform_indices = @transform_9, window_bounds = array<i64: 1, 256>}, {pipeline_mode = #tpu.pipeline_mode<synchronous>, transform_indices = @transform_10, window_bounds = array<i64: 256, 1568>}, {pipeline_mode = #tpu.pipeline_mode<synchronous>, transform_indices = @transform_11, window_bounds = array<i64: 1, 1568>}, {transform_indices = @transform_12, window_bounds = array<i64: 16, 128>}, {transform_indices = @transform_13, window_bounds = array<i64: 16, 1568>}]} {
    %c0 = arith.constant 0 : index
    %c0_0 = arith.constant 0 : index
    %0 = vector.load %arg1[%c0, %c0_0] : memref<16x1568xbf16, #tpu.memory_space<vmem>>, vector<16x1568xbf16>
    %c0_1 = arith.constant 0 : index
    %c0_2 = arith.constant 0 : index
    %1 = vector.load %arg2[%c0_1, %c0_2] : memref<1568x256xbf16, #tpu.memory_space<vmem>>, vector<1568x256xbf16>
    %cst = arith.constant dense<0.000000e+00> : vector<16x256xf32>
    %2 = tpu.matmul %0, %1, %cst {dimension_numbers = #tpu.dot_dimension_numbers<[1], [0], [0], [1], [0, 0, 1, 1], [], []>} : vector<16x1568xbf16>, vector<1568x256xbf16>, vector<16x256xf32> -> vector<16x256xf32>
    %c0_3 = arith.constant 0 : index
    %c0_4 = arith.constant 0 : index
    %3 = vector.load %arg3[%c0_3, %c0_4] : memref<1x256xf32, #tpu.memory_space<vmem>>, vector<1x256xf32>
    %4 = vector.broadcast %3 : vector<1x256xf32> to vector<16x256xf32>
    %5 = arith.addf %2, %4 : vector<16x256xf32>
    %cst_5 = arith.constant 0.000000e+00 : f32
    %6 = vector.broadcast %cst_5 : f32 to vector<16x256xf32>
    %7 = arith.maximumf %5, %6 : vector<16x256xf32>
    %c0_6 = arith.constant 0 : index
    %c0_7 = arith.constant 0 : index
    %8 = vector.load %arg4[%c0_6, %c0_7] : memref<256x128xf32, #tpu.memory_space<vmem>>, vector<256x128xf32>
    %9 = arith.mulf %7, %7 : vector<16x256xf32>
    %cst_8 = arith.constant dense<0.000000e+00> : vector<16xf32>
    %10 = vector.multi_reduction <add>, %9, %cst_8 [1] : vector<16x256xf32> to vector<16xf32>
    %11 = vector.shape_cast %10 : vector<16xf32> to vector<16x1xf32>
    %cst_9 = arith.constant dense<0.000000e+00> : vector<16x128xf32>
    %12 = tpu.matmul %7, %8, %cst_9 {dimension_numbers = #tpu.dot_dimension_numbers<[1], [0], [0], [1], [0, 0, 1, 1], [], []>} : vector<16x256xf32>, vector<256x128xf32>, vector<16x128xf32> -> vector<16x128xf32>
    %c0_10 = arith.constant 0 : index
    %c0_11 = arith.constant 0 : index
    %13 = vector.load %arg5[%c0_10, %c0_11] : memref<1x128xf32, #tpu.memory_space<vmem>>, vector<1x128xf32>
    %14 = vector.broadcast %11 : vector<16x1xf32> to vector<16x128xf32>
    %15 = vector.broadcast %13 : vector<1x128xf32> to vector<16x128xf32>
    %16 = arith.addf %14, %15 : vector<16x128xf32>
    %cst_12 = arith.constant 2.000000e+00 : f32
    %17 = vector.broadcast %cst_12 : f32 to vector<16x128xf32>
    %18 = arith.mulf %17, %12 : vector<16x128xf32>
    %19 = arith.subf %16, %18 : vector<16x128xf32>
    %cst_13 = arith.constant 0.000000e+00 : f32
    %20 = vector.broadcast %cst_13 : f32 to vector<16x128xf32>
    %21 = arith.maximumf %19, %20 : vector<16x128xf32>
    %22 = tpu.iota {dimensions = array<i32: 1>} : vector<16x128xi32>
    %23 = arith.sitofp %22 : vector<16x128xi32> to vector<16x128xf32>
    %c100_i32 = arith.constant 100 : i32
    %24 = vector.broadcast %c100_i32 : i32 to vector<16x128xi32>
    %25 = arith.cmpi slt, %22, %24 : vector<16x128xi32>
    %cst_14 = arith.constant 3.400000e+38 : f32
    %26 = vector.broadcast %cst_14 : f32 to vector<16x128xf32>
    %27 = arith.select %25, %21, %26 : vector<16x128xi1>, vector<16x128xf32>
    %cst_15 = arith.constant dense<0x7F800000> : vector<16xf32>
    %28 = vector.multi_reduction <minimumf>, %27, %cst_15 [1] : vector<16x128xf32> to vector<16xf32>
    %29 = vector.shape_cast %28 : vector<16xf32> to vector<16x1xf32>
    %30 = vector.broadcast %29 : vector<16x1xf32> to vector<16x128xf32>
    %31 = arith.cmpf ole, %27, %30 : vector<16x128xf32>
    %cst_16 = arith.constant 1.280000e+02 : f32
    %32 = vector.broadcast %cst_16 : f32 to vector<16x128xf32>
    %33 = arith.select %31, %23, %32 : vector<16x128xi1>, vector<16x128xf32>
    %cst_17 = arith.constant dense<0x7F800000> : vector<16xf32>
    %34 = vector.multi_reduction <minimumf>, %33, %cst_17 [1] : vector<16x128xf32> to vector<16xf32>
    %35 = vector.shape_cast %34 : vector<16xf32> to vector<16x1xf32>
    %36 = vector.broadcast %35 : vector<16x1xf32> to vector<16x128xf32>
    %37 = arith.cmpf oeq, %23, %36 : vector<16x128xf32>
    %c0_18 = arith.constant 0 : index
    %c0_19 = arith.constant 0 : index
    %38 = vector.load %arg6[%c0_18, %c0_19] : memref<1x128xf32, #tpu.memory_space<vmem>>, vector<1x128xf32>
    %cst_20 = arith.constant 0.000000e+00 : f32
    %39 = vector.shape_cast %38 : vector<1x128xf32> to vector<1x128xf32>
    %40 = vector.broadcast %39 : vector<1x128xf32> to vector<16x128xf32>
    %41 = vector.broadcast %cst_20 : f32 to vector<16x128xf32>
    %42 = arith.select %37, %40, %41 : vector<16x128xi1>, vector<16x128xf32>
    %cst_21 = arith.constant dense<0.000000e+00> : vector<16xf32>
    %43 = vector.multi_reduction <add>, %42, %cst_21 [1] : vector<16x128xf32> to vector<16xf32>
    %44 = vector.shape_cast %43 : vector<16xf32> to vector<16x1xf32>
    %c0_22 = arith.constant 0 : index
    %c0_23 = arith.constant 0 : index
    %45 = vector.load %arg7[%c0_22, %c0_23] : memref<1x128xf32, #tpu.memory_space<vmem>>, vector<1x128xf32>
    %cst_24 = arith.constant 0.000000e+00 : f32
    %46 = vector.shape_cast %45 : vector<1x128xf32> to vector<1x128xf32>
    %47 = vector.broadcast %46 : vector<1x128xf32> to vector<16x128xf32>
    %48 = vector.broadcast %cst_24 : f32 to vector<16x128xf32>
    %49 = arith.select %37, %47, %48 : vector<16x128xi1>, vector<16x128xf32>
    %cst_25 = arith.constant dense<0.000000e+00> : vector<16xf32>
    %50 = vector.multi_reduction <add>, %49, %cst_25 [1] : vector<16x128xf32> to vector<16xf32>
    %51 = vector.shape_cast %50 : vector<16xf32> to vector<16x1xf32>
    %c0_26 = arith.constant 0 : index
    %c0_27 = arith.constant 0 : index
    %52 = vector.load %arg6[%c0_26, %c0_27] : memref<1x128xf32, #tpu.memory_space<vmem>>, vector<1x128xf32>
    %53 = vector.broadcast %52 : vector<1x128xf32> to vector<16x128xf32>
    %54 = vector.broadcast %44 : vector<16x1xf32> to vector<16x128xf32>
    %55 = arith.subf %53, %54 : vector<16x128xf32>
    %56 = arith.mulf %55, %55 : vector<16x128xf32>
    %c0_28 = arith.constant 0 : index
    %c0_29 = arith.constant 0 : index
    %57 = vector.load %arg7[%c0_28, %c0_29] : memref<1x128xf32, #tpu.memory_space<vmem>>, vector<1x128xf32>
    %58 = vector.broadcast %57 : vector<1x128xf32> to vector<16x128xf32>
    %59 = vector.broadcast %51 : vector<16x1xf32> to vector<16x128xf32>
    %60 = arith.subf %58, %59 : vector<16x128xf32>
    %61 = arith.mulf %60, %60 : vector<16x128xf32>
    %62 = arith.addf %56, %61 : vector<16x128xf32>
    %c0_30 = arith.constant 0 : index
    %c0_31 = arith.constant 0 : index
    %63 = vector.load %arg8[%c0_30, %c0_31] : memref<1x128xf32, #tpu.memory_space<vmem>>, vector<1x128xf32>
    %64 = vector.broadcast %63 : vector<1x128xf32> to vector<16x128xf32>
    %65 = arith.mulf %62, %64 : vector<16x128xf32>
    %66 = math.exp %65 : vector<16x128xf32>
    %67 = arith.mulf %21, %66 : vector<16x128xf32>
    %c0_32 = arith.constant 0 : index
    %c0_33 = arith.constant 0 : index
    %68 = vector.load %arg13[%c0_32, %c0_33] : memref<16x128xf32, #tpu.memory_space<vmem>>, vector<16x128xf32>
    tpu.vector_store %arg13[%c0_32, %c0_33], %67 {strides = array<i32>} : memref<16x128xf32, #tpu.memory_space<vmem>>, vector<16x128xf32>,
    %69 = arith.truncf %66 : vector<16x128xf32> to vector<16x128xbf16>
    %c0_34 = arith.constant 0 : index
    %c0_35 = arith.constant 0 : index
    %70 = vector.load %arg9[%c0_34, %c0_35] : memref<128x256xbf16, #tpu.memory_space<vmem>>, vector<128x256xbf16>
    %cst_36 = arith.constant dense<0.000000e+00> : vector<16x256xf32>
    %71 = tpu.matmul %69, %70, %cst_36 {dimension_numbers = #tpu.dot_dimension_numbers<[1], [0], [0], [1], [0, 0, 1, 1], [], []>} : vector<16x128xbf16>, vector<128x256xbf16>, vector<16x256xf32> -> vector<16x256xf32>
    %c0_37 = arith.constant 0 : index
    %c0_38 = arith.constant 0 : index
    %72 = vector.load %arg10[%c0_37, %c0_38] : memref<1x256xf32, #tpu.memory_space<vmem>>, vector<1x256xf32>
    %73 = vector.broadcast %72 : vector<1x256xf32> to vector<16x256xf32>
    %74 = arith.addf %71, %73 : vector<16x256xf32>
    %cst_39 = arith.constant 0.000000e+00 : f32
    %75 = vector.broadcast %cst_39 : f32 to vector<16x256xf32>
    %76 = arith.maximumf %74, %75 : vector<16x256xf32>
    %77 = arith.truncf %76 : vector<16x256xf32> to vector<16x256xbf16>
    %c0_40 = arith.constant 0 : index
    %c0_41 = arith.constant 0 : index
    %78 = vector.load %arg11[%c0_40, %c0_41] : memref<256x1568xbf16, #tpu.memory_space<vmem>>, vector<256x1568xbf16>
    %cst_42 = arith.constant dense<0.000000e+00> : vector<16x1568xf32>
    %79 = tpu.matmul %77, %78, %cst_42 {dimension_numbers = #tpu.dot_dimension_numbers<[1], [0], [0], [1], [0, 0, 1, 1], [], []>} : vector<16x256xbf16>, vector<256x1568xbf16>, vector<16x1568xf32> -> vector<16x1568xf32>
    %c0_43 = arith.constant 0 : index
    %c0_44 = arith.constant 0 : index
    %80 = vector.load %arg12[%c0_43, %c0_44] : memref<1x1568xf32, #tpu.memory_space<vmem>>, vector<1x1568xf32>
    %81 = vector.broadcast %80 : vector<1x1568xf32> to vector<16x1568xf32>
    %82 = arith.addf %79, %81 : vector<16x1568xf32>
    %cst_45 = arith.constant 0.000000e+00 : f32
    %83 = vector.broadcast %cst_45 : f32 to vector<16x1568xf32>
    %84 = arith.maximumf %82, %83 : vector<16x1568xf32>
    %85 = arith.truncf %84 : vector<16x1568xf32> to vector<16x1568xbf16>
    %c0_46 = arith.constant 0 : index
    %c0_47 = arith.constant 0 : index
    %86 = vector.load %arg14[%c0_46, %c0_47] : memref<16x1568xbf16, #tpu.memory_space<vmem>>, vector<16x1568xbf16>
    tpu.vector_store %arg14[%c0_46, %c0_47], %85 {strides = array<i32>} : memref<16x1568xbf16, #tpu.memory_space<vmem>>, vector<16x1568xbf16>,
    return
  }
  func.func @transform_0(%arg0: i32) -> (i32, i32) {
    %c0_i32 = arith.constant 0 : i32
    %c0_i32_0 = arith.constant 0 : i32
    return %arg0, %c0_i32 : i32, i32
  }
  func.func @transform_1(%arg0: i32) -> (i32, i32) {
    %c0_i32 = arith.constant 0 : i32
    %c0_i32_0 = arith.constant 0 : i32
    %c0_i32_1 = arith.constant 0 : i32
    return %c0_i32, %c0_i32_0 : i32, i32
  }
  func.func @transform_2(%arg0: i32) -> (i32, i32) {
    %c0_i32 = arith.constant 0 : i32
    %c0_i32_0 = arith.constant 0 : i32
    %c0_i32_1 = arith.constant 0 : i32
    return %c0_i32, %c0_i32_0 : i32, i32
  }
  func.func @transform_3(%arg0: i32) -> (i32, i32) {
    %c0_i32 = arith.constant 0 : i32
    %c0_i32_0 = arith.constant 0 : i32
    %c0_i32_1 = arith.constant 0 : i32
    return %c0_i32, %c0_i32_0 : i32, i32
  }
  func.func @transform_4(%arg0: i32) -> (i32, i32) {
    %c0_i32 = arith.constant 0 : i32
    %c0_i32_0 = arith.constant 0 : i32
    %c0_i32_1 = arith.constant 0 : i32
    return %c0_i32, %c0_i32_0 : i32, i32
  }
  func.func @transform_5(%arg0: i32) -> (i32, i32) {
    %c0_i32 = arith.constant 0 : i32
    %c0_i32_0 = arith.constant 0 : i32
    %c0_i32_1 = arith.constant 0 : i32
    return %c0_i32, %c0_i32_0 : i32, i32
  }
  func.func @transform_6(%arg0: i32) -> (i32, i32) {
    %c0_i32 = arith.constant 0 : i32
    %c0_i32_0 = arith.constant 0 : i32
    %c0_i32_1 = arith.constant 0 : i32
    return %c0_i32, %c0_i32_0 : i32, i32
  }
  func.func @transform_7(%arg0: i32) -> (i32, i32) {
    %c0_i32 = arith.constant 0 : i32
    %c0_i32_0 = arith.constant 0 : i32
    %c0_i32_1 = arith.constant 0 : i32
    return %c0_i32, %c0_i32_0 : i32, i32
  }
  func.func @transform_8(%arg0: i32) -> (i32, i32) {
    %c0_i32 = arith.constant 0 : i32
    %c0_i32_0 = arith.constant 0 : i32
    %c0_i32_1 = arith.constant 0 : i32
    return %c0_i32, %c0_i32_0 : i32, i32
  }
  func.func @transform_9(%arg0: i32) -> (i32, i32) {
    %c0_i32 = arith.constant 0 : i32
    %c0_i32_0 = arith.constant 0 : i32
    %c0_i32_1 = arith.constant 0 : i32
    return %c0_i32, %c0_i32_0 : i32, i32
  }
  func.func @transform_10(%arg0: i32) -> (i32, i32) {
    %c0_i32 = arith.constant 0 : i32
    %c0_i32_0 = arith.constant 0 : i32
    %c0_i32_1 = arith.constant 0 : i32
    return %c0_i32, %c0_i32_0 : i32, i32
  }
  func.func @transform_11(%arg0: i32) -> (i32, i32) {
    %c0_i32 = arith.constant 0 : i32
    %c0_i32_0 = arith.constant 0 : i32
    %c0_i32_1 = arith.constant 0 : i32
    return %c0_i32, %c0_i32_0 : i32, i32
  }
  func.func @transform_12(%arg0: i32) -> (i32, i32) {
    %c0_i32 = arith.constant 0 : i32
    %c0_i32_0 = arith.constant 0 : i32
    return %arg0, %c0_i32 : i32, i32
  }
  func.func @transform_13(%arg0: i32) -> (i32, i32) {
    %c0_i32 = arith.constant 0 : i32
    %c0_i32_0 = arith.constant 0 : i32
    return %arg0, %c0_i32 : i32, i32
  }
}

module attributes {stable_mosaic.version = 11 : i64} {
  func.func @_gemm_bias_act_kernel(%arg0: i32, %arg1: memref<392x512xbf16, #tpu.memory_space<vmem>>, %arg2: memref<512x128xbf16, #tpu.memory_space<vmem>>, %arg3: memref<1x128xf32, #tpu.memory_space<vmem>>, %arg4: memref<392x128xbf16, #tpu.memory_space<vmem>>) attributes {dimension_semantics = [#tpu.dimension_semantics<parallel>], iteration_bounds = array<i64: 1>, scalar_prefetch = 0 : i64, scratch_operands = 0 : i64, tpu.core_type = #tpu.core_type<tc>, window_params = [{transform_indices = @transform_0, window_bounds = array<i64: 392, 512>}, {pipeline_mode = #tpu.pipeline_mode<synchronous>, transform_indices = @transform_1, window_bounds = array<i64: 512, 128>}, {pipeline_mode = #tpu.pipeline_mode<synchronous>, transform_indices = @transform_2, window_bounds = array<i64: 1, 128>}, {transform_indices = @transform_3, window_bounds = array<i64: 392, 128>}]} {
    %c0 = arith.constant 0 : index
    %c0_0 = arith.constant 0 : index
    %0 = vector.load %arg1[%c0, %c0_0] : memref<392x512xbf16, #tpu.memory_space<vmem>>, vector<392x512xbf16>
    %c0_1 = arith.constant 0 : index
    %c0_2 = arith.constant 0 : index
    %1 = vector.load %arg2[%c0_1, %c0_2] : memref<512x128xbf16, #tpu.memory_space<vmem>>, vector<512x128xbf16>
    %cst = arith.constant dense<0.000000e+00> : vector<392x128xf32>
    %2 = tpu.matmul %0, %1, %cst {dimension_numbers = #tpu.dot_dimension_numbers<[1], [0], [0], [1], [0, 0, 1, 1], [], []>} : vector<392x512xbf16>, vector<512x128xbf16>, vector<392x128xf32> -> vector<392x128xf32>
    %c0_3 = arith.constant 0 : index
    %c0_4 = arith.constant 0 : index
    %3 = vector.load %arg3[%c0_3, %c0_4] : memref<1x128xf32, #tpu.memory_space<vmem>>, vector<1x128xf32>
    %4 = vector.broadcast %3 : vector<1x128xf32> to vector<392x128xf32>
    %5 = arith.addf %2, %4 : vector<392x128xf32>
    %cst_5 = arith.constant 0.000000e+00 : f32
    %6 = vector.broadcast %cst_5 : f32 to vector<392x128xf32>
    %7 = arith.maximumf %5, %6 : vector<392x128xf32>
    %8 = arith.truncf %7 : vector<392x128xf32> to vector<392x128xbf16>
    %c0_6 = arith.constant 0 : index
    %c0_7 = arith.constant 0 : index
    %9 = vector.load %arg4[%c0_6, %c0_7] : memref<392x128xbf16, #tpu.memory_space<vmem>>, vector<392x128xbf16>
    tpu.vector_store %arg4[%c0_6, %c0_7], %8 {strides = array<i32>} : memref<392x128xbf16, #tpu.memory_space<vmem>>, vector<392x128xbf16>,
    return
  }
  func.func @transform_0(%arg0: i32) -> (i32, i32) {
    %c0_i32 = arith.constant 0 : i32
    %c0_i32_0 = arith.constant 0 : i32
    return %arg0, %c0_i32 : i32, i32
  }
  func.func @transform_1(%arg0: i32) -> (i32, i32) {
    %c0_i32 = arith.constant 0 : i32
    %c0_i32_0 = arith.constant 0 : i32
    %c0_i32_1 = arith.constant 0 : i32
    return %c0_i32, %c0_i32_0 : i32, i32
  }
  func.func @transform_2(%arg0: i32) -> (i32, i32) {
    %c0_i32 = arith.constant 0 : i32
    %c0_i32_0 = arith.constant 0 : i32
    %c0_i32_1 = arith.constant 0 : i32
    return %c0_i32, %c0_i32_0 : i32, i32
  }
  func.func @transform_3(%arg0: i32) -> (i32, i32) {
    %c0_i32 = arith.constant 0 : i32
    %c0_i32_0 = arith.constant 0 : i32
    return %arg0, %c0_i32 : i32, i32
  }
}

module attributes {stable_mosaic.version = 11 : i64} {
  func.func @_rowvec_gemm_sigmoid_kernel(%arg0: i32, %arg1: memref<1x256xbf16, #tpu.memory_space<vmem>>, %arg2: memref<256x1568xbf16, #tpu.memory_space<vmem>>, %arg3: memref<1xf32, #tpu.memory_space<smem>>, %arg4: memref<1x1568xf32, #tpu.memory_space<vmem>>) attributes {dimension_semantics = [#tpu.dimension_semantics<parallel>], iteration_bounds = array<i64: 1>, scalar_prefetch = 0 : i64, scratch_operands = 0 : i64, tpu.core_type = #tpu.core_type<tc>, window_params = [{pipeline_mode = #tpu.pipeline_mode<synchronous>, transform_indices = @transform_0, window_bounds = array<i64: 1, 256>}, {transform_indices = @transform_1, window_bounds = array<i64: 256, 1568>}, {transform_indices = @transform_2, window_bounds = array<i64: 1>}, {transform_indices = @transform_3, window_bounds = array<i64: 1, 1568>}]} {
    %c0 = arith.constant 0 : index
    %c0_0 = arith.constant 0 : index
    %0 = vector.load %arg1[%c0, %c0_0] : memref<1x256xbf16, #tpu.memory_space<vmem>>, vector<1x256xbf16>
    %c0_1 = arith.constant 0 : index
    %c0_2 = arith.constant 0 : index
    %1 = vector.load %arg2[%c0_1, %c0_2] : memref<256x1568xbf16, #tpu.memory_space<vmem>>, vector<256x1568xbf16>
    %cst = arith.constant dense<0.000000e+00> : vector<1x1568xf32>
    %2 = tpu.matmul %0, %1, %cst {dimension_numbers = #tpu.dot_dimension_numbers<[1], [0], [0], [1], [0, 0, 1, 1], [], []>} : vector<1x256xbf16>, vector<256x1568xbf16>, vector<1x1568xf32> -> vector<1x1568xf32>
    %c0_3 = arith.constant 0 : index
    %3 = memref.load %arg3[%c0_3] : memref<1xf32, #tpu.memory_space<smem>>
    %4 = vector.broadcast %3 : f32 to vector<1x1568xf32>
    %5 = arith.addf %2, %4 : vector<1x1568xf32>
    %6 = arith.negf %5 : vector<1x1568xf32>
    %7 = math.exp %6 : vector<1x1568xf32>
    %cst_4 = arith.constant 1.000000e+00 : f32
    %8 = vector.broadcast %cst_4 : f32 to vector<1x1568xf32>
    %9 = arith.addf %8, %7 : vector<1x1568xf32>
    %10 = arith.divf %8, %9 : vector<1x1568xf32>
    %c0_5 = arith.constant 0 : index
    %c0_6 = arith.constant 0 : index
    %11 = vector.load %arg4[%c0_5, %c0_6] : memref<1x1568xf32, #tpu.memory_space<vmem>>, vector<1x1568xf32>
    tpu.vector_store %arg4[%c0_5, %c0_6], %10 {strides = array<i32>} : memref<1x1568xf32, #tpu.memory_space<vmem>>, vector<1x1568xf32>,
    return
  }
  func.func @transform_0(%arg0: i32) -> (i32, i32) {
    %c0_i32 = arith.constant 0 : i32
    %c0_i32_0 = arith.constant 0 : i32
    %c0_i32_1 = arith.constant 0 : i32
    return %c0_i32, %c0_i32_0 : i32, i32
  }
  func.func @transform_1(%arg0: i32) -> (i32, i32) {
    %c0_i32 = arith.constant 0 : i32
    %c0_i32_0 = arith.constant 0 : i32
    return %c0_i32, %arg0 : i32, i32
  }
  func.func @transform_2(%arg0: i32) -> i32 {
    %c0_i32 = arith.constant 0 : i32
    %c0_i32_0 = arith.constant 0 : i32
    return %c0_i32 : i32
  }
  func.func @transform_3(%arg0: i32) -> (i32, i32) {
    %c0_i32 = arith.constant 0 : i32
    %c0_i32_0 = arith.constant 0 : i32
    return %c0_i32, %arg0 : i32, i32
  }
}

</mosaic_0001>

<bundles_post_ra>
// kernel: topological_ae_forward.5
= control target key start
LH: loop header
LB: loop body
LE: loop exit
PB: predicated region body
PF: predicated region fallthrough
CT: control target
= control target key end

     0   :  { %8 = vsyncpa [#allocation3], 0  ;;  %s1208_s0 = inlined_call_operand.vmem [shape: bf16[392,9], index: 0, kind: input, shape index: {}]   ;;  %s1209_s1 = inlined_call_operand.hbm [shape: bf16[9,128], index: 1, kind: input, shape index: {}]   ;;  %s1210_s2 = inlined_call_operand.hbm [shape: f32[1,128], index: 2, kind: input, shape index: {}]   ;;  %s1211_s3 = inlined_call_operand.vmem [shape: bf16[392,128], index: 3, kind: output, shape index: {}]  }
   0x1   :  { %s16_s14 = sshll.u32 %s1209_s1, 4  ;;  %s17_s14 = int_to_ptr.hbm [resolvable:$true] %s16_s14 }
   0x2   :  { %9 = vsyncpa [#allocation5], 0  ;;  %s951_s15 = smov [#allocation2]   ;;  %s30_s19 = sshll.u32 %s1210_s2, 4  ;;  %s31_s19 = int_to_ptr.hbm [resolvable:$true] %s30_s19 }
   0x3   :  { %s18_s16 = sshll.u32 %s951_s15, 4  ;;  %s952_s20 = smov 64   ;;  %s19_s16 = int_to_ptr.vmem [resolvable:$true] %s18_s16 }
   0x4   :  { %s953_s21 = smov 4   ;;  %s954_s22 = smov [#allocation4]  }
   0x5   :  { %24 = dma.hbm_to_vmem [thread:$0]  %s17_s14, 128, %s19_s16, [#allocation3], %s952_s20, %s952_s20, %s953_s21  }
   0x6   :  { %s32_s23 = sshll.u32 %s954_s22, 4  ;;  %s33_s23 = int_to_ptr.vmem [resolvable:$true] %s32_s23 }
   0x7   :  { %35 = dma.hbm_to_vmem [thread:$0]  %s31_s19, 16, %s33_s23, [#allocation5]  }
   0x8   :  { %947 = dma.done.wait [#allocation3], 128  }
   0x9   :  { %948 = vsyncadd [#allocation3], 4294967168 }
   0xa   :  { %949 = dma.done.wait [#allocation5], 16  }
   0xb   :  { %950 = vsyncadd [#allocation5], 4294967280  ;;  %vm304_vm0 = vcmask 1043456   ;;  %vm305_vm1 = vcmask 1044480   ;;  %v955_v0 = vmov 65535   ;;  %v722_v7 = vld [vmem:[%s1208_s0] sm:$0xff] }
   0xc   :  { %v306_v1 = vsel %vm304_vm0, 4294967295, %v955_v0  ;;  %v695_v2 = vld [vmem:[#allocation2] sm:$0xf]  ;;  %v746_v3 = vld [vmem:[#allocation2] sm:$0x10]  ;;  %v729_v8 = vld [vmem:[%s1208_s0 + $0x38] sm:$0xff] }
   0xd   :  { %v307_v4 = vsel %vm305_vm1, %v306_v1, 0  ;;  %v696_v5 = vor.u32 %v746_v3, %v695_v2  ;;  %vm228_vm2 = vcmask 72704   ;;  %v736_v9 = vld [vmem:[%s1208_s0 + $0x70] sm:$0xff]  ;;  %v743_v10 = vld [vmem:[%s1208_s0 + $0xa8] sm:$0xff]  ;;  %v730_v12 = vld [vmem:[%s1208_s0 + $0x40] sm:$0xff] }
   0xe   :  { %v723_v11 = vld [vmem:[%s1208_s0 + $0x8] sm:$0xff]  ;;  %v737_v13 = vld [vmem:[%s1208_s0 + $0x78] sm:$0xff]  ;;  %v744_v14 = vld [vmem:[%s1208_s0 + $0xb0] sm:$0xff] }
   0xf   :  { %v309_v6 = vand.u32 %v696_v5, %v307_v4  ;;  %v724_v15 = vld [vmem:[%s1208_s0 + $0x10] sm:$0xff]  ;;  %v731_v16 = vld [vmem:[%s1208_s0 + $0x48] sm:$0xff]  ;;  %v738_v17 = vld [vmem:[%s1208_s0 + $0x80] sm:$0xff] }
  0x10   :  { %v745_v18 = vld [vmem:[%s1208_s0 + $0xb8] sm:$0xff]  ;;  %v732_v20 = vld [vmem:[%s1208_s0 + $0x50] sm:$0xff]  ;;  %v739_v21 = vld [vmem:[%s1208_s0 + $0x88] sm:$0xff] }
  0x11   :  { %318 = vmatpush.bf16.msra.mxu0 %v309_v6  ;;  %890 = vmatpush.bf16.msra.mxu1 %v309_v6  ;;  %v725_v19 = vld [vmem:[%s1208_s0 + $0x18] sm:$0xff]  ;;  %v93_v22 = vld [vmem:[%s1208_s0 + $0xc0] sm:$0xf]  ;;  %v740_v27 = vld [vmem:[%s1208_s0 + $0x90] sm:$0xff] }
  0x12   :  { %891 = vmatpush.bf16.msra.mxu2 %v309_v6  ;;  %892 = vmatpush.bf16.msra.mxu3 %v309_v6  ;;  %v197_v23 = vunpack.c.l.b16 %v93_v22  ;;  %v726_v25 = vld [vmem:[%s1208_s0 + $0x20] sm:$0xff]  ;;  %v733_v26 = vld [vmem:[%s1208_s0 + $0x58] sm:$0xff]  ;;  %v727_v28 = vld [vmem:[%s1208_s0 + $0x28] sm:$0xff] }
  0x13   :  { %v734_v29 = vld [vmem:[%s1208_s0 + $0x60] sm:$0xff]  ;;  %v741_v30 = vld [vmem:[%s1208_s0 + $0x98] sm:$0xff]  ;;  %v728_v31 = vld [vmem:[%s1208_s0 + $0x30] sm:$0xff] }
  0x14   :  { %697 = vmatmul.msk.bf16.vlgmr.msra.gmra.mxu0 %vm228_vm2, %v722_v7  ;;  %704 = vmatmul.msk.bf16.vlgmr.msra.gmra.mxu1 %vm228_vm2, %v729_v8  ;;  %v222_v24 = vpack.c.b16 %v197_v23, %v197_v23  ;;  %v735_v32 = vld [vmem:[%s1208_s0 + $0x68] sm:$0xff]  ;;  %v742_v33 = vld [vmem:[%s1208_s0 + $0xa0] sm:$0xff] }
  0x15   :  { %711 = vmatmul.msk.bf16.vlgmr.msra.gmra.mxu2 %vm228_vm2, %v736_v9  ;;  %718 = vmatmul.msk.bf16.vlgmr.msra.gmra.mxu3 %vm228_vm2, %v743_v10  ;;  %v1082_v36 = vld [vmem:[#allocation4] ss:$0 sm:$0xff] }
  0x24   :  { %698 = vmatmul.msk.bf16.gmra.mxu0 %vm228_vm2, %v723_v11  ;;  %705 = vmatmul.msk.bf16.gmra.mxu1 %vm228_vm2, %v730_v12 }
  0x25   :  { %712 = vmatmul.msk.bf16.gmra.mxu2 %vm228_vm2, %v737_v13  ;;  %719 = vmatmul.msk.bf16.gmra.mxu3 %vm228_vm2, %v744_v14 }
  0x34   :  { %699 = vmatmul.msk.bf16.gmra.mxu0 %vm228_vm2, %v724_v15  ;;  %706 = vmatmul.msk.bf16.gmra.mxu1 %vm228_vm2, %v731_v16 }
  0x35   :  { %713 = vmatmul.msk.bf16.gmra.mxu2 %vm228_vm2, %v738_v17  ;;  %720 = vmatmul.msk.bf16.gmra.mxu3 %vm228_vm2, %v745_v18 }
  0x44   :  { %700 = vmatmul.msk.bf16.gmra.mxu0 %vm228_vm2, %v725_v19  ;;  %707 = vmatmul.msk.bf16.gmra.mxu1 %vm228_vm2, %v732_v20 }
  0x45   :  { %714 = vmatmul.msk.bf16.gmra.mxu2 %vm228_vm2, %v739_v21  ;;  %721 = vmatmul.msk.bf16.gmra.mxu3 %vm228_vm2, %v222_v24 }
  0x54   :  { %701 = vmatmul.msk.bf16.gmra.mxu0 %vm228_vm2, %v726_v25  ;;  %708 = vmatmul.msk.bf16.gmra.mxu1 %vm228_vm2, %v733_v26 }
  0x55   :  { %715 = vmatmul.msk.bf16.gmra.mxu2 %vm228_vm2, %v740_v27 }
  0x64   :  { %702 = vmatmul.msk.bf16.gmra.mxu0 %vm228_vm2, %v727_v28  ;;  %709 = vmatmul.msk.bf16.gmra.mxu1 %vm228_vm2, %v734_v29 }
  0x65   :  { %716 = vmatmul.msk.bf16.gmra.mxu2 %vm228_vm2, %v741_v30 }
  0x74   :  { %703 = vmatmul.msk.bf16.gmra.mxu0 %vm228_vm2, %v728_v31  ;;  %710 = vmatmul.msk.bf16.gmra.mxu1 %vm228_vm2, %v735_v32 }
  0x75   :  { %717 = vmatmul.msk.bf16.gmra.mxu2 %vm228_vm2, %v742_v33 }
  0x91   :  { %v320_v34 = vpop.f32.mrf.mxu0  ;;  %v355_v35 = vpop.f32.mrf.mxu1 }
  0x92   :  { %v321_v37 = vadd.f32 %v1082_v36, %v320_v34  ;;  %v356_v38 = vadd.f32 %v1082_v36, %v355_v35 }
  0x94   :  { %v444_v44 = vmax.f32 %v321_v37, 0.0  ;;  %v458_v45 = vmax.f32 %v356_v38, 0.0 }
  0x98   :  { %v390_v39 = vpop.f32.mrf.mxu2  ;;  %v425_v59 = vpop.f32.mrf.mxu3 }
  0x99   :  { %v322_v40 = vpop.f32.mrf.mxu0  ;;  %v357_v41 = vpop.f32.mrf.mxu1  ;;  %v391_v50 = vadd.f32 %v1082_v36, %v390_v39  ;;  %v426_v6 = vadd.f32 %v1082_v36, %v425_v59 }
  0x9a   :  { %v323_v42 = vadd.f32 %v1082_v36, %v322_v40  ;;  %v358_v43 = vadd.f32 %v1082_v36, %v357_v41 }
  0x9b   :  { %v472_v55 = vmax.f32 %v391_v50, 0.0  ;;  %v486_v12 = vmax.f32 %v426_v6, 0.0 }
  0x9c   :  { %v445_v46 = vmax.f32 %v323_v42, 0.0  ;;  %v459_v47 = vmax.f32 %v358_v43, 0.0 }
  0x9e   :  { %v750_v48 = vpack.c.bf16 %v445_v46, %v444_v44  ;;  %v785_v49 = vpack.c.bf16 %v459_v47, %v458_v45 }
  0xa0   :  { %751 = vst [vmem:[%s1211_s3] sm:$0xff] %v750_v48   ;;  %v392_v51 = vpop.f32.mrf.mxu2  ;;  %v427_v10 = vpop.f32.mrf.mxu3 }
  0xa1   :  { %873 = vst [vmem:[%s1211_s3 + $0x38] sm:$0xff] %v785_v49   ;;  %v393_v52 = vadd.f32 %v1082_v36, %v392_v51  ;;  %v325_v53 = vpop.f32.mrf.mxu0  ;;  %v360_v54 = vpop.f32.mrf.mxu1  ;;  %v428_v13 = vadd.f32 %v1082_v36, %v427_v10 }
  0xa2   :  { %v326_v58 = vadd.f32 %v1082_v36, %v325_v53  ;;  %v361_v60 = vadd.f32 %v1082_v36, %v360_v54 }
  0xa3   :  { %v473_v56 = vmax.f32 %v393_v52, 0.0  ;;  %v487_v17 = vmax.f32 %v428_v13, 0.0 }
  0xa4   :  { %v446_v2 = vmax.f32 %v326_v58, 0.0  ;;  %v460_v3 = vmax.f32 %v361_v60, 0.0 }
  0xa5   :  { %v820_v57 = vpack.c.bf16 %v473_v56, %v472_v55  ;;  %v855_v20 = vpack.c.bf16 %v487_v17, %v486_v12 }
  0xa7   :  { %880 = vst [vmem:[%s1211_s3 + $0x70] sm:$0xff] %v820_v57  }
  0xa8   :  { %v395_v61 = vpop.f32.mrf.mxu2  ;;  %887 = vst [vmem:[%s1211_s3 + $0xa8] sm:$0xff] %v855_v20   ;;  %v430_v23 = vpop.f32.mrf.mxu3 }
  0xa9   :  { %v327_v62 = vpop.f32.mrf.mxu0  ;;  %v362_v63 = vpop.f32.mrf.mxu1  ;;  %v396_v9 = vadd.f32 %v1082_v36, %v395_v61  ;;  %v431_v34 = vadd.f32 %v1082_v36, %v430_v23 }
  0xaa   :  { %v328_v0 = vadd.f32 %v1082_v36, %v327_v62  ;;  %v363_v1 = vadd.f32 %v1082_v36, %v362_v63 }
  0xab   :  { %v474_v18 = vmax.f32 %v396_v9, 0.0  ;;  %v488_v41 = vmax.f32 %v431_v34, 0.0 }
  0xac   :  { %v447_v4 = vmax.f32 %v328_v0, 0.0  ;;  %v461_v5 = vmax.f32 %v363_v1, 0.0 }
  0xae   :  { %v755_v7 = vpack.c.bf16 %v447_v4, %v446_v2  ;;  %v790_v8 = vpack.c.bf16 %v461_v5, %v460_v3 }
  0xb0   :  { %867 = vst [vmem:[%s1211_s3 + $0x8] sm:$0xff] %v755_v7   ;;  %v397_v11 = vpop.f32.mrf.mxu2  ;;  %v432_v39 = vpop.f32.mrf.mxu3 }
  0xb1   :  { %874 = vst [vmem:[%s1211_s3 + $0x40] sm:$0xff] %v790_v8   ;;  %v398_v14 = vadd.f32 %v1082_v36, %v397_v11  ;;  %v330_v15 = vpop.f32.mrf.mxu0  ;;  %v365_v16 = vpop.f32.mrf.mxu1  ;;  %v433_v42 = vadd.f32 %v1082_v36, %v432_v39 }
  0xb2   :  { %v331_v22 = vadd.f32 %v1082_v36, %v330_v15  ;;  %v366_v24 = vadd.f32 %v1082_v36, %v365_v16 }
  0xb3   :  { %v475_v19 = vmax.f32 %v398_v14, 0.0  ;;  %v489_v46 = vmax.f32 %v433_v42, 0.0 }
  0xb4   :  { %v448_v30 = vmax.f32 %v331_v22, 0.0  ;;  %v462_v31 = vmax.f32 %v366_v24, 0.0 }
  0xb5   :  { %v825_v21 = vpack.c.bf16 %v475_v19, %v474_v18  ;;  %v860_v49 = vpack.c.bf16 %v489_v46, %v488_v41 }
  0xb7   :  { %881 = vst [vmem:[%s1211_s3 + $0x78] sm:$0xff] %v825_v21  }
  0xb8   :  { %v400_v25 = vpop.f32.mrf.mxu2  ;;  %888 = vst [vmem:[%s1211_s3 + $0xb0] sm:$0xff] %v860_v49   ;;  %v435_v52 = vpop.f32.mrf.mxu3 }
  0xb9   :  { %v332_v26 = vpop.f32.mrf.mxu0  ;;  %v367_v27 = vpop.f32.mrf.mxu1  ;;  %v401_v38 = vadd.f32 %v1082_v36, %v400_v25  ;;  %v436_v63 = vadd.f32 %v1082_v36, %v435_v52 }
  0xba   :  { %v333_v28 = vadd.f32 %v1082_v36, %v332_v26  ;;  %v368_v29 = vadd.f32 %v1082_v36, %v367_v27 }
  0xbb   :  { %v476_v47 = vmax.f32 %v401_v38, 0.0  ;;  %v490_v5 = vmax.f32 %v436_v63, 0.0 }
  0xbc   :  { %v449_v32 = vmax.f32 %v333_v28, 0.0  ;;  %v463_v33 = vmax.f32 %v368_v29, 0.0 }
  0xbe   :  { %v760_v35 = vpack.c.bf16 %v449_v32, %v448_v30  ;;  %v795_v37 = vpack.c.bf16 %v463_v33, %v462_v31 }
  0xc0   :  { %868 = vst [vmem:[%s1211_s3 + $0x10] sm:$0xff] %v760_v35   ;;  %v402_v40 = vpop.f32.mrf.mxu2  ;;  %v437_v3 = vpop.f32.mrf.mxu3 }
  0xc1   :  { %875 = vst [vmem:[%s1211_s3 + $0x48] sm:$0xff] %v795_v37   ;;  %v403_v43 = vadd.f32 %v1082_v36, %v402_v40  ;;  %v335_v44 = vpop.f32.mrf.mxu0  ;;  %v370_v45 = vpop.f32.mrf.mxu1  ;;  %v438_v6 = vadd.f32 %v1082_v36, %v437_v3 }
  0xc2   :  { %v336_v51 = vadd.f32 %v1082_v36, %v335_v44  ;;  %v371_v53 = vadd.f32 %v1082_v36, %v370_v45 }
  0xc3   :  { %v477_v48 = vmax.f32 %v403_v43, 0.0  ;;  %v491_v10 = vmax.f32 %v438_v6, 0.0 }
  0xc4   :  { %v450_v59 = vmax.f32 %v336_v51, 0.0  ;;  %v464_v60 = vmax.f32 %v371_v53, 0.0 }
  0xc5   :  { %v830_v50 = vpack.c.bf16 %v477_v48, %v476_v47  ;;  %v865_v13 = vpack.c.bf16 %v491_v10, %v490_v5 }
  0xc7   :  { %882 = vst [vmem:[%s1211_s3 + $0x80] sm:$0xff] %v830_v50  }
  0xc8   :  { %v405_v54 = vpop.f32.mrf.mxu2  ;;  %889 = vst [vmem:[%s1211_s3 + $0xb8] sm:$0xff] %v865_v13   ;;  %v440_v16 = vpop.f32.mrf.mxu3 }
  0xc9   :  { %v337_v55 = vpop.f32.mrf.mxu0  ;;  %v372_v56 = vpop.f32.mrf.mxu1  ;;  %v406_v2 = vadd.f32 %v1082_v36, %v405_v54  ;;  %v441_v19 = vadd.f32 %v1082_v36, %v440_v16 }
  0xca   :  { %v338_v57 = vadd.f32 %v1082_v36, %v337_v55  ;;  %v373_v58 = vadd.f32 %v1082_v36, %v372_v56 }
  0xcb   :  { %v478_v11 = vmax.f32 %v406_v2, 0.0  ;;  %v492_v24 = vmax.f32 %v441_v19, 0.0 }
  0xcc   :  { %v451_v61 = vmax.f32 %v338_v57, 0.0  ;;  %v465_v62 = vmax.f32 %v373_v58, 0.0 }
  0xcd   :  { %v541_v29 = vpack.c.bf16 %v492_v24, %v492_v24 }
  0xce   :  { %v765_v0 = vpack.c.bf16 %v451_v61, %v450_v59  ;;  %v800_v1 = vpack.c.bf16 %v465_v62, %v464_v60 }
  0xcf   :  { %590 = vst [vmem:[%s1211_s3 + $0xc0] sm:$0xf] %v541_v29 }
  0xd0   :  { %869 = vst [vmem:[%s1211_s3 + $0x18] sm:$0xff] %v765_v0   ;;  %v407_v4 = vpop.f32.mrf.mxu2  ;;  %v442_v33 = vpop.f32.mrf.mxu3 }
  0xd1   :  { %876 = vst [vmem:[%s1211_s3 + $0x50] sm:$0xff] %v800_v1   ;;  %v408_v7 = vadd.f32 %v1082_v36, %v407_v4  ;;  %v340_v8 = vpop.f32.mrf.mxu0  ;;  %v375_v9 = vpop.f32.mrf.mxu1 }
  0xd2   :  { %v341_v15 = vadd.f32 %v1082_v36, %v340_v8  ;;  %v376_v17 = vadd.f32 %v1082_v36, %v375_v9 }
  0xd3   :  { %v479_v12 = vmax.f32 %v408_v7, 0.0 }
  0xd4   :  { %v452_v25 = vmax.f32 %v341_v15, 0.0  ;;  %v466_v26 = vmax.f32 %v376_v17, 0.0 }
  0xd5   :  { %v835_v14 = vpack.c.bf16 %v479_v12, %v478_v11 }
  0xd7   :  { %883 = vst [vmem:[%s1211_s3 + $0x88] sm:$0xff] %v835_v14  }
  0xd8   :  { %v410_v18 = vpop.f32.mrf.mxu2 }
  0xd9   :  { %v342_v20 = vpop.f32.mrf.mxu0  ;;  %v377_v21 = vpop.f32.mrf.mxu1  ;;  %v411_v32 = vadd.f32 %v1082_v36, %v410_v18 }
  0xda   :  { %v343_v22 = vadd.f32 %v1082_v36, %v342_v20  ;;  %v378_v23 = vadd.f32 %v1082_v36, %v377_v21 }
  0xdb   :  { %v480_v39 = vmax.f32 %v411_v32, 0.0 }
  0xdc   :  { %v453_v27 = vmax.f32 %v343_v22, 0.0  ;;  %v467_v28 = vmax.f32 %v378_v23, 0.0 }
  0xde   :  { %v770_v30 = vpack.c.bf16 %v453_v27, %v452_v25  ;;  %v805_v31 = vpack.c.bf16 %v467_v28, %v466_v26 }
  0xe0   :  { %870 = vst [vmem:[%s1211_s3 + $0x20] sm:$0xff] %v770_v30   ;;  %v412_v34 = vpop.f32.mrf.mxu2 }
  0xe1   :  { %877 = vst [vmem:[%s1211_s3 + $0x58] sm:$0xff] %v805_v31   ;;  %v413_v35 = vadd.f32 %v1082_v36, %v412_v34  ;;  %v345_v37 = vpop.f32.mrf.mxu0  ;;  %v380_v38 = vpop.f32.mrf.mxu1 }
  0xe2   :  { %v346_v42 = vadd.f32 %v1082_v36, %v345_v37  ;;  %v381_v43 = vadd.f32 %v1082_v36, %v380_v38 }
  0xe3   :  { %v481_v40 = vmax.f32 %v413_v35, 0.0 }
  0xe4   :  { %v454_v49 = vmax.f32 %v346_v42, 0.0  ;;  %v468_v50 = vmax.f32 %v381_v43, 0.0 }
  0xe5   :  { %v840_v41 = vpack.c.bf16 %v481_v40, %v480_v39 }
  0xe7   :  { %884 = vst [vmem:[%s1211_s3 + $0x90] sm:$0xff] %v840_v41  }
  0xe8   :  { %v415_v44 = vpop.f32.mrf.mxu2 }
  0xe9   :  { %v347_v45 = vpop.f32.mrf.mxu0  ;;  %v382_v46 = vpop.f32.mrf.mxu1  ;;  %v416_v55 = vadd.f32 %v1082_v36, %v415_v44 }
  0xea   :  { %v348_v47 = vadd.f32 %v1082_v36, %v347_v45  ;;  %v383_v48 = vadd.f32 %v1082_v36, %v382_v46 }
  0xeb   :  { %v482_v60 = vmax.f32 %v416_v55, 0.0 }
  0xec   :  { %v455_v51 = vmax.f32 %v348_v47, 0.0  ;;  %v469_v52 = vmax.f32 %v383_v48, 0.0 }
  0xee   :  { %v775_v53 = vpack.c.bf16 %v455_v51, %v454_v49  ;;  %v810_v54 = vpack.c.bf16 %v469_v52, %v468_v50 }
  0xf0   :  { %871 = vst [vmem:[%s1211_s3 + $0x28] sm:$0xff] %v775_v53   ;;  %v417_v56 = vpop.f32.mrf.mxu2 }
  0xf1   :  { %878 = vst [vmem:[%s1211_s3 + $0x60] sm:$0xff] %v810_v54   ;;  %v418_v57 = vadd.f32 %v1082_v36, %v417_v56  ;;  %v350_v58 = vpop.f32.mrf.mxu0  ;;  %v385_v59 = vpop.f32.mrf.mxu1 }
  0xf2   :  { %v351_v63 = vadd.f32 %v1082_v36, %v350_v58  ;;  %v386_v0 = vadd.f32 %v1082_v36, %v385_v59 }
  0xf3   :  { %v483_v61 = vmax.f32 %v418_v57, 0.0 }
  0xf4   :  { %v456_v6 = vmax.f32 %v351_v63, 0.0  ;;  %v470_v7 = vmax.f32 %v386_v0, 0.0 }
  0xf5   :  { %v845_v62 = vpack.c.bf16 %v483_v61, %v482_v60 }
  0xf7   :  { %885 = vst [vmem:[%s1211_s3 + $0x98] sm:$0xff] %v845_v62  }
  0xf8   :  { %v420_v1 = vpop.f32.mrf.mxu2 }
  0xf9   :  { %v352_v2 = vpop.f32.mrf.mxu0  ;;  %v387_v3 = vpop.f32.mrf.mxu1  ;;  %v421_v12 = vadd.f32 %v1082_v36, %v420_v1 }
  0xfa   :  { %v353_v4 = vadd.f32 %v1082_v36, %v352_v2  ;;  %v388_v5 = vadd.f32 %v1082_v36, %v387_v3 }
  0xfb   :  { %v484_v15 = vmax.f32 %v421_v12, 0.0 }
  0xfc   :  { %v457_v8 = vmax.f32 %v353_v4, 0.0  ;;  %v471_v9 = vmax.f32 %v388_v5, 0.0 }
  0xfe   :  { %v780_v10 = vpack.c.bf16 %v457_v8, %v456_v6  ;;  %v815_v11 = vpack.c.bf16 %v471_v9, %v470_v7 }
 0x100   :  { %872 = vst [vmem:[%s1211_s3 + $0x30] sm:$0xff] %v780_v10   ;;  %v422_v13 = vpop.f32.mrf.mxu2 }
 0x101   :  { %879 = vst [vmem:[%s1211_s3 + $0x68] sm:$0xff] %v815_v11   ;;  %v423_v14 = vadd.f32 %v1082_v36, %v422_v13 }
 0x103   :  { %v485_v16 = vmax.f32 %v423_v14, 0.0 }
 0x105   :  { %v850_v17 = vpack.c.bf16 %v485_v16, %v484_v15 }
 0x107   :  { %886 = vst [vmem:[%s1211_s3 + $0xa0] sm:$0xff] %v850_v17  }
 0x108   :  { %595 = vsyncpa [#allocation3], 1 }
 0x109   :  { %596 = vsyncpa [#allocation5], 1 }

// kernel: topological_ae_forward.6
= control target key start
LH: loop header
LB: loop body
LE: loop exit
PB: predicated region body
PF: predicated region fallthrough
CT: control target
= control target key end

     0   :  { %vm164_vm0 = vcmask 130048   ;;  %s640_s1 = inlined_call_operand.vmem [shape: bf16[144,128], index: 1, kind: input, shape index: {}]   ;;  %s641_s0 = inlined_call_operand.vmem [shape: bf16[104,144], index: 0, kind: input, shape index: {}]   ;;  %s642_s2 = inlined_call_operand.vmem [shape: f32[1,128], index: 2, kind: input, shape index: {}]   ;;  %s643_s3 = inlined_call_operand.vmem [shape: bf16[104,128], index: 3, kind: output, shape index: {}]  }
   0x1   :  { %v425_v0 = vld [vmem:[%s640_s1 + $0x38] sm:$0xff]  ;;  %v426_v1 = vld [vmem:[%s640_s1 + $0x40] sm:$0xff]  ;;  %v319_v3 = vld [vmem:[%s641_s0 + $0x8] sm:$0xf0] }
   0x2   :  { %v406_v2 = vld [vmem:[%s641_s0 + $0x4] sm:$0xf]  ;;  %186 = vmatpush.bf16.msra.mxu0 %v425_v0  ;;  %462 = vmatpush.bf16.msra.mxu2 %v425_v0  ;;  %v424_v5 = vld [vmem:[%s640_s1 + $0x30] sm:$0xff]  ;;  %v423_v6 = vld [vmem:[%s640_s1 + $0x28] sm:$0xff] }
   0x3   :  { %v322_v4 = vor.u32 %v406_v2, %v319_v3  ;;  %236 = vmatpush.bf16.msra.mxu1 %v426_v1  ;;  %470 = vmatpush.bf16.msra.mxu3 %v426_v1  ;;  %v422_v7 = vld [vmem:[%s640_s1 + $0x20] sm:$0xff]  ;;  %v421_v8 = vld [vmem:[%s640_s1 + $0x18] sm:$0xff]  ;;  %v408_v9 = vld [vmem:[%s641_s0 + $0x14] sm:$0xf] }
   0x4   :  { %v327_v10 = vld [vmem:[%s641_s0 + $0x18] sm:$0xf0]  ;;  %v420_v12 = vld [vmem:[%s640_s1 + $0x10] sm:$0xff]  ;;  %v419_v13 = vld [vmem:[%s640_s1 + $0x8] sm:$0xff] }
   0x5   :  { %v330_v11 = vor.u32 %v408_v9, %v327_v10  ;;  %v416_v14 = vld [vmem:[%s641_s0 + $0x54] sm:$0xf]  ;;  %v359_v15 = vld [vmem:[%s641_s0 + $0x58] sm:$0xf0]  ;;  %v418_v17 = vld [vmem:[%s640_s1] sm:$0xff] }
   0x6   :  { %399 = vmatmul.msk.bf16.vlgmr.msra.gmra.mxu1 %vm164_vm0, %v322_v4  ;;  %187 = vmatpush.bf16.msra.mxu0 %v424_v5  ;;  %v362_v16 = vor.u32 %v416_v14, %v359_v15  ;;  %v317_v18 = vld [vmem:[%s641_s0] sm:$0xf]  ;;  %v407_v19 = vld [vmem:[%s641_s0 + $0x4] sm:$0xf0]  ;;  %v341_v20 = vld [vmem:[%s641_s0 + $0x30] sm:$0xf] }
   0x7   :  { %463 = vmatpush.bf16.msra.mxu2 %v424_v5  ;;  %v413_v21 = vld [vmem:[%s641_s0 + $0x34] sm:$0xf0]  ;;  %v318_v22 = vor.u32 %v407_v19, %v317_v18  ;;  %v410_v24 = vld [vmem:[%s641_s0 + $0x24] sm:$0xf]  ;;  %v335_v25 = vld [vmem:[%s641_s0 + $0x28] sm:$0xf0] }
   0x8   :  { %404 = vmatmul.msk.bf16.vlgmr.msra.gmra.mxu3 %vm164_vm0, %v362_v16  ;;  %v342_v23 = vor.u32 %v413_v21, %v341_v20  ;;  %v338_v26 = vor.u32 %v410_v24, %v335_v25  ;;  %v27_v27 = vld [vmem:[%s641_s0 + $0x60] sm:$0xff]  ;;  %v325_v30 = vld [vmem:[%s641_s0 + $0x10] sm:$0xf]  ;;  %v409_v31 = vld [vmem:[%s641_s0 + $0x14] sm:$0xf0] }
   0x9   :  { %v88_v28 = vunpack.c.h.b16 %v27_v27  ;;  %v349_v32 = vld [vmem:[%s641_s0 + $0x40] sm:$0xf]  ;;  %v415_v33 = vld [vmem:[%s641_s0 + $0x44] sm:$0xf0]  ;;  %v326_v34 = vor.u32 %v409_v31, %v325_v30  ;;  %v412_v36 = vld [vmem:[%s641_s0 + $0x34] sm:$0xf]  ;;  %v87_v48 = vunpack.c.l.b16 %v27_v27 }
   0xa   :  { %188 = vmatpush.bf16.msra.mxu0 %v423_v6  ;;  %v350_v35 = vor.u32 %v415_v33, %v349_v32  ;;  %v343_v37 = vld [vmem:[%s641_s0 + $0x38] sm:$0xf0]  ;;  %v333_v39 = vld [vmem:[%s641_s0 + $0x20] sm:$0xf]  ;;  %v411_v40 = vld [vmem:[%s641_s0 + $0x24] sm:$0xf0] }
   0xb   :  { %464 = vmatpush.bf16.msra.mxu2 %v423_v6  ;;  %v102_v29 = vpack.c.b16 %v88_v28, %v88_v28  ;;  %v346_v38 = vor.u32 %v412_v36, %v343_v37  ;;  %v357_v41 = vld [vmem:[%s641_s0 + $0x50] sm:$0xf]  ;;  %v417_v42 = vld [vmem:[%s641_s0 + $0x54] sm:$0xf0]  ;;  %v334_v43 = vor.u32 %v411_v40, %v333_v39  ;;  %v414_v45 = vld [vmem:[%s641_s0 + $0x44] sm:$0xf]  ;;  %v101_v49 = vpack.c.b16 %v87_v48, %v87_v48 }
   0xc   :  { %v358_v44 = vor.u32 %v417_v42, %v357_v41  ;;  %v351_v46 = vld [vmem:[%s641_s0 + $0x48] sm:$0xf0]  ;;  %v604_v56 = vld [vmem:[%s642_s2] ss:$0 sm:$0xff] }
   0xd   :  { %v354_v47 = vor.u32 %v414_v45, %v351_v46 }
   0xe   :  { %189 = vmatpush.bf16.msra.mxu0 %v422_v7 }
   0xf   :  { %465 = vmatpush.bf16.msra.mxu2 %v422_v7 }
  0x12   :  { %190 = vmatpush.bf16.msra.mxu0 %v421_v8 }
  0x13   :  { %466 = vmatpush.bf16.msra.mxu2 %v421_v8 }
  0x16   :  { %400 = vmatmul.msk.bf16.gmra.mxu1 %vm164_vm0, %v330_v11  ;;  %191 = vmatpush.bf16.msra.mxu0 %v420_v12 }
  0x17   :  { %467 = vmatpush.bf16.msra.mxu2 %v420_v12 }
  0x18   :  { %405 = vmatmul.msk.bf16.gmra.mxu3 %vm164_vm0, %v102_v29 }
  0x1a   :  { %192 = vmatpush.bf16.msra.mxu0 %v419_v13 }
  0x1b   :  { %468 = vmatpush.bf16.msra.mxu2 %v419_v13 }
  0x1e   :  { %193 = vmatpush.bf16.msra.mxu0 %v418_v17 }
  0x1f   :  { %469 = vmatpush.bf16.msra.mxu2 %v418_v17 }
  0x21   :  { %194 = vmatmul.bf16.vlgmr.msra.gmra.mxu0 %v318_v22 }
  0x22   :  { %209 = vmatmul.bf16.vlgmr.msra.gmra.mxu2 %v342_v23 }
  0x26   :  { %401 = vmatmul.msk.bf16.gmra.mxu1 %vm164_vm0, %v338_v26 }
  0x31   :  { %199 = vmatmul.bf16.gmra.mxu0 %v326_v34 }
  0x32   :  { %214 = vmatmul.bf16.gmra.mxu2 %v350_v35 }
  0x36   :  { %402 = vmatmul.msk.bf16.gmra.mxu1 %vm164_vm0, %v346_v38 }
  0x41   :  { %204 = vmatmul.bf16.gmra.mxu0 %v334_v43 }
  0x42   :  { %219 = vmatmul.bf16.gmra.mxu2 %v358_v44 }
  0x46   :  { %403 = vmatmul.msk.bf16.gmra.mxu1 %vm164_vm0, %v354_v47 }
  0x52   :  { %224 = vmatmul.bf16.gmra.mxu2 %v101_v49 }
  0x83   :  { %v238_v50 = vpop.f32.mrf.mxu1 }
  0x8b   :  { %v240_v51 = vpop.f32.mrf.mxu1  ;;  %v263_v55 = vpop.f32.mrf.mxu3 }
  0x93   :  { %v243_v52 = vpop.f32.mrf.mxu1  ;;  %v265_v61 = vpop.f32.mrf.mxu3 }
  0x9b   :  { %v245_v53 = vpop.f32.mrf.mxu1  ;;  %v268_v7 = vpop.f32.mrf.mxu3 }
  0x9e   :  { %v195_v54 = vpop.f32.mrf.mxu0 }
  0x9f   :  { %v196_v57 = vadd.f32 %v604_v56, %v195_v54 }
  0xa1   :  { %v239_v62 = vadd.f32 %v238_v50, %v196_v57 }
  0xa3   :  { %v248_v58 = vpop.f32.mrf.mxu1  ;;  %v272_v1 = vmax.f32 %v239_v62, 0.0  ;;  %v270_v12 = vpop.f32.mrf.mxu3 }
  0xa5   :  { %v210_v59 = vpop.f32.mrf.mxu2 }
  0xa6   :  { %v197_v60 = vpop.f32.mrf.mxu0  ;;  %v211_v15 = vadd.f32 %v604_v56, %v210_v59 }
  0xa7   :  { %v198_v63 = vadd.f32 %v604_v56, %v197_v60 }
  0xa9   :  { %v241_v0 = vadd.f32 %v240_v51, %v198_v63 }
  0xab   :  { %v273_v2 = vmax.f32 %v241_v0, 0.0  ;;  %v250_v3 = vpop.f32.mrf.mxu1 }
  0xad   :  { %v430_v4 = vpack.c.bf16 %v273_v2, %v272_v1  ;;  %v212_v5 = vpop.f32.mrf.mxu2 }
  0xae   :  { %v200_v6 = vpop.f32.mrf.mxu0  ;;  %v213_v17 = vadd.f32 %v604_v56, %v212_v5 }
  0xaf   :  { %431 = vst [vmem:[%s643_s3] sm:$0xff] %v430_v4   ;;  %v201_v8 = vadd.f32 %v604_v56, %v200_v6 }
  0xb1   :  { %v244_v13 = vadd.f32 %v243_v52, %v201_v8 }
  0xb3   :  { %v253_v9 = vpop.f32.mrf.mxu1  ;;  %v274_v19 = vmax.f32 %v244_v13, 0.0 }
  0xb4   :  { %v254_v18 = vadd.f32 %v253_v9, %v211_v15 }
  0xb5   :  { %v215_v10 = vpop.f32.mrf.mxu2 }
  0xb6   :  { %v202_v11 = vpop.f32.mrf.mxu0  ;;  %v278_v25 = vmax.f32 %v254_v18, 0.0  ;;  %v216_v35 = vadd.f32 %v604_v56, %v215_v10 }
  0xb7   :  { %v203_v14 = vadd.f32 %v604_v56, %v202_v11 }
  0xb9   :  { %v246_v16 = vadd.f32 %v245_v53, %v203_v14 }
  0xbb   :  { %v275_v20 = vmax.f32 %v246_v16, 0.0  ;;  %v255_v21 = vpop.f32.mrf.mxu1 }
  0xbc   :  { %v256_v22 = vadd.f32 %v255_v21, %v213_v17 }
  0xbd   :  { %v435_v23 = vpack.c.bf16 %v275_v20, %v274_v19  ;;  %v217_v24 = vpop.f32.mrf.mxu2 }
  0xbe   :  { %v279_v26 = vmax.f32 %v256_v22, 0.0  ;;  %v205_v27 = vpop.f32.mrf.mxu0  ;;  %v218_v37 = vadd.f32 %v604_v56, %v217_v24 }
  0xbf   :  { %457 = vst [vmem:[%s643_s3 + $0x8] sm:$0xff] %v435_v23   ;;  %v206_v29 = vadd.f32 %v604_v56, %v205_v27 }
  0xc0   :  { %v445_v28 = vpack.c.bf16 %v279_v26, %v278_v25 }
  0xc1   :  { %v249_v33 = vadd.f32 %v248_v58, %v206_v29 }
  0xc2   :  { %459 = vst [vmem:[%s643_s3 + $0x18] sm:$0xff] %v445_v28  }
  0xc3   :  { %v258_v30 = vpop.f32.mrf.mxu1  ;;  %v276_v40 = vmax.f32 %v249_v33, 0.0 }
  0xc4   :  { %v259_v38 = vadd.f32 %v258_v30, %v216_v35 }
  0xc5   :  { %v220_v31 = vpop.f32.mrf.mxu2 }
  0xc6   :  { %v207_v32 = vpop.f32.mrf.mxu0  ;;  %v221_v39 = vadd.f32 %v604_v56, %v220_v31  ;;  %v280_v46 = vmax.f32 %v259_v38, 0.0 }
  0xc7   :  { %v208_v34 = vadd.f32 %v604_v56, %v207_v32 }
  0xc8   :  { %v264_v47 = vadd.f32 %v263_v55, %v221_v39 }
  0xc9   :  { %v251_v36 = vadd.f32 %v250_v3, %v208_v34 }
  0xca   :  { %v282_v52 = vmax.f32 %v264_v47, 0.0 }
  0xcb   :  { %v277_v41 = vmax.f32 %v251_v36, 0.0  ;;  %v260_v42 = vpop.f32.mrf.mxu1 }
  0xcc   :  { %v261_v43 = vadd.f32 %v260_v42, %v218_v37 }
  0xcd   :  { %v440_v44 = vpack.c.bf16 %v277_v41, %v276_v40  ;;  %v222_v45 = vpop.f32.mrf.mxu2 }
  0xce   :  { %v281_v48 = vmax.f32 %v261_v43, 0.0  ;;  %v223_v49 = vadd.f32 %v604_v56, %v222_v45 }
  0xcf   :  { %458 = vst [vmem:[%s643_s3 + $0x10] sm:$0xff] %v440_v44  }
  0xd0   :  { %v450_v50 = vpack.c.bf16 %v281_v48, %v280_v46  ;;  %v266_v51 = vadd.f32 %v265_v61, %v223_v49 }
  0xd2   :  { %460 = vst [vmem:[%s643_s3 + $0x20] sm:$0xff] %v450_v50   ;;  %v283_v53 = vmax.f32 %v266_v51, 0.0 }
  0xd4   :  { %v455_v54 = vpack.c.bf16 %v283_v53, %v282_v52 }
  0xd5   :  { %v225_v57 = vpop.f32.mrf.mxu2 }
  0xd6   :  { %461 = vst [vmem:[%s643_s3 + $0x28] sm:$0xff] %v455_v54   ;;  %v226_v55 = vadd.f32 %v604_v56, %v225_v57 }
  0xd8   :  { %v269_v58 = vadd.f32 %v268_v7, %v226_v55 }
  0xda   :  { %v284_v59 = vmax.f32 %v269_v58, 0.0 }
  0xdc   :  { %v297_v60 = vpack.c.bf16 %v284_v59, %v284_v59 }
  0xdd   :  { %v227_v62 = vpop.f32.mrf.mxu2 }
  0xde   :  { %310 = vst [vmem:[%s643_s3 + $0x30] sm:$0xf] %v297_v60 }

// kernel: topological_ae_forward.7
= control target key start
LH: loop header
LB: loop body
LE: loop exit
PB: predicated region body
PF: predicated region fallthrough
CT: control target
= control target key end

     0   :  { %vm1305_vm0 = vcmask 261120   ;;  %vm3698_vm6 = vcmask 257024   ;;  %s8865_s1 = inlined_call_operand.vmem [shape: bf16[1568,256], index: 1, kind: input, shape index: {}]   ;;  %s8866_s0 = inlined_call_operand.vmem [shape: bf16[16,1568], index: 0, kind: input, shape index: {}]   ;;  %s8867_s3 = inlined_call_operand.vmem [shape: f32[256,128], index: 3, kind: input, shape index: {}]   ;;  %s8868_s2 = inlined_call_operand.vmem [shape: f32[1,256], index: 2, kind: input, shape index: {}]   ;;  %s8869_s4 = inlined_call_operand.vmem [shape: f32[1,128], index: 4, kind: input, shape index: {}]   ;;  %s8870_s5 = inlined_call_operand.vmem [shape: f32[1,128], index: 5, kind: input, shape index: {}]   ;;  %s8871_s6 = inlined_call_operand.vmem [shape: f32[1,128], index: 6, kind: input, shape index: {}]   ;;  %s8872_s8 = inlined_call_operand.vmem [shape: bf16[128,256], index: 8, kind: input, shape index: {}]   ;;  %s8873_s7 = inlined_call_operand.vmem [shape: f32[1,128], index: 7, kind: input, shape index: {}]   ;;  %s8874_s10 = inlined_call_operand.vmem [shape: bf16[256,1568], index: 10, kind: input, shape index: {}]   ;;  %s8875_s12 = inlined_call_operand.vmem [shape: f32[16,128], index: 12, kind: output, shape index: {0}]   ;;  %s8876_s9 = inlined_call_operand.vmem [shape: f32[1,256], index: 9, kind: input, shape index: {}]   ;;  %s8877_s11 = inlined_call_operand.vmem [shape: f32[1,1568], index: 11, kind: input, shape index: {}]   ;;  %s8878_s13 = inlined_call_operand.vmem [shape: bf16[16,1568], index: 13, kind: output, shape index: {1}]  }
   0x1   :  { %v3825_v0 = vld [vmem:[%s8865_s1 + $0x70] sm:$0xf]  ;;  %v5477_v1 = vld [vmem:[%s8865_s1 + $0x74] sm:$0xf0]  ;;  %v3817_v11 = vld [vmem:[%s8865_s1 + $0x60] sm:$0xf] }
   0x2   :  { %v3889_v2 = vld [vmem:[%s8865_s1 + $0xf0] sm:$0xf]  ;;  %v3826_v3 = vor.u32 %v5477_v1, %v3825_v0  ;;  %v5493_v4 = vld [vmem:[%s8865_s1 + $0xf4] sm:$0xf0]  ;;  %v5475_v13 = vld [vmem:[%s8865_s1 + $0x64] sm:$0xf0] }
   0x3   :  { %v3953_v5 = vld [vmem:[%s8865_s1 + $0x170] sm:$0xf]  ;;  %v5509_v6 = vld [vmem:[%s8865_s1 + $0x174] sm:$0xf0]  ;;  %v3890_v7 = vor.u32 %v5493_v4, %v3889_v2  ;;  %v3881_v14 = vld [vmem:[%s8865_s1 + $0xe0] sm:$0xf]  ;;  %v3818_v16 = vor.u32 %v5475_v13, %v3817_v11 }
   0x4   :  { %v3954_v8 = vor.u32 %v5509_v6, %v3953_v5  ;;  %v4017_v9 = vld [vmem:[%s8865_s1 + $0x1f0] sm:$0xf]  ;;  %v5525_v10 = vld [vmem:[%s8865_s1 + $0x1f4] sm:$0xf0]  ;;  %1309 = vmatpush.bf16.msra.mxu0 %v3826_v3  ;;  %v5491_v15 = vld [vmem:[%s8865_s1 + $0xe4] sm:$0xf0] }
   0x5   :  { %v4018_v12 = vor.u32 %v5525_v10, %v4017_v9  ;;  %1323 = vmatpush.bf16.msra.mxu1 %v3890_v7  ;;  %v3882_v17 = vor.u32 %v5491_v15, %v3881_v14  ;;  %v3945_v18 = vld [vmem:[%s8865_s1 + $0x160] sm:$0xf]  ;;  %v5507_v19 = vld [vmem:[%s8865_s1 + $0x164] sm:$0xf0]  ;;  %v3809_v23 = vld [vmem:[%s8865_s1 + $0x50] sm:$0xf] }
   0x6   :  { %1337 = vmatpush.bf16.msra.mxu2 %v3954_v8  ;;  %v4009_v20 = vld [vmem:[%s8865_s1 + $0x1e0] sm:$0xf]  ;;  %v3946_v21 = vor.u32 %v5507_v19, %v3945_v18  ;;  %v5523_v22 = vld [vmem:[%s8865_s1 + $0x1e4] sm:$0xf0]  ;;  %v5473_v24 = vld [vmem:[%s8865_s1 + $0x54] sm:$0xf0] }
   0x7   :  { %1351 = vmatpush.bf16.msra.mxu3 %v4018_v12  ;;  %v4010_v25 = vor.u32 %v5523_v22, %v4009_v20  ;;  %v3873_v26 = vld [vmem:[%s8865_s1 + $0xd0] sm:$0xf]  ;;  %v5489_v27 = vld [vmem:[%s8865_s1 + $0xd4] sm:$0xf0]  ;;  %v3810_v29 = vor.u32 %v5473_v24, %v3809_v23  ;;  %v3801_v35 = vld [vmem:[%s8865_s1 + $0x40] sm:$0xf] }
   0x8   :  { %v3937_v28 = vld [vmem:[%s8865_s1 + $0x150] sm:$0xf]  ;;  %1310 = vmatpush.bf16.msra.mxu0 %v3818_v16  ;;  %v5505_v30 = vld [vmem:[%s8865_s1 + $0x154] sm:$0xf0]  ;;  %v3874_v33 = vor.u32 %v5489_v27, %v3873_v26  ;;  %v5471_v36 = vld [vmem:[%s8865_s1 + $0x44] sm:$0xf0] }
   0x9   :  { %v4001_v31 = vld [vmem:[%s8865_s1 + $0x1d0] sm:$0xf]  ;;  %v5521_v32 = vld [vmem:[%s8865_s1 + $0x1d4] sm:$0xf0]  ;;  %1324 = vmatpush.bf16.msra.mxu1 %v3882_v17  ;;  %v3938_v34 = vor.u32 %v5505_v30, %v3937_v28  ;;  %v3865_v37 = vld [vmem:[%s8865_s1 + $0xc0] sm:$0xf]  ;;  %v3802_v44 = vor.u32 %v5471_v36, %v3801_v35 }
   0xa   :  { %1338 = vmatpush.bf16.msra.mxu2 %v3946_v21  ;;  %v4002_v38 = vor.u32 %v5521_v32, %v4001_v31  ;;  %v5487_v39 = vld [vmem:[%s8865_s1 + $0xc4] sm:$0xf0]  ;;  %v3929_v40 = vld [vmem:[%s8865_s1 + $0x140] sm:$0xf]  ;;  %v3793_v47 = vld [vmem:[%s8865_s1 + $0x30] sm:$0xf] }
   0xb   :  { %1352 = vmatpush.bf16.msra.mxu3 %v4010_v25  ;;  %v5503_v41 = vld [vmem:[%s8865_s1 + $0x144] sm:$0xf0]  ;;  %v3993_v42 = vld [vmem:[%s8865_s1 + $0x1c0] sm:$0xf]  ;;  %v3866_v45 = vor.u32 %v5487_v39, %v3865_v37  ;;  %v5469_v48 = vld [vmem:[%s8865_s1 + $0x34] sm:$0xf0] }
   0xc   :  { %v5519_v43 = vld [vmem:[%s8865_s1 + $0x1c4] sm:$0xf0]  ;;  %1311 = vmatpush.bf16.msra.mxu0 %v3810_v29  ;;  %v3930_v46 = vor.u32 %v5503_v41, %v3929_v40  ;;  %v3857_v49 = vld [vmem:[%s8865_s1 + $0xb0] sm:$0xf]  ;;  %v5485_v51 = vld [vmem:[%s8865_s1 + $0xb4] sm:$0xf0]  ;;  %v3794_v56 = vor.u32 %v5469_v48, %v3793_v47 }
   0xd   :  { %1325 = vmatpush.bf16.msra.mxu1 %v3874_v33  ;;  %v3994_v50 = vor.u32 %v5519_v43, %v3993_v42  ;;  %v3921_v52 = vld [vmem:[%s8865_s1 + $0x130] sm:$0xf]  ;;  %v5501_v53 = vld [vmem:[%s8865_s1 + $0x134] sm:$0xf0]  ;;  %v3858_v57 = vor.u32 %v5485_v51, %v3857_v49  ;;  %v3785_v59 = vld [vmem:[%s8865_s1 + $0x20] sm:$0xf] }
   0xe   :  { %1339 = vmatpush.bf16.msra.mxu2 %v3938_v34  ;;  %v3985_v54 = vld [vmem:[%s8865_s1 + $0x1b0] sm:$0xf]  ;;  %v5517_v55 = vld [vmem:[%s8865_s1 + $0x1b4] sm:$0xf0]  ;;  %v3922_v58 = vor.u32 %v5501_v53, %v3921_v52  ;;  %v5467_v60 = vld [vmem:[%s8865_s1 + $0x24] sm:$0xf0] }
   0xf   :  { %1353 = vmatpush.bf16.msra.mxu3 %v4002_v38  ;;  %v3849_v61 = vld [vmem:[%s8865_s1 + $0xa0] sm:$0xf]  ;;  %v3986_v62 = vor.u32 %v5517_v55, %v3985_v54  ;;  %v5483_v63 = vld [vmem:[%s8865_s1 + $0xa4] sm:$0xf0]  ;;  %v3786_v4 = vor.u32 %v5467_v60, %v3785_v59  ;;  %v3777_v7 = vld [vmem:[%s8865_s1 + $0x10] sm:$0xf] }
  0x10   :  { %1312 = vmatpush.bf16.msra.mxu0 %v3802_v44  ;;  %v3913_v0 = vld [vmem:[%s8865_s1 + $0x120] sm:$0xf]  ;;  %v5499_v1 = vld [vmem:[%s8865_s1 + $0x124] sm:$0xf0]  ;;  %v3850_v5 = vor.u32 %v5483_v63, %v3849_v61  ;;  %v5465_v8 = vld [vmem:[%s8865_s1 + $0x14] sm:$0xf0] }
  0x11   :  { %1326 = vmatpush.bf16.msra.mxu1 %v3866_v45  ;;  %v3977_v2 = vld [vmem:[%s8865_s1 + $0x1a0] sm:$0xf]  ;;  %v5515_v3 = vld [vmem:[%s8865_s1 + $0x1a4] sm:$0xf0]  ;;  %v3914_v6 = vor.u32 %v5499_v1, %v3913_v0  ;;  %v3841_v9 = vld [vmem:[%s8865_s1 + $0x90] sm:$0xf]  ;;  %v3778_v16 = vor.u32 %v5465_v8, %v3777_v7 }
  0x12   :  { %1340 = vmatpush.bf16.msra.mxu2 %v3930_v46  ;;  %v3978_v10 = vor.u32 %v5515_v3, %v3977_v2  ;;  %v5481_v11 = vld [vmem:[%s8865_s1 + $0x94] sm:$0xf0]  ;;  %v3905_v12 = vld [vmem:[%s8865_s1 + $0x110] sm:$0xf]  ;;  %v3769_v17 = vld [vmem:[%s8865_s1] sm:$0xf] }
  0x13   :  { %1354 = vmatpush.bf16.msra.mxu3 %v3994_v50  ;;  %v5497_v13 = vld [vmem:[%s8865_s1 + $0x114] sm:$0xf0]  ;;  %v3969_v14 = vld [vmem:[%s8865_s1 + $0x190] sm:$0xf]  ;;  %v5463_v18 = vld [vmem:[%s8865_s1 + $0x4] sm:$0xf0]  ;;  %v3842_v19 = vor.u32 %v5481_v11, %v3841_v9 }
  0x14   :  { %1313 = vmatpush.bf16.msra.mxu0 %v3794_v56  ;;  %v5513_v15 = vld [vmem:[%s8865_s1 + $0x194] sm:$0xf0]  ;;  %v3906_v20 = vor.u32 %v5497_v13, %v3905_v12  ;;  %v3833_v21 = vld [vmem:[%s8865_s1 + $0x80] sm:$0xf]  ;;  %v5479_v22 = vld [vmem:[%s8865_s1 + $0x84] sm:$0xf0]  ;;  %v3770_v31 = vor.u32 %v5463_v18, %v3769_v17 }
  0x15   :  { %1327 = vmatpush.bf16.msra.mxu1 %v3858_v57  ;;  %v3897_v23 = vld [vmem:[%s8865_s1 + $0x100] sm:$0xf]  ;;  %v3970_v24 = vor.u32 %v5513_v15, %v3969_v14  ;;  %v5495_v25 = vld [vmem:[%s8865_s1 + $0x104] sm:$0xf0]  ;;  %v4081_v28 = vld [vmem:[%s8865_s1 + $0x270] sm:$0xf]  ;;  %v3834_v35 = vor.u32 %v5479_v22, %v3833_v21 }
  0x16   :  { %1341 = vmatpush.bf16.msra.mxu2 %v3922_v58  ;;  %v3961_v26 = vld [vmem:[%s8865_s1 + $0x180] sm:$0xf]  ;;  %v5511_v27 = vld [vmem:[%s8865_s1 + $0x184] sm:$0xf0]  ;;  %v5541_v29 = vld [vmem:[%s8865_s1 + $0x274] sm:$0xf0]  ;;  %v3898_v36 = vor.u32 %v5495_v25, %v3897_v23 }
  0x17   :  { %1355 = vmatpush.bf16.msra.mxu3 %v3986_v62  ;;  %v4145_v30 = vld [vmem:[%s8865_s1 + $0x2f0] sm:$0xf]  ;;  %v5557_v32 = vld [vmem:[%s8865_s1 + $0x2f4] sm:$0xf0]  ;;  %v3962_v39 = vor.u32 %v5511_v27, %v3961_v26  ;;  %v4082_v40 = vor.u32 %v5541_v29, %v4081_v28  ;;  %v4073_v41 = vld [vmem:[%s8865_s1 + $0x260] sm:$0xf] }
  0x18   :  { %1314 = vmatpush.bf16.msra.mxu0 %v3786_v4  ;;  %v4209_v33 = vld [vmem:[%s8865_s1 + $0x370] sm:$0xf]  ;;  %v5573_v34 = vld [vmem:[%s8865_s1 + $0x374] sm:$0xf0]  ;;  %v5539_v42 = vld [vmem:[%s8865_s1 + $0x264] sm:$0xf0]  ;;  %v4146_v43 = vor.u32 %v5557_v32, %v4145_v30 }
  0x19   :  { %1328 = vmatpush.bf16.msra.mxu1 %v3850_v5  ;;  %v4273_v37 = vld [vmem:[%s8865_s1 + $0x3f0] sm:$0xf]  ;;  %v5589_v38 = vld [vmem:[%s8865_s1 + $0x3f4] sm:$0xf0]  ;;  %v4210_v44 = vor.u32 %v5573_v34, %v4209_v33  ;;  %v4137_v45 = vld [vmem:[%s8865_s1 + $0x2e0] sm:$0xf]  ;;  %v4074_v55 = vor.u32 %v5539_v42, %v4073_v41 }
  0x1a   :  { %1342 = vmatpush.bf16.msra.mxu2 %v3914_v6  ;;  %v5555_v46 = vld [vmem:[%s8865_s1 + $0x2e4] sm:$0xf0]  ;;  %v4201_v47 = vld [vmem:[%s8865_s1 + $0x360] sm:$0xf]  ;;  %v4274_v48 = vor.u32 %v5589_v38, %v4273_v37  ;;  %v5455_v53 = vld [vmem:[%s8866_s0 + $0x30] sm:$0xf0] }
  0x1b   :  { %1356 = vmatpush.bf16.msra.mxu3 %v3978_v10  ;;  %v5571_v49 = vld [vmem:[%s8865_s1 + $0x364] sm:$0xf0]  ;;  %v4265_v50 = vld [vmem:[%s8865_s1 + $0x3e0] sm:$0xf]  ;;  %v4065_v56 = vld [vmem:[%s8865_s1 + $0x250] sm:$0xf]  ;;  %v4138_v60 = vor.u32 %v5555_v46, %v4137_v45 }
  0x1c   :  { %1315 = vmatpush.bf16.msra.mxu0 %v3778_v16  ;;  %v5587_v51 = vld [vmem:[%s8865_s1 + $0x3e4] sm:$0xf0]  ;;  %v3717_v52 = vld [vmem:[%s8866_s0] sm:$0xf]  ;;  %v5537_v57 = vld [vmem:[%s8865_s1 + $0x254] sm:$0xf0]  ;;  %v4202_v61 = vor.u32 %v5571_v49, %v4201_v47 }
  0x1d   :  { %1329 = vmatpush.bf16.msra.mxu1 %v3842_v19  ;;  %v3725_v54 = vld [vmem:[%s8866_s0 + $0x8] sm:$0xf]  ;;  %v6215_v58 = vor.u32 %v5455_v53, %v3717_v52  ;;  %v5456_v59 = vld [vmem:[%s8866_s0 + $0x38] sm:$0xf0]  ;;  %v4129_v62 = vld [vmem:[%s8865_s1 + $0x2d0] sm:$0xf]  ;;  %v4266_v2 = vor.u32 %v5587_v51, %v4265_v50  ;;  %v4066_v9 = vor.u32 %v5537_v57, %v4065_v56 }
  0x1e   :  { %1343 = vmatpush.bf16.msra.mxu2 %v3906_v20  ;;  %v5553_v63 = vld [vmem:[%s8865_s1 + $0x2d4] sm:$0xf0]  ;;  %v4193_v0 = vld [vmem:[%s8865_s1 + $0x350] sm:$0xf]  ;;  %v6229_v1 = vor.u32 %v5456_v59, %v3725_v54  ;;  %v5449_v6 = vld [vmem:[%s8866_s0 + $0x4] sm:$0xf] }
  0x1f   :  { %1357 = vmatpush.bf16.msra.mxu3 %v3970_v24  ;;  %v5569_v3 = vld [vmem:[%s8865_s1 + $0x354] sm:$0xf0]  ;;  %v4257_v4 = vld [vmem:[%s8865_s1 + $0x3d0] sm:$0xf]  ;;  %v5450_v8 = vld [vmem:[%s8866_s0 + $0xc] sm:$0xf]  ;;  %v4130_v12 = vor.u32 %v5553_v63, %v4129_v62 }
  0x20   :  { %1316 = vmatpush.bf16.msra.mxu0 %v3770_v31  ;;  %v5585_v5 = vld [vmem:[%s8865_s1 + $0x3d4] sm:$0xf0]  ;;  %v3727_v11 = vld [vmem:[%s8866_s0 + $0x3c] sm:$0xf0]  ;;  %v4194_v13 = vor.u32 %v5569_v3, %v4193_v0  ;;  %v5535_v15 = vld [vmem:[%s8865_s1 + $0x244] sm:$0xf0] }
  0x21   :  { %1330 = vmatpush.bf16.msra.mxu1 %v3834_v35  ;;  %v3719_v7 = vld [vmem:[%s8866_s0 + $0x34] sm:$0xf0]  ;;  %v4057_v14 = vld [vmem:[%s8865_s1 + $0x240] sm:$0xf]  ;;  %v6265_v17 = vor.u32 %v5450_v8, %v3727_v11  ;;  %v4258_v18 = vor.u32 %v5585_v5, %v4257_v4  ;;  %v5551_v19 = vld [vmem:[%s8865_s1 + $0x2c4] sm:$0xf0] }
  0x22   :  { %1344 = vmatpush.bf16.msra.mxu2 %v3898_v36  ;;  %v6251_v10 = vor.u32 %v5449_v6, %v3719_v7  ;;  %v4121_v16 = vld [vmem:[%s8865_s1 + $0x2c0] sm:$0xf]  ;;  %v5567_v21 = vld [vmem:[%s8865_s1 + $0x344] sm:$0xf0]  ;;  %v4058_v24 = vor.u32 %v5535_v15, %v4057_v14  ;;  %v4049_v27 = vld [vmem:[%s8865_s1 + $0x230] sm:$0xf] }
  0x23   :  { %1358 = vmatpush.bf16.msra.mxu3 %v3962_v39  ;;  %1317 = vmatmul.bf16.vlgmr.msra.gmra.mxu0 %v6215_v58  ;;  %v4185_v20 = vld [vmem:[%s8865_s1 + $0x340] sm:$0xf]  ;;  %v5583_v23 = vld [vmem:[%s8865_s1 + $0x3c4] sm:$0xf0]  ;;  %v4122_v25 = vor.u32 %v5551_v19, %v4121_v16  ;;  %v5533_v28 = vld [vmem:[%s8865_s1 + $0x234] sm:$0xf0] }
  0x24   :  { %1365 = vmatpush.bf16.msrb.mxu0 %v4082_v40  ;;  %1331 = vmatmul.bf16.vlgmr.msra.gmra.mxu1 %v6251_v10  ;;  %v4249_v22 = vld [vmem:[%s8865_s1 + $0x3c0] sm:$0xf]  ;;  %v4186_v26 = vor.u32 %v5567_v21, %v4185_v20  ;;  %v4113_v29 = vld [vmem:[%s8865_s1 + $0x2b0] sm:$0xf]  ;;  %v5549_v31 = vld [vmem:[%s8865_s1 + $0x2b4] sm:$0xf0]  ;;  %v4050_v36 = vor.u32 %v5533_v28, %v4049_v27 }
  0x25   :  { %1379 = vmatpush.bf16.msrb.mxu1 %v4146_v43  ;;  %1345 = vmatmul.bf16.vlgmr.msra.gmra.mxu2 %v6229_v1  ;;  %v4250_v30 = vor.u32 %v5583_v23, %v4249_v22  ;;  %v4177_v32 = vld [vmem:[%s8865_s1 + $0x330] sm:$0xf]  ;;  %v5565_v33 = vld [vmem:[%s8865_s1 + $0x334] sm:$0xf0]  ;;  %v4114_v37 = vor.u32 %v5549_v31, %v4113_v29  ;;  %v4041_v39 = vld [vmem:[%s8865_s1 + $0x220] sm:$0xf] }
  0x26   :  { %1393 = vmatpush.bf16.msrb.mxu2 %v4210_v44  ;;  %1359 = vmatmul.bf16.vlgmr.msra.gmra.mxu3 %v6265_v17  ;;  %v4241_v34 = vld [vmem:[%s8865_s1 + $0x3b0] sm:$0xf]  ;;  %v5581_v35 = vld [vmem:[%s8865_s1 + $0x3b4] sm:$0xf0]  ;;  %v4178_v38 = vor.u32 %v5565_v33, %v4177_v32  ;;  %v5531_v40 = vld [vmem:[%s8865_s1 + $0x224] sm:$0xf0] }
  0x27   :  { %1407 = vmatpush.bf16.msrb.mxu3 %v4274_v48  ;;  %v4105_v41 = vld [vmem:[%s8865_s1 + $0x2a0] sm:$0xf]  ;;  %v4242_v42 = vor.u32 %v5581_v35, %v4241_v34  ;;  %v5547_v43 = vld [vmem:[%s8865_s1 + $0x2a4] sm:$0xf0]  ;;  %v4042_v48 = vor.u32 %v5531_v40, %v4041_v39  ;;  %v4033_v49 = vld [vmem:[%s8865_s1 + $0x210] sm:$0xf] }
  0x28   :  { %1366 = vmatpush.bf16.msrb.mxu0 %v4074_v55  ;;  %v4169_v44 = vld [vmem:[%s8865_s1 + $0x320] sm:$0xf]  ;;  %v5563_v45 = vld [vmem:[%s8865_s1 + $0x324] sm:$0xf0]  ;;  %v4106_v50 = vor.u32 %v5547_v43, %v4105_v41  ;;  %v5529_v52 = vld [vmem:[%s8865_s1 + $0x214] sm:$0xf0] }
  0x29   :  { %1380 = vmatpush.bf16.msrb.mxu1 %v4138_v60  ;;  %v4233_v46 = vld [vmem:[%s8865_s1 + $0x3a0] sm:$0xf]  ;;  %v5579_v47 = vld [vmem:[%s8865_s1 + $0x3a4] sm:$0xf0]  ;;  %v4170_v51 = vor.u32 %v5563_v45, %v4169_v44  ;;  %v4097_v53 = vld [vmem:[%s8865_s1 + $0x290] sm:$0xf]  ;;  %v4034_v63 = vor.u32 %v5529_v52, %v4033_v49 }
  0x2a   :  { %1394 = vmatpush.bf16.msrb.mxu2 %v4202_v61  ;;  %v5545_v54 = vld [vmem:[%s8865_s1 + $0x294] sm:$0xf0]  ;;  %v4234_v55 = vor.u32 %v5579_v47, %v4233_v46  ;;  %v4161_v56 = vld [vmem:[%s8865_s1 + $0x310] sm:$0xf]  ;;  %v4025_v61 = vld [vmem:[%s8865_s1 + $0x200] sm:$0xf] }
  0x2b   :  { %1408 = vmatpush.bf16.msrb.mxu3 %v4266_v2  ;;  %v5561_v57 = vld [vmem:[%s8865_s1 + $0x314] sm:$0xf0]  ;;  %v4225_v59 = vld [vmem:[%s8865_s1 + $0x390] sm:$0xf]  ;;  %v5527_v62 = vld [vmem:[%s8865_s1 + $0x204] sm:$0xf0]  ;;  %v4098_v5 = vor.u32 %v5545_v54, %v4097_v53 }
  0x2c   :  { %1367 = vmatpush.bf16.msrb.mxu0 %v4066_v9  ;;  %v5577_v60 = vld [vmem:[%s8865_s1 + $0x394] sm:$0xf0]  ;;  %v4089_v0 = vld [vmem:[%s8865_s1 + $0x280] sm:$0xf]  ;;  %v5543_v2 = vld [vmem:[%s8865_s1 + $0x284] sm:$0xf0]  ;;  %v4162_v6 = vor.u32 %v5561_v57, %v4161_v56  ;;  %v4026_v19 = vor.u32 %v5527_v62, %v4025_v61 }
  0x2d   :  { %1381 = vmatpush.bf16.msrb.mxu1 %v4130_v12  ;;  %v4153_v3 = vld [vmem:[%s8865_s1 + $0x300] sm:$0xf]  ;;  %v5559_v4 = vld [vmem:[%s8865_s1 + $0x304] sm:$0xf0]  ;;  %v4337_v9 = vld [vmem:[%s8865_s1 + $0x470] sm:$0xf]  ;;  %v4226_v11 = vor.u32 %v5577_v60, %v4225_v59  ;;  %v4090_v23 = vor.u32 %v5543_v2, %v4089_v0 }
  0x2e   :  { %1395 = vmatpush.bf16.msrb.mxu2 %v4194_v13  ;;  %v4217_v7 = vld [vmem:[%s8865_s1 + $0x380] sm:$0xf]  ;;  %v5575_v8 = vld [vmem:[%s8865_s1 + $0x384] sm:$0xf0]  ;;  %v5605_v12 = vld [vmem:[%s8865_s1 + $0x474] sm:$0xf0] }
  0x2f   :  { %1409 = vmatpush.bf16.msrb.mxu3 %v4258_v18  ;;  %v4401_v13 = vld [vmem:[%s8865_s1 + $0x4f0] sm:$0xf]  ;;  %v5621_v14 = vld [vmem:[%s8865_s1 + $0x4f4] sm:$0xf0]  ;;  %v5457_v22 = vld [vmem:[%s8866_s0 + $0x40] sm:$0xf0]  ;;  %v4218_v28 = vor.u32 %v5575_v8, %v4217_v7  ;;  %v4338_v29 = vor.u32 %v5605_v12, %v4337_v9 }
  0x30   :  { %1368 = vmatpush.bf16.msrb.mxu0 %v4058_v24  ;;  %v4465_v15 = vld [vmem:[%s8865_s1 + $0x570] sm:$0xf]  ;;  %v5637_v16 = vld [vmem:[%s8865_s1 + $0x574] sm:$0xf0]  ;;  %v4154_v24 = vor.u32 %v5559_v4, %v4153_v3  ;;  %v5451_v27 = vld [vmem:[%s8866_s0 + $0x14] sm:$0xf]  ;;  %v4402_v33 = vor.u32 %v5621_v14, %v4401_v13 }
  0x31   :  { %1382 = vmatpush.bf16.msrb.mxu1 %v4122_v25  ;;  %v4529_v18 = vld [vmem:[%s8865_s1 + $0x5f0] sm:$0xf]  ;;  %v5653_v20 = vld [vmem:[%s8865_s1 + $0x5f4] sm:$0xf0]  ;;  %v5452_v31 = vld [vmem:[%s8866_s0 + $0x1c] sm:$0xf]  ;;  %v4466_v34 = vor.u32 %v5637_v16, %v4465_v15 }
  0x32   :  { %1396 = vmatpush.bf16.msrb.mxu2 %v4186_v26  ;;  %v3733_v21 = vld [vmem:[%s8866_s0 + $0x10] sm:$0xf]  ;;  %v3741_v25 = vld [vmem:[%s8866_s0 + $0x18] sm:$0xf]  ;;  %v5458_v26 = vld [vmem:[%s8866_s0 + $0x48] sm:$0xf0] }
  0x33   :  { %1410 = vmatpush.bf16.msrb.mxu3 %v4250_v30  ;;  %v3735_v30 = vld [vmem:[%s8866_s0 + $0x44] sm:$0xf0]  ;;  %v3743_v32 = vld [vmem:[%s8866_s0 + $0x4c] sm:$0xf0]  ;;  %v4329_v35 = vld [vmem:[%s8865_s1 + $0x460] sm:$0xf]  ;;  %v6437_v39 = vor.u32 %v5457_v22, %v3733_v21  ;;  %v6448_v43 = vor.u32 %v5458_v26, %v3741_v25 }
  0x34   :  { %1369 = vmatpush.bf16.msrb.mxu0 %v4050_v36  ;;  %v5603_v36 = vld [vmem:[%s8865_s1 + $0x464] sm:$0xf0]  ;;  %v4457_v41 = vld [vmem:[%s8865_s1 + $0x560] sm:$0xf]  ;;  %v6450_v44 = vor.u32 %v5451_v27, %v3735_v30  ;;  %v6458_v47 = vor.u32 %v5452_v31, %v3743_v32  ;;  %v5601_v52 = vld [vmem:[%s8865_s1 + $0x454] sm:$0xf0] }
  0x35   :  { %1383 = vmatpush.bf16.msrb.mxu1 %v4114_v37  ;;  %v4393_v37 = vld [vmem:[%s8865_s1 + $0x4e0] sm:$0xf]  ;;  %v5619_v40 = vld [vmem:[%s8865_s1 + $0x4e4] sm:$0xf0]  ;;  %v4385_v53 = vld [vmem:[%s8865_s1 + $0x4d0] sm:$0xf] }
  0x36   :  { %1397 = vmatpush.bf16.msrb.mxu2 %v4178_v38  ;;  %v4530_v38 = vor.u32 %v5653_v20, %v4529_v18  ;;  %v4521_v45 = vld [vmem:[%s8865_s1 + $0x5e0] sm:$0xf]  ;;  %v5651_v46 = vld [vmem:[%s8865_s1 + $0x5e4] sm:$0xf0]  ;;  %v4394_v49 = vor.u32 %v5619_v40, %v4393_v37  ;;  %v4449_v56 = vld [vmem:[%s8865_s1 + $0x550] sm:$0xf] }
  0x37   :  { %1411 = vmatpush.bf16.msrb.mxu3 %v4242_v42  ;;  %v5635_v42 = vld [vmem:[%s8865_s1 + $0x564] sm:$0xf0]  ;;  %v4522_v54 = vor.u32 %v5651_v46, %v4521_v45  ;;  %v5633_v57 = vld [vmem:[%s8865_s1 + $0x554] sm:$0xf0]  ;;  %v4513_v59 = vld [vmem:[%s8865_s1 + $0x5d0] sm:$0xf] }
  0x38   :  { %1370 = vmatpush.bf16.msrb.mxu0 %v4042_v48  ;;  %v4330_v48 = vor.u32 %v5603_v36, %v4329_v35  ;;  %v5649_v60 = vld [vmem:[%s8865_s1 + $0x5d4] sm:$0xf0]  ;;  %v4313_v0 = vld [vmem:[%s8865_s1 + $0x440] sm:$0xf]  ;;  %v5599_v2 = vld [vmem:[%s8865_s1 + $0x444] sm:$0xf0] }
  0x39   :  { %1384 = vmatpush.bf16.msrb.mxu1 %v4106_v50  ;;  %v4458_v50 = vor.u32 %v5635_v42, %v4457_v41  ;;  %v4377_v3 = vld [vmem:[%s8865_s1 + $0x4c0] sm:$0xf]  ;;  %v4514_v4 = vor.u32 %v5649_v60, %v4513_v59  ;;  %v5631_v7 = vld [vmem:[%s8865_s1 + $0x544] sm:$0xf0]  ;;  %v4305_v14 = vld [vmem:[%s8865_s1 + $0x430] sm:$0xf] }
  0x3a   :  { %1398 = vmatpush.bf16.msrb.mxu2 %v4170_v51  ;;  %v4321_v51 = vld [vmem:[%s8865_s1 + $0x450] sm:$0xf]  ;;  %v4505_v8 = vld [vmem:[%s8865_s1 + $0x5c0] sm:$0xf]  ;;  %v5647_v9 = vld [vmem:[%s8865_s1 + $0x5c4] sm:$0xf0] }
  0x3b   :  { %1412 = vmatpush.bf16.msrb.mxu3 %v4234_v55  ;;  %v5617_v55 = vld [vmem:[%s8865_s1 + $0x4d4] sm:$0xf0]  ;;  %v4322_v61 = vor.u32 %v5601_v52, %v4321_v51  ;;  %v4369_v16 = vld [vmem:[%s8865_s1 + $0x4b0] sm:$0xf]  ;;  %v4506_v18 = vor.u32 %v5647_v9, %v4505_v8  ;;  %v4297_v27 = vld [vmem:[%s8865_s1 + $0x420] sm:$0xf] }
  0x3c   :  { %1371 = vmatpush.bf16.msrb.mxu0 %v4034_v63  ;;  %v4386_v62 = vor.u32 %v5617_v55, %v4385_v53  ;;  %v4450_v63 = vor.u32 %v5633_v57, %v4449_v56  ;;  %v5597_v15 = vld [vmem:[%s8865_s1 + $0x434] sm:$0xf0]  ;;  %v4433_v20 = vld [vmem:[%s8865_s1 + $0x530] sm:$0xf]  ;;  %v5611_v31 = vld [vmem:[%s8865_s1 + $0x4a4] sm:$0xf0] }
  0x3d   :  { %1385 = vmatpush.bf16.msrb.mxu1 %v4098_v5  ;;  %v5615_v5 = vld [vmem:[%s8865_s1 + $0x4c4] sm:$0xf0]  ;;  %v5629_v21 = vld [vmem:[%s8865_s1 + $0x534] sm:$0xf0]  ;;  %v4497_v22 = vld [vmem:[%s8865_s1 + $0x5b0] sm:$0xf] }
  0x3e   :  { %1399 = vmatpush.bf16.msrb.mxu2 %v4162_v6  ;;  %v4441_v6 = vld [vmem:[%s8865_s1 + $0x540] sm:$0xf]  ;;  %v4378_v12 = vor.u32 %v5615_v5, %v4377_v3  ;;  %v4434_v26 = vor.u32 %v5629_v21, %v4433_v20  ;;  %v5643_v35 = vld [vmem:[%s8865_s1 + $0x5a4] sm:$0xf0]  ;;  %v4289_v37 = vld [vmem:[%s8865_s1 + $0x410] sm:$0xf] }
  0x3f   :  { %1413 = vmatpush.bf16.msrb.mxu3 %v4226_v11  ;;  %v4314_v11 = vor.u32 %v5599_v2, %v4313_v0  ;;  %v4442_v13 = vor.u32 %v5631_v7, %v4441_v6  ;;  %v4425_v32 = vld [vmem:[%s8865_s1 + $0x520] sm:$0xf]  ;;  %v5593_v41 = vld [vmem:[%s8865_s1 + $0x414] sm:$0xf0]  ;;  %v4353_v42 = vld [vmem:[%s8865_s1 + $0x490] sm:$0xf] }
  0x40   :  { %1372 = vmatpush.bf16.msrb.mxu0 %v4026_v19  ;;  %v5613_v19 = vld [vmem:[%s8865_s1 + $0x4b4] sm:$0xf0]  ;;  %v4281_v52 = vld [vmem:[%s8865_s1 + $0x400] sm:$0xf]  ;;  %v5591_v53 = vld [vmem:[%s8865_s1 + $0x404] sm:$0xf0] }
  0x41   :  { %1386 = vmatpush.bf16.msrb.mxu1 %v4090_v23  ;;  %v5645_v23 = vld [vmem:[%s8865_s1 + $0x5b4] sm:$0xf0]  ;;  %v4370_v25 = vor.u32 %v5613_v19, %v4369_v16  ;;  %v4345_v55 = vld [vmem:[%s8865_s1 + $0x480] sm:$0xf]  ;;  %v5607_v56 = vld [vmem:[%s8865_s1 + $0x484] sm:$0xf0]  ;;  %v4282_v9 = vor.u32 %v5591_v53, %v4281_v52 }
  0x42   :  { %1400 = vmatpush.bf16.msrb.mxu2 %v4154_v24  ;;  %v4306_v24 = vor.u32 %v5597_v15, %v4305_v14  ;;  %v4498_v30 = vor.u32 %v5645_v23, %v4497_v22  ;;  %v5609_v45 = vld [vmem:[%s8865_s1 + $0x494] sm:$0xf0]  ;;  %v4409_v57 = vld [vmem:[%s8865_s1 + $0x500] sm:$0xf]  ;;  %v5623_v59 = vld [vmem:[%s8865_s1 + $0x504] sm:$0xf0]  ;;  %v4346_v14 = vor.u32 %v5607_v56, %v4345_v55 }
  0x43   :  { %1414 = vmatpush.bf16.msrb.mxu3 %v4218_v28  ;;  %1373 = vmatmul.bf16.vlgmr.msrb.gmra.mxu0 %v6437_v39  ;;  %v5595_v28 = vld [vmem:[%s8865_s1 + $0x424] sm:$0xf0]  ;;  %v5641_v51 = vld [vmem:[%s8865_s1 + $0x594] sm:$0xf0]  ;;  %v4354_v60 = vor.u32 %v5609_v45, %v4353_v42  ;;  %v5476_v0 = vld [vmem:[%s8865_s1 + $0x74] sm:$0xf]  ;;  %v4410_v15 = vor.u32 %v5623_v59, %v4409_v57 }
  0x44   :  { %1421 = vmatpush.bf16.msra.mxu0 %v4338_v29  ;;  %1387 = vmatmul.bf16.vlgmr.msrb.gmra.mxu1 %v6450_v44  ;;  %v4361_v29 = vld [vmem:[%s8865_s1 + $0x4a0] sm:$0xf]  ;;  %v4298_v36 = vor.u32 %v5595_v28, %v4297_v27  ;;  %v3827_v3 = vld [vmem:[%s8865_s1 + $0x78] sm:$0xf0]  ;;  %v5508_v6 = vld [vmem:[%s8865_s1 + $0x174] sm:$0xf] }
  0x45   :  { %1435 = vmatpush.bf16.msra.mxu1 %v4402_v33  ;;  %1401 = vmatmul.bf16.vlgmr.msrb.gmra.mxu2 %v6448_v43  ;;  %v5627_v33 = vld [vmem:[%s8865_s1 + $0x524] sm:$0xf0]  ;;  %v3891_v5 = vld [vmem:[%s8865_s1 + $0xf8] sm:$0xf0]  ;;  %v4545_v8 = vld [vmem:[%s8865_s1 + $0x610] sm:$0xf]  ;;  %v3830_v21 = vor.u32 %v5476_v0, %v3827_v3 }
  0x46   :  { %1449 = vmatpush.bf16.msra.mxu2 %v4466_v34  ;;  %1415 = vmatmul.bf16.vlgmr.msrb.gmra.mxu3 %v6458_v47  ;;  %v4489_v34 = vld [vmem:[%s8865_s1 + $0x5a0] sm:$0xf]  ;;  %v4426_v40 = vor.u32 %v5627_v33, %v4425_v32  ;;  %v3955_v7 = vld [vmem:[%s8865_s1 + $0x178] sm:$0xf0]  ;;  %v3757_v16 = vld [vmem:[%s8866_s0 + $0x28] sm:$0xf] }
  0x47   :  { %1463 = vmatpush.bf16.msra.mxu3 %v4530_v38  ;;  %v4362_v38 = vor.u32 %v5611_v31, %v4361_v29  ;;  %v4490_v46 = vor.u32 %v5643_v35, %v4489_v34  ;;  %v5453_v19 = vld [vmem:[%s8866_s0 + $0x24] sm:$0xf]  ;;  %v3751_v22 = vld [vmem:[%s8866_s0 + $0x54] sm:$0xf0]  ;;  %v5454_v23 = vld [vmem:[%s8866_s0 + $0x2c] sm:$0xf] }
  0x48   :  { %1422 = vmatpush.bf16.msra.mxu0 %v4330_v48  ;;  %v4417_v48 = vld [vmem:[%s8865_s1 + $0x510] sm:$0xf]  ;;  %v5474_v27 = vld [vmem:[%s8865_s1 + $0x64] sm:$0xf]  ;;  %v3819_v28 = vld [vmem:[%s8865_s1 + $0x68] sm:$0xf0] }
  0x49   :  { %1436 = vmatpush.bf16.msra.mxu1 %v4394_v49  ;;  %v5625_v49 = vld [vmem:[%s8865_s1 + $0x514] sm:$0xf0]  ;;  %v5490_v29 = vld [vmem:[%s8865_s1 + $0xe4] sm:$0xf]  ;;  %v3883_v32 = vld [vmem:[%s8865_s1 + $0xe8] sm:$0xf0] }
  0x4a   :  { %1450 = vmatpush.bf16.msra.mxu2 %v4458_v50  ;;  %v4481_v50 = vld [vmem:[%s8865_s1 + $0x590] sm:$0xf]  ;;  %v5506_v33 = vld [vmem:[%s8865_s1 + $0x164] sm:$0xf]  ;;  %v3947_v34 = vld [vmem:[%s8865_s1 + $0x168] sm:$0xf0] }
  0x4b   :  { %1464 = vmatpush.bf16.msra.mxu3 %v4522_v54  ;;  %v4290_v54 = vor.u32 %v5593_v41, %v4289_v37  ;;  %v4482_v2 = vor.u32 %v5641_v51, %v4481_v50  ;;  %v4537_v37 = vld [vmem:[%s8865_s1 + $0x600] sm:$0xf]  ;;  %v3822_v41 = vor.u32 %v5474_v27, %v3819_v28  ;;  %v5524_v42 = vld [vmem:[%s8865_s1 + $0x1f4] sm:$0xf]  ;;  %v4019_v45 = vld [vmem:[%s8865_s1 + $0x1f8] sm:$0xf0] }
  0x4c   :  { %1423 = vmatpush.bf16.msra.mxu0 %v4322_v61  ;;  %v4418_v61 = vor.u32 %v5625_v49, %v4417_v48  ;;  %v3950_v48 = vor.u32 %v5506_v33, %v3947_v34  ;;  %v5472_v49 = vld [vmem:[%s8865_s1 + $0x54] sm:$0xf]  ;;  %v3811_v50 = vld [vmem:[%s8865_s1 + $0x58] sm:$0xf0]  ;;  %v4022_v56 = vor.u32 %v5524_v42, %v4019_v45  ;;  %v5522_v59 = vld [vmem:[%s8865_s1 + $0x1e4] sm:$0xf] }
  0x4d   :  { %1437 = vmatpush.bf16.msra.mxu1 %v4386_v62  ;;  %v4473_v62 = vld [vmem:[%s8865_s1 + $0x580] sm:$0xf]  ;;  %v5488_v51 = vld [vmem:[%s8865_s1 + $0xd4] sm:$0xf]  ;;  %v3875_v53 = vld [vmem:[%s8865_s1 + $0xd8] sm:$0xf0]  ;;  %v3814_v57 = vor.u32 %v5472_v49, %v3811_v50 }
  0x4e   :  { %1451 = vmatpush.bf16.msra.mxu2 %v4450_v63  ;;  %v5639_v63 = vld [vmem:[%s8865_s1 + $0x584] sm:$0xf0]  ;;  %v3939_v55 = vld [vmem:[%s8865_s1 + $0x158] sm:$0xf0]  ;;  %v3803_v0 = vld [vmem:[%s8865_s1 + $0x48] sm:$0xf0] }
  0x4f   :  { %1465 = vmatpush.bf16.msra.mxu3 %v4514_v4  ;;  %v5492_v4 = vld [vmem:[%s8865_s1 + $0xf4] sm:$0xf]  ;;  %v4474_v20 = vor.u32 %v5639_v63, %v4473_v62  ;;  %v5470_v63 = vld [vmem:[%s8865_s1 + $0x44] sm:$0xf]  ;;  %v3867_v3 = vld [vmem:[%s8865_s1 + $0xc8] sm:$0xf0] }
  0x50   :  { %1424 = vmatpush.bf16.msra.mxu0 %v4314_v11  ;;  %v5657_v11 = vld [vmem:[%s8865_s1 + $0x614] sm:$0xf0]  ;;  %v5466_v28 = vld [vmem:[%s8865_s1 + $0x24] sm:$0xf]  ;;  %v3915_v34 = vld [vmem:[%s8865_s1 + $0x128] sm:$0xf0] }
  0x51   :  { %1438 = vmatpush.bf16.msra.mxu1 %v4378_v12  ;;  %v3749_v12 = vld [vmem:[%s8866_s0 + $0x20] sm:$0xf]  ;;  %v5498_v33 = vld [vmem:[%s8865_s1 + $0x124] sm:$0xf]  ;;  %v5516_v42 = vld [vmem:[%s8865_s1 + $0x1b4] sm:$0xf] }
  0x52   :  { %1452 = vmatpush.bf16.msra.mxu2 %v4442_v13  ;;  %v5459_v13 = vld [vmem:[%s8866_s0 + $0x50] sm:$0xf0]  ;;  %v3987_v45 = vld [vmem:[%s8865_s1 + $0x1b8] sm:$0xf0] }
  0x53   :  { %1466 = vmatpush.bf16.msra.mxu3 %v4506_v18  ;;  %v5460_v18 = vld [vmem:[%s8866_s0 + $0x58] sm:$0xf0]  ;;  %v6676_v35 = vor.u32 %v5459_v13, %v3749_v12  ;;  %v5468_v13 = vld [vmem:[%s8865_s1 + $0x34] sm:$0xf] }
  0x54   :  { %1425 = vmatpush.bf16.msra.mxu0 %v4306_v24  ;;  %v3759_v24 = vld [vmem:[%s8866_s0 + $0x5c] sm:$0xf0]  ;;  %v6665_v31 = vor.u32 %v5460_v18, %v3757_v16  ;;  %v3859_v16 = vld [vmem:[%s8865_s1 + $0xb8] sm:$0xf0]  ;;  %v5500_v18 = vld [vmem:[%s8865_s1 + $0x134] sm:$0xf] }
  0x55   :  { %1439 = vmatpush.bf16.msra.mxu1 %v4370_v25  ;;  %v3894_v25 = vor.u32 %v5492_v4, %v3891_v5  ;;  %v5502_v4 = vld [vmem:[%s8865_s1 + $0x144] sm:$0xf]  ;;  %v3931_v5 = vld [vmem:[%s8865_s1 + $0x148] sm:$0xf0]  ;;  %v5464_v49 = vld [vmem:[%s8865_s1 + $0x14] sm:$0xf] }
  0x56   :  { %1453 = vmatpush.bf16.msra.mxu2 %v4434_v26  ;;  %v3958_v26 = vor.u32 %v5508_v6, %v3955_v7  ;;  %v3806_v7 = vor.u32 %v5470_v63, %v3803_v0  ;;  %v3934_v12 = vor.u32 %v5502_v4, %v3931_v5  ;;  %v3779_v50 = vld [vmem:[%s8865_s1 + $0x18] sm:$0xf0]  ;;  %v3771_v63 = vld [vmem:[%s8865_s1 + $0x8] sm:$0xf0]  ;;  %v5478_v0 = vld [vmem:[%s8865_s1 + $0x84] sm:$0xf] }
  0x57   :  { %1467 = vmatpush.bf16.msra.mxu3 %v4498_v30  ;;  %v4546_v30 = vor.u32 %v5657_v11, %v4545_v8  ;;  %v5520_v8 = vld [vmem:[%s8865_s1 + $0x1d4] sm:$0xf]  ;;  %v3899_v4 = vld [vmem:[%s8865_s1 + $0x108] sm:$0xf0] }
  0x58   :  { %1426 = vmatpush.bf16.msra.mxu0 %v4298_v36  ;;  %v6678_v36 = vor.u32 %v5453_v19, %v3751_v22  ;;  %v3923_v19 = vld [vmem:[%s8865_s1 + $0x138] sm:$0xf0]  ;;  %v5540_v5 = vld [vmem:[%s8865_s1 + $0x274] sm:$0xf] }
  0x59   :  { %1440 = vmatpush.bf16.msra.mxu1 %v4362_v38  ;;  %v5655_v38 = vld [vmem:[%s8865_s1 + $0x604] sm:$0xf0]  ;;  %v3926_v27 = vor.u32 %v5500_v18, %v3923_v19  ;;  %v3971_v18 = vld [vmem:[%s8865_s1 + $0x198] sm:$0xf0] }
  0x5a   :  { %1454 = vmatpush.bf16.msra.mxu2 %v4426_v40  ;;  %v6686_v40 = vor.u32 %v5454_v23, %v3759_v24  ;;  %v4538_v52 = vor.u32 %v5655_v38, %v4537_v37  ;;  %v5461_v23 = vld [vmem:[%s8866_s0 + $0x60] sm:$0xf0] }
  0x5b   :  { %1468 = vmatpush.bf16.msra.mxu3 %v4490_v46  ;;  %v3886_v46 = vor.u32 %v5490_v29, %v3883_v32  ;;  %v5518_v24 = vld [vmem:[%s8865_s1 + $0x1c4] sm:$0xf]  ;;  %v3787_v29 = vld [vmem:[%s8865_s1 + $0x28] sm:$0xf0] }
  0x5c   :  { %1427 = vmatpush.bf16.msra.mxu0 %v4290_v54  ;;  %v5504_v54 = vld [vmem:[%s8865_s1 + $0x154] sm:$0xf]  ;;  %v3851_v32 = vld [vmem:[%s8865_s1 + $0xa8] sm:$0xf0] }
  0x5d   :  { %1441 = vmatpush.bf16.msra.mxu1 %v4354_v60  ;;  %v4011_v60 = vld [vmem:[%s8865_s1 + $0x1e8] sm:$0xf0]  ;;  %v3942_v62 = vor.u32 %v5504_v54, %v3939_v55  ;;  %v3907_v54 = vld [vmem:[%s8865_s1 + $0x118] sm:$0xf0]  ;;  %v3990_v55 = vor.u32 %v5516_v42, %v3987_v45 }
  0x5e   :  { %1455 = vmatpush.bf16.msra.mxu2 %v4418_v61  ;;  %v3878_v61 = vor.u32 %v5488_v51, %v3875_v53  ;;  %v4014_v6 = vor.u32 %v5522_v59, %v4011_v60  ;;  %v5480_v51 = vld [vmem:[%s8865_s1 + $0x94] sm:$0xf]  ;;  %v3979_v59 = vld [vmem:[%s8865_s1 + $0x1a8] sm:$0xf0]  ;;  %v5462_v60 = vld [vmem:[%s8865_s1 + $0x4] sm:$0xf] }
  0x5f   :  { %1469 = vmatpush.bf16.msra.mxu3 %v4482_v2  ;;  %v5486_v2 = vld [vmem:[%s8865_s1 + $0xc4] sm:$0xf]  ;;  %v5496_v53 = vld [vmem:[%s8865_s1 + $0x114] sm:$0xf]  ;;  %v4067_v45 = vld [vmem:[%s8865_s1 + $0x258] sm:$0xf0] }
  0x60   :  { %1428 = vmatpush.bf16.msra.mxu0 %v4282_v9  ;;  %v4003_v9 = vld [vmem:[%s8865_s1 + $0x1d8] sm:$0xf0]  ;;  %v3870_v11 = vor.u32 %v5486_v2, %v3867_v3  ;;  %v3835_v2 = vld [vmem:[%s8865_s1 + $0x88] sm:$0xf0]  ;;  %v5494_v3 = vld [vmem:[%s8865_s1 + $0x104] sm:$0xf] }
  0x61   :  { %1442 = vmatpush.bf16.msra.mxu1 %v4346_v14  ;;  %v3795_v14 = vld [vmem:[%s8865_s1 + $0x38] sm:$0xf0] }
  0x62   :  { %1456 = vmatpush.bf16.msra.mxu2 %v4410_v15  ;;  %v5484_v15 = vld [vmem:[%s8865_s1 + $0xb4] sm:$0xf]  ;;  %v3798_v22 = vor.u32 %v5468_v13, %v3795_v14  ;;  %v4211_v13 = vld [vmem:[%s8865_s1 + $0x378] sm:$0xf0]  ;;  %v3838_v14 = vor.u32 %v5478_v0, %v3835_v2 }
  0x63   :  { %1470 = vmatpush.bf16.msra.mxu3 %v4474_v20  ;;  %1429 = vmatmul.bf16.vlgmr.msra.gmra.mxu0 %v6676_v35  ;;  %v4006_v20 = vor.u32 %v5520_v8, %v4003_v9  ;;  %v4147_v8 = vld [vmem:[%s8865_s1 + $0x2f8] sm:$0xf0]  ;;  %v5584_v2 = vld [vmem:[%s8865_s1 + $0x3d4] sm:$0xf] }
  0x64   :  { %1483 = vmatpush.bf16.msrb.mxu0 %v4546_v30  ;;  %1443 = vmatmul.bf16.vlgmr.msra.gmra.mxu1 %v6678_v36  ;;  %v5482_v30 = vld [vmem:[%s8865_s1 + $0xa4] sm:$0xf] }
  0x65   :  { %1491 = vmatpush.bf16.msrb.mxu1 %v3830_v21  ;;  %1457 = vmatmul.bf16.vlgmr.msra.gmra.mxu2 %v6665_v31  ;;  %v3765_v21 = vld [vmem:[%s8866_s0 + $0x30] sm:$0xf] }
  0x66   :  { %1505 = vmatpush.bf16.msrb.mxu2 %v3894_v25  ;;  %1471 = vmatmul.bf16.vlgmr.msra.gmra.mxu3 %v6686_v40  ;;  %v3995_v25 = vld [vmem:[%s8865_s1 + $0x1c8] sm:$0xf0]  ;;  %v6794_v37 = vor.u32 %v5461_v23, %v3765_v21  ;;  %v5538_v21 = vld [vmem:[%s8865_s1 + $0x264] sm:$0xf] }
  0x67   :  { %1519 = vmatpush.bf16.msrb.mxu3 %v3958_v26  ;;  %v3862_v26 = vor.u32 %v5484_v15, %v3859_v16  ;;  %v3998_v38 = vor.u32 %v5518_v24, %v3995_v25  ;;  %v3902_v15 = vor.u32 %v5494_v3, %v3899_v4  ;;  %v5512_v16 = vld [vmem:[%s8865_s1 + $0x194] sm:$0xf]  ;;  %v4075_v23 = vld [vmem:[%s8865_s1 + $0x268] sm:$0xf0]  ;;  %v5554_v24 = vld [vmem:[%s8865_s1 + $0x2e4] sm:$0xf] }
  0x68   :  { %1484 = vmatpush.bf16.msrb.mxu0 %v4538_v52  ;;  %v3843_v52 = vld [vmem:[%s8865_s1 + $0x98] sm:$0xf0]  ;;  %v4139_v25 = vld [vmem:[%s8865_s1 + $0x2e8] sm:$0xf0]  ;;  %v5532_v4 = vld [vmem:[%s8865_s1 + $0x234] sm:$0xf] }
  0x69   :  { %1492 = vmatpush.bf16.msrb.mxu1 %v3822_v41  ;;  %v3790_v41 = vor.u32 %v5466_v28, %v3787_v29  ;;  %v4203_v28 = vld [vmem:[%s8865_s1 + $0x368] sm:$0xf0]  ;;  %v5510_v29 = vld [vmem:[%s8865_s1 + $0x184] sm:$0xf]  ;;  %v4259_v3 = vld [vmem:[%s8865_s1 + $0x3d8] sm:$0xf0] }
  0x6a   :  { %1506 = vmatpush.bf16.msrb.mxu2 %v3886_v46  ;;  %v3854_v46 = vor.u32 %v5482_v30, %v3851_v32  ;;  %v3963_v30 = vld [vmem:[%s8865_s1 + $0x188] sm:$0xf0]  ;;  %v4078_v32 = vor.u32 %v5538_v21, %v4075_v23 }
  0x6b   :  { %1520 = vmatpush.bf16.msrb.mxu3 %v3950_v48  ;;  %v3918_v48 = vor.u32 %v5498_v33, %v3915_v34  ;;  %v4142_v33 = vor.u32 %v5554_v24, %v4139_v25  ;;  %v5588_v34 = vld [vmem:[%s8865_s1 + $0x3f4] sm:$0xf]  ;;  %v4107_v21 = vld [vmem:[%s8865_s1 + $0x2a8] sm:$0xf0] }
  0x6c   :  { %1533 = vmatpush.bf16.msra.mxu0 %v4022_v56  ;;  %v3782_v56 = vor.u32 %v5464_v49, %v3779_v50  ;;  %v3966_v49 = vor.u32 %v5510_v29, %v3963_v30  ;;  %v5568_v50 = vld [vmem:[%s8865_s1 + $0x354] sm:$0xf]  ;;  %v4171_v23 = vld [vmem:[%s8865_s1 + $0x328] sm:$0xf0] }
  0x6d   :  { %1493 = vmatpush.bf16.msrb.mxu1 %v3814_v57  ;;  %v5514_v57 = vld [vmem:[%s8865_s1 + $0x1a4] sm:$0xf]  ;;  %v5528_v29 = vld [vmem:[%s8865_s1 + $0x214] sm:$0xf] }
  0x6e   :  { %1507 = vmatpush.bf16.msrb.mxu2 %v3878_v61  ;;  %v3846_v61 = vor.u32 %v5480_v51, %v3843_v52  ;;  %v3982_v9 = vor.u32 %v5514_v57, %v3979_v59  ;;  %v4195_v51 = vld [vmem:[%s8865_s1 + $0x358] sm:$0xf0]  ;;  %v5550_v57 = vld [vmem:[%s8865_s1 + $0x2c4] sm:$0xf]  ;;  %v4123_v59 = vld [vmem:[%s8865_s1 + $0x2c8] sm:$0xf0] }
  0x6f   :  { %1521 = vmatpush.bf16.msrb.mxu3 %v3942_v62  ;;  %v3910_v62 = vor.u32 %v5496_v53, %v3907_v54  ;;  %v4126_v0 = vor.u32 %v5550_v57, %v4123_v59  ;;  %v4403_v59 = vld [vmem:[%s8865_s1 + $0x4f8] sm:$0xf0] }
  0x70   :  { %1534 = vmatpush.bf16.msra.mxu0 %v4014_v6  ;;  %v4083_v6 = vld [vmem:[%s8865_s1 + $0x278] sm:$0xf0] }
  0x71   :  { %1494 = vmatpush.bf16.msrb.mxu1 %v3806_v7  ;;  %v5556_v7 = vld [vmem:[%s8865_s1 + $0x2f4] sm:$0xf]  ;;  %v4086_v19 = vor.u32 %v5540_v5, %v4083_v6  ;;  %v4051_v6 = vld [vmem:[%s8865_s1 + $0x238] sm:$0xf0] }
  0x72   :  { %1508 = vmatpush.bf16.msrb.mxu2 %v3870_v11  ;;  %v3774_v11 = vor.u32 %v5462_v60, %v3771_v63  ;;  %v5566_v60 = vld [vmem:[%s8865_s1 + $0x344] sm:$0xf] }
  0x73   :  { %1522 = vmatpush.bf16.msrb.mxu3 %v3934_v12  ;;  %4551 = vmatmul.msk.bf16.vlgmr.msrb.gmra.mxu0 %vm1305_vm0, %v6794_v37  ;;  %v5572_v12 = vld [vmem:[%s8865_s1 + $0x374] sm:$0xf] }
  0x74   :  { %1535 = vmatpush.bf16.msra.mxu0 %v4006_v20  ;;  %v4150_v20 = vor.u32 %v5556_v7, %v4147_v8  ;;  %v5548_v7 = vld [vmem:[%s8865_s1 + $0x2b4] sm:$0xf]  ;;  %v4115_v8 = vld [vmem:[%s8865_s1 + $0x2b8] sm:$0xf0] }
  0x75   :  { %1495 = vmatpush.bf16.msrb.mxu1 %v3798_v22  ;;  %v4214_v22 = vor.u32 %v5572_v12, %v4211_v13  ;;  %v4262_v12 = vor.u32 %v5584_v2, %v4259_v3  ;;  %v4054_v13 = vor.u32 %v5532_v4, %v4051_v6  ;;  %v4227_v2 = vld [vmem:[%s8865_s1 + $0x398] sm:$0xf0] }
  0x76   :  { %1509 = vmatpush.bf16.msrb.mxu2 %v3862_v26  ;;  %v3974_v26 = vor.u32 %v5512_v16, %v3971_v18  ;;  %v5530_v16 = vld [vmem:[%s8865_s1 + $0x224] sm:$0xf] }
  0x77   :  { %1523 = vmatpush.bf16.msrb.mxu3 %v3926_v27  ;;  %v5570_v27 = vld [vmem:[%s8865_s1 + $0x364] sm:$0xf] }
  0x78   :  { %1536 = vmatpush.bf16.msra.mxu0 %v3998_v38  ;;  %v4275_v38 = vld [vmem:[%s8865_s1 + $0x3f8] sm:$0xf0]  ;;  %v4206_v42 = vor.u32 %v5570_v27, %v4203_v28  ;;  %v5580_v27 = vld [vmem:[%s8865_s1 + $0x3b4] sm:$0xf] }
  0x79   :  { %1496 = vmatpush.bf16.msrb.mxu1 %v3790_v41  ;;  %v5536_v41 = vld [vmem:[%s8865_s1 + $0x254] sm:$0xf]  ;;  %v4278_v52 = vor.u32 %v5588_v34, %v4275_v38  ;;  %v4243_v28 = vld [vmem:[%s8865_s1 + $0x3b8] sm:$0xf0] }
  0x7a   :  { %1510 = vmatpush.bf16.msrb.mxu2 %v3854_v46  ;;  %v5552_v46 = vld [vmem:[%s8865_s1 + $0x2d4] sm:$0xf]  ;;  %v4070_v53 = vor.u32 %v5536_v41, %v4067_v45  ;;  %v4099_v34 = vld [vmem:[%s8865_s1 + $0x298] sm:$0xf0]  ;;  %v5578_v45 = vld [vmem:[%s8865_s1 + $0x3a4] sm:$0xf] }
  0x7b   :  { %1524 = vmatpush.bf16.msrb.mxu3 %v3918_v48  ;;  %v4131_v48 = vld [vmem:[%s8865_s1 + $0x2d8] sm:$0xf0]  ;;  %v5560_v38 = vld [vmem:[%s8865_s1 + $0x314] sm:$0xf] }
  0x7c   :  { %1537 = vmatpush.bf16.msra.mxu0 %v3990_v55  ;;  %v4134_v54 = vor.u32 %v5552_v46, %v4131_v48  ;;  %v4267_v55 = vld [vmem:[%s8865_s1 + $0x3e8] sm:$0xf0]  ;;  %v4163_v41 = vld [vmem:[%s8865_s1 + $0x318] sm:$0xf0] }
  0x7d   :  { %1497 = vmatpush.bf16.msrb.mxu1 %v3782_v56  ;;  %v5534_v56 = vld [vmem:[%s8865_s1 + $0x244] sm:$0xf]  ;;  %v4235_v46 = vld [vmem:[%s8865_s1 + $0x3a8] sm:$0xf0] }
  0x7e   :  { %1511 = vmatpush.bf16.msrb.mxu2 %v3846_v61  ;;  %v4187_v61 = vld [vmem:[%s8865_s1 + $0x348] sm:$0xf0]  ;;  %v4238_v57 = vor.u32 %v5578_v45, %v4235_v46 }
  0x7f   :  { %1525 = vmatpush.bf16.msrb.mxu3 %v3910_v62  ;;  %v4190_v5 = vor.u32 %v5566_v60, %v4187_v61  ;;  %v5636_v60 = vld [vmem:[%s8865_s1 + $0x574] sm:$0xf]  ;;  %v4467_v61 = vld [vmem:[%s8865_s1 + $0x578] sm:$0xf0]  ;;  %v4443_v45 = vld [vmem:[%s8865_s1 + $0x548] sm:$0xf0] }
  0x80   :  { %1538 = vmatpush.bf16.msra.mxu0 %v3982_v9  ;;  %v5564_v9 = vld [vmem:[%s8865_s1 + $0x334] sm:$0xf]  ;;  %v4470_v6 = vor.u32 %v5636_v60, %v4467_v61 }
  0x81   :  { %1498 = vmatpush.bf16.msrb.mxu1 %v3774_v11  ;;  %v4179_v11 = vld [vmem:[%s8865_s1 + $0x338] sm:$0xf0] }
  0x82   :  { %1512 = vmatpush.bf16.msrb.mxu2 %v3838_v14  ;;  %v4118_v14 = vor.u32 %v5548_v7, %v4115_v8  ;;  %v4182_v18 = vor.u32 %v5564_v9, %v4179_v11  ;;  %v5602_v7 = vld [vmem:[%s8865_s1 + $0x464] sm:$0xf]  ;;  %v4331_v8 = vld [vmem:[%s8865_s1 + $0x468] sm:$0xf0] }
  0x83   :  { %1526 = vmatpush.bf16.msrb.mxu3 %v3902_v15  ;;  %v5582_v15 = vld [vmem:[%s8865_s1 + $0x3c4] sm:$0xf] }
  0x84   :  { %1499 = vmatmul.bf16.vlgmr.msrb.gmra.mxu1 %v6215_v58  ;;  %1539 = vmatpush.bf16.msra.mxu0 %v3974_v26  ;;  %v5586_v58 = vld [vmem:[%s8865_s1 + $0x3e4] sm:$0xf] }
  0x85   :  { %1547 = vmatpush.bf16.msra.mxu1 %v4086_v19  ;;  %1513 = vmatmul.bf16.vlgmr.msrb.gmra.mxu2 %v6251_v10  ;;  %v4198_v10 = vor.u32 %v5568_v50, %v4195_v51  ;;  %v4270_v62 = vor.u32 %v5586_v58, %v4267_v55  ;;  %v4043_v19 = vld [vmem:[%s8865_s1 + $0x228] sm:$0xf0]  ;;  %v5526_v50 = vld [vmem:[%s8865_s1 + $0x204] sm:$0xf] }
  0x86   :  { %1561 = vmatpush.bf16.msra.mxu2 %v4150_v20  ;;  %1527 = vmatmul.bf16.vlgmr.msrb.gmra.mxu3 %v6229_v1  ;;  %v4059_v1 = vld [vmem:[%s8865_s1 + $0x248] sm:$0xf0]  ;;  %v5546_v20 = vld [vmem:[%s8865_s1 + $0x2a4] sm:$0xf]  ;;  %v4046_v25 = vor.u32 %v5530_v16, %v4043_v19  ;;  %v4334_v16 = vor.u32 %v5602_v7, %v4331_v8  ;;  %v4531_v19 = vld [vmem:[%s8865_s1 + $0x5f8] sm:$0xf0] }
  0x87   :  { %1575 = vmatpush.bf16.msra.mxu3 %v4214_v22  ;;  %v4062_v63 = vor.u32 %v5534_v56, %v4059_v1  ;;  %v5562_v22 = vld [vmem:[%s8865_s1 + $0x324] sm:$0xf]  ;;  %v4110_v26 = vor.u32 %v5546_v20, %v4107_v21  ;;  %v4027_v51 = vld [vmem:[%s8865_s1 + $0x208] sm:$0xf0]  ;;  %v5604_v56 = vld [vmem:[%s8865_s1 + $0x474] sm:$0xf] }
  0x88   :  { %1540 = vmatpush.bf16.msra.mxu0 %v3966_v49  ;;  %v4174_v30 = vor.u32 %v5562_v22, %v4171_v23  ;;  %v5558_v58 = vld [vmem:[%s8865_s1 + $0x304] sm:$0xf]  ;;  %v4155_v55 = vld [vmem:[%s8865_s1 + $0x308] sm:$0xf0]  ;;  %v5620_v1 = vld [vmem:[%s8865_s1 + $0x4f4] sm:$0xf] }
  0x89   :  { %1548 = vmatpush.bf16.msra.mxu1 %v4078_v32  ;;  %v4035_v32 = vld [vmem:[%s8865_s1 + $0x218] sm:$0xf0]  ;;  %v4158_v3 = vor.u32 %v5558_v58, %v4155_v55  ;;  %v5618_v9 = vld [vmem:[%s8865_s1 + $0x4e4] sm:$0xf]  ;;  %v5600_v22 = vld [vmem:[%s8865_s1 + $0x454] sm:$0xf] }
  0x8a   :  { %1562 = vmatpush.bf16.msra.mxu2 %v4142_v33  ;;  %v5544_v33 = vld [vmem:[%s8865_s1 + $0x294] sm:$0xf]  ;;  %v4038_v48 = vor.u32 %v5528_v29, %v4035_v32  ;;  %v4323_v23 = vld [vmem:[%s8865_s1 + $0x458] sm:$0xf0]  ;;  %v4523_v32 = vld [vmem:[%s8865_s1 + $0x5e8] sm:$0xf0] }
  0x8b   :  { %1576 = vmatpush.bf16.msra.mxu3 %v4206_v42  ;;  %1541 = vmatmul.bf16.vlgmr.msra.gmra.mxu0 %v6265_v17  ;;  %v4251_v17 = vld [vmem:[%s8865_s1 + $0x3c8] sm:$0xf0]  ;;  %v4246_v42 = vor.u32 %v5580_v27, %v4243_v28  ;;  %v4102_v49 = vor.u32 %v5544_v33, %v4099_v34  ;;  %v5632_v27 = vld [vmem:[%s8865_s1 + $0x554] sm:$0xf]  ;;  %v4451_v28 = vld [vmem:[%s8865_s1 + $0x558] sm:$0xf0] }
  0x8c   :  { %1589 = vmatpush.bf16.msrb.mxu0 %v4278_v52  ;;  %v4254_v24 = vor.u32 %v5582_v15, %v4251_v17  ;;  %v5542_v52 = vld [vmem:[%s8865_s1 + $0x284] sm:$0xf]  ;;  %v4219_v17 = vld [vmem:[%s8865_s1 + $0x388] sm:$0xf0]  ;;  %v4454_v34 = vor.u32 %v5632_v27, %v4451_v28  ;;  %v5612_v58 = vld [vmem:[%s8865_s1 + $0x4b4] sm:$0xf] }
  0x8d   :  { %1549 = vmatpush.bf16.msra.mxu1 %v4070_v53  ;;  %v4166_v53 = vor.u32 %v5560_v38, %v4163_v41  ;;  %v5574_v15 = vld [vmem:[%s8865_s1 + $0x384] sm:$0xf]  ;;  %v4379_v41 = vld [vmem:[%s8865_s1 + $0x4c8] sm:$0xf0]  ;;  %v4371_v55 = vld [vmem:[%s8865_s1 + $0x4b8] sm:$0xf0] }
  0x8e   :  { %1563 = vmatpush.bf16.msra.mxu2 %v4134_v54  ;;  %v4091_v54 = vld [vmem:[%s8865_s1 + $0x288] sm:$0xf0]  ;;  %v5614_v38 = vld [vmem:[%s8865_s1 + $0x4c4] sm:$0xf]  ;;  %v4374_v60 = vor.u32 %v5612_v58, %v4371_v55  ;;  %v5644_v7 = vld [vmem:[%s8865_s1 + $0x5b4] sm:$0xf] }
  0x8f   :  { %1577 = vmatpush.bf16.msra.mxu3 %v4198_v10  ;;  %v4339_v10 = vld [vmem:[%s8865_s1 + $0x478] sm:$0xf0]  ;;  %v4347_v27 = vld [vmem:[%s8865_s1 + $0x488] sm:$0xf0]  ;;  %v5622_v28 = vld [vmem:[%s8865_s1 + $0x504] sm:$0xf] }
  0x90   :  { %1590 = vmatpush.bf16.msrb.mxu0 %v4270_v62  ;;  %v4030_v62 = vor.u32 %v5526_v50, %v4027_v51  ;;  %v4342_v4 = vor.u32 %v5604_v56, %v4339_v10  ;;  %v4515_v50 = vld [vmem:[%s8865_s1 + $0x5d8] sm:$0xf0]  ;;  %v4382_v51 = vor.u32 %v5614_v38, %v4379_v41  ;;  %v5628_v56 = vld [vmem:[%s8865_s1 + $0x534] sm:$0xf]  ;;  %v1690_v58 = vld [vmem:[%s8867_s3 + $0x68] sm:$0xff] }
  0x91   :  { %1550 = vmatpush.bf16.msra.mxu1 %v4062_v63  ;;  %v4094_v63 = vor.u32 %v5542_v52, %v4091_v54  ;;  %v4307_v54 = vld [vmem:[%s8865_s1 + $0x438] sm:$0xf0]  ;;  %v1689_v55 = vld [vmem:[%s8867_s3 + $0x60] sm:$0xff] }
  0x92   :  { %1564 = vmatpush.bf16.msra.mxu2 %v4126_v0  ;;  %v5576_v0 = vld [vmem:[%s8865_s1 + $0x394] sm:$0xf]  ;;  %v4435_v10 = vld [vmem:[%s8865_s1 + $0x538] sm:$0xf0] }
  0x93   :  { %1578 = vmatpush.bf16.msra.mxu3 %v4190_v5  ;;  %v4406_v5 = vor.u32 %v5620_v1, %v4403_v59  ;;  %v4230_v11 = vor.u32 %v5576_v0, %v4227_v2  ;;  %v4507_v59 = vld [vmem:[%s8865_s1 + $0x5c8] sm:$0xf0]  ;;  %v4438_v61 = vor.u32 %v5628_v56, %v4435_v10  ;;  %v5610_v0 = vld [vmem:[%s8865_s1 + $0x4a4] sm:$0xf]  ;;  %v4499_v8 = vld [vmem:[%s8865_s1 + $0x5b8] sm:$0xf0] }
  0x94   :  { %1591 = vmatpush.bf16.msrb.mxu0 %v4262_v12  ;;  %v4395_v12 = vld [vmem:[%s8865_s1 + $0x4e8] sm:$0xf0]  ;;  %v1687_v10 = vld [vmem:[%s8867_s3 + $0x50] sm:$0xff] }
  0x95   :  { %1551 = vmatpush.bf16.msra.mxu1 %v4054_v13  ;;  %v5634_v13 = vld [vmem:[%s8865_s1 + $0x564] sm:$0xf]  ;;  %v4398_v20 = vor.u32 %v5618_v9, %v4395_v12  ;;  %v4363_v2 = vld [vmem:[%s8865_s1 + $0x4a8] sm:$0xf0]  ;;  %v5592_v12 = vld [vmem:[%s8865_s1 + $0x414] sm:$0xf] }
  0x96   :  { %1565 = vmatpush.bf16.msra.mxu2 %v4118_v14  ;;  %v4459_v14 = vld [vmem:[%s8865_s1 + $0x568] sm:$0xf0]  ;;  %v4366_v9 = vor.u32 %v5610_v0, %v4363_v2 }
  0x97   :  { %1579 = vmatpush.bf16.msra.mxu3 %v4182_v18  ;;  %v5652_v18 = vld [vmem:[%s8865_s1 + $0x5f4] sm:$0xf]  ;;  %v4462_v21 = vor.u32 %v5634_v13, %v4459_v14  ;;  %v4291_v13 = vld [vmem:[%s8865_s1 + $0x418] sm:$0xf0] }
  0x98   :  { %1592 = vmatpush.bf16.msrb.mxu0 %v4254_v24  ;;  %v5616_v24 = vld [vmem:[%s8865_s1 + $0x4d4] sm:$0xf]  ;;  %v4534_v29 = vor.u32 %v5652_v18, %v4531_v19  ;;  %v4502_v18 = vor.u32 %v5644_v7, %v4499_v8  ;;  %v4294_v19 = vor.u32 %v5592_v12, %v4291_v13  ;;  %v1680_v8 = vld [vmem:[%s8867_s3 + $0x18] sm:$0xff]  ;;  %v1678_v13 = vld [vmem:[%s8867_s3 + $0x8] sm:$0xff] }
  0x99   :  { %1552 = vmatpush.bf16.msra.mxu1 %v4046_v25  ;;  %v4222_v25 = vor.u32 %v5574_v15, %v4219_v17  ;;  %v5608_v14 = vld [vmem:[%s8865_s1 + $0x494] sm:$0xf]  ;;  %v4355_v15 = vld [vmem:[%s8865_s1 + $0x498] sm:$0xf0] }
  0x9a   :  { %1566 = vmatpush.bf16.msra.mxu2 %v4110_v26  ;;  %v4387_v26 = vld [vmem:[%s8865_s1 + $0x4d8] sm:$0xf0]  ;;  %v5624_v17 = vld [vmem:[%s8865_s1 + $0x514] sm:$0xf] }
  0x9b   :  { %1580 = vmatpush.bf16.msra.mxu3 %v4174_v30  ;;  %v5650_v30 = vld [vmem:[%s8865_s1 + $0x5e4] sm:$0xf]  ;;  %v4390_v33 = vor.u32 %v5616_v24, %v4387_v26 }
  0x9c   :  { %1593 = vmatpush.bf16.msrb.mxu0 %v4246_v42  ;;  %v5630_v42 = vld [vmem:[%s8865_s1 + $0x544] sm:$0xf]  ;;  %v4526_v46 = vor.u32 %v5650_v30, %v4523_v32  ;;  %v5656_v30 = vld [vmem:[%s8865_s1 + $0x614] sm:$0xf]  ;;  %v4547_v32 = vld [vmem:[%s8865_s1 + $0x618] sm:$0xf0] }
  0x9d   :  { %1553 = vmatpush.bf16.msra.mxu1 %v4038_v48  ;;  %v4446_v52 = vor.u32 %v5630_v42, %v4443_v45  ;;  %v5590_v24 = vld [vmem:[%s8865_s1 + $0x404] sm:$0xf]  ;;  %v4550_v41 = vor.u32 %v5656_v30, %v4547_v32 }
  0x9e   :  { %1567 = vmatpush.bf16.msra.mxu2 %v4102_v49  ;;  %v5648_v49 = vld [vmem:[%s8865_s1 + $0x5d4] sm:$0xf]  ;;  %v5606_v26 = vld [vmem:[%s8865_s1 + $0x484] sm:$0xf] }
  0x9f   :  { %1581 = vmatpush.bf16.msra.mxu3 %v4166_v53  ;;  %v5596_v53 = vld [vmem:[%s8865_s1 + $0x434] sm:$0xf]  ;;  %v4518_v1 = vor.u32 %v5648_v49, %v4515_v50  ;;  %v5654_v45 = vld [vmem:[%s8865_s1 + $0x604] sm:$0xf]  ;;  %v4475_v50 = vld [vmem:[%s8865_s1 + $0x588] sm:$0xf0] }
  0xa0   :  { %1594 = vmatpush.bf16.msrb.mxu0 %v4238_v57  ;;  %v4310_v57 = vor.u32 %v5596_v53, %v4307_v54  ;;  %v5638_v49 = vld [vmem:[%s8865_s1 + $0x584] sm:$0xf]  ;;  %v1318_v53 = vpop.f32.mrf.mxu0 }
  0xa1   :  { %1554 = vmatpush.bf16.msra.mxu1 %v4030_v62  ;;  %v5594_v62 = vld [vmem:[%s8865_s1 + $0x424] sm:$0xf]  ;;  %v4478_v54 = vor.u32 %v5638_v49, %v4475_v50  ;;  %v1332_v56 = vpop.f32.mrf.mxu1 }
  0xa2   :  { %1568 = vmatpush.bf16.msra.mxu2 %v4094_v63  ;;  %v4299_v63 = vld [vmem:[%s8865_s1 + $0x428] sm:$0xf0] }
  0xa3   :  { %1582 = vmatpush.bf16.msra.mxu3 %v4158_v3  ;;  %v5626_v3 = vld [vmem:[%s8865_s1 + $0x524] sm:$0xf] }
  0xa4   :  { %1595 = vmatpush.bf16.msrb.mxu0 %v4230_v11  ;;  %1555 = vmatmul.bf16.vlgmr.msra.gmra.mxu1 %v6437_v39  ;;  %v4326_v39 = vor.u32 %v5600_v22, %v4323_v23  ;;  %v4358_v22 = vor.u32 %v5608_v14, %v4355_v15  ;;  %v1677_v15 = vld [vmem:[%s8867_s3] sm:$0xff] }
  0xa5   :  { %1603 = vmatpush.bf16.msrb.mxu1 %v4342_v4  ;;  %1569 = vmatmul.bf16.vlgmr.msra.gmra.mxu2 %v6450_v44  ;;  %v5598_v44 = vld [vmem:[%s8865_s1 + $0x444] sm:$0xf]  ;;  %v4427_v4 = vld [vmem:[%s8865_s1 + $0x528] sm:$0xf0] }
  0xa6   :  { %1617 = vmatpush.bf16.msrb.mxu2 %v4406_v5  ;;  %1583 = vmatmul.bf16.vlgmr.msra.gmra.mxu3 %v6448_v43  ;;  %v4315_v43 = vld [vmem:[%s8865_s1 + $0x448] sm:$0xf0]  ;;  %v4430_v11 = vor.u32 %v5626_v3, %v4427_v4  ;;  %v1681_v4 = vld [vmem:[%s8867_s3 + $0x20] sm:$0xff] }
  0xa7   :  { %1631 = vmatpush.bf16.msrb.mxu3 %v4470_v6  ;;  %v4318_v48 = vor.u32 %v5598_v44, %v4315_v43  ;;  %v4302_v6 = vor.u32 %v5594_v62, %v4299_v63  ;;  %v4483_v44 = vld [vmem:[%s8865_s1 + $0x598] sm:$0xf0]  ;;  %v4350_v43 = vor.u32 %v5606_v26, %v4347_v27  ;;  %v1683_v63 = vld [vmem:[%s8867_s3 + $0x30] sm:$0xff]  ;;  %v1682_v3 = vld [vmem:[%s8867_s3 + $0x28] sm:$0xff] }
  0xa8   :  { %1596 = vmatpush.bf16.msrb.mxu0 %v4222_v25  ;;  %v4283_v25 = vld [vmem:[%s8865_s1 + $0x408] sm:$0xf0] }
  0xa9   :  { %1604 = vmatpush.bf16.msrb.mxu1 %v4334_v16  ;;  %v4419_v16 = vld [vmem:[%s8865_s1 + $0x518] sm:$0xf0]  ;;  %v1334_v62 = vpop.f32.mrf.mxu1 }
  0xaa   :  { %1618 = vmatpush.bf16.msrb.mxu2 %v4398_v20  ;;  %v5642_v20 = vld [vmem:[%s8865_s1 + $0x5a4] sm:$0xf]  ;;  %v4422_v23 = vor.u32 %v5624_v17, %v4419_v16 }
  0xab   :  { %1632 = vmatpush.bf16.msrb.mxu3 %v4462_v21  ;;  %1597 = vmatmul.bf16.vlgmr.msrb.gmra.mxu0 %v6458_v47  ;;  %v5646_v47 = vld [vmem:[%s8865_s1 + $0x5c4] sm:$0xf]  ;;  %v4491_v21 = vld [vmem:[%s8865_s1 + $0x5a8] sm:$0xf0] }
  0xac   :  { %1645 = vmatpush.bf16.msra.mxu0 %v4534_v29  ;;  %v4510_v5 = vor.u32 %v5646_v47, %v4507_v59  ;;  %v4411_v29 = vld [vmem:[%s8865_s1 + $0x508] sm:$0xf0]  ;;  %v1320_v47 = vpop.f32.mrf.mxu0  ;;  %v1360_v59 = vpop.f32.mrf.mxu3 }
  0xad   :  { %1605 = vmatpush.bf16.msrb.mxu1 %v4326_v39  ;;  %v4494_v39 = vor.u32 %v5642_v20, %v4491_v21  ;;  %v4414_v38 = vor.u32 %v5622_v28, %v4411_v29 }
  0xae   :  { %1619 = vmatpush.bf16.msrb.mxu2 %v4390_v33  ;;  %v4286_v33 = vor.u32 %v5590_v24, %v4283_v25 }
  0xaf   :  { %1633 = vmatpush.bf16.msrb.mxu3 %v4454_v34  ;;  %v5640_v34 = vld [vmem:[%s8865_s1 + $0x594] sm:$0xf] }
  0xb0   :  { %1646 = vmatpush.bf16.msra.mxu0 %v4526_v46  ;;  %v4486_v42 = vor.u32 %v5640_v34, %v4483_v44  ;;  %v4539_v46 = vld [vmem:[%s8865_s1 + $0x608] sm:$0xf0] }
  0xb1   :  { %1606 = vmatpush.bf16.msrb.mxu1 %v4318_v48  ;;  %v1692_v48 = vld [vmem:[%s8867_s3 + $0x78] sm:$0xff] }
  0xb2   :  { %1620 = vmatpush.bf16.msrb.mxu2 %v4382_v51  ;;  %v4542_v51 = vor.u32 %v5654_v45, %v4539_v46 }
  0xb3   :  { %1634 = vmatpush.bf16.msrb.mxu3 %v4446_v52  ;;  %v1691_v52 = vld [vmem:[%s8867_s3 + $0x70] sm:$0xff] }
  0xb4   :  { %1647 = vmatpush.bf16.msra.mxu0 %v4518_v1 }
  0xb5   :  { %1607 = vmatpush.bf16.msrb.mxu1 %v4310_v57  ;;  %v1686_v57 = vld [vmem:[%s8867_s3 + $0x48] sm:$0xff] }
  0xb6   :  { %1621 = vmatpush.bf16.msrb.mxu2 %v4374_v60  ;;  %v1685_v60 = vld [vmem:[%s8867_s3 + $0x40] sm:$0xff] }
  0xb7   :  { %1635 = vmatpush.bf16.msrb.mxu3 %v4438_v61  ;;  %v1684_v61 = vld [vmem:[%s8867_s3 + $0x38] sm:$0xff] }
  0xb8   :  { %1648 = vmatpush.bf16.msra.mxu0 %v4510_v5  ;;  %v1362_v5 = vpop.f32.mrf.mxu3 }
  0xb9   :  { %1608 = vmatpush.bf16.msrb.mxu1 %v4302_v6 }
  0xba   :  { %1622 = vmatpush.bf16.msrb.mxu2 %v4366_v9 }
  0xbb   :  { %1636 = vmatpush.bf16.msrb.mxu3 %v4430_v11 }
  0xbc   :  { %1649 = vmatpush.bf16.msra.mxu0 %v4502_v18 }
  0xbd   :  { %1609 = vmatpush.bf16.msrb.mxu1 %v4294_v19 }
  0xbe   :  { %1623 = vmatpush.bf16.msrb.mxu2 %v4358_v22 }
  0xbf   :  { %1637 = vmatpush.bf16.msrb.mxu3 %v4422_v23 }
  0xc0   :  { %1650 = vmatpush.bf16.msra.mxu0 %v4494_v39  ;;  %v1374_v6 = vpop.f32.mrf.mxu0 }
  0xc1   :  { %1610 = vmatpush.bf16.msrb.mxu1 %v4286_v33  ;;  %v1388_v9 = vpop.f32.mrf.mxu1 }
  0xc2   :  { %1624 = vmatpush.bf16.msrb.mxu2 %v4350_v43 }
  0xc3   :  { %1638 = vmatpush.bf16.msrb.mxu3 %v4414_v38 }
  0xc4   :  { %1651 = vmatpush.bf16.msra.mxu0 %v4486_v42  ;;  %1611 = vmatmul.bf16.vlgmr.msrb.gmra.mxu1 %v6676_v35  ;;  %v1688_v35 = vld [vmem:[%s8867_s3 + $0x58] sm:$0xff] }
  0xc5   :  { %1665 = vmatpush.bf16.msra.mxu1 %v4550_v41  ;;  %1625 = vmatmul.bf16.vlgmr.msrb.gmra.mxu2 %v6678_v36  ;;  %v1346_v36 = vpop.f32.mrf.mxu2 }
  0xc6   :  { %1719 = vmatpush.msra.mxu2 %v1692_v48  ;;  %1639 = vmatmul.bf16.vlgmr.msrb.gmra.mxu3 %v6665_v31  ;;  %v7283_v31 = vld [vmem:[%s8868_s2] sm:$0x3] }
  0xc7   :  { %v256_v1 = vperm.slane %v7283_v31, 0 }
  0xc8   :  { %1720 = vmatpush.msra.mxu2 %v1691_v52  ;;  %1652 = vmatpush.bf16.msra.mxu0 %v4478_v54  ;;  %v1376_v18 = vpop.f32.mrf.mxu0 }
  0xc9   :  { %1666 = vmatpush.bf16.msra.mxu1 %v4542_v51  ;;  %v1321_v11 = vadd.f32 %v1320_v47, %v256_v1  ;;  %v1416_v19 = vpop.f32.mrf.mxu3  ;;  %v1390_v22 = vpop.f32.mrf.mxu1 }
  0xca   :  { %1721 = vmatpush.msra.mxu2 %v1690_v58 }
  0xcb   :  { %1653 = vmatmul.bf16.vlgmr.msra.gmra.mxu0 %v6686_v40  ;;  %v1319_v40 = vadd.f32 %v1318_v53, %v256_v1  ;;  %v1335_v17 = vadd.f32 %v1334_v62, %v1321_v11  ;;  %v1707_v1 = vld [vmem:[%s8867_s3 + $0xf0] sm:$0xff]  ;;  %v1702_v62 = vld [vmem:[%s8867_s3 + $0xc8] sm:$0xff]  ;;  %v1697_v11 = vld [vmem:[%s8867_s3 + $0xa0] sm:$0xff] }
  0xcc   :  { %1722 = vmatpush.msra.mxu2 %v1689_v55 }
  0xcd   :  { %v1348_v0 = vpop.f32.mrf.mxu2  ;;  %v1333_v2 = vadd.f32 %v1332_v56, %v1319_v40  ;;  %v1703_v40 = vld [vmem:[%s8867_s3 + $0xd0] sm:$0xff] }
  0xce   :  { %1723 = vmatpush.msra.mxu2 %v1688_v35  ;;  %v1349_v20 = vadd.f32 %v1348_v0, %v1335_v17  ;;  %v1701_v0 = vld [vmem:[%s8867_s3 + $0xc0] sm:$0xff]  ;;  %v1695_v17 = vld [vmem:[%s8867_s3 + $0x90] sm:$0xff] }
  0xcf   :  { %v1347_v7 = vadd.f32 %v1346_v36, %v1333_v2  ;;  %v257_v2 = vperm.slane %v7283_v31, 1 }
  0xd0   :  { %1724 = vmatpush.msra.mxu2 %v1687_v10  ;;  %v1363_v24 = vadd.f32 %v1362_v5, %v1349_v20  ;;  %v1708_v10 = vld [vmem:[%s8867_s3 + $0xf8] sm:$0xff]  ;;  %v1693_v20 = vld [vmem:[%s8867_s3 + $0x80] sm:$0xff] }
  0xd1   :  { %v1361_v12 = vadd.f32 %v1360_v59, %v1347_v7  ;;  %v1418_v28 = vpop.f32.mrf.mxu3  ;;  %1742 = vmatpush.msra.mxu3 %v1708_v10  ;;  %v1705_v59 = vld [vmem:[%s8867_s3 + $0xe0] sm:$0xff]  ;;  %v1700_v5 = vld [vmem:[%s8867_s3 + $0xb8] sm:$0xff]  ;;  %v1699_v7 = vld [vmem:[%s8867_s3 + $0xb0] sm:$0xff] }
  0xd2   :  { %1725 = vmatpush.msra.mxu2 %v1686_v57  ;;  %v1377_v27 = vadd.f32 %v1376_v18, %v1363_v24  ;;  %v1706_v57 = vld [vmem:[%s8867_s3 + $0xe8] sm:$0xff] }
  0xd3   :  { %v1375_v16 = vadd.f32 %v1374_v6, %v1361_v12  ;;  %1743 = vmatpush.msra.mxu3 %v1707_v1 }
  0xd4   :  { %1726 = vmatpush.msra.mxu2 %v1685_v60  ;;  %4552 = vmatmul.msk.bf16.vlgmr.msra.gmra.mxu1 %vm1305_vm0, %v6794_v37  ;;  %v1679_v37 = vld [vmem:[%s8867_s3 + $0x10] sm:$0xff]  ;;  %v1391_v30 = vadd.f32 %v1390_v22, %v1377_v27  ;;  %v1704_v60 = vld [vmem:[%s8867_s3 + $0xd8] sm:$0xff] }
  0xd5   :  { %v1402_v14 = vpop.f32.mrf.mxu2  ;;  %v1389_v21 = vadd.f32 %v1388_v9, %v1375_v16  ;;  %1744 = vmatpush.msra.mxu3 %v1706_v57  ;;  %v1694_v16 = vld [vmem:[%s8867_s3 + $0x88] sm:$0xff] }
  0xd6   :  { %1727 = vmatpush.msra.mxu2 %v1684_v61 }
  0xd7   :  { %v1403_v25 = vadd.f32 %v1402_v14, %v1389_v21  ;;  %1745 = vmatpush.msra.mxu3 %v1705_v59 }
  0xd8   :  { %1728 = vmatpush.msra.mxu2 %v1683_v63 }
  0xd9   :  { %v1417_v29 = vadd.f32 %v1416_v19, %v1403_v25  ;;  %1746 = vmatpush.msra.mxu3 %v1704_v60 }
  0xda   :  { %1729 = vmatpush.msra.mxu2 %v1682_v3 }
  0xdb   :  { %1747 = vmatpush.msra.mxu3 %v1703_v40 }
  0xdc   :  { %1730 = vmatpush.msra.mxu2 %v1681_v4 }
  0xdd   :  { %v1404_v23 = vpop.f32.mrf.mxu2  ;;  %1748 = vmatpush.msra.mxu3 %v1702_v62 }
  0xde   :  { %1731 = vmatpush.msra.mxu2 %v1680_v8  ;;  %v1405_v34 = vadd.f32 %v1404_v23, %v1391_v30 }
  0xdf   :  { %1749 = vmatpush.msra.mxu3 %v1701_v0 }
  0xe0   :  { %1732 = vmatpush.msra.mxu2 %v1679_v37  ;;  %v1430_v26 = vpop.f32.mrf.mxu0  ;;  %v1419_v41 = vadd.f32 %v1418_v28, %v1405_v34  ;;  %v1698_v37 = vld [vmem:[%s8867_s3 + $0xa8] sm:$0xff] }
  0xe1   :  { %v1444_v39 = vpop.f32.mrf.mxu1  ;;  %v1431_v32 = vadd.f32 %v1430_v26, %v1417_v29  ;;  %1750 = vmatpush.msra.mxu3 %v1700_v5 }
  0xe2   :  { %1733 = vmatpush.msra.mxu2 %v1678_v13  ;;  %v1696_v13 = vld [vmem:[%s8867_s3 + $0x98] sm:$0xff] }
  0xe3   :  { %v1445_v43 = vadd.f32 %v1444_v39, %v1431_v32  ;;  %1751 = vmatpush.msra.mxu3 %v1699_v7 }
  0xe4   :  { %1734 = vmatpush.msra.mxu2 %v1677_v15 }
  0xe5   :  { %1752 = vmatpush.msra.mxu3 %v1698_v37 }
  0xe7   :  { %1753 = vmatpush.msra.mxu3 %v1697_v11 }
  0xe8   :  { %v1458_v33 = vpop.f32.mrf.mxu2  ;;  %v1432_v44 = vpop.f32.mrf.mxu0 }
  0xe9   :  { %v1472_v38 = vpop.f32.mrf.mxu3  ;;  %v1459_v42 = vadd.f32 %v1458_v33, %v1445_v43  ;;  %v1433_v45 = vadd.f32 %v1432_v44, %v1419_v41  ;;  %v1446_v46 = vpop.f32.mrf.mxu1  ;;  %1754 = vmatpush.msra.mxu3 %v1696_v13 }
  0xeb   :  { %v1473_v48 = vadd.f32 %v1472_v38, %v1459_v42  ;;  %v1447_v51 = vadd.f32 %v1446_v46, %v1433_v45  ;;  %1755 = vmatpush.msra.mxu3 %v1695_v17 }
  0xed   :  { %1756 = vmatpush.msra.mxu3 %v1694_v16 }
  0xef   :  { %1757 = vmatpush.msra.mxu3 %v1693_v20 }
  0xf0   :  { %v1460_v49 = vpop.f32.mrf.mxu2  ;;  %v1486_v50 = vpop.f32.mrf.mxu0 }
  0xf1   :  { %v1487_v52 = vadd.f32 %v1486_v50, %v1473_v48  ;;  %v1461_v53 = vadd.f32 %v1460_v49, %v1447_v51  ;;  %v1474_v58 = vpop.f32.mrf.mxu3 }
  0xf3   :  { %v7322_v54 = vmax.f32 %v1487_v52, 0.0  ;;  %v1475_v55 = vadd.f32 %v1474_v58, %v1461_v53 }
  0xf5   :  { %1735 = vmatmul.f32.vlgmr.msra.gmra.mxu2 %v7322_v54  ;;  %v1709_v59 = vmul.f32 %v7322_v54, %v7322_v54  ;;  %v5882_v54 = vld [vmem:[%s8869_s4] ss:$0 sm:$0xff] }
  0xf8   :  { %v1488_v56 = vpop.f32.mrf.mxu0 }
  0xf9   :  { %v1489_v35 = vadd.f32 %v1488_v56, %v1475_v55 }
  0xfb   :  { %v7325_v36 = vmax.f32 %v1489_v35, 0.0 }
  0xfd   :  { %1738 = vmatmul.f32.gmra.mxu2 %v7325_v36 }
 0x101   :  { %v1500_v47 = vpop.f32.mrf.mxu1 }
 0x102   :  { %v1501_v6 = vadd.f32 %v1500_v47, %v257_v2 }
 0x108   :  { %v1514_v61 = vpop.f32.mrf.mxu2  ;;  %v1542_v4 = vpop.f32.mrf.mxu0 }
 0x109   :  { %v1528_v63 = vpop.f32.mrf.mxu3  ;;  %v1502_v3 = vpop.f32.mrf.mxu1  ;;  %v1515_v31 = vadd.f32 %v1514_v61, %v1501_v6 }
 0x10a   :  { %v1503_v18 = vadd.f32 %v1502_v3, %v257_v2  ;;  %v1711_v3 = vmul.f32 %v7325_v36, %v7325_v36 }
 0x10b   :  { %v1529_v14 = vadd.f32 %v1528_v63, %v1515_v31 }
 0x10d   :  { %v1543_v19 = vadd.f32 %v1542_v4, %v1529_v14 }
 0x110   :  { %v1516_v8 = vpop.f32.mrf.mxu2  ;;  %v1544_v15 = vpop.f32.mrf.mxu0 }
 0x111   :  { %v1530_v9 = vpop.f32.mrf.mxu3  ;;  %v1517_v23 = vadd.f32 %v1516_v8, %v1503_v18  ;;  %v1777_v8 = vlaneseq }
 0x113   :  { %v1531_v27 = vadd.f32 %v1530_v9, %v1517_v23  ;;  %v1778_v9 = vand.u32 127, %v1777_v8  ;;  %v5662_v8 = vld [vmem:[%s8872_s8 + $0x24] sm:$0xf] }
 0x115   :  { %v1545_v39 = vadd.f32 %v1544_v15, %v1531_v27  ;;  %vm1780_vm1 = vcmp.lt.s32.totalorder %v1778_v9, 100 }
 0x121   :  { %v1556_v12 = vpop.f32.mrf.mxu1 }
 0x122   :  { %v1557_v24 = vadd.f32 %v1556_v12, %v1543_v19 }
 0x128   :  { %v1570_v21 = vpop.f32.mrf.mxu2  ;;  %v1598_v26 = vpop.f32.mrf.mxu0 }
 0x129   :  { %v1584_v22 = vpop.f32.mrf.mxu3  ;;  %v1558_v25 = vpop.f32.mrf.mxu1  ;;  %v1571_v28 = vadd.f32 %v1570_v21, %v1557_v24  ;;  %v1779_v24 = vcvt.s32.f32 %v1778_v9  ;;  %v4563_v9 = vld [vmem:[%s8872_s8 + $0x10] sm:$0xf] }
 0x12a   :  { %v1559_v34 = vadd.f32 %v1558_v25, %v1545_v39  ;;  %v5673_v39 = vld [vmem:[%s8872_s8 + $0x74] sm:$0xf0] }
 0x12b   :  { %v1585_v30 = vadd.f32 %v1584_v22, %v1571_v28 }
 0x12d   :  { %v1599_v44 = vadd.f32 %v1598_v26, %v1585_v30  ;;  %v5672_v30 = vld [vmem:[%s8872_s8 + $0x74] sm:$0xf] }
 0x130   :  { %v1572_v29 = vpop.f32.mrf.mxu2  ;;  %v1600_v38 = vpop.f32.mrf.mxu0 }
 0x131   :  { %v1586_v32 = vpop.f32.mrf.mxu3  ;;  %v1573_v43 = vadd.f32 %v1572_v29, %v1559_v34  ;;  %v4611_v29 = vld [vmem:[%s8872_s8 + $0x70] sm:$0xf] }
 0x133   :  { %v1587_v45 = vadd.f32 %v1586_v32, %v1573_v43  ;;  %v4612_v32 = vor.u32 %v5673_v39, %v4611_v29  ;;  %v7410_v43 = vld [vmem:[%s8871_s6] ss:$0 sm:$0xff]  ;;  %v4985_v29 = vld [vmem:[%s8874_s10 + $0x30c] sm:$0xf0] }
 0x135   :  { %v1601_v51 = vadd.f32 %v1600_v38, %v1587_v45  ;;  %1944 = vmatpush.bf16.msrb.mxu0 %v4612_v32  ;;  %v5869_v32 = vld [vmem:[%s8874_s10 + $0x61c] sm:$0xf] }
 0x141   :  { %v1612_v33 = vpop.f32.mrf.mxu1 }
 0x142   :  { %v1613_v41 = vadd.f32 %v1612_v33, %v1599_v44  ;;  %v4613_v33 = vld [vmem:[%s8872_s8 + $0x78] sm:$0xf0]  ;;  %v7405_v44 = vld [vmem:[%s8870_s5] ss:$0 sm:$0xff] }
 0x143   :  { %v4616_v34 = vor.u32 %v5672_v30, %v4613_v33  ;;  %v5401_v33 = vld [vmem:[%s8874_s10 + $0x64c] sm:$0xf0] }
 0x145   :  { %1958 = vmatpush.bf16.msrb.mxu1 %v4616_v34  ;;  %v4931_v34 = vld [vmem:[%s8874_s10 + $0x270] sm:$0xf] }
 0x148   :  { %v1626_v42 = vpop.f32.mrf.mxu2  ;;  %v1654_v52 = vpop.f32.mrf.mxu0 }
 0x149   :  { %v1627_v46 = vadd.f32 %v1626_v42, %v1613_v41  ;;  %v1640_v48 = vpop.f32.mrf.mxu3  ;;  %v1614_v49 = vpop.f32.mrf.mxu1 }
 0x14a   :  { %v1615_v53 = vadd.f32 %v1614_v49, %v1601_v51  ;;  %v4603_v49 = vld [vmem:[%s8872_s8 + $0x60] sm:$0xf]  ;;  %v5670_v51 = vld [vmem:[%s8872_s8 + $0x64] sm:$0xf] }
 0x14b   :  { %v1641_v50 = vadd.f32 %v1640_v48, %v1627_v46 }
 0x14d   :  { %v1655_v58 = vadd.f32 %v1654_v52, %v1641_v50  ;;  %v5671_v50 = vld [vmem:[%s8872_s8 + $0x64] sm:$0xf0] }
 0x14e   :  { %v4604_v52 = vor.u32 %v5671_v50, %v4603_v49 }
 0x150   :  { %v1628_v55 = vpop.f32.mrf.mxu2  ;;  %v1656_v40 = vpop.f32.mrf.mxu0  ;;  %1945 = vmatpush.bf16.msrb.mxu0 %v4604_v52  ;;  %v4933_v52 = vld [vmem:[%s8874_s10 + $0x2a4] sm:$0xf0] }
 0x151   :  { %v1629_v56 = vadd.f32 %v1628_v55, %v1615_v53  ;;  %v1668_v35 = vpop.f32.mrf.mxu1  ;;  %v1642_v1 = vpop.f32.mrf.mxu3  ;;  %v4605_v53 = vld [vmem:[%s8872_s8 + $0x68] sm:$0xf0]  ;;  %v4595_v55 = vld [vmem:[%s8872_s8 + $0x50] sm:$0xf] }
 0x152   :  { %v1669_v10 = vadd.f32 %v1668_v35, %v1655_v58  ;;  %v4608_v58 = vor.u32 %v5670_v51, %v4605_v53  ;;  %v5668_v35 = vld [vmem:[%s8872_s8 + $0x54] sm:$0xf] }
 0x153   :  { %v1643_v57 = vadd.f32 %v1642_v1, %v1629_v56  ;;  %v5669_v56 = vld [vmem:[%s8872_s8 + $0x54] sm:$0xf0]  ;;  %v4597_v1 = vld [vmem:[%s8872_s8 + $0x58] sm:$0xf0]  ;;  %v5752_v51 = vld [vmem:[%s8874_s10 + $0x274] sm:$0xf] }
 0x154   :  { %v1674_v47 = vmax.f32 %v1669_v10, 0.0  ;;  %1959 = vmatpush.bf16.msrb.mxu1 %v4608_v58  ;;  %v4596_v10 = vor.u32 %v5669_v56, %v4595_v55  ;;  %v5856_v53 = vld [vmem:[%s8874_s10 + $0x5b4] sm:$0xf]  ;;  %v7549_v55 = vld [vmem:[%s8873_s7] ss:$0 sm:$0xff] }
 0x155   :  { %v1657_v61 = vadd.f32 %v1656_v40, %v1643_v57  ;;  %v4600_v57 = vor.u32 %v5668_v35, %v4597_v1  ;;  %v4936_v35 = vor.u32 %v5752_v51, %v4933_v52  ;;  %v4879_v1 = vld [vmem:[%s8874_s10 + $0x208] sm:$0xf]  ;;  %v5804_v52 = vld [vmem:[%s8874_s10 + $0x414] sm:$0xf] }
 0x156   :  { %1758 = vmatmul.f32.vlgmr.msra.gmra.mxu3 %v1674_v47  ;;  %v1710_v60 = vmul.f32 %v1674_v47, %v1674_v47  ;;  %1946 = vmatpush.bf16.msrb.mxu0 %v4596_v10  ;;  %v4587_v47 = vld [vmem:[%s8872_s8 + $0x40] sm:$0xf]  ;;  %v5349_v10 = vld [vmem:[%s8874_s10 + $0x5e4] sm:$0xf0] }
 0x157   :  { %v4725_v51 = vld [vmem:[%s8874_s10 + $0x104] sm:$0xf0] }
 0x158   :  { %v1713_v62 = vadd.f32 %v1710_v60, %v1709_v59  ;;  %1960 = vmatpush.bf16.msrb.mxu1 %v4600_v57  ;;  %v5667_v59 = vld [vmem:[%s8872_s8 + $0x44] sm:$0xf0]  ;;  %v5666_v60 = vld [vmem:[%s8872_s8 + $0x44] sm:$0xf]  ;;  %v5745_v57 = vld [vmem:[%s8874_s10 + $0x238] sm:$0xf0] }
 0x159   :  { %v1670_v63 = vpop.f32.mrf.mxu1  ;;  %v4588_v40 = vor.u32 %v5667_v59, %v4587_v47  ;;  %v5352_v47 = vor.u32 %v5856_v53, %v5349_v10  ;;  %v5295_v59 = vld [vmem:[%s8874_s10 + $0x548] sm:$0xf] }
 0x15a   :  { %v1671_v0 = vadd.f32 %v1670_v63, %v1657_v61  ;;  %1714 = vadd.xlane.f32.xlu0 %v1713_v62  ;;  %v4589_v61 = vld [vmem:[%s8872_s8 + $0x48] sm:$0xf0]  ;;  %v4579_v63 = vld [vmem:[%s8872_s8 + $0x30] sm:$0xf]  ;;  %v5141_v53 = vld [vmem:[%s8874_s10 + $0x444] sm:$0xf0] }
 0x15b   :  { %v4592_v62 = vor.u32 %v5666_v60, %v4589_v61  ;;  %1947 = vmatpush.bf16.msrb.mxu0 %v4588_v40  ;;  %v5849_v60 = vld [vmem:[%s8874_s10 + $0x578] sm:$0xf0]  ;;  %v5739_v40 = vld [vmem:[%s8874_s10 + $0x20c] sm:$0xf] }
 0x15c   :  { %v1676_v2 = vmax.f32 %v1671_v0, 0.0  ;;  %v5665_v0 = vld [vmem:[%s8872_s8 + $0x34] sm:$0xf0] }
 0x15d   :  { %1961 = vmatpush.bf16.msrb.mxu1 %v4592_v62 }
 0x15e   :  { %v1712_v4 = vmul.f32 %v1676_v2, %v1676_v2  ;;  %1761 = vmatmul.f32.gmra.mxu3 %v1676_v2  ;;  %v5664_v2 = vld [vmem:[%s8872_s8 + $0x34] sm:$0xf] }
 0x160   :  { %v1716_v5 = vadd.f32 %v1712_v4, %v1711_v3  ;;  %v4580_v3 = vor.u32 %v5665_v0, %v4579_v63  ;;  %v4581_v4 = vld [vmem:[%s8872_s8 + $0x38] sm:$0xf0]  ;;  %v4880_v63 = vor.u32 %v5745_v57, %v4879_v1  ;;  %v4881_v0 = vld [vmem:[%s8874_s10 + $0x23c] sm:$0xf0] }
 0x161   :  { %v5693_v57 = vld [vmem:[%s8874_s10 + $0x98] sm:$0xf0] }
 0x162   :  { %1717 = vadd.xlane.f32.xlu0 %v1716_v5  ;;  %v4584_v5 = vor.u32 %v5664_v2, %v4581_v4  ;;  %1948 = vmatpush.bf16.msrb.mxu0 %v4580_v3  ;;  %v5843_v2 = vld [vmem:[%s8874_s10 + $0x54c] sm:$0xf]  ;;  %v5297_v3 = vld [vmem:[%s8874_s10 + $0x57c] sm:$0xf0]  ;;  %v5296_v4 = vor.u32 %v5849_v60, %v5295_v59 }
 0x164   :  { %1962 = vmatpush.bf16.msrb.mxu1 %v4584_v5  ;;  %v4884_v5 = vor.u32 %v5739_v40, %v4881_v0  ;;  %v5144_v40 = vor.u32 %v5804_v52, %v5141_v53  ;;  %v5791_v0 = vld [vmem:[%s8874_s10 + $0x3ac] sm:$0xf]  ;;  %v5850_v52 = vld [vmem:[%s8874_s10 + $0x580] sm:$0xf0]  ;;  %v5740_v53 = vld [vmem:[%s8874_s10 + $0x214] sm:$0xf] }
 0x178   :  { %v1736_v6 = vpop.f32.mrf.mxu2 }
 0x180   :  { %v1739_v14 = vpop.f32.mrf.mxu2 }
 0x1cd   :  { %v1715_v7 = vpop.xlane.xlu0 %1714 }
 0x1ce   :  { %v1769_v11 = vadd.f32 %v5882_v54, %v1715_v7  ;;  %v5663_v7 = vld [vmem:[%s8872_s8 + $0x24] sm:$0xf0] }
 0x1d5   :  { %v1718_v15 = vpop.xlane.xlu0 %1717 }
 0x1d6   :  { %v1770_v19 = vadd.f32 %v5882_v54, %v1718_v15 }
 0x1d9   :  { %v1759_v37 = vpop.f32.mrf.mxu3 }
 0x1da   :  { %v1760_v31 = vadd.f32 %v1759_v37, %v1736_v6  ;;  %v4571_v6 = vld [vmem:[%s8872_s8 + $0x20] sm:$0xf]  ;;  %v4573_v37 = vld [vmem:[%s8872_s8 + $0x28] sm:$0xf0] }
 0x1db   :  { %v4572_v54 = vor.u32 %v5663_v7, %v4571_v6  ;;  %v4827_v6 = vld [vmem:[%s8874_s10 + $0x1a0] sm:$0xf]  ;;  %v5732_v7 = vld [vmem:[%s8874_s10 + $0x1d0] sm:$0xf0] }
 0x1dc   :  { %v1771_v12 = vmul.f32 2.0, %v1760_v31  ;;  %v4576_v31 = vor.u32 %v5662_v8, %v4573_v37  ;;  %v5243_v8 = vld [vmem:[%s8874_s10 + $0x4e0] sm:$0xf]  ;;  %v5300_v37 = vor.u32 %v5843_v2, %v5297_v3 }
 0x1dd   :  { %1949 = vmatpush.bf16.msrb.mxu0 %v4572_v54  ;;  %v5089_v2 = vld [vmem:[%s8874_s10 + $0x3dc] sm:$0xf0] }
 0x1de   :  { %v1773_v13 = vsub.f32 %v1769_v11, %v1771_v12  ;;  %1963 = vmatpush.bf16.msrb.mxu1 %v4576_v31  ;;  %v5661_v11 = vld [vmem:[%s8872_s8 + $0x14] sm:$0xf0]  ;;  %v5660_v12 = vld [vmem:[%s8872_s8 + $0x14] sm:$0xf] }
 0x1df   :  { %v5836_v31 = vld [vmem:[%s8874_s10 + $0x510] sm:$0xf0] }
 0x1e0   :  { %v7384_v36 = vmax.f32 %v1773_v13, 0.0  ;;  %v4564_v13 = vor.u32 %v5661_v11, %v4563_v9  ;;  %v5726_v9 = vld [vmem:[%s8874_s10 + $0x1a4] sm:$0xf]  ;;  %v4829_v11 = vld [vmem:[%s8874_s10 + $0x1d4] sm:$0xf0] }
 0x1e1   :  { %v1762_v17 = vpop.f32.mrf.mxu3 }
 0x1e2   :  { %v1763_v16 = vadd.f32 %v1762_v17, %v1739_v14  ;;  %v1781_v18 = vsel %vm1780_vm1, %v7384_v36, 3.4e+38  ;;  %v4565_v14 = vld [vmem:[%s8872_s8 + $0x18] sm:$0xf0]  ;;  %1950 = vmatpush.bf16.msrb.mxu0 %v4564_v13  ;;  %v4555_v17 = vld [vmem:[%s8872_s8] sm:$0xf] }
 0x1e3   :  { %1783 = vmin.xlane.f32.xlu1 %v1781_v18  ;;  %v4568_v15 = vor.u32 %v5660_v12, %v4565_v14  ;;  %v5830_v12 = vld [vmem:[%s8874_s10 + $0x4e4] sm:$0xf]  ;;  %v5245_v13 = vld [vmem:[%s8874_s10 + $0x514] sm:$0xf0] }
 0x1e4   :  { %v1772_v20 = vmul.f32 2.0, %v1763_v16  ;;  %v5659_v16 = vld [vmem:[%s8872_s8 + $0x4] sm:$0xf0] }
 0x1e5   :  { %1964 = vmatpush.bf16.msrb.mxu1 %v4568_v15  ;;  %v4828_v15 = vor.u32 %v5732_v7, %v4827_v6  ;;  %v5680_v6 = vld [vmem:[%s8874_s10 + $0x30] sm:$0xf0]  ;;  %v5092_v7 = vor.u32 %v5791_v0, %v5089_v2  ;;  %v5253_v0 = vld [vmem:[%s8874_s10 + $0x51c] sm:$0xf0] }
 0x1e6   :  { %v1774_v21 = vsub.f32 %v1770_v19, %v1772_v20  ;;  %v4556_v19 = vor.u32 %v5659_v16, %v4555_v17  ;;  %v4557_v20 = vld [vmem:[%s8872_s8 + $0x8] sm:$0xf0]  ;;  %v4775_v17 = vld [vmem:[%s8874_s10 + $0x138] sm:$0xf] }
 0x1e8   :  { %v7387_v22 = vmax.f32 %v1774_v21, 0.0  ;;  %1951 = vmatpush.bf16.msrb.mxu0 %v4556_v19  ;;  %v5244_v19 = vor.u32 %v5836_v31, %v5243_v8  ;;  %v5035_v8 = vld [vmem:[%s8874_s10 + $0x340] sm:$0xf]  ;;  %v4621_v31 = vld [vmem:[%s8874_s10 + $0x34] sm:$0xf0] }
 0x1ea   :  { %v1782_v23 = vsel %vm1780_vm1, %v7387_v22, 3.4e+38 }
 0x1eb   :  { %1785 = vmin.xlane.f32.xlu1 %v1782_v23 }
 0x256   :  { %v1784_v25 = vpop.xlane.xlu1 %1783 }
 0x257   :  { %vm1787_vm2 = vcmp.le.f32.partialorder %v1781_v18, %v1784_v25  ;;  %v5658_v18 = vld [vmem:[%s8872_s8 + $0x4] sm:$0xf]  ;;  %v5399_v25 = vld [vmem:[%s8874_s10 + $0x618] sm:$0xf] }
 0x258   :  { %v1789_v26 = vsel %vm1787_vm2, %v1779_v24, 128.0  ;;  %v4560_v21 = vor.u32 %v5658_v18, %v4557_v20  ;;  %v4832_v20 = vor.u32 %v5726_v9, %v4829_v11  ;;  %v5778_v9 = vld [vmem:[%s8874_s10 + $0x344] sm:$0xf]  ;;  %v5037_v11 = vld [vmem:[%s8874_s10 + $0x374] sm:$0xf0] }
 0x259   :  { %1791 = vmin.xlane.f32.xlu2 %v1789_v26 }
 0x25a   :  { %1965 = vmatpush.bf16.msrb.mxu1 %v4560_v21  ;;  %v5719_v21 = vld [vmem:[%s8874_s10 + $0x168] sm:$0xf0] }
 0x25e   :  { %v1786_v27 = vpop.xlane.xlu1 %1785 }
 0x25f   :  { %vm1788_vm3 = vcmp.le.f32.partialorder %v1782_v23, %v1786_v27  ;;  %v4983_v23 = vld [vmem:[%s8874_s10 + $0x2d8] sm:$0xf]  ;;  %v5875_v27 = vld [vmem:[%s8874_s10 + $0x648] sm:$0xf0] }
 0x260   :  { %v1790_v28 = vsel %vm1788_vm3, %v1779_v24, 128.0  ;;  %v5400_v39 = vor.u32 %v5875_v27, %v5399_v25 }
 0x261   :  { %1793 = vmin.xlane.f32.xlu2 %v1790_v28  ;;  %v5765_v28 = vld [vmem:[%s8874_s10 + $0x2dc] sm:$0xf] }
 0x262   :  { %v4988_v30 = vor.u32 %v5765_v28, %v4985_v29  ;;  %3302 = vmatpush.bf16.msrb.mxu3 %v5400_v39  ;;  %v5248_v28 = vor.u32 %v5830_v12, %v5245_v13  ;;  %v5713_v29 = vld [vmem:[%s8874_s10 + $0x13c] sm:$0xf]  ;;  %v4777_v39 = vld [vmem:[%s8874_s10 + $0x16c] sm:$0xf0]  ;;  %v4991_v13 = vld [vmem:[%s8874_s10 + $0x2e0] sm:$0xf] }
 0x264   :  { %3316 = vmatpush.bf16.msra.mxu0 %v4988_v30  ;;  %v5817_v30 = vld [vmem:[%s8874_s10 + $0x47c] sm:$0xf] }
 0x268   :  { %3317 = vmatpush.bf16.msra.mxu0 %v4936_v35  ;;  %v4671_v35 = vld [vmem:[%s8874_s10 + $0x68] sm:$0xf] }
 0x269   :  { %v4672_v3 = vor.u32 %v5693_v57, %v4671_v35  ;;  %v5305_v35 = vld [vmem:[%s8874_s10 + $0x584] sm:$0xf0] }
 0x26c   :  { %3318 = vmatpush.bf16.msra.mxu0 %v4884_v5 }
 0x270   :  { %3319 = vmatpush.bf16.msra.mxu0 %v4832_v20 }
 0x2cc   :  { %v1792_v38 = vpop.xlane.xlu2 %1791 }
 0x2cd   :  { %vm1795_vm4 = vcmp.eq.f32.partialorder %v1779_v24, %v1792_v38  ;;  %v5404_v38 = vor.u32 %v5869_v32, %v5401_v33  ;;  %v4776_v33 = vor.u32 %v5719_v21, %v4775_v17  ;;  %v5876_v17 = vld [vmem:[%s8874_s10 + $0x650] sm:$0xf0] }
 0x2ce   :  { %v1801_v41 = vsel %vm1795_vm4, %v7405_v44, 0.0  ;;  %v1811_v42 = vsel %vm1795_vm4, %v7410_v43, 0.0 }
 0x2cf   :  { %1803 = vadd.xlane.f32.xlu0 %v1801_v41  ;;  %1813 = vadd.xlane.f32.xlu2 %v1811_v42  ;;  %v5758_v41 = vld [vmem:[%s8874_s10 + $0x2a0] sm:$0xf0]  ;;  %v5347_v42 = vld [vmem:[%s8874_s10 + $0x5b0] sm:$0xf] }
 0x2d0   :  { %v4932_v49 = vor.u32 %v5758_v41, %v4931_v34  ;;  %3330 = vmatpush.bf16.msra.mxu1 %v5404_v38  ;;  %v4780_v38 = vor.u32 %v5713_v29, %v4777_v39  ;;  %v4723_v41 = vld [vmem:[%s8874_s10 + $0xd0] sm:$0xf]  ;;  %v4939_v29 = vld [vmem:[%s8874_s10 + $0x278] sm:$0xf] }
 0x2d2   :  { %3320 = vmatpush.bf16.msra.mxu0 %v4780_v38  ;;  %v5857_v38 = vld [vmem:[%s8874_s10 + $0x5bc] sm:$0xf] }
 0x2d4   :  { %v1794_v45 = vpop.xlane.xlu2 %1793  ;;  %3331 = vmatpush.bf16.msra.mxu1 %v5352_v47  ;;  %v5087_v47 = vld [vmem:[%s8874_s10 + $0x3a8] sm:$0xf] }
 0x2d5   :  { %vm1796_vm5 = vcmp.eq.f32.partialorder %v1779_v24, %v1794_v45  ;;  %v5771_v24 = vld [vmem:[%s8874_s10 + $0x308] sm:$0xf0]  ;;  %v5862_v45 = vld [vmem:[%s8874_s10 + $0x5e0] sm:$0xf0] }
 0x2d6   :  { %v1812_v46 = vsel %vm1796_vm5, %v7410_v43, 0.0  ;;  %v1802_v48 = vsel %vm1796_vm5, %v7405_v44, 0.0  ;;  %v4984_v26 = vor.u32 %v5771_v24, %v4983_v23  ;;  %v5348_v50 = vor.u32 %v5862_v45, %v5347_v42  ;;  %v5191_v23 = vld [vmem:[%s8874_s10 + $0x478] sm:$0xf]  ;;  %v5823_v24 = vld [vmem:[%s8874_s10 + $0x4a8] sm:$0xf0] }
 0x2d7   :  { %1815 = vadd.xlane.f32.xlu0 %v1812_v46  ;;  %1805 = vadd.xlane.f32.xlu1 %v1802_v48  ;;  %v5192_v34 = vor.u32 %v5823_v24, %v5191_v23  ;;  %v5706_v42 = vld [vmem:[%s8874_s10 + $0x100] sm:$0xf0]  ;;  %v5139_v45 = vld [vmem:[%s8874_s10 + $0x410] sm:$0xf]  ;;  %v5409_v24 = vld [vmem:[%s8874_s10 + $0x654] sm:$0xf0] }
 0x2d8   :  { %3288 = vmatpush.bf16.msrb.mxu2 %v4984_v26  ;;  %3303 = vmatpush.bf16.msrb.mxu3 %v5348_v50  ;;  %v5700_v50 = vld [vmem:[%s8874_s10 + $0xd4] sm:$0xf]  ;;  %v5870_v23 = vld [vmem:[%s8874_s10 + $0x624] sm:$0xf] }
 0x2d9   :  { %3332 = vmatpush.bf16.msra.mxu1 %v5300_v37  ;;  %v4728_v1 = vor.u32 %v5700_v50, %v4725_v51  ;;  %v5674_v37 = vld [vmem:[%s8874_s10 + $0x4] sm:$0xf]  ;;  %v5303_v50 = vld [vmem:[%s8874_s10 + $0x550] sm:$0xf] }
 0x2da   :  { %v4624_v21 = vor.u32 %v5674_v37, %v4621_v31  ;;  %v5714_v37 = vld [vmem:[%s8874_s10 + $0x144] sm:$0xf] }
 0x2db   :  { %3321 = vmatpush.bf16.msra.mxu0 %v4728_v1  ;;  %v5304_v1 = vor.u32 %v5850_v52, %v5303_v50  ;;  %v5675_v50 = vld [vmem:[%s8874_s10 + $0xc] sm:$0xf] }
 0x2dc   :  { %3289 = vmatpush.bf16.msrb.mxu2 %v4932_v49  ;;  %3304 = vmatpush.bf16.msrb.mxu3 %v5296_v4  ;;  %v5810_v49 = vld [vmem:[%s8874_s10 + $0x440] sm:$0xf0] }
 0x2dd   :  { %3333 = vmatpush.bf16.msra.mxu1 %v5248_v28  ;;  %v5140_v10 = vor.u32 %v5810_v49, %v5139_v45  ;;  %v5746_v49 = vld [vmem:[%s8874_s10 + $0x240] sm:$0xf0] }
 0x2e0   :  { %3290 = vmatpush.bf16.msrb.mxu2 %v4880_v63  ;;  %3305 = vmatpush.bf16.msrb.mxu3 %v5244_v19 }
 0x2e4   :  { %3291 = vmatpush.bf16.msrb.mxu2 %v4828_v15  ;;  %3306 = vmatpush.bf16.msrb.mxu3 %v5192_v34  ;;  %v5407_v15 = vld [vmem:[%s8874_s10 + $0x620] sm:$0xf]  ;;  %v4941_v34 = vld [vmem:[%s8874_s10 + $0x2ac] sm:$0xf0] }
 0x2e5   :  { %v5408_v39 = vor.u32 %v5876_v17, %v5407_v15  ;;  %v4731_v15 = vld [vmem:[%s8874_s10 + $0xd8] sm:$0xf]  ;;  %v5707_v17 = vld [vmem:[%s8874_s10 + $0x108] sm:$0xf0] }
 0x2e8   :  { %3292 = vmatpush.bf16.msrb.mxu2 %v4776_v33  ;;  %3307 = vmatpush.bf16.msrb.mxu3 %v5140_v10  ;;  %v5753_v33 = vld [vmem:[%s8874_s10 + $0x27c] sm:$0xf] }
 0x342   :  { %v1814_v46 = vpop.xlane.xlu2 %1813  ;;  %v1804_v48 = vpop.xlane.xlu0 %1803 }
 0x343   :  { %v1821_v58 = vsub.f32 %v7410_v43, %v1814_v46  ;;  %v1817_v56 = vsub.f32 %v7405_v44, %v1804_v48 }
 0x345   :  { %v1823_v61 = vmul.f32 %v1821_v58, %v1821_v58  ;;  %v1819_v62 = vmul.f32 %v1817_v56, %v1817_v56  ;;  %v4724_v56 = vor.u32 %v5706_v42, %v4723_v41  ;;  %v5357_v41 = vld [vmem:[%s8874_s10 + $0x5ec] sm:$0xf0] }
 0x346   :  { %v5360_v51 = vor.u32 %v5857_v38, %v5357_v41  ;;  %v5097_v38 = vld [vmem:[%s8874_s10 + $0x3e4] sm:$0xf0] }
 0x347   :  { %v1825_v54 = vadd.f32 %v1823_v61, %v1819_v62  ;;  %v5687_v61 = vld [vmem:[%s8874_s10 + $0x6c] sm:$0xf]  ;;  %v4673_v62 = vld [vmem:[%s8874_s10 + $0x9c] sm:$0xf0]  ;;  %3293 = vmatpush.bf16.msrb.mxu2 %v4724_v56  ;;  %v5844_v56 = vld [vmem:[%s8874_s10 + $0x554] sm:$0xf] }
 0x348   :  { %v4676_v5 = vor.u32 %v5687_v61, %v4673_v62  ;;  %v5727_v61 = vld [vmem:[%s8874_s10 + $0x1ac] sm:$0xf]  ;;  %v4837_v62 = vld [vmem:[%s8874_s10 + $0x1dc] sm:$0xf0] }
 0x349   :  { %v1831_v14 = vmul.f32 %v7549_v55, %v1825_v54  ;;  %v5784_v54 = vld [vmem:[%s8874_s10 + $0x370] sm:$0xf0] }
 0x34a   :  { %v1806_v16 = vpop.xlane.xlu1 %1805  ;;  %v1816_v18 = vpop.xlane.xlu0 %1815  ;;  %3322 = vmatpush.bf16.msra.mxu0 %v4676_v5  ;;  %v5036_v20 = vor.u32 %v5784_v54, %v5035_v8  ;;  %v5199_v8 = vld [vmem:[%s8874_s10 + $0x480] sm:$0xf]  ;;  %v5824_v54 = vld [vmem:[%s8874_s10 + $0x4b0] sm:$0xf0] }
 0x34b   :  { %v1833_v25 = vmul.f32 1.442695, %v1831_v14  ;;  %v1818_v26 = vsub.f32 %v7405_v44, %v1806_v16  ;;  %v1822_v27 = vsub.f32 %v7410_v43, %v1816_v18  ;;  %v5193_v44 = vld [vmem:[%s8874_s10 + $0x4ac] sm:$0xf0]  ;;  %3294 = vmatpush.bf16.msrb.mxu2 %v4672_v3  ;;  %v5772_v14 = vld [vmem:[%s8874_s10 + $0x310] sm:$0xf0]  ;;  %v5200_v31 = vor.u32 %v5824_v54, %v5199_v8 }
 0x34c   :  { %v5196_v48 = vor.u32 %v5817_v30, %v5193_v44  ;;  %v5766_v16 = vld [vmem:[%s8874_s10 + $0x2e4] sm:$0xf]  ;;  %v4993_v18 = vld [vmem:[%s8874_s10 + $0x314] sm:$0xf0]  ;;  %v4992_v28 = vor.u32 %v5772_v14, %v4991_v13  ;;  %v5759_v44 = vld [vmem:[%s8874_s10 + $0x2a8] sm:$0xf0] }
 0x34d   :  { %5886 = vpow2.f32 %v1833_v25  ;;  %v1820_v43 = vmul.f32 %v1818_v26, %v1818_v26  ;;  %v1824_v32 = vmul.f32 %v1822_v27, %v1822_v27  ;;  %v5040_v27 = vor.u32 %v5778_v9, %v5037_v11  ;;  %v4785_v9 = vld [vmem:[%s8874_s10 + $0x174] sm:$0xf0]  ;;  %v5818_v11 = vld [vmem:[%s8874_s10 + $0x484] sm:$0xf] }
 0x34e   :  { %3334 = vmatpush.bf16.msra.mxu1 %v5196_v48  ;;  %v4996_v30 = vor.u32 %v5766_v16, %v4993_v18  ;;  %3323 = vmatpush.bf16.msra.mxu0 %v4624_v21  ;;  %v4940_v42 = vor.u32 %v5759_v44, %v4939_v29  ;;  %v4887_v48 = vld [vmem:[%s8874_s10 + $0x210] sm:$0xf]  ;;  %v4788_v13 = vor.u32 %v5714_v37, %v4785_v9  ;;  %v5147_v16 = vld [vmem:[%s8874_s10 + $0x418] sm:$0xf]  ;;  %v5694_v29 = vld [vmem:[%s8874_s10 + $0xa0] sm:$0xf0] }
 0x34f   :  { %v1826_v46 = vadd.f32 %v1824_v32, %v1820_v43  ;;  %v5355_v43 = vld [vmem:[%s8874_s10 + $0x5b8] sm:$0xf]  ;;  %v5412_v32 = vor.u32 %v5870_v23, %v5409_v24  ;;  %v4888_v10 = vor.u32 %v5746_v49, %v4887_v48  ;;  %v4732_v18 = vor.u32 %v5707_v17, %v4731_v15  ;;  %v4733_v21 = vld [vmem:[%s8874_s10 + $0x10c] sm:$0xf0]  ;;  %v5798_v44 = vld [vmem:[%s8874_s10 + $0x3e0] sm:$0xf0] }
 0x350   :  { %v5785_v49 = vld [vmem:[%s8874_s10 + $0x378] sm:$0xf0]  ;;  %v5760_v15 = vld [vmem:[%s8874_s10 + $0x2b0] sm:$0xf0] }
 0x351   :  { %v1832_v58 = vmul.f32 %v7549_v55, %v1826_v46  ;;  %v5797_v55 = vld [vmem:[%s8874_s10 + $0x3d8] sm:$0xf0]  ;;  %v4944_v46 = vor.u32 %v5753_v33, %v4941_v34  ;;  %v5792_v34 = vld [vmem:[%s8874_s10 + $0x3b4] sm:$0xf] }
 0x352   :  { %v5088_v4 = vor.u32 %v5797_v55, %v5087_v47  ;;  %3335 = vmatpush.bf16.msra.mxu1 %v5144_v40  ;;  %v4835_v47 = vld [vmem:[%s8874_s10 + $0x1a8] sm:$0xf]  ;;  %v5733_v55 = vld [vmem:[%s8874_s10 + $0x1d8] sm:$0xf0]  ;;  %v5100_v41 = vor.u32 %v5792_v34, %v5097_v38 }
 0x353   :  { %v5887_v59 = vpop.eup %5886  ;;  %v1835_v60 = vmul.f32 1.442695, %v1832_v58  ;;  %v4889_v58 = vld [vmem:[%s8874_s10 + $0x244] sm:$0xf0]  ;;  %v5837_v40 = vld [vmem:[%s8874_s10 + $0x518] sm:$0xf0]  ;;  %v4836_v2 = vor.u32 %v5733_v55, %v4835_v47 }
 0x354   :  { %v1837_v63 = vmul.f32 %v5887_v59, %v7384_v36  ;;  %v4619_v36 = vld [vmem:[%s8874_s10] sm:$0xf]  ;;  %3308 = vmatpush.bf16.msrb.mxu3 %v5088_v4  ;;  %v4892_v57 = vor.u32 %v5740_v53, %v4889_v58  ;;  %v4840_v4 = vor.u32 %v5727_v61, %v4837_v62  ;;  %v5779_v58 = vld [vmem:[%s8874_s10 + $0x34c] sm:$0xf]  ;;  %v4999_v62 = vld [vmem:[%s8874_s10 + $0x2e8] sm:$0xf] }
 0x355   :  { %5888 = vpow2.f32 %v1835_v60  ;;  %v4620_v12 = vor.u32 %v5680_v6, %v4619_v36  ;;  %v5308_v60 = vor.u32 %v5844_v56, %v5305_v35  ;;  %v4783_v36 = vld [vmem:[%s8874_s10 + $0x140] sm:$0xf]  ;;  %v5720_v6 = vld [vmem:[%s8874_s10 + $0x170] sm:$0xf0] }
 0x356   :  { %1839 = vst [vmem:[%s8875_s12] sm:$0xff] %v1837_v63  ;;  %3336 = vmatpush.bf16.msra.mxu1 %v5092_v7  ;;  %v5831_v63 = vld [vmem:[%s8874_s10 + $0x4ec] sm:$0xf]  ;;  %v4784_v7 = vor.u32 %v5720_v6, %v4783_v36  ;;  %v5045_v56 = vld [vmem:[%s8874_s10 + $0x37c] sm:$0xf0] }
 0x357   :  { %3295 = vmatpush.bf16.msrb.mxu2 %v4620_v12  ;;  %v5256_v5 = vor.u32 %v5831_v63, %v5253_v0  ;;  %v5201_v12 = vld [vmem:[%s8874_s10 + $0x4b4] sm:$0xf0]  ;;  %v5048_v35 = vor.u32 %v5779_v58, %v5045_v56  ;;  %v5001_v36 = vld [vmem:[%s8874_s10 + $0x31c] sm:$0xf0]  ;;  %v5871_v6 = vld [vmem:[%s8874_s10 + $0x62c] sm:$0xf] }
 0x358   :  { %3309 = vmatpush.bf16.msrb.mxu3 %v5036_v20  ;;  %v5204_v14 = vor.u32 %v5818_v11, %v5201_v12  ;;  %v5701_v20 = vld [vmem:[%s8874_s10 + $0xdc] sm:$0xf] }
 0x359   :  { %v4736_v24 = vor.u32 %v5701_v20, %v4733_v21  ;;  %v5754_v20 = vld [vmem:[%s8874_s10 + $0x284] sm:$0xf]  ;;  %v4949_v21 = vld [vmem:[%s8874_s10 + $0x2b4] sm:$0xf0] }
 0x35a   :  { %3337 = vmatpush.bf16.msra.mxu1 %v5040_v27 }
 0x35b   :  { %v5889_v19 = vpop.eup %5888  ;;  %3344 = vmatpush.bf16.msra.mxu2 %v4992_v28  ;;  %v4679_v28 = vld [vmem:[%s8874_s10 + $0x70] sm:$0xf] }
 0x35c   :  { %v1838_v25 = vmul.f32 %v5889_v19, %v7387_v22  ;;  %v1841_v26 = vpack.c.bf16 %v5889_v19, %v5887_v59  ;;  %v5863_v22 = vld [vmem:[%s8874_s10 + $0x5e8] sm:$0xf0]  ;;  %3358 = vmatpush.bf16.msra.mxu3 %v5408_v39  ;;  %v5251_v59 = vld [vmem:[%s8874_s10 + $0x4e8] sm:$0xf]  ;;  %v5095_v39 = vld [vmem:[%s8874_s10 + $0x3b0] sm:$0xf] }
 0x35d   :  { %v5356_v45 = vor.u32 %v5863_v22, %v5355_v43  ;;  %v5252_v3 = vor.u32 %v5837_v40, %v5251_v59  ;;  %v5811_v19 = vld [vmem:[%s8874_s10 + $0x448] sm:$0xf0]  ;;  %v5688_v43 = vld [vmem:[%s8874_s10 + $0x74] sm:$0xf]  ;;  %v4681_v22 = vld [vmem:[%s8874_s10 + $0xa4] sm:$0xf0] }
 0x35e   :  { %1840 = vst [vmem:[%s8875_s12 + $0x8] sm:$0xff] %v1838_v25  ;;  %1952 = vmatmul.bf16.vlgmr.msrb.gmra.mxu0 %v1841_v26  ;;  %1966 = vmatmul.bf16.vlgmr.msrb.gmra.mxu1 %v1841_v26  ;;  %v5148_v23 = vor.u32 %v5811_v19, %v5147_v16  ;;  %v5805_v25 = vld [vmem:[%s8874_s10 + $0x41c] sm:$0xf]  ;;  %v5149_v26 = vld [vmem:[%s8874_s10 + $0x44c] sm:$0xf0]  ;;  %v4684_v33 = vor.u32 %v5688_v43, %v4681_v22 }
 0x35f   :  { %3372 = vmatpush.bf16.msrb.mxu0 %v4996_v30  ;;  %3386 = vmatpush.bf16.msrb.mxu1 %v5412_v32  ;;  %v5152_v27 = vor.u32 %v5805_v25, %v5149_v26  ;;  %v4680_v30 = vor.u32 %v5694_v29, %v4679_v28  ;;  %v5096_v32 = vor.u32 %v5798_v44, %v5095_v39  ;;  %v5864_v19 = vld [vmem:[%s8874_s10 + $0x5f0] sm:$0xf0]  ;;  %v5747_v28 = vld [vmem:[%s8874_s10 + $0x248] sm:$0xf0]  ;;  %v5741_v43 = vld [vmem:[%s8874_s10 + $0x21c] sm:$0xf] }
 0x360   :  { %3345 = vmatpush.bf16.msra.mxu2 %v4940_v42  ;;  %3359 = vmatpush.bf16.msra.mxu3 %v5356_v45  ;;  %v4627_v42 = vld [vmem:[%s8874_s10 + $0x8] sm:$0xf]  ;;  %v5681_v45 = vld [vmem:[%s8874_s10 + $0x38] sm:$0xf0]  ;;  %v4952_v29 = vor.u32 %v5754_v20, %v4949_v21  ;;  %v5851_v44 = vld [vmem:[%s8874_s10 + $0x588] sm:$0xf0] }
 0x361   :  { %v4628_v48 = vor.u32 %v5681_v45, %v4627_v42  ;;  %v4897_v22 = vld [vmem:[%s8874_s10 + $0x24c] sm:$0xf0]  ;;  %v5734_v42 = vld [vmem:[%s8874_s10 + $0x1e0] sm:$0xf0]  ;;  %v5793_v20 = vld [vmem:[%s8874_s10 + $0x3bc] sm:$0xf] }
 0x362   :  { %v4900_v45 = vor.u32 %v5741_v43, %v4897_v22  ;;  %v5105_v21 = vld [vmem:[%s8874_s10 + $0x3ec] sm:$0xf0]  ;;  %v5780_v43 = vld [vmem:[%s8874_s10 + $0x354] sm:$0xf]  ;;  %v5053_v22 = vld [vmem:[%s8874_s10 + $0x384] sm:$0xf0] }
 0x363   :  { %3373 = vmatpush.bf16.msrb.mxu0 %v4944_v46  ;;  %3387 = vmatpush.bf16.msrb.mxu1 %v5360_v51  ;;  %v5043_v46 = vld [vmem:[%s8874_s10 + $0x348] sm:$0xf]  ;;  %v4629_v51 = vld [vmem:[%s8874_s10 + $0x3c] sm:$0xf0] }
 0x364   :  { %3346 = vmatpush.bf16.msra.mxu2 %v4888_v10  ;;  %3360 = vmatpush.bf16.msra.mxu3 %v5304_v1  ;;  %v5044_v52 = vor.u32 %v5785_v49, %v5043_v46  ;;  %v4632_v53 = vor.u32 %v5675_v50, %v4629_v51  ;;  %v1858_v10 = vld [vmem:[%s8876_s9] sm:$0x3]  ;;  %v5838_v49 = vld [vmem:[%s8874_s10 + $0x520] sm:$0xf0]  ;;  %v5728_v50 = vld [vmem:[%s8874_s10 + $0x1b4] sm:$0xf] }
 0x365   :  { %v1860_v47 = vperm.slane %v1858_v10, 0  ;;  %v1861_v55 = vperm.slane %v1858_v10, 1  ;;  %v4845_v51 = vld [vmem:[%s8874_s10 + $0x1e4] sm:$0xf0]  ;;  %v5721_v10 = vld [vmem:[%s8874_s10 + $0x178] sm:$0xf0] }
 0x367   :  { %3374 = vmatpush.bf16.msrb.mxu0 %v4892_v57  ;;  %3388 = vmatpush.bf16.msrb.mxu1 %v5308_v60 }
 0x368   :  { %3347 = vmatpush.bf16.msra.mxu2 %v4836_v2  ;;  %3361 = vmatpush.bf16.msra.mxu3 %v5252_v3  ;;  %v5773_v2 = vld [vmem:[%s8874_s10 + $0x318] sm:$0xf0]  ;;  %v5415_v3 = vld [vmem:[%s8874_s10 + $0x628] sm:$0xf] }
 0x369   :  { %v5000_v12 = vor.u32 %v5773_v2, %v4999_v62  ;;  %v5708_v2 = vld [vmem:[%s8874_s10 + $0x110] sm:$0xf0] }
 0x36b   :  { %3375 = vmatpush.bf16.msrb.mxu0 %v4840_v4  ;;  %3389 = vmatpush.bf16.msrb.mxu1 %v5256_v5  ;;  %v5877_v4 = vld [vmem:[%s8874_s10 + $0x658] sm:$0xf0]  ;;  %v5767_v5 = vld [vmem:[%s8874_s10 + $0x2ec] sm:$0xf] }
 0x36c   :  { %3348 = vmatpush.bf16.msra.mxu2 %v4784_v7  ;;  %3362 = vmatpush.bf16.msra.mxu3 %v5200_v31  ;;  %v5417_v31 = vld [vmem:[%s8874_s10 + $0x65c] sm:$0xf0]  ;;  %v5004_v17 = vor.u32 %v5767_v5, %v5001_v36  ;;  %v5812_v36 = vld [vmem:[%s8874_s10 + $0x450] sm:$0xf0] }
 0x36d   :  { %v5420_v16 = vor.u32 %v5871_v6, %v5417_v31  ;;  %v5155_v5 = vld [vmem:[%s8874_s10 + $0x420] sm:$0xf]  ;;  %v5702_v6 = vld [vmem:[%s8874_s10 + $0xe4] sm:$0xf] }
 0x36e   :  { %v5156_v31 = vor.u32 %v5812_v36, %v5155_v5  ;;  %v5742_v5 = vld [vmem:[%s8874_s10 + $0x224] sm:$0xf]  ;;  %v4905_v36 = vld [vmem:[%s8874_s10 + $0x254] sm:$0xf0] }
 0x36f   :  { %3376 = vmatpush.bf16.msrb.mxu0 %v4788_v13  ;;  %3390 = vmatpush.bf16.msrb.mxu1 %v5204_v14  ;;  %v5416_v13 = vor.u32 %v5877_v4, %v5415_v3  ;;  %v4947_v14 = vld [vmem:[%s8874_s10 + $0x280] sm:$0xf] }
 0x370   :  { %3349 = vmatpush.bf16.msra.mxu2 %v4732_v18  ;;  %3363 = vmatpush.bf16.msra.mxu3 %v5148_v23  ;;  %v5363_v18 = vld [vmem:[%s8874_s10 + $0x5c0] sm:$0xf]  ;;  %v5858_v23 = vld [vmem:[%s8874_s10 + $0x5c4] sm:$0xf]  ;;  %v4948_v25 = vor.u32 %v5760_v15, %v4947_v14 }
 0x371   :  { %v5364_v26 = vor.u32 %v5864_v19, %v5363_v18  ;;  %v5689_v18 = vld [vmem:[%s8874_s10 + $0x7c] sm:$0xf]  ;;  %v4689_v19 = vld [vmem:[%s8874_s10 + $0xac] sm:$0xf0] }
 0x373   :  { %3377 = vmatpush.bf16.msrb.mxu0 %v4736_v24  ;;  %3391 = vmatpush.bf16.msrb.mxu1 %v5152_v27  ;;  %v5365_v24 = vld [vmem:[%s8874_s10 + $0x5f4] sm:$0xf0] }
 0x374   :  { %3350 = vmatpush.bf16.msra.mxu2 %v4680_v30  ;;  %3364 = vmatpush.bf16.msra.mxu3 %v5096_v32  ;;  %v4895_v27 = vld [vmem:[%s8874_s10 + $0x218] sm:$0xf]  ;;  %v5368_v39 = vor.u32 %v5858_v23, %v5365_v24  ;;  %v5845_v32 = vld [vmem:[%s8874_s10 + $0x55c] sm:$0xf]  ;;  %v4635_v23 = vld [vmem:[%s8874_s10 + $0x10] sm:$0xf] }
 0x375   :  { %v5311_v30 = vld [vmem:[%s8874_s10 + $0x558] sm:$0xf]  ;;  %v4896_v34 = vor.u32 %v5747_v28, %v4895_v27  ;;  %v5051_v27 = vld [vmem:[%s8874_s10 + $0x350] sm:$0xf]  ;;  %v5786_v28 = vld [vmem:[%s8874_s10 + $0x380] sm:$0xf0] }
 0x376   :  { %v5312_v38 = vor.u32 %v5851_v44, %v5311_v30  ;;  %v5676_v30 = vld [vmem:[%s8874_s10 + $0x14] sm:$0xf]  ;;  %v4637_v44 = vld [vmem:[%s8874_s10 + $0x44] sm:$0xf0] }
 0x377   :  { %3378 = vmatpush.bf16.msrb.mxu0 %v4684_v33  ;;  %3392 = vmatpush.bf16.msrb.mxu1 %v5100_v41  ;;  %v5313_v33 = vld [vmem:[%s8874_s10 + $0x58c] sm:$0xf0] }
 0x378   :  { %3351 = vmatpush.bf16.msra.mxu2 %v4628_v48  ;;  %3365 = vmatpush.bf16.msra.mxu3 %v5044_v52  ;;  %v4843_v41 = vld [vmem:[%s8874_s10 + $0x1b0] sm:$0xf]  ;;  %v5316_v46 = vor.u32 %v5845_v32, %v5313_v33  ;;  %v5832_v52 = vld [vmem:[%s8874_s10 + $0x4f4] sm:$0xf]  ;;  %v5774_v33 = vld [vmem:[%s8874_s10 + $0x320] sm:$0xf0] }
 0x379   :  { %v5259_v48 = vld [vmem:[%s8874_s10 + $0x4f0] sm:$0xf]  ;;  %v4844_v58 = vor.u32 %v5734_v42, %v4843_v41  ;;  %v5768_v41 = vld [vmem:[%s8874_s10 + $0x2f4] sm:$0xf] }
 0x37a   :  { %v5260_v56 = vor.u32 %v5838_v49, %v5259_v48  ;;  %v5007_v32 = vld [vmem:[%s8874_s10 + $0x2f0] sm:$0xf]  ;;  %v5872_v48 = vld [vmem:[%s8874_s10 + $0x634] sm:$0xf]  ;;  %v5425_v49 = vld [vmem:[%s8874_s10 + $0x664] sm:$0xf0] }
 0x37b   :  { %3379 = vmatpush.bf16.msrb.mxu0 %v4632_v53  ;;  %3393 = vmatpush.bf16.msrb.mxu1 %v5048_v35  ;;  %v5261_v53 = vld [vmem:[%s8874_s10 + $0x524] sm:$0xf0] }
 0x37c   :  { %v4791_v35 = vld [vmem:[%s8874_s10 + $0x148] sm:$0xf] }
 0x37d   :  { %v4792_v62 = vor.u32 %v5721_v10, %v4791_v35  ;;  %v5428_v10 = vor.u32 %v5872_v48, %v5425_v49  ;;  %v5807_v48 = vld [vmem:[%s8874_s10 + $0x42c] sm:$0xf]  ;;  %v5165_v49 = vld [vmem:[%s8874_s10 + $0x45c] sm:$0xf0] }
 0x3db   :  { %v1953_v1 = vpop.f32.mrf.mxu0  ;;  %v1967_v57 = vpop.f32.mrf.mxu1 }
 0x3dc   :  { %v1954_v59 = vadd.f32 %v1953_v1, %v1860_v47  ;;  %v1968_v60 = vadd.f32 %v1967_v57, %v1861_v55  ;;  %v4848_v1 = vor.u32 %v5728_v50, %v4845_v51  ;;  %v5264_v57 = vor.u32 %v5832_v52, %v5261_v53 }
 0x3dd   :  { %v4640_v50 = vor.u32 %v5676_v30, %v4637_v44  ;;  %v5056_v51 = vor.u32 %v5780_v43, %v5053_v22  ;;  %v5008_v52 = vor.u32 %v5774_v33, %v5007_v32  ;;  %v5820_v30 = vld [vmem:[%s8874_s10 + $0x494] sm:$0xf]  ;;  %v5217_v44 = vld [vmem:[%s8874_s10 + $0x4c4] sm:$0xf0]  ;;  %v5709_v33 = vld [vmem:[%s8874_s10 + $0x118] sm:$0xf0] }
 0x3de   :  { %v1972_v7 = vmax.f32 %v1954_v59, 0.0  ;;  %v1973_v8 = vmax.f32 %v1968_v60, 0.0  ;;  %v5715_v59 = vld [vmem:[%s8874_s10 + $0x14c] sm:$0xf]  ;;  %v4793_v60 = vld [vmem:[%s8874_s10 + $0x17c] sm:$0xf0] }
 0x3df   :  { %v4796_v3 = vor.u32 %v5715_v59, %v4793_v60  ;;  %v5859_v59 = vld [vmem:[%s8874_s10 + $0x5cc] sm:$0xf]  ;;  %v5373_v60 = vld [vmem:[%s8874_s10 + $0x5fc] sm:$0xf0]  ;;  %v4747_v32 = vld [vmem:[%s8874_s10 + $0xe8] sm:$0xf] }
 0x3e3   :  { %v1955_v40 = vpop.f32.mrf.mxu0  ;;  %v1969_v61 = vpop.f32.mrf.mxu1 }
 0x3e4   :  { %v1956_v63 = vadd.f32 %v1955_v40, %v1860_v47  ;;  %v1970_v0 = vadd.f32 %v1969_v61, %v1861_v55  ;;  %v5207_v47 = vld [vmem:[%s8874_s10 + $0x488] sm:$0xf]  ;;  %v5825_v55 = vld [vmem:[%s8874_s10 + $0x4b8] sm:$0xf0]  ;;  %v5819_v40 = vld [vmem:[%s8874_s10 + $0x48c] sm:$0xf] }
 0x3e5   :  { %v5209_v61 = vld [vmem:[%s8874_s10 + $0x4bc] sm:$0xf0] }
 0x3e6   :  { %v1974_v54 = vmax.f32 %v1956_v63, 0.0  ;;  %v1975_v37 = vmax.f32 %v1970_v0, 0.0  ;;  %v5208_v63 = vor.u32 %v5825_v55, %v5207_v47  ;;  %v4739_v0 = vld [vmem:[%s8874_s10 + $0xe0] sm:$0xf]  ;;  %v5212_v4 = vor.u32 %v5819_v40, %v5209_v61  ;;  %v5755_v47 = vld [vmem:[%s8874_s10 + $0x28c] sm:$0xf] }
 0x3e7   :  { %v4957_v55 = vld [vmem:[%s8874_s10 + $0x2bc] sm:$0xf0] }
 0x3e8   :  { %v7930_v9 = vpack.c.bf16 %v1974_v54, %v1972_v7  ;;  %v7932_v11 = vpack.c.bf16 %v1975_v37, %v1973_v8  ;;  %v4741_v7 = vld [vmem:[%s8874_s10 + $0x114] sm:$0xf0]  ;;  %v5806_v8 = vld [vmem:[%s8874_s10 + $0x424] sm:$0xf]  ;;  %v4740_v37 = vor.u32 %v5708_v2, %v4739_v0  ;;  %v4960_v0 = vor.u32 %v5755_v47, %v4957_v55 }
 0x3e9   :  { %v5157_v54 = vld [vmem:[%s8874_s10 + $0x454] sm:$0xf0]  ;;  %v4744_v14 = vor.u32 %v5702_v6, %v4741_v7  ;;  %v5376_v2 = vor.u32 %v5859_v59, %v5373_v60  ;;  %v5846_v6 = vld [vmem:[%s8874_s10 + $0x564] sm:$0xf] }
 0x3ea   :  { %3296 = vmatmul.bf16.vlgmr.msrb.gmra.mxu2 %v7930_v9  ;;  %3310 = vmatmul.bf16.vlgmr.msrb.gmra.mxu3 %v7932_v11  ;;  %v5160_v15 = vor.u32 %v5806_v8, %v5157_v54  ;;  %v5321_v7 = vld [vmem:[%s8874_s10 + $0x594] sm:$0xf0]  ;;  %v5794_v47 = vld [vmem:[%s8874_s10 + $0x3c4] sm:$0xf] }
 0x3eb   :  { %3324 = vmatmul.bf16.vlgmr.msra.gmra.mxu0 %v7930_v9  ;;  %3338 = vmatmul.bf16.vlgmr.msra.gmra.mxu1 %v7932_v11  ;;  %v5113_v55 = vld [vmem:[%s8874_s10 + $0x3f4] sm:$0xf0] }
 0x3ec   :  { %3400 = vmatpush.bf16.msrb.mxu2 %v5000_v12  ;;  %3414 = vmatpush.bf16.msrb.mxu3 %v5416_v13  ;;  %v4687_v12 = vld [vmem:[%s8874_s10 + $0x78] sm:$0xf]  ;;  %v5695_v13 = vld [vmem:[%s8874_s10 + $0xa8] sm:$0xf0] }
 0x3ed   :  { %3428 = vmatpush.bf16.msra.mxu0 %v5004_v17  ;;  %3442 = vmatpush.bf16.msra.mxu1 %v5420_v16  ;;  %v5103_v17 = vld [vmem:[%s8874_s10 + $0x3b8] sm:$0xf]  ;;  %v5799_v16 = vld [vmem:[%s8874_s10 + $0x3e8] sm:$0xf0]  ;;  %v4688_v24 = vor.u32 %v5695_v13, %v4687_v12  ;;  %v4908_v12 = vor.u32 %v5742_v5, %v4905_v36  ;;  %v5324_v13 = vor.u32 %v5846_v6, %v5321_v7  ;;  %v5781_v5 = vld [vmem:[%s8874_s10 + $0x35c] sm:$0xf] }
 0x3ee   :  { %v4643_v59 = vld [vmem:[%s8874_s10 + $0x18] sm:$0xf]  ;;  %v5061_v36 = vld [vmem:[%s8874_s10 + $0x38c] sm:$0xf0]  ;;  %v5775_v7 = vld [vmem:[%s8874_s10 + $0x328] sm:$0xf0] }
 0x3ef   :  { %v5015_v6 = vld [vmem:[%s8874_s10 + $0x2f8] sm:$0xf] }
 0x3f0   :  { %3401 = vmatpush.bf16.msrb.mxu2 %v4948_v25  ;;  %3415 = vmatpush.bf16.msrb.mxu3 %v5364_v26  ;;  %v5104_v25 = vor.u32 %v5799_v16, %v5103_v17  ;;  %v5682_v26 = vld [vmem:[%s8874_s10 + $0x40] sm:$0xf0]  ;;  %v5729_v17 = vld [vmem:[%s8874_s10 + $0x1bc] sm:$0xf]  ;;  %v4853_v16 = vld [vmem:[%s8874_s10 + $0x1ec] sm:$0xf0] }
 0x3f1   :  { %3429 = vmatpush.bf16.msra.mxu0 %v4952_v29  ;;  %3443 = vmatpush.bf16.msra.mxu1 %v5368_v39  ;;  %v4692_v29 = vor.u32 %v5689_v18, %v4689_v19  ;;  %v5108_v39 = vor.u32 %v5793_v20, %v5105_v21  ;;  %v4636_v42 = vor.u32 %v5682_v26, %v4635_v23  ;;  %v5833_v18 = vld [vmem:[%s8874_s10 + $0x4fc] sm:$0xf]  ;;  %v5269_v19 = vld [vmem:[%s8874_s10 + $0x52c] sm:$0xf0] }
 0x3f2   :  { %v4799_v23 = vld [vmem:[%s8874_s10 + $0x150] sm:$0xf]  ;;  %v5272_v26 = vor.u32 %v5833_v18, %v5269_v19  ;;  %v5016_v18 = vor.u32 %v5775_v7, %v5015_v6  ;;  %v5710_v7 = vld [vmem:[%s8874_s10 + $0x120] sm:$0xf0] }
 0x3f3   :  { %v4755_v6 = vld [vmem:[%s8874_s10 + $0xf0] sm:$0xf] }
 0x3f4   :  { %3402 = vmatpush.bf16.msrb.mxu2 %v4896_v34  ;;  %3416 = vmatpush.bf16.msrb.mxu3 %v5312_v38  ;;  %v5423_v34 = vld [vmem:[%s8874_s10 + $0x630] sm:$0xf]  ;;  %v5878_v38 = vld [vmem:[%s8874_s10 + $0x660] sm:$0xf0] }
 0x3f5   :  { %3430 = vmatpush.bf16.msra.mxu0 %v4900_v45  ;;  %3444 = vmatpush.bf16.msra.mxu1 %v5316_v46  ;;  %v5052_v45 = vor.u32 %v5786_v28, %v5051_v27  ;;  %v5009_v46 = vld [vmem:[%s8874_s10 + $0x324] sm:$0xf0]  ;;  %v5424_v53 = vor.u32 %v5878_v38, %v5423_v34  ;;  %v5215_v27 = vld [vmem:[%s8874_s10 + $0x490] sm:$0xf]  ;;  %v5826_v28 = vld [vmem:[%s8874_s10 + $0x4c0] sm:$0xf0]  ;;  %v5220_v38 = vor.u32 %v5820_v30, %v5217_v44 }
 0x3f6   :  { %v5012_v35 = vor.u32 %v5768_v41, %v5009_v46  ;;  %v5216_v22 = vor.u32 %v5826_v28, %v5215_v27  ;;  %v5163_v41 = vld [vmem:[%s8874_s10 + $0x428] sm:$0xf]  ;;  %v4749_v46 = vld [vmem:[%s8874_s10 + $0x11c] sm:$0xf0]  ;;  %v5756_v27 = vld [vmem:[%s8874_s10 + $0x294] sm:$0xf] }
 0x3f7   :  { %v4965_v28 = vld [vmem:[%s8874_s10 + $0x2c4] sm:$0xf0] }
 0x3f8   :  { %3403 = vmatpush.bf16.msrb.mxu2 %v4844_v58  ;;  %3417 = vmatpush.bf16.msrb.mxu3 %v5260_v56  ;;  %v4955_v58 = vld [vmem:[%s8874_s10 + $0x288] sm:$0xf]  ;;  %v5761_v56 = vld [vmem:[%s8874_s10 + $0x2b8] sm:$0xf0] }
 0x3f9   :  { %3431 = vmatpush.bf16.msra.mxu0 %v4848_v1  ;;  %3445 = vmatpush.bf16.msra.mxu1 %v5264_v57  ;;  %v5371_v1 = vld [vmem:[%s8874_s10 + $0x5c8] sm:$0xf]  ;;  %v5865_v57 = vld [vmem:[%s8874_s10 + $0x5f8] sm:$0xf0]  ;;  %v4956_v40 = vor.u32 %v5761_v56, %v4955_v58  ;;  %v5168_v56 = vor.u32 %v5807_v48, %v5165_v49 }
 0x3fa   :  { %3352 = vmatmul.bf16.vlgmr.msra.gmra.mxu2 %v7930_v9  ;;  %3366 = vmatmul.bf16.vlgmr.msra.gmra.mxu3 %v7932_v11  ;;  %v5372_v61 = vor.u32 %v5865_v57, %v5371_v1  ;;  %v5690_v1 = vld [vmem:[%s8874_s10 + $0x84] sm:$0xf]  ;;  %v4697_v57 = vld [vmem:[%s8874_s10 + $0xb4] sm:$0xf0] }
 0x3fb   :  { %3380 = vmatmul.bf16.vlgmr.msrb.gmra.mxu0 %v7930_v9  ;;  %3394 = vmatmul.bf16.vlgmr.msrb.gmra.mxu1 %v7932_v11 }
 0x3fc   :  { %3404 = vmatpush.bf16.msrb.mxu2 %v4792_v62  ;;  %3418 = vmatpush.bf16.msrb.mxu3 %v5208_v63  ;;  %v4903_v62 = vld [vmem:[%s8874_s10 + $0x220] sm:$0xf]  ;;  %v5748_v63 = vld [vmem:[%s8874_s10 + $0x250] sm:$0xf0] }
 0x3fd   :  { %3432 = vmatpush.bf16.msra.mxu0 %v4796_v3  ;;  %3446 = vmatpush.bf16.msra.mxu1 %v5212_v4  ;;  %v5319_v3 = vld [vmem:[%s8874_s10 + $0x560] sm:$0xf]  ;;  %v5852_v4 = vld [vmem:[%s8874_s10 + $0x590] sm:$0xf0]  ;;  %v4904_v8 = vor.u32 %v5748_v63, %v4903_v62  ;;  %v5059_v62 = vld [vmem:[%s8874_s10 + $0x358] sm:$0xf] }
 0x3fe   :  { %v5320_v54 = vor.u32 %v5852_v4, %v5319_v3  ;;  %v5787_v63 = vld [vmem:[%s8874_s10 + $0x388] sm:$0xf0]  ;;  %v5677_v3 = vld [vmem:[%s8874_s10 + $0x1c] sm:$0xf]  ;;  %v4645_v4 = vld [vmem:[%s8874_s10 + $0x4c] sm:$0xf0] }
 0x400   :  { %3405 = vmatpush.bf16.msrb.mxu2 %v4740_v37  ;;  %3419 = vmatpush.bf16.msrb.mxu3 %v5156_v31  ;;  %v4851_v37 = vld [vmem:[%s8874_s10 + $0x1b8] sm:$0xf]  ;;  %v5735_v31 = vld [vmem:[%s8874_s10 + $0x1e8] sm:$0xf0] }
 0x401   :  { %3433 = vmatpush.bf16.msra.mxu0 %v4744_v14  ;;  %3447 = vmatpush.bf16.msra.mxu1 %v5160_v15  ;;  %v5267_v14 = vld [vmem:[%s8874_s10 + $0x4f8] sm:$0xf]  ;;  %v5839_v15 = vld [vmem:[%s8874_s10 + $0x528] sm:$0xf0]  ;;  %v4852_v20 = vor.u32 %v5735_v31, %v4851_v37  ;;  %v5769_v37 = vld [vmem:[%s8874_s10 + $0x2fc] sm:$0xf] }
 0x402   :  { %v5268_v21 = vor.u32 %v5839_v15, %v5267_v14  ;;  %v5873_v14 = vld [vmem:[%s8874_s10 + $0x63c] sm:$0xf]  ;;  %v5433_v15 = vld [vmem:[%s8874_s10 + $0x66c] sm:$0xf0] }
 0x404   :  { %3406 = vmatpush.bf16.msrb.mxu2 %v4688_v24  ;;  %3420 = vmatpush.bf16.msrb.mxu3 %v5104_v25  ;;  %v5722_v24 = vld [vmem:[%s8874_s10 + $0x180] sm:$0xf0]  ;;  %v4856_v25 = vor.u32 %v5729_v17, %v4853_v16  ;;  %v4648_v17 = vor.u32 %v5677_v3, %v4645_v4  ;;  %v5064_v16 = vor.u32 %v5781_v5, %v5061_v36  ;;  %v5821_v3 = vld [vmem:[%s8874_s10 + $0x49c] sm:$0xf]  ;;  %v5225_v4 = vld [vmem:[%s8874_s10 + $0x4cc] sm:$0xf0] }
 0x405   :  { %3434 = vmatpush.bf16.msra.mxu0 %v4692_v29  ;;  %3448 = vmatpush.bf16.msra.mxu1 %v5108_v39  ;;  %v5716_v29 = vld [vmem:[%s8874_s10 + $0x154] sm:$0xf]  ;;  %v4801_v39 = vld [vmem:[%s8874_s10 + $0x184] sm:$0xf0]  ;;  %v4800_v43 = vor.u32 %v5722_v24, %v4799_v23  ;;  %v5436_v24 = vor.u32 %v5873_v14, %v5433_v15 }
 0x406   :  { %v4804_v34 = vor.u32 %v5716_v29, %v4801_v39  ;;  %v5860_v29 = vld [vmem:[%s8874_s10 + $0x5d4] sm:$0xf]  ;;  %v5381_v39 = vld [vmem:[%s8874_s10 + $0x604] sm:$0xf0] }
 0x407   :  { %v5808_v14 = vld [vmem:[%s8874_s10 + $0x434] sm:$0xf]  ;;  %v5173_v15 = vld [vmem:[%s8874_s10 + $0x464] sm:$0xf0] }
 0x408   :  { %3407 = vmatpush.bf16.msrb.mxu2 %v4636_v42  ;;  %3421 = vmatpush.bf16.msrb.mxu3 %v5052_v45  ;;  %v5813_v42 = vld [vmem:[%s8874_s10 + $0x458] sm:$0xf0]  ;;  %v5703_v45 = vld [vmem:[%s8874_s10 + $0xec] sm:$0xf] }
 0x409   :  { %3435 = vmatpush.bf16.msra.mxu0 %v4640_v50  ;;  %3449 = vmatpush.bf16.msra.mxu1 %v5056_v51  ;;  %v4748_v50 = vor.u32 %v5709_v33, %v4747_v32  ;;  %v5164_v51 = vor.u32 %v5813_v42, %v5163_v41  ;;  %v4752_v58 = vor.u32 %v5703_v45, %v4749_v46  ;;  %v5743_v41 = vld [vmem:[%s8874_s10 + $0x22c] sm:$0xf]  ;;  %v4913_v42 = vld [vmem:[%s8874_s10 + $0x25c] sm:$0xf0] }
 0x40a   :  { %v4968_v32 = vor.u32 %v5756_v27, %v4965_v28  ;;  %v5384_v33 = vor.u32 %v5860_v29, %v5381_v39  ;;  %v5847_v45 = vld [vmem:[%s8874_s10 + $0x56c] sm:$0xf]  ;;  %v5329_v46 = vld [vmem:[%s8874_s10 + $0x59c] sm:$0xf0] }
 0x40b   :  { %3408 = vmatmul.bf16.vlgmr.msrb.gmra.mxu2 %v7930_v9  ;;  %3422 = vmatmul.bf16.vlgmr.msrb.gmra.mxu3 %v7932_v11  ;;  %v5795_v27 = vld [vmem:[%s8874_s10 + $0x3cc] sm:$0xf]  ;;  %v5121_v28 = vld [vmem:[%s8874_s10 + $0x3fc] sm:$0xf0] }
 0x40c   :  { %3456 = vmatpush.bf16.msra.mxu2 %v5008_v52  ;;  %3470 = vmatpush.bf16.msra.mxu3 %v5424_v53  ;;  %v4695_v52 = vld [vmem:[%s8874_s10 + $0x80] sm:$0xf]  ;;  %v5696_v53 = vld [vmem:[%s8874_s10 + $0xb0] sm:$0xf0] }
 0x40d   :  { %3484 = vmatpush.bf16.msrb.mxu0 %v5012_v35  ;;  %3498 = vmatpush.bf16.msrb.mxu1 %v5428_v10  ;;  %v5111_v35 = vld [vmem:[%s8874_s10 + $0x3c0] sm:$0xf]  ;;  %v5800_v10 = vld [vmem:[%s8874_s10 + $0x3f0] sm:$0xf0]  ;;  %v4696_v60 = vor.u32 %v5696_v53, %v4695_v52  ;;  %v4916_v52 = vor.u32 %v5743_v41, %v4913_v42  ;;  %v5332_v53 = vor.u32 %v5847_v45, %v5329_v46  ;;  %v5782_v41 = vld [vmem:[%s8874_s10 + $0x364] sm:$0xf] }
 0x40e   :  { %3436 = vmatmul.bf16.vlgmr.msra.gmra.mxu0 %v7930_v9  ;;  %3450 = vmatmul.bf16.vlgmr.msra.gmra.mxu1 %v7932_v11  ;;  %v4651_v29 = vld [vmem:[%s8874_s10 + $0x20] sm:$0xf]  ;;  %v5069_v42 = vld [vmem:[%s8874_s10 + $0x394] sm:$0xf0]  ;;  %v5776_v46 = vld [vmem:[%s8874_s10 + $0x330] sm:$0xf0] }
 0x40f   :  { %v5023_v45 = vld [vmem:[%s8874_s10 + $0x300] sm:$0xf] }
 0x410   :  { %3457 = vmatpush.bf16.msra.mxu2 %v4956_v40  ;;  %3471 = vmatpush.bf16.msra.mxu3 %v5372_v61  ;;  %v5112_v40 = vor.u32 %v5800_v10, %v5111_v35  ;;  %v5683_v61 = vld [vmem:[%s8874_s10 + $0x48] sm:$0xf0]  ;;  %v5730_v35 = vld [vmem:[%s8874_s10 + $0x1c4] sm:$0xf]  ;;  %v4861_v10 = vld [vmem:[%s8874_s10 + $0x1f4] sm:$0xf0] }
 0x411   :  { %3485 = vmatpush.bf16.msrb.mxu0 %v4960_v0  ;;  %3499 = vmatpush.bf16.msrb.mxu1 %v5376_v2  ;;  %v4700_v0 = vor.u32 %v5690_v1, %v4697_v57  ;;  %v5116_v2 = vor.u32 %v5794_v47, %v5113_v55  ;;  %v4644_v31 = vor.u32 %v5683_v61, %v4643_v59  ;;  %v5834_v1 = vld [vmem:[%s8874_s10 + $0x504] sm:$0xf]  ;;  %v5277_v57 = vld [vmem:[%s8874_s10 + $0x534] sm:$0xf0] }
 0x412   :  { %v4807_v59 = vld [vmem:[%s8874_s10 + $0x158] sm:$0xf]  ;;  %v5280_v61 = vor.u32 %v5834_v1, %v5277_v57  ;;  %v5024_v1 = vor.u32 %v5776_v46, %v5023_v45  ;;  %v5711_v46 = vld [vmem:[%s8874_s10 + $0x128] sm:$0xf0] }
 0x413   :  { %v4763_v45 = vld [vmem:[%s8874_s10 + $0xf8] sm:$0xf] }
 0x414   :  { %3458 = vmatpush.bf16.msra.mxu2 %v4904_v8  ;;  %3472 = vmatpush.bf16.msra.mxu3 %v5320_v54  ;;  %v5431_v8 = vld [vmem:[%s8874_s10 + $0x638] sm:$0xf]  ;;  %v5879_v54 = vld [vmem:[%s8874_s10 + $0x668] sm:$0xf0] }
 0x415   :  { %3486 = vmatpush.bf16.msrb.mxu0 %v4908_v12  ;;  %3500 = vmatpush.bf16.msrb.mxu1 %v5324_v13  ;;  %v5060_v12 = vor.u32 %v5787_v63, %v5059_v62  ;;  %v5017_v13 = vld [vmem:[%s8874_s10 + $0x32c] sm:$0xf0]  ;;  %v5432_v19 = vor.u32 %v5879_v54, %v5431_v8  ;;  %v5223_v62 = vld [vmem:[%s8874_s10 + $0x498] sm:$0xf]  ;;  %v5827_v63 = vld [vmem:[%s8874_s10 + $0x4c8] sm:$0xf0]  ;;  %v5228_v54 = vor.u32 %v5821_v3, %v5225_v4 }
 0x416   :  { %v5020_v23 = vor.u32 %v5769_v37, %v5017_v13  ;;  %v5224_v36 = vor.u32 %v5827_v63, %v5223_v62  ;;  %v5171_v37 = vld [vmem:[%s8874_s10 + $0x430] sm:$0xf]  ;;  %v4757_v13 = vld [vmem:[%s8874_s10 + $0x124] sm:$0xf0]  ;;  %v5757_v62 = vld [vmem:[%s8874_s10 + $0x29c] sm:$0xf] }
 0x417   :  { %v4973_v63 = vld [vmem:[%s8874_s10 + $0x2cc] sm:$0xf0] }
 0x418   :  { %3459 = vmatpush.bf16.msra.mxu2 %v4852_v20  ;;  %3473 = vmatpush.bf16.msra.mxu3 %v5268_v21  ;;  %v4963_v20 = vld [vmem:[%s8874_s10 + $0x290] sm:$0xf]  ;;  %v5762_v21 = vld [vmem:[%s8874_s10 + $0x2c0] sm:$0xf0] }
 0x419   :  { %3487 = vmatpush.bf16.msrb.mxu0 %v4856_v25  ;;  %3501 = vmatpush.bf16.msrb.mxu1 %v5272_v26  ;;  %v5379_v25 = vld [vmem:[%s8874_s10 + $0x5d0] sm:$0xf]  ;;  %v5866_v26 = vld [vmem:[%s8874_s10 + $0x600] sm:$0xf0]  ;;  %v4964_v30 = vor.u32 %v5762_v21, %v4963_v20  ;;  %v5176_v21 = vor.u32 %v5808_v14, %v5173_v15 }
 0x41a   :  { %v5380_v44 = vor.u32 %v5866_v26, %v5379_v25  ;;  %v5691_v25 = vld [vmem:[%s8874_s10 + $0x8c] sm:$0xf]  ;;  %v4705_v26 = vld [vmem:[%s8874_s10 + $0xbc] sm:$0xf0] }
 0x41c   :  { %3460 = vmatpush.bf16.msra.mxu2 %v4800_v43  ;;  %3474 = vmatpush.bf16.msra.mxu3 %v5216_v22  ;;  %v4911_v43 = vld [vmem:[%s8874_s10 + $0x228] sm:$0xf]  ;;  %v5749_v22 = vld [vmem:[%s8874_s10 + $0x258] sm:$0xf0] }
 0x41d   :  { %3488 = vmatpush.bf16.msrb.mxu0 %v4804_v34  ;;  %3502 = vmatpush.bf16.msrb.mxu1 %v5220_v38  ;;  %v5327_v34 = vld [vmem:[%s8874_s10 + $0x568] sm:$0xf]  ;;  %v5853_v38 = vld [vmem:[%s8874_s10 + $0x598] sm:$0xf0]  ;;  %v4912_v48 = vor.u32 %v5749_v22, %v4911_v43  ;;  %v5067_v43 = vld [vmem:[%s8874_s10 + $0x360] sm:$0xf] }
 0x41e   :  { %v5328_v49 = vor.u32 %v5853_v38, %v5327_v34  ;;  %v5788_v22 = vld [vmem:[%s8874_s10 + $0x390] sm:$0xf0]  ;;  %v5678_v34 = vld [vmem:[%s8874_s10 + $0x24] sm:$0xf]  ;;  %v4653_v38 = vld [vmem:[%s8874_s10 + $0x54] sm:$0xf0] }
 0x420   :  { %3461 = vmatpush.bf16.msra.mxu2 %v4748_v50  ;;  %3475 = vmatpush.bf16.msra.mxu3 %v5164_v51  ;;  %v4859_v50 = vld [vmem:[%s8874_s10 + $0x1c0] sm:$0xf]  ;;  %v5736_v51 = vld [vmem:[%s8874_s10 + $0x1f0] sm:$0xf0] }
 0x421   :  { %3489 = vmatpush.bf16.msrb.mxu0 %v4752_v58  ;;  %3503 = vmatpush.bf16.msrb.mxu1 %v5168_v56  ;;  %v5275_v58 = vld [vmem:[%s8874_s10 + $0x500] sm:$0xf]  ;;  %v5840_v56 = vld [vmem:[%s8874_s10 + $0x530] sm:$0xf0]  ;;  %v4860_v47 = vor.u32 %v5736_v51, %v4859_v50  ;;  %v5770_v50 = vld [vmem:[%s8874_s10 + $0x304] sm:$0xf] }
 0x422   :  { %v5276_v55 = vor.u32 %v5840_v56, %v5275_v58  ;;  %v5874_v58 = vld [vmem:[%s8874_s10 + $0x644] sm:$0xf]  ;;  %v5441_v56 = vld [vmem:[%s8874_s10 + $0x674] sm:$0xf0] }
 0x424   :  { %3462 = vmatpush.bf16.msra.mxu2 %v4696_v60  ;;  %3476 = vmatpush.bf16.msra.mxu3 %v5112_v40  ;;  %v5723_v60 = vld [vmem:[%s8874_s10 + $0x188] sm:$0xf0]  ;;  %v4864_v40 = vor.u32 %v5730_v35, %v4861_v10  ;;  %v4656_v35 = vor.u32 %v5678_v34, %v4653_v38  ;;  %v5072_v10 = vor.u32 %v5782_v41, %v5069_v42  ;;  %v5822_v34 = vld [vmem:[%s8874_s10 + $0x4a4] sm:$0xf]  ;;  %v5233_v38 = vld [vmem:[%s8874_s10 + $0x4d4] sm:$0xf0] }
 0x425   :  { %3490 = vmatpush.bf16.msrb.mxu0 %v4700_v0  ;;  %3504 = vmatpush.bf16.msrb.mxu1 %v5116_v2  ;;  %v5717_v0 = vld [vmem:[%s8874_s10 + $0x15c] sm:$0xf]  ;;  %v4809_v2 = vld [vmem:[%s8874_s10 + $0x18c] sm:$0xf0]  ;;  %v4808_v5 = vor.u32 %v5723_v60, %v4807_v59  ;;  %v5444_v60 = vor.u32 %v5874_v58, %v5441_v56 }
 0x426   :  { %v4812_v8 = vor.u32 %v5717_v0, %v4809_v2  ;;  %v5861_v0 = vld [vmem:[%s8874_s10 + $0x5dc] sm:$0xf]  ;;  %v5389_v2 = vld [vmem:[%s8874_s10 + $0x60c] sm:$0xf0] }
 0x427   :  { %v5809_v58 = vld [vmem:[%s8874_s10 + $0x43c] sm:$0xf]  ;;  %v5181_v56 = vld [vmem:[%s8874_s10 + $0x46c] sm:$0xf0] }
 0x428   :  { %3463 = vmatpush.bf16.msra.mxu2 %v4644_v31  ;;  %3477 = vmatpush.bf16.msra.mxu3 %v5060_v12  ;;  %v5814_v31 = vld [vmem:[%s8874_s10 + $0x460] sm:$0xf0]  ;;  %v5704_v12 = vld [vmem:[%s8874_s10 + $0xf4] sm:$0xf] }
 0x429   :  { %3491 = vmatpush.bf16.msrb.mxu0 %v4648_v17  ;;  %3505 = vmatpush.bf16.msrb.mxu1 %v5064_v16  ;;  %v4756_v17 = vor.u32 %v5710_v7, %v4755_v6  ;;  %v5172_v16 = vor.u32 %v5814_v31, %v5171_v37  ;;  %v4760_v20 = vor.u32 %v5704_v12, %v4757_v13  ;;  %v5744_v37 = vld [vmem:[%s8874_s10 + $0x234] sm:$0xf]  ;;  %v4921_v31 = vld [vmem:[%s8874_s10 + $0x264] sm:$0xf0] }
 0x42a   :  { %v4976_v6 = vor.u32 %v5757_v62, %v4973_v63  ;;  %v5392_v7 = vor.u32 %v5861_v0, %v5389_v2  ;;  %v5848_v12 = vld [vmem:[%s8874_s10 + $0x574] sm:$0xf]  ;;  %v5337_v13 = vld [vmem:[%s8874_s10 + $0x5a4] sm:$0xf0] }
 0x42b   :  { %3464 = vmatmul.bf16.vlgmr.msra.gmra.mxu2 %v7930_v9  ;;  %3478 = vmatmul.bf16.vlgmr.msra.gmra.mxu3 %v7932_v11  ;;  %v5796_v62 = vld [vmem:[%s8874_s10 + $0x3d4] sm:$0xf]  ;;  %v5129_v63 = vld [vmem:[%s8874_s10 + $0x404] sm:$0xf0] }
 0x42c   :  { %3512 = vmatpush.bf16.msrb.mxu2 %v5016_v18  ;;  %3526 = vmatpush.bf16.msrb.mxu3 %v5432_v19  ;;  %v4703_v18 = vld [vmem:[%s8874_s10 + $0x88] sm:$0xf]  ;;  %v5697_v19 = vld [vmem:[%s8874_s10 + $0xb8] sm:$0xf0] }
 0x42d   :  { %3540 = vmatpush.bf16.msra.mxu0 %v5020_v23  ;;  %3554 = vmatpush.bf16.msra.mxu1 %v5436_v24  ;;  %v5119_v23 = vld [vmem:[%s8874_s10 + $0x3c8] sm:$0xf]  ;;  %v5801_v24 = vld [vmem:[%s8874_s10 + $0x3f8] sm:$0xf0]  ;;  %v4704_v39 = vor.u32 %v5697_v19, %v4703_v18  ;;  %v4924_v18 = vor.u32 %v5744_v37, %v4921_v31  ;;  %v5340_v19 = vor.u32 %v5848_v12, %v5337_v13  ;;  %v5783_v37 = vld [vmem:[%s8874_s10 + $0x36c] sm:$0xf] }
 0x42e   :  { %3492 = vmatmul.bf16.vlgmr.msrb.gmra.mxu0 %v7930_v9  ;;  %3506 = vmatmul.bf16.vlgmr.msrb.gmra.mxu1 %v7932_v11  ;;  %v5077_v31 = vld [vmem:[%s8874_s10 + $0x39c] sm:$0xf0]  ;;  %v5031_v12 = vld [vmem:[%s8874_s10 + $0x308] sm:$0xf]  ;;  %v5777_v13 = vld [vmem:[%s8874_s10 + $0x338] sm:$0xf0] }
 0x430   :  { %3513 = vmatpush.bf16.msrb.mxu2 %v4964_v30  ;;  %3527 = vmatpush.bf16.msrb.mxu3 %v5380_v44  ;;  %v5120_v30 = vor.u32 %v5801_v24, %v5119_v23  ;;  %v5684_v44 = vld [vmem:[%s8874_s10 + $0x50] sm:$0xf0]  ;;  %v5731_v23 = vld [vmem:[%s8874_s10 + $0x1cc] sm:$0xf]  ;;  %v4869_v24 = vld [vmem:[%s8874_s10 + $0x1fc] sm:$0xf0] }
 0x431   :  { %3541 = vmatpush.bf16.msra.mxu0 %v4968_v32  ;;  %3555 = vmatpush.bf16.msra.mxu1 %v5384_v33  ;;  %v4708_v32 = vor.u32 %v5691_v25, %v4705_v26  ;;  %v5124_v33 = vor.u32 %v5795_v27, %v5121_v28  ;;  %v4652_v51 = vor.u32 %v5684_v44, %v4651_v29  ;;  %v5835_v25 = vld [vmem:[%s8874_s10 + $0x50c] sm:$0xf]  ;;  %v5285_v26 = vld [vmem:[%s8874_s10 + $0x53c] sm:$0xf0] }
 0x432   :  { %v4815_v29 = vld [vmem:[%s8874_s10 + $0x160] sm:$0xf]  ;;  %v5288_v44 = vor.u32 %v5835_v25, %v5285_v26  ;;  %v5868_v26 = vld [vmem:[%s8874_s10 + $0x610] sm:$0xf0] }
 0x433   :  { %v5395_v25 = vld [vmem:[%s8874_s10 + $0x5e0] sm:$0xf] }
 0x434   :  { %3514 = vmatpush.bf16.msrb.mxu2 %v4912_v48  ;;  %3528 = vmatpush.bf16.msrb.mxu3 %v5328_v49  ;;  %v5439_v48 = vld [vmem:[%s8874_s10 + $0x640] sm:$0xf]  ;;  %v5880_v49 = vld [vmem:[%s8874_s10 + $0x670] sm:$0xf0] }
 0x435   :  { %3542 = vmatpush.bf16.msra.mxu0 %v4916_v52  ;;  %3556 = vmatpush.bf16.msra.mxu1 %v5332_v53  ;;  %v5068_v52 = vor.u32 %v5788_v22, %v5067_v43  ;;  %v5025_v53 = vld [vmem:[%s8874_s10 + $0x334] sm:$0xf0]  ;;  %v5440_v57 = vor.u32 %v5880_v49, %v5439_v48  ;;  %v5231_v43 = vld [vmem:[%s8874_s10 + $0x4a0] sm:$0xf]  ;;  %v5828_v22 = vld [vmem:[%s8874_s10 + $0x4d0] sm:$0xf0]  ;;  %v5236_v49 = vor.u32 %v5822_v34, %v5233_v38 }
 0x436   :  { %v5028_v59 = vor.u32 %v5770_v50, %v5025_v53  ;;  %v5232_v42 = vor.u32 %v5828_v22, %v5231_v43  ;;  %v5179_v50 = vld [vmem:[%s8874_s10 + $0x438] sm:$0xf]  ;;  %v4765_v53 = vld [vmem:[%s8874_s10 + $0x12c] sm:$0xf0]  ;;  %v5855_v43 = vld [vmem:[%s8874_s10 + $0x5a8] sm:$0xf0] }
 0x438   :  { %3515 = vmatpush.bf16.msrb.mxu2 %v4860_v47  ;;  %3529 = vmatpush.bf16.msrb.mxu3 %v5276_v55  ;;  %v4971_v47 = vld [vmem:[%s8874_s10 + $0x298] sm:$0xf]  ;;  %v5763_v55 = vld [vmem:[%s8874_s10 + $0x2c8] sm:$0xf0] }
 0x439   :  { %3543 = vmatpush.bf16.msra.mxu0 %v4864_v40  ;;  %3557 = vmatpush.bf16.msra.mxu1 %v5280_v61  ;;  %v5387_v40 = vld [vmem:[%s8874_s10 + $0x5d8] sm:$0xf]  ;;  %v5867_v61 = vld [vmem:[%s8874_s10 + $0x608] sm:$0xf0]  ;;  %v4972_v3 = vor.u32 %v5763_v55, %v4971_v47  ;;  %v5184_v55 = vor.u32 %v5809_v58, %v5181_v56  ;;  %v5725_v56 = vld [vmem:[%s8874_s10 + $0x198] sm:$0xf0] }
 0x43a   :  { %v5388_v4 = vor.u32 %v5867_v61, %v5387_v40  ;;  %v5692_v40 = vld [vmem:[%s8874_s10 + $0x94] sm:$0xf]  ;;  %v4713_v61 = vld [vmem:[%s8874_s10 + $0xc4] sm:$0xf0] }
 0x43c   :  { %3516 = vmatpush.bf16.msrb.mxu2 %v4808_v5  ;;  %3530 = vmatpush.bf16.msrb.mxu3 %v5224_v36  ;;  %v4919_v5 = vld [vmem:[%s8874_s10 + $0x230] sm:$0xf]  ;;  %v5750_v36 = vld [vmem:[%s8874_s10 + $0x260] sm:$0xf0] }
 0x43d   :  { %3544 = vmatpush.bf16.msra.mxu0 %v4812_v8  ;;  %3558 = vmatpush.bf16.msra.mxu1 %v5228_v54  ;;  %v5335_v8 = vld [vmem:[%s8874_s10 + $0x570] sm:$0xf]  ;;  %v5854_v54 = vld [vmem:[%s8874_s10 + $0x5a0] sm:$0xf0]  ;;  %v4920_v14 = vor.u32 %v5750_v36, %v4919_v5  ;;  %v5075_v5 = vld [vmem:[%s8874_s10 + $0x368] sm:$0xf]  ;;  %v4716_v36 = vor.u32 %v5692_v40, %v4713_v61 }
 0x43e   :  { %v5336_v15 = vor.u32 %v5854_v54, %v5335_v8  ;;  %v5679_v8 = vld [vmem:[%s8874_s10 + $0x2c] sm:$0xf]  ;;  %v4661_v54 = vld [vmem:[%s8874_s10 + $0x5c] sm:$0xf0] }
 0x43f   :  { %v4771_v61 = vld [vmem:[%s8874_s10 + $0x100] sm:$0xf] }
 0x440   :  { %3517 = vmatpush.bf16.msrb.mxu2 %v4756_v17  ;;  %3531 = vmatpush.bf16.msrb.mxu3 %v5172_v16  ;;  %v4867_v17 = vld [vmem:[%s8874_s10 + $0x1c8] sm:$0xf]  ;;  %v5737_v16 = vld [vmem:[%s8874_s10 + $0x1f8] sm:$0xf0] }
 0x441   :  { %3545 = vmatpush.bf16.msra.mxu0 %v4760_v20  ;;  %3559 = vmatpush.bf16.msra.mxu1 %v5176_v21  ;;  %v5283_v20 = vld [vmem:[%s8874_s10 + $0x508] sm:$0xf]  ;;  %v5841_v21 = vld [vmem:[%s8874_s10 + $0x538] sm:$0xf0]  ;;  %v4868_v27 = vor.u32 %v5737_v16, %v4867_v17 }
 0x442   :  { %v5284_v28 = vor.u32 %v5841_v21, %v5283_v20  ;;  %v5032_v20 = vor.u32 %v5777_v13, %v5031_v12  ;;  %v5803_v12 = vld [vmem:[%s8874_s10 + $0x408] sm:$0xf0] }
 0x444   :  { %3518 = vmatpush.bf16.msrb.mxu2 %v4704_v39  ;;  %3532 = vmatpush.bf16.msrb.mxu3 %v5120_v30  ;;  %v5724_v39 = vld [vmem:[%s8874_s10 + $0x190] sm:$0xf0]  ;;  %v4872_v30 = vor.u32 %v5731_v23, %v4869_v24  ;;  %v4979_v23 = vld [vmem:[%s8874_s10 + $0x2a0] sm:$0xf] }
 0x445   :  { %3546 = vmatpush.bf16.msra.mxu0 %v4708_v32  ;;  %3560 = vmatpush.bf16.msra.mxu1 %v5124_v33  ;;  %v5718_v32 = vld [vmem:[%s8874_s10 + $0x164] sm:$0xf]  ;;  %v4817_v33 = vld [vmem:[%s8874_s10 + $0x194] sm:$0xf0]  ;;  %v4816_v41 = vor.u32 %v5724_v39, %v4815_v29  ;;  %v5764_v24 = vld [vmem:[%s8874_s10 + $0x2d0] sm:$0xf0]  ;;  %v5396_v29 = vor.u32 %v5868_v26, %v5395_v25 }
 0x446   :  { %v4820_v48 = vor.u32 %v5718_v32, %v4817_v33  ;;  %v4927_v39 = vld [vmem:[%s8874_s10 + $0x238] sm:$0xf]  ;;  %v5790_v25 = vld [vmem:[%s8874_s10 + $0x3a0] sm:$0xf0] }
 0x448   :  { %3519 = vmatpush.bf16.msrb.mxu2 %v4652_v51  ;;  %3533 = vmatpush.bf16.msrb.mxu3 %v5068_v52  ;;  %v5815_v51 = vld [vmem:[%s8874_s10 + $0x468] sm:$0xf0]  ;;  %v5705_v52 = vld [vmem:[%s8874_s10 + $0xfc] sm:$0xf] }
 0x449   :  { %3547 = vmatpush.bf16.msra.mxu0 %v4656_v35  ;;  %3561 = vmatpush.bf16.msra.mxu1 %v5072_v10  ;;  %v4764_v35 = vor.u32 %v5711_v46, %v4763_v45  ;;  %v5180_v10 = vor.u32 %v5815_v51, %v5179_v50  ;;  %v4768_v47 = vor.u32 %v5705_v52, %v4765_v53  ;;  %v5291_v45 = vld [vmem:[%s8874_s10 + $0x510] sm:$0xf]  ;;  %v5842_v46 = vld [vmem:[%s8874_s10 + $0x540] sm:$0xf0]  ;;  %v4823_v52 = vld [vmem:[%s8874_s10 + $0x168] sm:$0xf] }
 0x44a   :  { %v5292_v51 = vor.u32 %v5842_v46, %v5291_v45 }
 0x44b   :  { %3520 = vmatmul.bf16.vlgmr.msrb.gmra.mxu2 %v7930_v9  ;;  %3534 = vmatmul.bf16.vlgmr.msrb.gmra.mxu3 %v7932_v11 }
 0x44c   :  { %3568 = vmatpush.bf16.msra.mxu2 %v5024_v1  ;;  %3582 = vmatpush.bf16.msra.mxu3 %v5440_v57  ;;  %v4711_v1 = vld [vmem:[%s8874_s10 + $0x90] sm:$0xf]  ;;  %v5698_v57 = vld [vmem:[%s8874_s10 + $0xc0] sm:$0xf0] }
 0x44d   :  { %3596 = vmatpush.bf16.msrb.mxu0 %v5028_v59  ;;  %3610 = vmatpush.bf16.msrb.mxu1 %v5444_v60  ;;  %v5127_v59 = vld [vmem:[%s8874_s10 + $0x3d0] sm:$0xf]  ;;  %v5802_v60 = vld [vmem:[%s8874_s10 + $0x400] sm:$0xf0]  ;;  %v4712_v0 = vor.u32 %v5698_v57, %v4711_v1 }
 0x44e   :  { %3548 = vmatmul.bf16.vlgmr.msra.gmra.mxu0 %v7930_v9  ;;  %3562 = vmatmul.bf16.vlgmr.msra.gmra.mxu1 %v7932_v11  ;;  %v5128_v2 = vor.u32 %v5802_v60, %v5127_v59 }
 0x450   :  { %3569 = vmatpush.bf16.msra.mxu2 %v4972_v3  ;;  %3583 = vmatpush.bf16.msra.mxu3 %v5388_v4  ;;  %v4659_v3 = vld [vmem:[%s8874_s10 + $0x28] sm:$0xf]  ;;  %v5685_v4 = vld [vmem:[%s8874_s10 + $0x58] sm:$0xf0] }
 0x451   :  { %3597 = vmatpush.bf16.msrb.mxu0 %v4976_v6  ;;  %3611 = vmatpush.bf16.msrb.mxu1 %v5392_v7  ;;  %v5132_v6 = vor.u32 %v5796_v62, %v5129_v63  ;;  %v5789_v7 = vld [vmem:[%s8874_s10 + $0x398] sm:$0xf0]  ;;  %v4660_v17 = vor.u32 %v5685_v4, %v4659_v3  ;;  %v5712_v62 = vld [vmem:[%s8874_s10 + $0x130] sm:$0xf0]  ;;  %v5187_v63 = vld [vmem:[%s8874_s10 + $0x440] sm:$0xf] }
 0x452   :  { %v5076_v16 = vor.u32 %v5789_v7, %v5075_v5  ;;  %v4719_v7 = vld [vmem:[%s8874_s10 + $0x98] sm:$0xf] }
 0x454   :  { %3570 = vmatpush.bf16.msra.mxu2 %v4920_v14  ;;  %3584 = vmatpush.bf16.msra.mxu3 %v5336_v15  ;;  %v5447_v14 = vld [vmem:[%s8874_s10 + $0x648] sm:$0xf]  ;;  %v5881_v15 = vld [vmem:[%s8874_s10 + $0x678] sm:$0xf0] }
 0x455   :  { %3598 = vmatpush.bf16.msrb.mxu0 %v4924_v18  ;;  %3612 = vmatpush.bf16.msrb.mxu1 %v5340_v19  ;;  %v4664_v18 = vor.u32 %v5679_v8, %v4661_v54  ;;  %v5080_v19 = vor.u32 %v5783_v37, %v5077_v31  ;;  %v5448_v21 = vor.u32 %v5881_v15, %v5447_v14  ;;  %v5699_v37 = vld [vmem:[%s8874_s10 + $0xc8] sm:$0xf0]  ;;  %v5135_v31 = vld [vmem:[%s8874_s10 + $0x3d8] sm:$0xf] }
 0x458   :  { %3571 = vmatpush.bf16.msra.mxu2 %v4868_v27  ;;  %3585 = vmatpush.bf16.msra.mxu3 %v5284_v28  ;;  %v8725_v27 = vld [vmem:[%s8877_s11] sm:$0xff]  ;;  %v4980_v28 = vor.u32 %v5764_v24, %v4979_v23  ;;  %v5083_v24 = vld [vmem:[%s8874_s10 + $0x370] sm:$0xf] }
 0x459   :  { %3599 = vmatpush.bf16.msrb.mxu0 %v4872_v30  ;;  %3613 = vmatpush.bf16.msrb.mxu1 %v5288_v44  ;;  %v5751_v30 = vld [vmem:[%s8874_s10 + $0x268] sm:$0xf0]  ;;  %v5343_v44 = vld [vmem:[%s8874_s10 + $0x578] sm:$0xf]  ;;  %v2207_v22 = vperm.slane %v8725_v27, 1  ;;  %v2209_v15 = vperm.slane %v8725_v27, 3 }
 0x45a   :  { %v4928_v32 = vor.u32 %v5751_v30, %v4927_v39  ;;  %v5344_v33 = vor.u32 %v5855_v43, %v5343_v44  ;;  %v5686_v23 = vld [vmem:[%s8874_s10 + $0x60] sm:$0xf0]  ;;  %v2208_v39 = vperm.slane %v8725_v27, 2  ;;  %v5084_v43 = vor.u32 %v5790_v25, %v5083_v24 }
 0x45c   :  { %3572 = vmatpush.bf16.msra.mxu2 %v4816_v41  ;;  %3586 = vmatpush.bf16.msra.mxu3 %v5232_v42  ;;  %v4875_v41 = vld [vmem:[%s8874_s10 + $0x1d0] sm:$0xf]  ;;  %v5738_v42 = vld [vmem:[%s8874_s10 + $0x200] sm:$0xf0] }
 0x45d   :  { %3600 = vmatpush.bf16.msrb.mxu0 %v4820_v48  ;;  %3614 = vmatpush.bf16.msrb.mxu1 %v5236_v49  ;;  %v2206_v49 = vperm.slane %v8725_v27, 0  ;;  %v4876_v50 = vor.u32 %v5738_v42, %v4875_v41 }
 0x460   :  { %3573 = vmatpush.bf16.msra.mxu2 %v4764_v35  ;;  %3587 = vmatpush.bf16.msra.mxu3 %v5180_v10  ;;  %v5239_v35 = vld [vmem:[%s8874_s10 + $0x4a8] sm:$0xf]  ;;  %v5829_v10 = vld [vmem:[%s8874_s10 + $0x4d8] sm:$0xf0] }
 0x461   :  { %3601 = vmatpush.bf16.msrb.mxu0 %v4768_v47  ;;  %3615 = vmatpush.bf16.msrb.mxu1 %v5184_v55  ;;  %v4824_v55 = vor.u32 %v5725_v56, %v4823_v52  ;;  %v5240_v59 = vor.u32 %v5829_v10, %v5239_v35  ;;  %v2211_v56 = vperm.slane %v8725_v27, 5 }
 0x464   :  { %3574 = vmatpush.bf16.msra.mxu2 %v4712_v0  ;;  %3588 = vmatpush.bf16.msra.mxu3 %v5128_v2  ;;  %v5816_v0 = vld [vmem:[%s8874_s10 + $0x470] sm:$0xf0] }
 0x465   :  { %3602 = vmatpush.bf16.msrb.mxu0 %v4716_v36  ;;  %3616 = vmatpush.bf16.msrb.mxu1 %v5132_v6  ;;  %v4772_v36 = vor.u32 %v5712_v62, %v4771_v61  ;;  %v5188_v6 = vor.u32 %v5816_v0, %v5187_v63 }
 0x468   :  { %3575 = vmatpush.bf16.msra.mxu2 %v4660_v17  ;;  %3589 = vmatpush.bf16.msra.mxu3 %v5076_v16  ;;  %v3325_v34 = vpop.f32.mrf.mxu0  ;;  %v3339_v38 = vpop.f32.mrf.mxu1  ;;  %v4720_v16 = vor.u32 %v5699_v37, %v4719_v7 }
 0x469   :  { %3603 = vmatpush.bf16.msrb.mxu0 %v4664_v18  ;;  %3617 = vmatpush.bf16.msrb.mxu1 %v5080_v19  ;;  %v3326_v48 = vadd.f32 %v3325_v34, %v2207_v22  ;;  %v5136_v18 = vor.u32 %v5803_v12, %v5135_v31  ;;  %v2213_v12 = vperm.slane %v8725_v27, 7 }
 0x46b   :  { %3576 = vmatmul.bf16.vlgmr.msra.gmra.mxu2 %v7930_v9  ;;  %3590 = vmatmul.bf16.vlgmr.msra.gmra.mxu3 %v7932_v11  ;;  %v3340_v1 = vadd.f32 %v3339_v38, %v3326_v48 }
 0x46c   :  { %3624 = vmatpush.bf16.msrb.mxu2 %v5032_v20  ;;  %3638 = vmatpush.bf16.msrb.mxu3 %v5448_v21  ;;  %v4667_v20 = vld [vmem:[%s8874_s10 + $0x30] sm:$0xf] }
 0x46d   :  { %3604 = vmatmul.bf16.vlgmr.msrb.gmra.mxu0 %v7930_v9  ;;  %3618 = vmatmul.bf16.vlgmr.msrb.gmra.mxu1 %v7932_v11  ;;  %v3297_v53 = vpop.f32.mrf.mxu2  ;;  %v3311_v58 = vpop.f32.mrf.mxu3  ;;  %v3653_v2 = vmax.f32 %v3340_v1, 0.0  ;;  %v4668_v44 = vor.u32 %v5686_v23, %v4667_v20 }
 0x46e   :  { %v3298_v57 = vadd.f32 %v3297_v53, %v2206_v49 }
 0x470   :  { %3625 = vmatpush.bf16.msrb.mxu2 %v4980_v28  ;;  %3639 = vmatpush.bf16.msrb.mxu3 %v5396_v29  ;;  %v3312_v47 = vadd.f32 %v3311_v58, %v3298_v57  ;;  %v3327_v60 = vpop.f32.mrf.mxu0  ;;  %v3341_v40 = vpop.f32.mrf.mxu1 }
 0x471   :  { %v3328_v4 = vadd.f32 %v3327_v60, %v2207_v22 }
 0x472   :  { %v3652_v3 = vmax.f32 %v3312_v47, 0.0 }
 0x473   :  { %v3342_v13 = vadd.f32 %v3341_v40, %v3328_v4 }
 0x474   :  { %3626 = vmatpush.bf16.msrb.mxu2 %v4928_v32  ;;  %3640 = vmatpush.bf16.msrb.mxu3 %v5344_v33  ;;  %v3678_v5 = vpack.c.bf16 %v3653_v2, %v3652_v3 }
 0x475   :  { %v3299_v8 = vpop.f32.mrf.mxu2  ;;  %v3313_v54 = vpop.f32.mrf.mxu3  ;;  %v3666_v26 = vmax.f32 %v3342_v13, 0.0 }
 0x476   :  { %3692 = vst [vmem:[%s8878_s13] sm:$0xff] %v3678_v5  ;;  %v3300_v14 = vadd.f32 %v3299_v8, %v2206_v49 }
 0x478   :  { %3627 = vmatpush.bf16.msrb.mxu2 %v4876_v50  ;;  %3641 = vmatpush.bf16.msrb.mxu3 %v5292_v51  ;;  %v3314_v17 = vadd.f32 %v3313_v54, %v3300_v14  ;;  %v3381_v19 = vpop.f32.mrf.mxu0  ;;  %v3395_v21 = vpop.f32.mrf.mxu1 }
 0x479   :  { %v3382_v29 = vadd.f32 %v3381_v19, %v2209_v15 }
 0x47a   :  { %v3665_v28 = vmax.f32 %v3314_v17, 0.0 }
 0x47b   :  { %v3396_v33 = vadd.f32 %v3395_v21, %v3382_v29 }
 0x47c   :  { %3628 = vmatpush.bf16.msrb.mxu2 %v4824_v55  ;;  %3642 = vmatpush.bf16.msrb.mxu3 %v5240_v59  ;;  %v3685_v30 = vpack.c.bf16 %v3666_v26, %v3665_v28 }
 0x47d   :  { %v3353_v22 = vpop.f32.mrf.mxu2  ;;  %v3367_v32 = vpop.f32.mrf.mxu3  ;;  %v3655_v42 = vmax.f32 %v3396_v33, 0.0 }
 0x47e   :  { %3700 = vst [vmem:[%s8878_s13 + $0x34] sm:$0xff] %v3685_v30  ;;  %v3354_v34 = vadd.f32 %v3353_v22, %v2208_v39 }
 0x480   :  { %3629 = vmatpush.bf16.msrb.mxu2 %v4772_v36  ;;  %3643 = vmatpush.bf16.msrb.mxu3 %v5188_v6  ;;  %v3368_v38 = vadd.f32 %v3367_v32, %v3354_v34  ;;  %v3383_v41 = vpop.f32.mrf.mxu0  ;;  %v3397_v48 = vpop.f32.mrf.mxu1  ;;  %v8840_v34 = vld [vmem:[%s8877_s11 + $0x8] sm:$0x1f] }
 0x481   :  { %v3384_v46 = vadd.f32 %v3383_v41, %v2209_v15  ;;  %v2212_v15 = vperm.slane %v8725_v27, 6 }
 0x482   :  { %v3654_v45 = vmax.f32 %v3368_v38, 0.0  ;;  %v2215_v38 = vperm.slane %v8840_v34, 1 }
 0x483   :  { %v3398_v52 = vadd.f32 %v3397_v48, %v3384_v46 }
 0x484   :  { %3630 = vmatpush.bf16.msrb.mxu2 %v4720_v16  ;;  %3644 = vmatpush.bf16.msrb.mxu3 %v5136_v18  ;;  %v3679_v49 = vpack.c.bf16 %v3655_v42, %v3654_v45  ;;  %v2214_v45 = vperm.slane %v8840_v34, 0 }
 0x485   :  { %v3355_v50 = vpop.f32.mrf.mxu2  ;;  %v3369_v51 = vpop.f32.mrf.mxu3  ;;  %v3668_v35 = vmax.f32 %v3398_v52, 0.0 }
 0x486   :  { %3693 = vst [vmem:[%s8878_s13 + $0x8] sm:$0xff] %v3679_v49  ;;  %v3356_v53 = vadd.f32 %v3355_v50, %v2208_v39 }
 0x488   :  { %3631 = vmatpush.bf16.msrb.mxu2 %v4668_v44  ;;  %3645 = vmatpush.bf16.msrb.mxu3 %v5084_v43  ;;  %v3370_v58 = vadd.f32 %v3369_v51, %v3356_v53 }
 0x48a   :  { %v3667_v10 = vmax.f32 %v3370_v58, 0.0 }
 0x48b   :  { %3632 = vmatmul.bf16.vlgmr.msrb.gmra.mxu2 %v7930_v9  ;;  %3646 = vmatmul.bf16.vlgmr.msrb.gmra.mxu3 %v7932_v11  ;;  %v3437_v1 = vpop.f32.mrf.mxu0  ;;  %v2210_v11 = vperm.slane %v8725_v27, 4  ;;  %v3451_v47 = vpop.f32.mrf.mxu1 }
 0x48c   :  { %v3686_v57 = vpack.c.bf16 %v3668_v35, %v3667_v10  ;;  %v3438_v9 = vadd.f32 %v3437_v1, %v2211_v56 }
 0x48e   :  { %3701 = vst [vmem:[%s8878_s13 + $0x3c] sm:$0xff] %v3686_v57  ;;  %v3409_v55 = vpop.f32.mrf.mxu2  ;;  %v3423_v59 = vpop.f32.mrf.mxu3  ;;  %v3452_v60 = vadd.f32 %v3451_v47, %v3438_v9 }
 0x48f   :  { %v3410_v40 = vadd.f32 %v3409_v55, %v2210_v11 }
 0x490   :  { %v3657_v63 = vmax.f32 %v3452_v60, 0.0 }
 0x491   :  { %v3424_v61 = vadd.f32 %v3423_v59, %v3410_v40 }
 0x493   :  { %v3439_v62 = vpop.f32.mrf.mxu0  ;;  %v3656_v0 = vmax.f32 %v3424_v61, 0.0  ;;  %v3453_v4 = vpop.f32.mrf.mxu1  ;;  %v2217_v61 = vperm.slane %v8840_v34, 3 }
 0x494   :  { %v3440_v2 = vadd.f32 %v3439_v62, %v2211_v56 }
 0x495   :  { %v3680_v3 = vpack.c.bf16 %v3657_v63, %v3656_v0  ;;  %v2216_v0 = vperm.slane %v8840_v34, 2 }
 0x496   :  { %v3411_v5 = vpop.f32.mrf.mxu2  ;;  %v3454_v36 = vadd.f32 %v3453_v4, %v3440_v2  ;;  %v3425_v7 = vpop.f32.mrf.mxu3 }
 0x497   :  { %3694 = vst [vmem:[%s8878_s13 + $0x10] sm:$0xff] %v3680_v3  ;;  %v3412_v6 = vadd.f32 %v3411_v5, %v2210_v11 }
 0x498   :  { %v3670_v54 = vmax.f32 %v3454_v36, 0.0 }
 0x499   :  { %v3426_v8 = vadd.f32 %v3425_v7, %v3412_v6 }
 0x49b   :  { %v3669_v37 = vmax.f32 %v3426_v8, 0.0 }
 0x49d   :  { %v3687_v31 = vpack.c.bf16 %v3670_v54, %v3669_v37 }
 0x49f   :  { %3702 = vst [vmem:[%s8878_s13 + $0x44] sm:$0xff] %v3687_v31 }
 0x4ab   :  { %v3493_v13 = vpop.f32.mrf.mxu0  ;;  %v3507_v17 = vpop.f32.mrf.mxu1 }
 0x4ac   :  { %v3494_v14 = vadd.f32 %v3493_v13, %v2213_v12 }
 0x4ae   :  { %v3465_v16 = vpop.f32.mrf.mxu2  ;;  %v3479_v18 = vpop.f32.mrf.mxu3  ;;  %v3508_v19 = vadd.f32 %v3507_v17, %v3494_v14 }
 0x4af   :  { %v3466_v20 = vadd.f32 %v3465_v16, %v2212_v15 }
 0x4b0   :  { %v3659_v24 = vmax.f32 %v3508_v19, 0.0 }
 0x4b1   :  { %v3480_v21 = vadd.f32 %v3479_v18, %v3466_v20 }
 0x4b3   :  { %v3495_v23 = vpop.f32.mrf.mxu0  ;;  %v3658_v25 = vmax.f32 %v3480_v21, 0.0  ;;  %v3509_v29 = vpop.f32.mrf.mxu1  ;;  %v2218_v21 = vperm.slane %v8840_v34, 4 }
 0x4b4   :  { %v3496_v26 = vadd.f32 %v3495_v23, %v2213_v12 }
 0x4b5   :  { %v3681_v28 = vpack.c.bf16 %v3659_v24, %v3658_v25 }
 0x4b6   :  { %v3467_v39 = vpop.f32.mrf.mxu2  ;;  %v3510_v30 = vadd.f32 %v3509_v29, %v3496_v26  ;;  %v3481_v27 = vpop.f32.mrf.mxu3 }
 0x4b7   :  { %3695 = vst [vmem:[%s8878_s13 + $0x18] sm:$0xff] %v3681_v28  ;;  %v3468_v44 = vadd.f32 %v3467_v39, %v2212_v15 }
 0x4b8   :  { %v3672_v22 = vmax.f32 %v3510_v30, 0.0 }
 0x4b9   :  { %v3482_v43 = vadd.f32 %v3481_v27, %v3468_v44 }
 0x4bb   :  { %v3671_v32 = vmax.f32 %v3482_v43, 0.0 }
 0x4bd   :  { %v3688_v33 = vpack.c.bf16 %v3672_v22, %v3671_v32 }
 0x4bf   :  { %3703 = vst [vmem:[%s8878_s13 + $0x4c] sm:$0xff] %v3688_v33 }
 0x4cb   :  { %v3549_v41 = vpop.f32.mrf.mxu0  ;;  %v3563_v46 = vpop.f32.mrf.mxu1 }
 0x4cc   :  { %v3550_v42 = vadd.f32 %v3549_v41, %v2215_v38 }
 0x4ce   :  { %v3521_v48 = vpop.f32.mrf.mxu2  ;;  %v3535_v49 = vpop.f32.mrf.mxu3  ;;  %v3564_v50 = vadd.f32 %v3563_v46, %v3550_v42 }
 0x4cf   :  { %v3522_v51 = vadd.f32 %v3521_v48, %v2214_v45 }
 0x4d0   :  { %v3661_v58 = vmax.f32 %v3564_v50, 0.0 }
 0x4d1   :  { %v3536_v52 = vadd.f32 %v3535_v49, %v3522_v51 }
 0x4d3   :  { %v3551_v53 = vpop.f32.mrf.mxu0  ;;  %v3660_v56 = vmax.f32 %v3536_v52, 0.0  ;;  %v3565_v1 = vpop.f32.mrf.mxu1 }
 0x4d4   :  { %v3552_v35 = vadd.f32 %v3551_v53, %v2215_v38 }
 0x4d5   :  { %v3682_v10 = vpack.c.bf16 %v3661_v58, %v3660_v56 }
 0x4d6   :  { %v3523_v57 = vpop.f32.mrf.mxu2  ;;  %v3566_v9 = vadd.f32 %v3565_v1, %v3552_v35  ;;  %v3537_v47 = vpop.f32.mrf.mxu3 }
 0x4d7   :  { %3696 = vst [vmem:[%s8878_s13 + $0x20] sm:$0xff] %v3682_v10  ;;  %v3524_v11 = vadd.f32 %v3523_v57, %v2214_v45 }
 0x4d8   :  { %v3674_v59 = vmax.f32 %v3566_v9, 0.0 }
 0x4d9   :  { %v3538_v55 = vadd.f32 %v3537_v47, %v3524_v11 }
 0x4db   :  { %v3673_v60 = vmax.f32 %v3538_v55, 0.0 }
 0x4dd   :  { %v3689_v40 = vpack.c.bf16 %v3674_v59, %v3673_v60 }
 0x4df   :  { %3704 = vst [vmem:[%s8878_s13 + $0x54] sm:$0xff] %v3689_v40 }
 0x4ea   :  { %v3605_v62 = vpop.f32.mrf.mxu0  ;;  %v3619_v2 = vpop.f32.mrf.mxu1 }
 0x4eb   :  { %v3606_v63 = vadd.f32 %v3605_v62, %v2217_v61 }
 0x4ed   :  { %v3620_v5 = vadd.f32 %v3619_v2, %v3606_v63 }
 0x4ee   :  { %v3577_v3 = vpop.f32.mrf.mxu2  ;;  %v3591_v4 = vpop.f32.mrf.mxu3 }
 0x4ef   :  { %v3578_v36 = vadd.f32 %v3577_v3, %v2216_v0  ;;  %v3663_v8 = vmax.f32 %v3620_v5, 0.0 }
 0x4f1   :  { %v3592_v6 = vadd.f32 %v3591_v4, %v3578_v36 }
 0x4f2   :  { %v3607_v7 = vpop.f32.mrf.mxu0  ;;  %v3621_v12 = vpop.f32.mrf.mxu1 }
 0x4f3   :  { %v3662_v54 = vmax.f32 %v3592_v6, 0.0  ;;  %v3608_v37 = vadd.f32 %v3607_v7, %v2217_v61 }
 0x4f5   :  { %v3683_v31 = vpack.c.bf16 %v3663_v8, %v3662_v54  ;;  %v3622_v14 = vadd.f32 %v3621_v12, %v3608_v37 }
 0x4f6   :  { %v3579_v13 = vpop.f32.mrf.mxu2  ;;  %v3593_v17 = vpop.f32.mrf.mxu3 }
 0x4f7   :  { %3697 = vst [vmem:[%s8878_s13 + $0x28] sm:$0xff] %v3683_v31  ;;  %v3580_v15 = vadd.f32 %v3579_v13, %v2216_v0  ;;  %v3676_v18 = vmax.f32 %v3622_v14, 0.0 }
 0x4f9   :  { %v3594_v16 = vadd.f32 %v3593_v17, %v3580_v15 }
 0x4fb   :  { %v3675_v19 = vmax.f32 %v3594_v16, 0.0 }
 0x4fd   :  { %v3690_v20 = vpack.c.bf16 %v3676_v18, %v3675_v19 }
 0x4ff   :  { %3705 = vst [vmem:[%s8878_s13 + $0x5c] sm:$0xff] %v3690_v20 }
 0x50e   :  { %v3633_v23 = vpop.f32.mrf.mxu2  ;;  %v3647_v24 = vpop.f32.mrf.mxu3 }
 0x50f   :  { %v3634_v25 = vadd.f32 %v3633_v23, %v2218_v21 }
 0x511   :  { %v3648_v26 = vadd.f32 %v3647_v24, %v3634_v25 }
 0x513   :  { %v3664_v28 = vmax.f32 %v3648_v26, 0.0 }
 0x515   :  { %v3684_v29 = vpack.c.bf16 %v3664_v28, %v3664_v28 }
 0x516   :  { %v3635_v39 = vpop.f32.mrf.mxu2  ;;  %v3649_v44 = vpop.f32.mrf.mxu3 }
 0x517   :  { %3699 = vst.msk [vmem:[%s8878_s13 + $0x30] sm:$0xf] %vm3698_vm6, %v3684_v29  ;;  %v3636_v30 = vadd.f32 %v3635_v39, %v2218_v21 }
 0x519   :  { %v3650_v27 = vadd.f32 %v3649_v44, %v3636_v30 }
 0x51b   :  { %v3677_v43 = vmax.f32 %v3650_v27, 0.0 }
 0x51d   :  { %v3691_v22 = vpack.c.bf16 %v3677_v43, %v3677_v43 }
 0x51f   :  { %3706 = vst.msk [vmem:[%s8878_s13 + $0x64] sm:$0xf] %vm3698_vm6, %v3691_v22 }

// kernel: topological_ae_forward.8
= control target key start
LH: loop header
LB: loop body
LE: loop exit
PB: predicated region body
PF: predicated region fallthrough
CT: control target
= control target key end

     0   :  { %s3166_s1 = inlined_call_operand.vmem [shape: bf16[512,128], index: 1, kind: input, shape index: {}]   ;;  %s3167_s2 = inlined_call_operand.vmem [shape: f32[1,128], index: 2, kind: input, shape index: {}]   ;;  %s3168_s0 = inlined_call_operand.vmem [shape: bf16[392,512], index: 0, kind: input, shape index: {}]   ;;  %s3169_s3 = inlined_call_operand.vmem [shape: bf16[392,128], index: 3, kind: output, shape index: {}]  }
   0x1   :  { %v2164_v0 = vld [vmem:[%s3166_s1 + $0x38] sm:$0xff]  ;;  %v2163_v4 = vld [vmem:[%s3166_s1 + $0x30] sm:$0xff]  ;;  %v2162_v8 = vld [vmem:[%s3166_s1 + $0x28] sm:$0xff] }
   0x2   :  { %v2172_v1 = vld [vmem:[%s3166_s1 + $0x78] sm:$0xff]  ;;  %866 = vmatpush.bf16.msra.mxu0 %v2164_v0  ;;  %v2171_v5 = vld [vmem:[%s3166_s1 + $0x70] sm:$0xff]  ;;  %v2170_v9 = vld [vmem:[%s3166_s1 + $0x68] sm:$0xff] }
   0x3   :  { %v2180_v2 = vld [vmem:[%s3166_s1 + $0xb8] sm:$0xff]  ;;  %999 = vmatpush.bf16.msra.mxu1 %v2172_v1  ;;  %v2179_v6 = vld [vmem:[%s3166_s1 + $0xb0] sm:$0xff]  ;;  %v2178_v10 = vld [vmem:[%s3166_s1 + $0xa8] sm:$0xff] }
   0x4   :  { %v2188_v3 = vld [vmem:[%s3166_s1 + $0xf8] sm:$0xff]  ;;  %1132 = vmatpush.bf16.msra.mxu2 %v2180_v2  ;;  %v2187_v7 = vld [vmem:[%s3166_s1 + $0xf0] sm:$0xff]  ;;  %v2186_v11 = vld [vmem:[%s3166_s1 + $0xe8] sm:$0xff] }
   0x5   :  { %1265 = vmatpush.bf16.msra.mxu3 %v2188_v3  ;;  %v2161_v12 = vld [vmem:[%s3166_s1 + $0x20] sm:$0xff]  ;;  %v2160_v16 = vld [vmem:[%s3166_s1 + $0x18] sm:$0xff]  ;;  %v2159_v20 = vld [vmem:[%s3166_s1 + $0x10] sm:$0xff] }
   0x6   :  { %867 = vmatpush.bf16.msra.mxu0 %v2163_v4  ;;  %v2169_v13 = vld [vmem:[%s3166_s1 + $0x60] sm:$0xff]  ;;  %v2168_v17 = vld [vmem:[%s3166_s1 + $0x58] sm:$0xff]  ;;  %v2167_v21 = vld [vmem:[%s3166_s1 + $0x50] sm:$0xff] }
   0x7   :  { %1000 = vmatpush.bf16.msra.mxu1 %v2171_v5  ;;  %v2177_v14 = vld [vmem:[%s3166_s1 + $0xa0] sm:$0xff]  ;;  %v2176_v18 = vld [vmem:[%s3166_s1 + $0x98] sm:$0xff]  ;;  %v2175_v22 = vld [vmem:[%s3166_s1 + $0x90] sm:$0xff] }
   0x8   :  { %1133 = vmatpush.bf16.msra.mxu2 %v2179_v6  ;;  %v2185_v15 = vld [vmem:[%s3166_s1 + $0xe0] sm:$0xff]  ;;  %v2184_v19 = vld [vmem:[%s3166_s1 + $0xd8] sm:$0xff]  ;;  %v2183_v23 = vld [vmem:[%s3166_s1 + $0xd0] sm:$0xff] }
   0x9   :  { %1266 = vmatpush.bf16.msra.mxu3 %v2187_v7  ;;  %v2158_v24 = vld [vmem:[%s3166_s1 + $0x8] sm:$0xff]  ;;  %v2157_v28 = vld [vmem:[%s3166_s1] sm:$0xff]  ;;  %v2063_v33 = vld [vmem:[%s3168_s0 + $0xc] sm:$0xf0] }
   0xa   :  { %868 = vmatpush.bf16.msra.mxu0 %v2162_v8  ;;  %v2166_v25 = vld [vmem:[%s3166_s1 + $0x48] sm:$0xff]  ;;  %v2165_v29 = vld [vmem:[%s3166_s1 + $0x40] sm:$0xff]  ;;  %v1553_v35 = vld [vmem:[%s3168_s0 + $0x10] sm:$0xf0] }
   0xb   :  { %1001 = vmatpush.bf16.msra.mxu1 %v2170_v9  ;;  %v2174_v26 = vld [vmem:[%s3166_s1 + $0x88] sm:$0xff]  ;;  %v2173_v30 = vld [vmem:[%s3166_s1 + $0x80] sm:$0xff]  ;;  %v2064_v37 = vld [vmem:[%s3168_s0 + $0x14] sm:$0xf0] }
   0xc   :  { %1134 = vmatpush.bf16.msra.mxu2 %v2178_v10  ;;  %v2182_v27 = vld [vmem:[%s3166_s1 + $0xc8] sm:$0xff]  ;;  %v2181_v31 = vld [vmem:[%s3166_s1 + $0xc0] sm:$0xff]  ;;  %v1561_v39 = vld [vmem:[%s3168_s0 + $0x18] sm:$0xf0] }
   0xd   :  { %1267 = vmatpush.bf16.msra.mxu3 %v2186_v11  ;;  %v1551_v32 = vld [vmem:[%s3168_s0] sm:$0xf]  ;;  %v2061_v34 = vld [vmem:[%s3168_s0 + $0x4] sm:$0xf]  ;;  %v1559_v36 = vld [vmem:[%s3168_s0 + $0x8] sm:$0xf] }
   0xe   :  { %869 = vmatpush.bf16.msra.mxu0 %v2161_v12  ;;  %v2062_v38 = vld [vmem:[%s3168_s0 + $0xc] sm:$0xf]  ;;  %v1552_v40 = vor.u32 %v2063_v33, %v1551_v32  ;;  %v1556_v41 = vor.u32 %v2061_v34, %v1553_v35  ;;  %v1560_v42 = vor.u32 %v2064_v37, %v1559_v36  ;;  %v1567_v44 = vld [vmem:[%s3168_s0 + $0x20] sm:$0xf]  ;;  %v2067_v45 = vld [vmem:[%s3168_s0 + $0x2c] sm:$0xf0] }
   0xf   :  { %1002 = vmatpush.bf16.msra.mxu1 %v2169_v13  ;;  %v1564_v43 = vor.u32 %v2062_v38, %v1561_v39  ;;  %v2065_v46 = vld [vmem:[%s3168_s0 + $0x24] sm:$0xf]  ;;  %v1569_v47 = vld [vmem:[%s3168_s0 + $0x30] sm:$0xf0]  ;;  %v1575_v48 = vld [vmem:[%s3168_s0 + $0x28] sm:$0xf]  ;;  %v1568_v52 = vor.u32 %v2067_v45, %v1567_v44 }
  0x10   :  { %1135 = vmatpush.bf16.msra.mxu2 %v2177_v14  ;;  %v2068_v49 = vld [vmem:[%s3168_s0 + $0x34] sm:$0xf0]  ;;  %v2066_v50 = vld [vmem:[%s3168_s0 + $0x2c] sm:$0xf]  ;;  %v1577_v51 = vld [vmem:[%s3168_s0 + $0x38] sm:$0xf0]  ;;  %v1572_v53 = vor.u32 %v2065_v46, %v1569_v47 }
  0x11   :  { %1268 = vmatpush.bf16.msra.mxu3 %v2185_v15  ;;  %v1576_v54 = vor.u32 %v2068_v49, %v1575_v48  ;;  %v1580_v55 = vor.u32 %v2066_v50, %v1577_v51  ;;  %v1583_v56 = vld [vmem:[%s3168_s0 + $0x40] sm:$0xf]  ;;  %v2071_v57 = vld [vmem:[%s3168_s0 + $0x4c] sm:$0xf0]  ;;  %v2069_v58 = vld [vmem:[%s3168_s0 + $0x44] sm:$0xf] }
  0x12   :  { %870 = vmatpush.bf16.msra.mxu0 %v2160_v16  ;;  %v1585_v59 = vld [vmem:[%s3168_s0 + $0x50] sm:$0xf0]  ;;  %v1591_v60 = vld [vmem:[%s3168_s0 + $0x48] sm:$0xf]  ;;  %v2072_v61 = vld [vmem:[%s3168_s0 + $0x54] sm:$0xf0]  ;;  %v1584_v0 = vor.u32 %v2071_v57, %v1583_v56 }
  0x13   :  { %1003 = vmatpush.bf16.msra.mxu1 %v2168_v17  ;;  %v2070_v62 = vld [vmem:[%s3168_s0 + $0x4c] sm:$0xf]  ;;  %v1593_v63 = vld [vmem:[%s3168_s0 + $0x58] sm:$0xf0]  ;;  %v1588_v1 = vor.u32 %v2069_v58, %v1585_v59  ;;  %v1592_v2 = vor.u32 %v2072_v61, %v1591_v60  ;;  %v1599_v4 = vld [vmem:[%s3168_s0 + $0x60] sm:$0xf] }
  0x14   :  { %1136 = vmatpush.bf16.msra.mxu2 %v2176_v18  ;;  %v1596_v3 = vor.u32 %v2070_v62, %v1593_v63  ;;  %v2075_v5 = vld [vmem:[%s3168_s0 + $0x6c] sm:$0xf0]  ;;  %v2073_v6 = vld [vmem:[%s3168_s0 + $0x64] sm:$0xf]  ;;  %v1601_v7 = vld [vmem:[%s3168_s0 + $0x70] sm:$0xf0] }
  0x15   :  { %1269 = vmatpush.bf16.msra.mxu3 %v2184_v19  ;;  %v1607_v8 = vld [vmem:[%s3168_s0 + $0x68] sm:$0xf]  ;;  %v2076_v9 = vld [vmem:[%s3168_s0 + $0x74] sm:$0xf0]  ;;  %v2074_v10 = vld [vmem:[%s3168_s0 + $0x6c] sm:$0xf]  ;;  %v1600_v12 = vor.u32 %v2075_v5, %v1599_v4  ;;  %v1604_v13 = vor.u32 %v2073_v6, %v1601_v7 }
  0x16   :  { %871 = vmatpush.bf16.msra.mxu0 %v2159_v20  ;;  %v1609_v11 = vld [vmem:[%s3168_s0 + $0x78] sm:$0xf0]  ;;  %v1608_v14 = vor.u32 %v2076_v9, %v1607_v8  ;;  %v1615_v16 = vld [vmem:[%s3168_s0 + $0x80] sm:$0xf]  ;;  %v2079_v17 = vld [vmem:[%s3168_s0 + $0x8c] sm:$0xf0] }
  0x17   :  { %1004 = vmatpush.bf16.msra.mxu1 %v2167_v21  ;;  %v1612_v15 = vor.u32 %v2074_v10, %v1609_v11  ;;  %v2077_v18 = vld [vmem:[%s3168_s0 + $0x84] sm:$0xf]  ;;  %v1617_v19 = vld [vmem:[%s3168_s0 + $0x90] sm:$0xf0]  ;;  %v1623_v20 = vld [vmem:[%s3168_s0 + $0x88] sm:$0xf] }
  0x18   :  { %1137 = vmatpush.bf16.msra.mxu2 %v2175_v22  ;;  %v2080_v21 = vld [vmem:[%s3168_s0 + $0x94] sm:$0xf0]  ;;  %v2078_v22 = vld [vmem:[%s3168_s0 + $0x8c] sm:$0xf]  ;;  %v1639_v32 = vld [vmem:[%s3168_s0 + $0xa8] sm:$0xf] }
  0x19   :  { %1270 = vmatpush.bf16.msra.mxu3 %v2183_v23  ;;  %v1625_v23 = vld [vmem:[%s3168_s0 + $0x98] sm:$0xf0]  ;;  %v2084_v33 = vld [vmem:[%s3168_s0 + $0xb4] sm:$0xf0]  ;;  %v2082_v34 = vld [vmem:[%s3168_s0 + $0xac] sm:$0xf] }
  0x1a   :  { %872 = vmatpush.bf16.msra.mxu0 %v2158_v24  ;;  %v1616_v24 = vor.u32 %v2079_v17, %v1615_v16  ;;  %v1641_v35 = vld [vmem:[%s3168_s0 + $0xb8] sm:$0xf0]  ;;  %v1640_v38 = vor.u32 %v2084_v33, %v1639_v32  ;;  %v1655_v44 = vld [vmem:[%s3168_s0 + $0xc8] sm:$0xf]  ;;  %v2088_v45 = vld [vmem:[%s3168_s0 + $0xd4] sm:$0xf0] }
  0x1b   :  { %1005 = vmatpush.bf16.msra.mxu1 %v2166_v25  ;;  %v1620_v25 = vor.u32 %v2077_v18, %v1617_v19  ;;  %v1644_v39 = vor.u32 %v2082_v34, %v1641_v35  ;;  %v2086_v46 = vld [vmem:[%s3168_s0 + $0xcc] sm:$0xf]  ;;  %v1657_v47 = vld [vmem:[%s3168_s0 + $0xd8] sm:$0xf0]  ;;  %v1656_v50 = vor.u32 %v2088_v45, %v1655_v44  ;;  %v1671_v56 = vld [vmem:[%s3168_s0 + $0xe8] sm:$0xf] }
  0x1c   :  { %1138 = vmatpush.bf16.msra.mxu2 %v2174_v26  ;;  %v1624_v26 = vor.u32 %v2080_v21, %v1623_v20  ;;  %v1660_v51 = vor.u32 %v2086_v46, %v1657_v47  ;;  %v2092_v57 = vld [vmem:[%s3168_s0 + $0xf4] sm:$0xf0]  ;;  %v2090_v58 = vld [vmem:[%s3168_s0 + $0xec] sm:$0xf]  ;;  %v1673_v59 = vld [vmem:[%s3168_s0 + $0xf8] sm:$0xf0] }
  0x1d   :  { %1271 = vmatpush.bf16.msra.mxu3 %v2182_v27  ;;  %v1628_v27 = vor.u32 %v2078_v22, %v1625_v23  ;;  %v1672_v62 = vor.u32 %v2092_v57, %v1671_v56  ;;  %v1676_v63 = vor.u32 %v2090_v58, %v1673_v59  ;;  %v1687_v4 = vld [vmem:[%s3168_s0 + $0x108] sm:$0xf]  ;;  %v2096_v5 = vld [vmem:[%s3168_s0 + $0x114] sm:$0xf0]  ;;  %v2094_v6 = vld [vmem:[%s3168_s0 + $0x10c] sm:$0xf] }
  0x1e   :  { %873 = vmatpush.bf16.msra.mxu0 %v2157_v28  ;;  %v1631_v28 = vld [vmem:[%s3168_s0 + $0xa0] sm:$0xf]  ;;  %v1689_v7 = vld [vmem:[%s3168_s0 + $0x118] sm:$0xf0]  ;;  %v2099_v23 = vld [vmem:[%s3168_s0 + $0x12c] sm:$0xf0] }
  0x1f   :  { %1006 = vmatpush.bf16.msra.mxu1 %v2165_v29  ;;  %v2083_v29 = vld [vmem:[%s3168_s0 + $0xac] sm:$0xf0]  ;;  %v2669_v10 = vld [vmem:[%s3167_s2] ss:$0 sm:$0xff]  ;;  %v2101_v56 = vld [vmem:[%s3168_s0 + $0x144] sm:$0xf] }
  0x20   :  { %1139 = vmatpush.bf16.msra.mxu2 %v2173_v30  ;;  %v2081_v30 = vld [vmem:[%s3168_s0 + $0xa4] sm:$0xf]  ;;  %v1632_v36 = vor.u32 %v2083_v29, %v1631_v28  ;;  %v1695_v22 = vld [vmem:[%s3168_s0 + $0x120] sm:$0xf]  ;;  %v2100_v28 = vld [vmem:[%s3168_s0 + $0x134] sm:$0xf0] }
  0x21   :  { %1272 = vmatpush.bf16.msra.mxu3 %v2181_v31  ;;  %874 = vmatmul.bf16.vlgmr.msra.gmra.mxu0 %v1552_v40  ;;  %v1633_v31 = vld [vmem:[%s3168_s0 + $0xb0] sm:$0xf0]  ;;  %v1647_v40 = vld [vmem:[%s3168_s0 + $0xc0] sm:$0xf]  ;;  %v2098_v29 = vld [vmem:[%s3168_s0 + $0x12c] sm:$0xf]  ;;  %v1696_v34 = vor.u32 %v2099_v23, %v1695_v22 }
  0x22   :  { %1007 = vmatmul.bf16.vlgmr.msra.gmra.mxu1 %v1556_v41  ;;  %v1636_v37 = vor.u32 %v2081_v30, %v1633_v31  ;;  %v2087_v41 = vld [vmem:[%s3168_s0 + $0xcc] sm:$0xf0]  ;;  %v1705_v30 = vld [vmem:[%s3168_s0 + $0x138] sm:$0xf0]  ;;  %v1713_v57 = vld [vmem:[%s3168_s0 + $0x150] sm:$0xf0] }
  0x23   :  { %1140 = vmatmul.bf16.vlgmr.msra.gmra.mxu2 %v1560_v42  ;;  %v2085_v42 = vld [vmem:[%s3168_s0 + $0xc4] sm:$0xf]  ;;  %v1648_v48 = vor.u32 %v2087_v41, %v1647_v40  ;;  %v1708_v41 = vor.u32 %v2098_v29, %v1705_v30  ;;  %v1719_v58 = vld [vmem:[%s3168_s0 + $0x148] sm:$0xf]  ;;  %v2104_v59 = vld [vmem:[%s3168_s0 + $0x154] sm:$0xf0] }
  0x24   :  { %1273 = vmatmul.bf16.vlgmr.msra.gmra.mxu3 %v1564_v43  ;;  %v1649_v43 = vld [vmem:[%s3168_s0 + $0xd0] sm:$0xf0]  ;;  %v2107_v22 = vld [vmem:[%s3168_s0 + $0x16c] sm:$0xf0]  ;;  %v1737_v29 = vld [vmem:[%s3168_s0 + $0x178] sm:$0xf0] }
  0x25   :  { %v1652_v49 = vor.u32 %v2085_v42, %v1649_v43 }
  0x31   :  { %879 = vmatmul.bf16.gmra.mxu0 %v1568_v52  ;;  %v1663_v52 = vld [vmem:[%s3168_s0 + $0xe0] sm:$0xf] }
  0x32   :  { %1012 = vmatmul.bf16.gmra.mxu1 %v1572_v53  ;;  %v2091_v53 = vld [vmem:[%s3168_s0 + $0xec] sm:$0xf0] }
  0x33   :  { %1145 = vmatmul.bf16.gmra.mxu2 %v1576_v54  ;;  %v2089_v54 = vld [vmem:[%s3168_s0 + $0xe4] sm:$0xf]  ;;  %v1664_v60 = vor.u32 %v2091_v53, %v1663_v52  ;;  %v1711_v53 = vld [vmem:[%s3168_s0 + $0x140] sm:$0xf] }
  0x34   :  { %1278 = vmatmul.bf16.gmra.mxu3 %v1580_v55  ;;  %v1665_v55 = vld [vmem:[%s3168_s0 + $0xf0] sm:$0xf0] }
  0x35   :  { %v1668_v61 = vor.u32 %v2089_v54, %v1665_v55  ;;  %v2103_v54 = vld [vmem:[%s3168_s0 + $0x14c] sm:$0xf0] }
  0x41   :  { %884 = vmatmul.bf16.gmra.mxu0 %v1584_v0  ;;  %v1679_v0 = vld [vmem:[%s3168_s0 + $0x100] sm:$0xf] }
  0x42   :  { %1017 = vmatmul.bf16.gmra.mxu1 %v1588_v1  ;;  %v2095_v1 = vld [vmem:[%s3168_s0 + $0x10c] sm:$0xf0] }
  0x43   :  { %1150 = vmatmul.bf16.gmra.mxu2 %v1592_v2  ;;  %v2093_v2 = vld [vmem:[%s3168_s0 + $0x104] sm:$0xf]  ;;  %v1680_v8 = vor.u32 %v2095_v1, %v1679_v0  ;;  %v1712_v1 = vor.u32 %v2103_v54, %v1711_v53  ;;  %v2111_v53 = vld [vmem:[%s3168_s0 + $0x18c] sm:$0xf0] }
  0x44   :  { %1283 = vmatmul.bf16.gmra.mxu3 %v1596_v3  ;;  %v1681_v3 = vld [vmem:[%s3168_s0 + $0x110] sm:$0xf0] }
  0x45   :  { %v1684_v9 = vor.u32 %v2093_v2, %v1681_v3  ;;  %v1716_v2 = vor.u32 %v2101_v56, %v1713_v57  ;;  %v1745_v56 = vld [vmem:[%s3168_s0 + $0x190] sm:$0xf0]  ;;  %v1751_v57 = vld [vmem:[%s3168_s0 + $0x188] sm:$0xf] }
  0x51   :  { %889 = vmatmul.bf16.gmra.mxu0 %v1600_v12 }
  0x52   :  { %1022 = vmatmul.bf16.gmra.mxu1 %v1604_v13  ;;  %v1688_v13 = vor.u32 %v2096_v5, %v1687_v4 }
  0x53   :  { %1155 = vmatmul.bf16.gmra.mxu2 %v1608_v14  ;;  %v1692_v14 = vor.u32 %v2094_v6, %v1689_v7  ;;  %v1720_v7 = vor.u32 %v2104_v59, %v1719_v58  ;;  %v2112_v58 = vld [vmem:[%s3168_s0 + $0x194] sm:$0xf0]  ;;  %v2110_v59 = vld [vmem:[%s3168_s0 + $0x18c] sm:$0xf] }
  0x54   :  { %1288 = vmatmul.bf16.gmra.mxu3 %v1612_v15 }
  0x61   :  { %894 = vmatmul.bf16.gmra.mxu0 %v1616_v24 }
  0x62   :  { %1027 = vmatmul.bf16.gmra.mxu1 %v1620_v25  ;;  %v2097_v25 = vld [vmem:[%s3168_s0 + $0x124] sm:$0xf] }
  0x63   :  { %1160 = vmatmul.bf16.gmra.mxu2 %v1624_v26  ;;  %v1697_v26 = vld [vmem:[%s3168_s0 + $0x130] sm:$0xf0] }
  0x64   :  { %1293 = vmatmul.bf16.gmra.mxu3 %v1628_v27  ;;  %v1703_v27 = vld [vmem:[%s3168_s0 + $0x128] sm:$0xf]  ;;  %v1700_v35 = vor.u32 %v2097_v25, %v1697_v26  ;;  %v1729_v25 = vld [vmem:[%s3168_s0 + $0x170] sm:$0xf0] }
  0x65   :  { %v1704_v40 = vor.u32 %v2100_v28, %v1703_v27  ;;  %v1735_v26 = vld [vmem:[%s3168_s0 + $0x168] sm:$0xf]  ;;  %v2108_v27 = vld [vmem:[%s3168_s0 + $0x174] sm:$0xf0]  ;;  %v2106_v28 = vld [vmem:[%s3168_s0 + $0x16c] sm:$0xf] }
  0x71   :  { %899 = vmatmul.bf16.gmra.mxu0 %v1632_v36 }
  0x72   :  { %1032 = vmatmul.bf16.gmra.mxu1 %v1636_v37 }
  0x73   :  { %1165 = vmatmul.bf16.gmra.mxu2 %v1640_v38 }
  0x74   :  { %1298 = vmatmul.bf16.gmra.mxu3 %v1644_v39 }
  0x81   :  { %904 = vmatmul.bf16.gmra.mxu0 %v1648_v48 }
  0x82   :  { %1037 = vmatmul.bf16.gmra.mxu1 %v1652_v49 }
  0x83   :  { %1170 = vmatmul.bf16.gmra.mxu2 %v1656_v50 }
  0x84   :  { %1303 = vmatmul.bf16.gmra.mxu3 %v1660_v51 }
  0x91   :  { %909 = vmatmul.bf16.gmra.mxu0 %v1664_v60  ;;  %v2102_v60 = vld [vmem:[%s3168_s0 + $0x14c] sm:$0xf] }
  0x92   :  { %1042 = vmatmul.bf16.gmra.mxu1 %v1668_v61  ;;  %v1721_v61 = vld [vmem:[%s3168_s0 + $0x158] sm:$0xf0] }
  0x93   :  { %1175 = vmatmul.bf16.gmra.mxu2 %v1672_v62 }
  0x94   :  { %1308 = vmatmul.bf16.gmra.mxu3 %v1676_v63 }
  0x9e   :  { %v875_v11 = vpop.f32.mrf.mxu0 }
  0x9f   :  { %v1008_v12 = vpop.f32.mrf.mxu1  ;;  %v876_v15 = vadd.f32 %v2669_v10, %v875_v11 }
  0xa1   :  { %914 = vmatmul.bf16.gmra.mxu0 %v1680_v8  ;;  %v1009_v18 = vadd.f32 %v1008_v12, %v876_v15  ;;  %v1724_v8 = vor.u32 %v2102_v60, %v1721_v61  ;;  %v1753_v60 = vld [vmem:[%s3168_s0 + $0x198] sm:$0xf0] }
  0xa2   :  { %1047 = vmatmul.bf16.gmra.mxu1 %v1684_v9 }
  0xa3   :  { %1180 = vmatmul.bf16.gmra.mxu2 %v1688_v13 }
  0xa4   :  { %1313 = vmatmul.bf16.gmra.mxu3 %v1692_v14 }
  0xa6   :  { %v1141_v16 = vpop.f32.mrf.mxu2  ;;  %v877_v19 = vpop.f32.mrf.mxu0 }
  0xa7   :  { %v1274_v17 = vpop.f32.mrf.mxu3  ;;  %v1010_v20 = vpop.f32.mrf.mxu1  ;;  %v878_v21 = vadd.f32 %v2669_v10, %v877_v19  ;;  %v1142_v24 = vadd.f32 %v1141_v16, %v1009_v18 }
  0xa9   :  { %v1011_v31 = vadd.f32 %v1010_v20, %v878_v21  ;;  %v1275_v36 = vadd.f32 %v1274_v17, %v1142_v24  ;;  %v1727_v21 = vld [vmem:[%s3168_s0 + $0x160] sm:$0xf]  ;;  %v2105_v24 = vld [vmem:[%s3168_s0 + $0x164] sm:$0xf] }
  0xab   :  { %v1398_v43 = vmax.f32 %v1275_v36, 0.0 }
  0xae   :  { %v1143_v32 = vpop.f32.mrf.mxu2  ;;  %v880_v38 = vpop.f32.mrf.mxu0 }
  0xaf   :  { %v1276_v33 = vpop.f32.mrf.mxu3  ;;  %v1144_v37 = vadd.f32 %v1143_v32, %v1011_v31  ;;  %v1013_v39 = vpop.f32.mrf.mxu1  ;;  %v881_v45 = vadd.f32 %v2669_v10, %v880_v38 }
  0xb1   :  { %v1277_v42 = vadd.f32 %v1276_v33, %v1144_v37  ;;  %919 = vmatmul.bf16.gmra.mxu0 %v1696_v34  ;;  %v1014_v49 = vadd.f32 %v1013_v39, %v881_v45  ;;  %v1728_v33 = vor.u32 %v2107_v22, %v1727_v21  ;;  %v1732_v34 = vor.u32 %v2105_v24, %v1729_v25  ;;  %v2115_v21 = vld [vmem:[%s3168_s0 + $0x1ac] sm:$0xf0]  ;;  %v1761_v24 = vld [vmem:[%s3168_s0 + $0x1b0] sm:$0xf0]  ;;  %v1767_v25 = vld [vmem:[%s3168_s0 + $0x1a8] sm:$0xf] }
  0xb2   :  { %1052 = vmatmul.bf16.gmra.mxu1 %v1700_v35  ;;  %v1736_v39 = vor.u32 %v2108_v27, %v1735_v26  ;;  %v2116_v26 = vld [vmem:[%s3168_s0 + $0x1b4] sm:$0xf0]  ;;  %v2114_v27 = vld [vmem:[%s3168_s0 + $0x1ac] sm:$0xf] }
  0xb3   :  { %v1399_v44 = vmax.f32 %v1277_v42, 0.0  ;;  %1185 = vmatmul.bf16.gmra.mxu2 %v1704_v40  ;;  %v1740_v40 = vor.u32 %v2106_v28, %v1737_v29  ;;  %v1769_v28 = vld [vmem:[%s3168_s0 + $0x1b8] sm:$0xf0] }
  0xb4   :  { %1318 = vmatmul.bf16.gmra.mxu3 %v1708_v41 }
  0xb5   :  { %v2192_v46 = vpack.c.bf16 %v1399_v44, %v1398_v43 }
  0xb6   :  { %v1146_v47 = vpop.f32.mrf.mxu2  ;;  %v882_v50 = vpop.f32.mrf.mxu0 }
  0xb7   :  { %v1279_v48 = vpop.f32.mrf.mxu3  ;;  %2193 = vst [vmem:[%s3169_s3] sm:$0xff] %v2192_v46   ;;  %v1015_v51 = vpop.f32.mrf.mxu1  ;;  %v883_v52 = vadd.f32 %v2669_v10, %v882_v50  ;;  %v1147_v55 = vadd.f32 %v1146_v47, %v1014_v49 }
  0xb9   :  { %v1016_v62 = vadd.f32 %v1015_v51, %v883_v52  ;;  %v1280_v3 = vadd.f32 %v1279_v48, %v1147_v55  ;;  %v1743_v52 = vld [vmem:[%s3168_s0 + $0x180] sm:$0xf]  ;;  %v2109_v55 = vld [vmem:[%s3168_s0 + $0x184] sm:$0xf] }
  0xbb   :  { %v1400_v11 = vmax.f32 %v1280_v3, 0.0 }
  0xbe   :  { %v1148_v63 = vpop.f32.mrf.mxu2  ;;  %v885_v5 = vpop.f32.mrf.mxu0 }
  0xbf   :  { %v1281_v0 = vpop.f32.mrf.mxu3  ;;  %v1149_v4 = vadd.f32 %v1148_v63, %v1016_v62  ;;  %v1018_v6 = vpop.f32.mrf.mxu1  ;;  %v886_v13 = vadd.f32 %v2669_v10, %v885_v5 }
  0xc1   :  { %v1282_v9 = vadd.f32 %v1281_v0, %v1149_v4  ;;  %924 = vmatmul.bf16.gmra.mxu0 %v1712_v1  ;;  %v1019_v17 = vadd.f32 %v1018_v6, %v886_v13  ;;  %v1744_v0 = vor.u32 %v2111_v53, %v1743_v52  ;;  %v1748_v1 = vor.u32 %v2109_v55, %v1745_v56  ;;  %v2119_v52 = vld [vmem:[%s3168_s0 + $0x1cc] sm:$0xf0]  ;;  %v1777_v55 = vld [vmem:[%s3168_s0 + $0x1d0] sm:$0xf0]  ;;  %v1783_v56 = vld [vmem:[%s3168_s0 + $0x1c8] sm:$0xf] }
  0xc2   :  { %1057 = vmatmul.bf16.gmra.mxu1 %v1716_v2  ;;  %v1752_v6 = vor.u32 %v2112_v58, %v1751_v57  ;;  %v2120_v57 = vld [vmem:[%s3168_s0 + $0x1d4] sm:$0xf0]  ;;  %v2118_v58 = vld [vmem:[%s3168_s0 + $0x1cc] sm:$0xf] }
  0xc3   :  { %v1401_v12 = vmax.f32 %v1282_v9, 0.0  ;;  %1190 = vmatmul.bf16.gmra.mxu2 %v1720_v7  ;;  %v1756_v7 = vor.u32 %v2110_v59, %v1753_v60  ;;  %v1785_v59 = vld [vmem:[%s3168_s0 + $0x1d8] sm:$0xf0] }
  0xc4   :  { %1323 = vmatmul.bf16.gmra.mxu3 %v1724_v8 }
  0xc5   :  { %v2197_v14 = vpack.c.bf16 %v1401_v12, %v1400_v11 }
  0xc6   :  { %v1151_v15 = vpop.f32.mrf.mxu2  ;;  %v887_v18 = vpop.f32.mrf.mxu0 }
  0xc7   :  { %v1284_v16 = vpop.f32.mrf.mxu3  ;;  %2309 = vst [vmem:[%s3169_s3 + $0x8] sm:$0xff] %v2197_v14   ;;  %v1020_v19 = vpop.f32.mrf.mxu1  ;;  %v888_v20 = vadd.f32 %v2669_v10, %v887_v18  ;;  %v1152_v23 = vadd.f32 %v1151_v15, %v1019_v17 }
  0xc9   :  { %v1021_v30 = vadd.f32 %v1020_v19, %v888_v20  ;;  %v1285_v35 = vadd.f32 %v1284_v16, %v1152_v23  ;;  %v1759_v20 = vld [vmem:[%s3168_s0 + $0x1a0] sm:$0xf]  ;;  %v2113_v23 = vld [vmem:[%s3168_s0 + $0x1a4] sm:$0xf] }
  0xcb   :  { %v1402_v42 = vmax.f32 %v1285_v35, 0.0 }
  0xce   :  { %v1153_v31 = vpop.f32.mrf.mxu2  ;;  %v890_v37 = vpop.f32.mrf.mxu0 }
  0xcf   :  { %v1286_v32 = vpop.f32.mrf.mxu3  ;;  %v1154_v36 = vadd.f32 %v1153_v31, %v1021_v30  ;;  %v1023_v38 = vpop.f32.mrf.mxu1  ;;  %v891_v44 = vadd.f32 %v2669_v10, %v890_v37 }
  0xd1   :  { %v1287_v41 = vadd.f32 %v1286_v32, %v1154_v36  ;;  %929 = vmatmul.bf16.gmra.mxu0 %v1728_v33  ;;  %v1024_v48 = vadd.f32 %v1023_v38, %v891_v44  ;;  %v1760_v32 = vor.u32 %v2115_v21, %v1759_v20  ;;  %v1764_v33 = vor.u32 %v2113_v23, %v1761_v24  ;;  %v2123_v20 = vld [vmem:[%s3168_s0 + $0x1ec] sm:$0xf0]  ;;  %v1793_v23 = vld [vmem:[%s3168_s0 + $0x1f0] sm:$0xf0]  ;;  %v1799_v24 = vld [vmem:[%s3168_s0 + $0x1e8] sm:$0xf] }
  0xd2   :  { %1062 = vmatmul.bf16.gmra.mxu1 %v1732_v34  ;;  %v1768_v38 = vor.u32 %v2116_v26, %v1767_v25  ;;  %v2124_v25 = vld [vmem:[%s3168_s0 + $0x1f4] sm:$0xf0]  ;;  %v2122_v26 = vld [vmem:[%s3168_s0 + $0x1ec] sm:$0xf] }
  0xd3   :  { %v1403_v43 = vmax.f32 %v1287_v41, 0.0  ;;  %1195 = vmatmul.bf16.gmra.mxu2 %v1736_v39  ;;  %v1772_v39 = vor.u32 %v2114_v27, %v1769_v28  ;;  %v1801_v27 = vld [vmem:[%s3168_s0 + $0x1f8] sm:$0xf0] }
  0xd4   :  { %1328 = vmatmul.bf16.gmra.mxu3 %v1740_v40 }
  0xd5   :  { %v2202_v45 = vpack.c.bf16 %v1403_v43, %v1402_v42 }
  0xd6   :  { %v1156_v46 = vpop.f32.mrf.mxu2  ;;  %v892_v49 = vpop.f32.mrf.mxu0 }
  0xd7   :  { %v1289_v47 = vpop.f32.mrf.mxu3  ;;  %2310 = vst [vmem:[%s3169_s3 + $0x10] sm:$0xff] %v2202_v45   ;;  %v1025_v50 = vpop.f32.mrf.mxu1  ;;  %v893_v51 = vadd.f32 %v2669_v10, %v892_v49  ;;  %v1157_v54 = vadd.f32 %v1156_v46, %v1024_v48 }
  0xd9   :  { %v1026_v61 = vadd.f32 %v1025_v50, %v893_v51  ;;  %v1290_v2 = vadd.f32 %v1289_v47, %v1157_v54  ;;  %v1775_v51 = vld [vmem:[%s3168_s0 + $0x1c0] sm:$0xf]  ;;  %v2117_v54 = vld [vmem:[%s3168_s0 + $0x1c4] sm:$0xf] }
  0xdb   :  { %v1404_v9 = vmax.f32 %v1290_v2, 0.0 }
  0xde   :  { %v1158_v62 = vpop.f32.mrf.mxu2  ;;  %v895_v4 = vpop.f32.mrf.mxu0 }
  0xdf   :  { %v1291_v63 = vpop.f32.mrf.mxu3  ;;  %v1159_v3 = vadd.f32 %v1158_v62, %v1026_v61  ;;  %v1028_v5 = vpop.f32.mrf.mxu1  ;;  %v896_v12 = vadd.f32 %v2669_v10, %v895_v4 }
  0xe1   :  { %v1292_v8 = vadd.f32 %v1291_v63, %v1159_v3  ;;  %934 = vmatmul.bf16.gmra.mxu0 %v1744_v0  ;;  %v1029_v16 = vadd.f32 %v1028_v5, %v896_v12  ;;  %v1776_v63 = vor.u32 %v2119_v52, %v1775_v51  ;;  %v1780_v0 = vor.u32 %v2117_v54, %v1777_v55  ;;  %v2127_v51 = vld [vmem:[%s3168_s0 + $0x20c] sm:$0xf0]  ;;  %v1809_v54 = vld [vmem:[%s3168_s0 + $0x210] sm:$0xf0]  ;;  %v1815_v55 = vld [vmem:[%s3168_s0 + $0x208] sm:$0xf] }
  0xe2   :  { %1067 = vmatmul.bf16.gmra.mxu1 %v1748_v1  ;;  %v1784_v5 = vor.u32 %v2120_v57, %v1783_v56  ;;  %v2128_v56 = vld [vmem:[%s3168_s0 + $0x214] sm:$0xf0]  ;;  %v2126_v57 = vld [vmem:[%s3168_s0 + $0x20c] sm:$0xf] }
  0xe3   :  { %v1405_v11 = vmax.f32 %v1292_v8, 0.0  ;;  %1200 = vmatmul.bf16.gmra.mxu2 %v1752_v6  ;;  %v1788_v6 = vor.u32 %v2118_v58, %v1785_v59  ;;  %v1817_v58 = vld [vmem:[%s3168_s0 + $0x218] sm:$0xf0] }
  0xe4   :  { %1333 = vmatmul.bf16.gmra.mxu3 %v1756_v7 }
  0xe5   :  { %v2207_v13 = vpack.c.bf16 %v1405_v11, %v1404_v9 }
  0xe6   :  { %v1161_v14 = vpop.f32.mrf.mxu2  ;;  %v897_v17 = vpop.f32.mrf.mxu0 }
  0xe7   :  { %v1294_v15 = vpop.f32.mrf.mxu3  ;;  %2311 = vst [vmem:[%s3169_s3 + $0x18] sm:$0xff] %v2207_v13   ;;  %v1030_v18 = vpop.f32.mrf.mxu1  ;;  %v898_v19 = vadd.f32 %v2669_v10, %v897_v17  ;;  %v1162_v22 = vadd.f32 %v1161_v14, %v1029_v16 }
  0xe9   :  { %v1031_v29 = vadd.f32 %v1030_v18, %v898_v19  ;;  %v1295_v34 = vadd.f32 %v1294_v15, %v1162_v22  ;;  %v1791_v19 = vld [vmem:[%s3168_s0 + $0x1e0] sm:$0xf]  ;;  %v2121_v22 = vld [vmem:[%s3168_s0 + $0x1e4] sm:$0xf] }
  0xeb   :  { %v1406_v41 = vmax.f32 %v1295_v34, 0.0 }
  0xee   :  { %v1163_v30 = vpop.f32.mrf.mxu2  ;;  %v900_v36 = vpop.f32.mrf.mxu0 }
  0xef   :  { %v1296_v31 = vpop.f32.mrf.mxu3  ;;  %v1164_v35 = vadd.f32 %v1163_v30, %v1031_v29  ;;  %v1033_v37 = vpop.f32.mrf.mxu1  ;;  %v901_v43 = vadd.f32 %v2669_v10, %v900_v36 }
  0xf1   :  { %v1297_v40 = vadd.f32 %v1296_v31, %v1164_v35  ;;  %939 = vmatmul.bf16.gmra.mxu0 %v1760_v32  ;;  %v1034_v47 = vadd.f32 %v1033_v37, %v901_v43  ;;  %v1792_v31 = vor.u32 %v2123_v20, %v1791_v19  ;;  %v1796_v32 = vor.u32 %v2121_v22, %v1793_v23  ;;  %v2131_v19 = vld [vmem:[%s3168_s0 + $0x22c] sm:$0xf0]  ;;  %v1825_v22 = vld [vmem:[%s3168_s0 + $0x230] sm:$0xf0]  ;;  %v1831_v23 = vld [vmem:[%s3168_s0 + $0x228] sm:$0xf] }
  0xf2   :  { %1072 = vmatmul.bf16.gmra.mxu1 %v1764_v33  ;;  %v1800_v37 = vor.u32 %v2124_v25, %v1799_v24  ;;  %v2132_v24 = vld [vmem:[%s3168_s0 + $0x234] sm:$0xf0]  ;;  %v2130_v25 = vld [vmem:[%s3168_s0 + $0x22c] sm:$0xf] }
  0xf3   :  { %v1407_v42 = vmax.f32 %v1297_v40, 0.0  ;;  %1205 = vmatmul.bf16.gmra.mxu2 %v1768_v38  ;;  %v1804_v38 = vor.u32 %v2122_v26, %v1801_v27  ;;  %v1833_v26 = vld [vmem:[%s3168_s0 + $0x238] sm:$0xf0] }
  0xf4   :  { %1338 = vmatmul.bf16.gmra.mxu3 %v1772_v39 }
  0xf5   :  { %v2212_v44 = vpack.c.bf16 %v1407_v42, %v1406_v41 }
  0xf6   :  { %v1166_v45 = vpop.f32.mrf.mxu2  ;;  %v902_v48 = vpop.f32.mrf.mxu0 }
  0xf7   :  { %v1299_v46 = vpop.f32.mrf.mxu3  ;;  %2312 = vst [vmem:[%s3169_s3 + $0x20] sm:$0xff] %v2212_v44   ;;  %v1035_v49 = vpop.f32.mrf.mxu1  ;;  %v903_v50 = vadd.f32 %v2669_v10, %v902_v48  ;;  %v1167_v53 = vadd.f32 %v1166_v45, %v1034_v47 }
  0xf9   :  { %v1036_v60 = vadd.f32 %v1035_v49, %v903_v50  ;;  %v1300_v1 = vadd.f32 %v1299_v46, %v1167_v53  ;;  %v1807_v50 = vld [vmem:[%s3168_s0 + $0x200] sm:$0xf]  ;;  %v2125_v53 = vld [vmem:[%s3168_s0 + $0x204] sm:$0xf] }
  0xfb   :  { %v1408_v8 = vmax.f32 %v1300_v1, 0.0 }
  0xfe   :  { %v1168_v61 = vpop.f32.mrf.mxu2  ;;  %v905_v3 = vpop.f32.mrf.mxu0 }
  0xff   :  { %v1301_v62 = vpop.f32.mrf.mxu3  ;;  %v1169_v2 = vadd.f32 %v1168_v61, %v1036_v60  ;;  %v1038_v4 = vpop.f32.mrf.mxu1  ;;  %v906_v11 = vadd.f32 %v2669_v10, %v905_v3 }
 0x101   :  { %v1302_v7 = vadd.f32 %v1301_v62, %v1169_v2  ;;  %944 = vmatmul.bf16.gmra.mxu0 %v1776_v63  ;;  %v1039_v15 = vadd.f32 %v1038_v4, %v906_v11  ;;  %v1808_v62 = vor.u32 %v2127_v51, %v1807_v50  ;;  %v1812_v63 = vor.u32 %v2125_v53, %v1809_v54  ;;  %v2135_v50 = vld [vmem:[%s3168_s0 + $0x24c] sm:$0xf0]  ;;  %v1841_v53 = vld [vmem:[%s3168_s0 + $0x250] sm:$0xf0]  ;;  %v1847_v54 = vld [vmem:[%s3168_s0 + $0x248] sm:$0xf] }
 0x102   :  { %1077 = vmatmul.bf16.gmra.mxu1 %v1780_v0  ;;  %v1816_v4 = vor.u32 %v2128_v56, %v1815_v55  ;;  %v2136_v55 = vld [vmem:[%s3168_s0 + $0x254] sm:$0xf0]  ;;  %v2134_v56 = vld [vmem:[%s3168_s0 + $0x24c] sm:$0xf] }
 0x103   :  { %v1409_v9 = vmax.f32 %v1302_v7, 0.0  ;;  %1210 = vmatmul.bf16.gmra.mxu2 %v1784_v5  ;;  %v1820_v5 = vor.u32 %v2126_v57, %v1817_v58  ;;  %v1849_v57 = vld [vmem:[%s3168_s0 + $0x258] sm:$0xf0] }
 0x104   :  { %1343 = vmatmul.bf16.gmra.mxu3 %v1788_v6 }
 0x105   :  { %v2217_v12 = vpack.c.bf16 %v1409_v9, %v1408_v8 }
 0x106   :  { %v1171_v13 = vpop.f32.mrf.mxu2  ;;  %v907_v16 = vpop.f32.mrf.mxu0 }
 0x107   :  { %v1304_v14 = vpop.f32.mrf.mxu3  ;;  %2313 = vst [vmem:[%s3169_s3 + $0x28] sm:$0xff] %v2217_v12   ;;  %v1040_v17 = vpop.f32.mrf.mxu1  ;;  %v908_v18 = vadd.f32 %v2669_v10, %v907_v16  ;;  %v1172_v21 = vadd.f32 %v1171_v13, %v1039_v15 }
 0x109   :  { %v1041_v28 = vadd.f32 %v1040_v17, %v908_v18  ;;  %v1305_v33 = vadd.f32 %v1304_v14, %v1172_v21  ;;  %v1823_v18 = vld [vmem:[%s3168_s0 + $0x220] sm:$0xf]  ;;  %v2129_v21 = vld [vmem:[%s3168_s0 + $0x224] sm:$0xf] }
 0x10b   :  { %v1410_v40 = vmax.f32 %v1305_v33, 0.0 }
 0x10e   :  { %v1173_v29 = vpop.f32.mrf.mxu2  ;;  %v910_v35 = vpop.f32.mrf.mxu0 }
 0x10f   :  { %v1306_v30 = vpop.f32.mrf.mxu3  ;;  %v1174_v34 = vadd.f32 %v1173_v29, %v1041_v28  ;;  %v1043_v36 = vpop.f32.mrf.mxu1  ;;  %v911_v42 = vadd.f32 %v2669_v10, %v910_v35 }
 0x111   :  { %v1307_v39 = vadd.f32 %v1306_v30, %v1174_v34  ;;  %949 = vmatmul.bf16.gmra.mxu0 %v1792_v31  ;;  %v1044_v46 = vadd.f32 %v1043_v36, %v911_v42  ;;  %v1824_v30 = vor.u32 %v2131_v19, %v1823_v18  ;;  %v1828_v31 = vor.u32 %v2129_v21, %v1825_v22  ;;  %v2139_v18 = vld [vmem:[%s3168_s0 + $0x26c] sm:$0xf0]  ;;  %v1857_v21 = vld [vmem:[%s3168_s0 + $0x270] sm:$0xf0]  ;;  %v1863_v22 = vld [vmem:[%s3168_s0 + $0x268] sm:$0xf] }
 0x112   :  { %1082 = vmatmul.bf16.gmra.mxu1 %v1796_v32  ;;  %v1832_v36 = vor.u32 %v2132_v24, %v1831_v23  ;;  %v2140_v23 = vld [vmem:[%s3168_s0 + $0x274] sm:$0xf0]  ;;  %v2138_v24 = vld [vmem:[%s3168_s0 + $0x26c] sm:$0xf] }
 0x113   :  { %v1411_v41 = vmax.f32 %v1307_v39, 0.0  ;;  %1215 = vmatmul.bf16.gmra.mxu2 %v1800_v37  ;;  %v1836_v37 = vor.u32 %v2130_v25, %v1833_v26  ;;  %v1865_v25 = vld [vmem:[%s3168_s0 + $0x278] sm:$0xf0] }
 0x114   :  { %1348 = vmatmul.bf16.gmra.mxu3 %v1804_v38 }
 0x115   :  { %v2222_v43 = vpack.c.bf16 %v1411_v41, %v1410_v40 }
 0x116   :  { %v1176_v44 = vpop.f32.mrf.mxu2  ;;  %v912_v47 = vpop.f32.mrf.mxu0 }
 0x117   :  { %v1309_v45 = vpop.f32.mrf.mxu3  ;;  %2314 = vst [vmem:[%s3169_s3 + $0x30] sm:$0xff] %v2222_v43   ;;  %v1045_v48 = vpop.f32.mrf.mxu1  ;;  %v913_v49 = vadd.f32 %v2669_v10, %v912_v47  ;;  %v1177_v52 = vadd.f32 %v1176_v44, %v1044_v46 }
 0x119   :  { %v1046_v59 = vadd.f32 %v1045_v48, %v913_v49  ;;  %v1310_v0 = vadd.f32 %v1309_v45, %v1177_v52  ;;  %v1839_v49 = vld [vmem:[%s3168_s0 + $0x240] sm:$0xf]  ;;  %v2133_v52 = vld [vmem:[%s3168_s0 + $0x244] sm:$0xf] }
 0x11b   :  { %v1412_v7 = vmax.f32 %v1310_v0, 0.0 }
 0x11e   :  { %v1178_v60 = vpop.f32.mrf.mxu2  ;;  %v915_v2 = vpop.f32.mrf.mxu0 }
 0x11f   :  { %v1311_v61 = vpop.f32.mrf.mxu3  ;;  %v1179_v1 = vadd.f32 %v1178_v60, %v1046_v59  ;;  %v1048_v3 = vpop.f32.mrf.mxu1  ;;  %v916_v9 = vadd.f32 %v2669_v10, %v915_v2 }
 0x121   :  { %v1312_v6 = vadd.f32 %v1311_v61, %v1179_v1  ;;  %954 = vmatmul.bf16.gmra.mxu0 %v1808_v62  ;;  %v1049_v14 = vadd.f32 %v1048_v3, %v916_v9  ;;  %v1840_v61 = vor.u32 %v2135_v50, %v1839_v49  ;;  %v1844_v62 = vor.u32 %v2133_v52, %v1841_v53  ;;  %v2143_v49 = vld [vmem:[%s3168_s0 + $0x28c] sm:$0xf0]  ;;  %v1873_v52 = vld [vmem:[%s3168_s0 + $0x290] sm:$0xf0]  ;;  %v1879_v53 = vld [vmem:[%s3168_s0 + $0x288] sm:$0xf] }
 0x122   :  { %1087 = vmatmul.bf16.gmra.mxu1 %v1812_v63  ;;  %v1848_v3 = vor.u32 %v2136_v55, %v1847_v54  ;;  %v2144_v54 = vld [vmem:[%s3168_s0 + $0x294] sm:$0xf0]  ;;  %v2142_v55 = vld [vmem:[%s3168_s0 + $0x28c] sm:$0xf] }
 0x123   :  { %v1413_v8 = vmax.f32 %v1312_v6, 0.0  ;;  %1220 = vmatmul.bf16.gmra.mxu2 %v1816_v4  ;;  %v1852_v4 = vor.u32 %v2134_v56, %v1849_v57  ;;  %v1881_v56 = vld [vmem:[%s3168_s0 + $0x298] sm:$0xf0] }
 0x124   :  { %1353 = vmatmul.bf16.gmra.mxu3 %v1820_v5 }
 0x125   :  { %v2227_v11 = vpack.c.bf16 %v1413_v8, %v1412_v7 }
 0x126   :  { %v1181_v12 = vpop.f32.mrf.mxu2  ;;  %v917_v15 = vpop.f32.mrf.mxu0 }
 0x127   :  { %v1314_v13 = vpop.f32.mrf.mxu3  ;;  %2315 = vst [vmem:[%s3169_s3 + $0x38] sm:$0xff] %v2227_v11   ;;  %v1050_v16 = vpop.f32.mrf.mxu1  ;;  %v918_v17 = vadd.f32 %v2669_v10, %v917_v15  ;;  %v1182_v20 = vadd.f32 %v1181_v12, %v1049_v14 }
 0x129   :  { %v1051_v27 = vadd.f32 %v1050_v16, %v918_v17  ;;  %v1315_v32 = vadd.f32 %v1314_v13, %v1182_v20  ;;  %v1855_v17 = vld [vmem:[%s3168_s0 + $0x260] sm:$0xf]  ;;  %v2137_v20 = vld [vmem:[%s3168_s0 + $0x264] sm:$0xf] }
 0x12b   :  { %v1414_v39 = vmax.f32 %v1315_v32, 0.0 }
 0x12e   :  { %v1183_v28 = vpop.f32.mrf.mxu2  ;;  %v920_v34 = vpop.f32.mrf.mxu0 }
 0x12f   :  { %v1316_v29 = vpop.f32.mrf.mxu3  ;;  %v1184_v33 = vadd.f32 %v1183_v28, %v1051_v27  ;;  %v1053_v35 = vpop.f32.mrf.mxu1  ;;  %v921_v41 = vadd.f32 %v2669_v10, %v920_v34 }
 0x131   :  { %v1317_v38 = vadd.f32 %v1316_v29, %v1184_v33  ;;  %959 = vmatmul.bf16.gmra.mxu0 %v1824_v30  ;;  %v1054_v45 = vadd.f32 %v1053_v35, %v921_v41  ;;  %v1856_v29 = vor.u32 %v2139_v18, %v1855_v17  ;;  %v1860_v30 = vor.u32 %v2137_v20, %v1857_v21  ;;  %v2147_v17 = vld [vmem:[%s3168_s0 + $0x2ac] sm:$0xf0]  ;;  %v1889_v20 = vld [vmem:[%s3168_s0 + $0x2b0] sm:$0xf0]  ;;  %v1895_v21 = vld [vmem:[%s3168_s0 + $0x2a8] sm:$0xf] }
 0x132   :  { %1092 = vmatmul.bf16.gmra.mxu1 %v1828_v31  ;;  %v1864_v35 = vor.u32 %v2140_v23, %v1863_v22  ;;  %v2148_v22 = vld [vmem:[%s3168_s0 + $0x2b4] sm:$0xf0]  ;;  %v2146_v23 = vld [vmem:[%s3168_s0 + $0x2ac] sm:$0xf] }
 0x133   :  { %v1415_v40 = vmax.f32 %v1317_v38, 0.0  ;;  %1225 = vmatmul.bf16.gmra.mxu2 %v1832_v36  ;;  %v1868_v36 = vor.u32 %v2138_v24, %v1865_v25  ;;  %v1897_v24 = vld [vmem:[%s3168_s0 + $0x2b8] sm:$0xf0] }
 0x134   :  { %1358 = vmatmul.bf16.gmra.mxu3 %v1836_v37 }
 0x135   :  { %v2232_v42 = vpack.c.bf16 %v1415_v40, %v1414_v39 }
 0x136   :  { %v1186_v43 = vpop.f32.mrf.mxu2  ;;  %v922_v46 = vpop.f32.mrf.mxu0 }
 0x137   :  { %v1319_v44 = vpop.f32.mrf.mxu3  ;;  %2316 = vst [vmem:[%s3169_s3 + $0x40] sm:$0xff] %v2232_v42   ;;  %v1055_v47 = vpop.f32.mrf.mxu1  ;;  %v923_v48 = vadd.f32 %v2669_v10, %v922_v46  ;;  %v1187_v51 = vadd.f32 %v1186_v43, %v1054_v45 }
 0x139   :  { %v1056_v58 = vadd.f32 %v1055_v47, %v923_v48  ;;  %v1320_v63 = vadd.f32 %v1319_v44, %v1187_v51  ;;  %v1871_v48 = vld [vmem:[%s3168_s0 + $0x280] sm:$0xf]  ;;  %v2141_v51 = vld [vmem:[%s3168_s0 + $0x284] sm:$0xf] }
 0x13b   :  { %v1416_v6 = vmax.f32 %v1320_v63, 0.0 }
 0x13e   :  { %v1188_v59 = vpop.f32.mrf.mxu2  ;;  %v925_v1 = vpop.f32.mrf.mxu0 }
 0x13f   :  { %v1321_v60 = vpop.f32.mrf.mxu3  ;;  %v1189_v0 = vadd.f32 %v1188_v59, %v1056_v58  ;;  %v1058_v2 = vpop.f32.mrf.mxu1  ;;  %v926_v8 = vadd.f32 %v2669_v10, %v925_v1 }
 0x141   :  { %v1322_v5 = vadd.f32 %v1321_v60, %v1189_v0  ;;  %964 = vmatmul.bf16.gmra.mxu0 %v1840_v61  ;;  %v1059_v13 = vadd.f32 %v1058_v2, %v926_v8  ;;  %v1872_v60 = vor.u32 %v2143_v49, %v1871_v48  ;;  %v1876_v61 = vor.u32 %v2141_v51, %v1873_v52  ;;  %v2151_v48 = vld [vmem:[%s3168_s0 + $0x2cc] sm:$0xf0]  ;;  %v1905_v51 = vld [vmem:[%s3168_s0 + $0x2d0] sm:$0xf0]  ;;  %v1911_v52 = vld [vmem:[%s3168_s0 + $0x2c8] sm:$0xf] }
 0x142   :  { %1097 = vmatmul.bf16.gmra.mxu1 %v1844_v62  ;;  %v1880_v2 = vor.u32 %v2144_v54, %v1879_v53  ;;  %v2152_v53 = vld [vmem:[%s3168_s0 + $0x2d4] sm:$0xf0]  ;;  %v2150_v54 = vld [vmem:[%s3168_s0 + $0x2cc] sm:$0xf] }
 0x143   :  { %v1417_v7 = vmax.f32 %v1322_v5, 0.0  ;;  %1230 = vmatmul.bf16.gmra.mxu2 %v1848_v3  ;;  %v1884_v3 = vor.u32 %v2142_v55, %v1881_v56  ;;  %v1913_v55 = vld [vmem:[%s3168_s0 + $0x2d8] sm:$0xf0] }
 0x144   :  { %1363 = vmatmul.bf16.gmra.mxu3 %v1852_v4 }
 0x145   :  { %v2237_v9 = vpack.c.bf16 %v1417_v7, %v1416_v6 }
 0x146   :  { %v1191_v11 = vpop.f32.mrf.mxu2  ;;  %v927_v14 = vpop.f32.mrf.mxu0 }
 0x147   :  { %v1324_v12 = vpop.f32.mrf.mxu3  ;;  %2317 = vst [vmem:[%s3169_s3 + $0x48] sm:$0xff] %v2237_v9   ;;  %v1060_v15 = vpop.f32.mrf.mxu1  ;;  %v928_v16 = vadd.f32 %v2669_v10, %v927_v14  ;;  %v1192_v19 = vadd.f32 %v1191_v11, %v1059_v13 }
 0x149   :  { %v1061_v26 = vadd.f32 %v1060_v15, %v928_v16  ;;  %v1325_v31 = vadd.f32 %v1324_v12, %v1192_v19  ;;  %v1887_v16 = vld [vmem:[%s3168_s0 + $0x2a0] sm:$0xf]  ;;  %v2145_v19 = vld [vmem:[%s3168_s0 + $0x2a4] sm:$0xf] }
 0x14b   :  { %v1418_v38 = vmax.f32 %v1325_v31, 0.0 }
 0x14e   :  { %v1193_v27 = vpop.f32.mrf.mxu2  ;;  %v930_v33 = vpop.f32.mrf.mxu0 }
 0x14f   :  { %v1326_v28 = vpop.f32.mrf.mxu3  ;;  %v1194_v32 = vadd.f32 %v1193_v27, %v1061_v26  ;;  %v1063_v34 = vpop.f32.mrf.mxu1  ;;  %v931_v40 = vadd.f32 %v2669_v10, %v930_v33 }
 0x151   :  { %v1327_v37 = vadd.f32 %v1326_v28, %v1194_v32  ;;  %969 = vmatmul.bf16.gmra.mxu0 %v1856_v29  ;;  %v1064_v44 = vadd.f32 %v1063_v34, %v931_v40  ;;  %v1888_v28 = vor.u32 %v2147_v17, %v1887_v16  ;;  %v1892_v29 = vor.u32 %v2145_v19, %v1889_v20  ;;  %v2155_v16 = vld [vmem:[%s3168_s0 + $0x2ec] sm:$0xf0]  ;;  %v1921_v19 = vld [vmem:[%s3168_s0 + $0x2f0] sm:$0xf0]  ;;  %v1927_v20 = vld [vmem:[%s3168_s0 + $0x2e8] sm:$0xf] }
 0x152   :  { %1102 = vmatmul.bf16.gmra.mxu1 %v1860_v30  ;;  %v1896_v34 = vor.u32 %v2148_v22, %v1895_v21  ;;  %v2156_v21 = vld [vmem:[%s3168_s0 + $0x2f4] sm:$0xf0]  ;;  %v2154_v22 = vld [vmem:[%s3168_s0 + $0x2ec] sm:$0xf] }
 0x153   :  { %v1419_v39 = vmax.f32 %v1327_v37, 0.0  ;;  %1235 = vmatmul.bf16.gmra.mxu2 %v1864_v35  ;;  %v1900_v35 = vor.u32 %v2146_v23, %v1897_v24  ;;  %v1929_v23 = vld [vmem:[%s3168_s0 + $0x2f8] sm:$0xf0] }
 0x154   :  { %1368 = vmatmul.bf16.gmra.mxu3 %v1868_v36 }
 0x155   :  { %v2242_v41 = vpack.c.bf16 %v1419_v39, %v1418_v38 }
 0x156   :  { %v1196_v42 = vpop.f32.mrf.mxu2  ;;  %v932_v45 = vpop.f32.mrf.mxu0 }
 0x157   :  { %v1329_v43 = vpop.f32.mrf.mxu3  ;;  %2318 = vst [vmem:[%s3169_s3 + $0x50] sm:$0xff] %v2242_v41   ;;  %v1065_v46 = vpop.f32.mrf.mxu1  ;;  %v933_v47 = vadd.f32 %v2669_v10, %v932_v45  ;;  %v1197_v50 = vadd.f32 %v1196_v42, %v1064_v44 }
 0x159   :  { %v1066_v57 = vadd.f32 %v1065_v46, %v933_v47  ;;  %v1330_v62 = vadd.f32 %v1329_v43, %v1197_v50  ;;  %v1903_v47 = vld [vmem:[%s3168_s0 + $0x2c0] sm:$0xf]  ;;  %v2149_v50 = vld [vmem:[%s3168_s0 + $0x2c4] sm:$0xf] }
 0x15b   :  { %v1420_v5 = vmax.f32 %v1330_v62, 0.0 }
 0x15e   :  { %v1198_v58 = vpop.f32.mrf.mxu2  ;;  %v935_v0 = vpop.f32.mrf.mxu0 }
 0x15f   :  { %v1331_v59 = vpop.f32.mrf.mxu3  ;;  %v1199_v63 = vadd.f32 %v1198_v58, %v1066_v57  ;;  %v1068_v1 = vpop.f32.mrf.mxu1  ;;  %v936_v7 = vadd.f32 %v2669_v10, %v935_v0 }
 0x161   :  { %v1332_v4 = vadd.f32 %v1331_v59, %v1199_v63  ;;  %974 = vmatmul.bf16.gmra.mxu0 %v1872_v60  ;;  %v1069_v12 = vadd.f32 %v1068_v1, %v936_v7  ;;  %v1904_v59 = vor.u32 %v2151_v48, %v1903_v47  ;;  %v1908_v60 = vor.u32 %v2149_v50, %v1905_v51 }
 0x162   :  { %1107 = vmatmul.bf16.gmra.mxu1 %v1876_v61  ;;  %v1912_v1 = vor.u32 %v2152_v53, %v1911_v52 }
 0x163   :  { %v1421_v6 = vmax.f32 %v1332_v4, 0.0  ;;  %1240 = vmatmul.bf16.gmra.mxu2 %v1880_v2  ;;  %v1916_v2 = vor.u32 %v2150_v54, %v1913_v55 }
 0x164   :  { %1373 = vmatmul.bf16.gmra.mxu3 %v1884_v3 }
 0x165   :  { %v2247_v8 = vpack.c.bf16 %v1421_v6, %v1420_v5 }
 0x166   :  { %v1201_v9 = vpop.f32.mrf.mxu2  ;;  %v937_v13 = vpop.f32.mrf.mxu0 }
 0x167   :  { %v1334_v11 = vpop.f32.mrf.mxu3  ;;  %2319 = vst [vmem:[%s3169_s3 + $0x58] sm:$0xff] %v2247_v8   ;;  %v1070_v14 = vpop.f32.mrf.mxu1  ;;  %v938_v15 = vadd.f32 %v2669_v10, %v937_v13  ;;  %v1202_v18 = vadd.f32 %v1201_v9, %v1069_v12 }
 0x169   :  { %v1071_v25 = vadd.f32 %v1070_v14, %v938_v15  ;;  %v1335_v30 = vadd.f32 %v1334_v11, %v1202_v18  ;;  %v3081_v14 = vld [vmem:[%s3167_s2] ss:$0 sm:$0xff]  ;;  %v2153_v18 = vld [vmem:[%s3168_s0 + $0x2e4] sm:$0xf] }
 0x16b   :  { %v1422_v37 = vmax.f32 %v1335_v30, 0.0 }
 0x16e   :  { %v1203_v26 = vpop.f32.mrf.mxu2  ;;  %v940_v32 = vpop.f32.mrf.mxu0 }
 0x16f   :  { %v1336_v27 = vpop.f32.mrf.mxu3  ;;  %v1204_v31 = vadd.f32 %v1203_v26, %v1071_v25  ;;  %v1073_v33 = vpop.f32.mrf.mxu1  ;;  %v941_v39 = vadd.f32 %v2669_v10, %v940_v32 }
 0x171   :  { %v1337_v36 = vadd.f32 %v1336_v27, %v1204_v31  ;;  %979 = vmatmul.bf16.gmra.mxu0 %v1888_v28  ;;  %v1074_v43 = vadd.f32 %v1073_v33, %v941_v39  ;;  %v1924_v28 = vor.u32 %v2153_v18, %v1921_v19  ;;  %v1928_v33 = vor.u32 %v2156_v21, %v1927_v20 }
 0x172   :  { %1112 = vmatmul.bf16.gmra.mxu1 %v1892_v29 }
 0x173   :  { %v1423_v38 = vmax.f32 %v1337_v36, 0.0  ;;  %1245 = vmatmul.bf16.gmra.mxu2 %v1896_v34  ;;  %v1932_v34 = vor.u32 %v2154_v22, %v1929_v23 }
 0x174   :  { %1378 = vmatmul.bf16.gmra.mxu3 %v1900_v35 }
 0x175   :  { %v2252_v40 = vpack.c.bf16 %v1423_v38, %v1422_v37 }
 0x176   :  { %v1206_v41 = vpop.f32.mrf.mxu2  ;;  %v942_v44 = vpop.f32.mrf.mxu0 }
 0x177   :  { %v1339_v42 = vpop.f32.mrf.mxu3  ;;  %2320 = vst [vmem:[%s3169_s3 + $0x60] sm:$0xff] %v2252_v40   ;;  %v1075_v45 = vpop.f32.mrf.mxu1  ;;  %v943_v46 = vadd.f32 %v2669_v10, %v942_v44  ;;  %v1207_v49 = vadd.f32 %v1206_v41, %v1074_v43 }
 0x179   :  { %v1076_v56 = vadd.f32 %v1075_v45, %v943_v46  ;;  %v1340_v61 = vadd.f32 %v1339_v42, %v1207_v49  ;;  %v110_v45 = vld [vmem:[%s3168_s0 + $0x300] sm:$0xff]  ;;  %v111_v46 = vld [vmem:[%s3168_s0 + $0x308] sm:$0xff] }
 0x17a   :  { %v470_v48 = vunpack.c.l.b16 %v110_v45  ;;  %v471_v49 = vunpack.c.h.b16 %v110_v45  ;;  %v472_v51 = vunpack.c.l.b16 %v111_v46  ;;  %v473_v52 = vunpack.c.h.b16 %v111_v46 }
 0x17b   :  { %v1424_v4 = vmax.f32 %v1340_v61, 0.0 }
 0x17e   :  { %v1208_v57 = vpop.f32.mrf.mxu2  ;;  %v945_v63 = vpop.f32.mrf.mxu0 }
 0x17f   :  { %v1341_v58 = vpop.f32.mrf.mxu3  ;;  %v1209_v62 = vadd.f32 %v1208_v57, %v1076_v56  ;;  %v1078_v0 = vpop.f32.mrf.mxu1  ;;  %v946_v6 = vadd.f32 %v2669_v10, %v945_v63  ;;  %v1919_v10 = vld [vmem:[%s3168_s0 + $0x2e0] sm:$0xf]  ;;  %v570_v56 = vpack.c.b16 %v470_v48, %v470_v48  ;;  %v571_v57 = vpack.c.b16 %v471_v49, %v471_v49 }
 0x180   :  { %v1920_v27 = vor.u32 %v2155_v16, %v1919_v10  ;;  %v573_v63 = vpack.c.b16 %v473_v52, %v473_v52 }
 0x181   :  { %v1342_v3 = vadd.f32 %v1341_v58, %v1209_v62  ;;  %984 = vmatmul.bf16.gmra.mxu0 %v1904_v59  ;;  %v1079_v11 = vadd.f32 %v1078_v0, %v946_v6  ;;  %v572_v62 = vpack.c.b16 %v472_v51, %v472_v51 }
 0x182   :  { %1117 = vmatmul.bf16.gmra.mxu1 %v1908_v60 }
 0x183   :  { %v1425_v5 = vmax.f32 %v1342_v3, 0.0  ;;  %1250 = vmatmul.bf16.gmra.mxu2 %v1912_v1 }
 0x184   :  { %1383 = vmatmul.bf16.gmra.mxu3 %v1916_v2 }
 0x185   :  { %v2257_v7 = vpack.c.bf16 %v1425_v5, %v1424_v4 }
 0x186   :  { %v1211_v8 = vpop.f32.mrf.mxu2  ;;  %v947_v12 = vpop.f32.mrf.mxu0 }
 0x187   :  { %v1344_v9 = vpop.f32.mrf.mxu3  ;;  %2321 = vst [vmem:[%s3169_s3 + $0x68] sm:$0xff] %v2257_v7   ;;  %v1080_v13 = vpop.f32.mrf.mxu1  ;;  %v948_v15 = vadd.f32 %v3081_v14, %v947_v12  ;;  %v1212_v17 = vadd.f32 %v1211_v8, %v1079_v11 }
 0x189   :  { %v1081_v24 = vadd.f32 %v1080_v13, %v948_v15  ;;  %v1345_v29 = vadd.f32 %v1344_v9, %v1212_v17 }
 0x18b   :  { %v1426_v36 = vmax.f32 %v1345_v29, 0.0 }
 0x18e   :  { %v1213_v25 = vpop.f32.mrf.mxu2  ;;  %v950_v31 = vpop.f32.mrf.mxu0 }
 0x18f   :  { %v1346_v26 = vpop.f32.mrf.mxu3  ;;  %v1214_v30 = vadd.f32 %v1213_v25, %v1081_v24  ;;  %v1083_v32 = vpop.f32.mrf.mxu1  ;;  %v951_v38 = vadd.f32 %v3081_v14, %v950_v31 }
 0x191   :  { %v1347_v35 = vadd.f32 %v1346_v26, %v1214_v30  ;;  %989 = vmatmul.bf16.gmra.mxu0 %v1920_v27  ;;  %v1084_v42 = vadd.f32 %v1083_v32, %v951_v38 }
 0x192   :  { %1122 = vmatmul.bf16.gmra.mxu1 %v1924_v28 }
 0x193   :  { %v1427_v37 = vmax.f32 %v1347_v35, 0.0  ;;  %1255 = vmatmul.bf16.gmra.mxu2 %v1928_v33 }
 0x194   :  { %1388 = vmatmul.bf16.gmra.mxu3 %v1932_v34 }
 0x195   :  { %v2262_v39 = vpack.c.bf16 %v1427_v37, %v1426_v36 }
 0x196   :  { %v1216_v40 = vpop.f32.mrf.mxu2  ;;  %v952_v43 = vpop.f32.mrf.mxu0 }
 0x197   :  { %v1349_v41 = vpop.f32.mrf.mxu3  ;;  %2322 = vst [vmem:[%s3169_s3 + $0x70] sm:$0xff] %v2262_v39   ;;  %v1085_v44 = vpop.f32.mrf.mxu1  ;;  %v953_v47 = vadd.f32 %v3081_v14, %v952_v43  ;;  %v1217_v50 = vadd.f32 %v1216_v40, %v1084_v42 }
 0x199   :  { %v1086_v53 = vadd.f32 %v1085_v44, %v953_v47  ;;  %v1350_v58 = vadd.f32 %v1349_v41, %v1217_v50 }
 0x19b   :  { %v1428_v1 = vmax.f32 %v1350_v58, 0.0 }
 0x19e   :  { %v1218_v54 = vpop.f32.mrf.mxu2  ;;  %v955_v60 = vpop.f32.mrf.mxu0 }
 0x19f   :  { %v1351_v55 = vpop.f32.mrf.mxu3  ;;  %v1219_v59 = vadd.f32 %v1218_v54, %v1086_v53  ;;  %v1088_v61 = vpop.f32.mrf.mxu1  ;;  %v956_v3 = vadd.f32 %v3081_v14, %v955_v60 }
 0x1a1   :  { %v1352_v0 = vadd.f32 %v1351_v55, %v1219_v59  ;;  %994 = vmatmul.bf16.gmra.mxu0 %v570_v56  ;;  %v1089_v7 = vadd.f32 %v1088_v61, %v956_v3 }
 0x1a2   :  { %1127 = vmatmul.bf16.gmra.mxu1 %v571_v57 }
 0x1a3   :  { %v1429_v2 = vmax.f32 %v1352_v0, 0.0  ;;  %1260 = vmatmul.bf16.gmra.mxu2 %v572_v62 }
 0x1a4   :  { %1393 = vmatmul.bf16.gmra.mxu3 %v573_v63 }
 0x1a5   :  { %v2267_v4 = vpack.c.bf16 %v1429_v2, %v1428_v1 }
 0x1a6   :  { %v1221_v5 = vpop.f32.mrf.mxu2  ;;  %v957_v8 = vpop.f32.mrf.mxu0 }
 0x1a7   :  { %v1354_v6 = vpop.f32.mrf.mxu3  ;;  %2323 = vst [vmem:[%s3169_s3 + $0x78] sm:$0xff] %v2267_v4   ;;  %v1090_v9 = vpop.f32.mrf.mxu1  ;;  %v958_v11 = vadd.f32 %v3081_v14, %v957_v8  ;;  %v1222_v12 = vadd.f32 %v1221_v5, %v1089_v7 }
 0x1a9   :  { %v1091_v13 = vadd.f32 %v1090_v9, %v958_v11  ;;  %v1355_v16 = vadd.f32 %v1354_v6, %v1222_v12 }
 0x1ab   :  { %v1430_v21 = vmax.f32 %v1355_v16, 0.0 }
 0x1ae   :  { %v1223_v15 = vpop.f32.mrf.mxu2  ;;  %v960_v18 = vpop.f32.mrf.mxu0 }
 0x1af   :  { %v1356_v10 = vpop.f32.mrf.mxu3  ;;  %v1224_v17 = vadd.f32 %v1223_v15, %v1091_v13  ;;  %v1093_v19 = vpop.f32.mrf.mxu1  ;;  %v961_v23 = vadd.f32 %v3081_v14, %v960_v18 }
 0x1b1   :  { %v1357_v20 = vadd.f32 %v1356_v10, %v1224_v17  ;;  %v1094_v27 = vadd.f32 %v1093_v19, %v961_v23 }
 0x1b3   :  { %v1431_v22 = vmax.f32 %v1357_v20, 0.0 }
 0x1b5   :  { %v2272_v24 = vpack.c.bf16 %v1431_v22, %v1430_v21 }
 0x1b6   :  { %v1226_v25 = vpop.f32.mrf.mxu2  ;;  %v962_v28 = vpop.f32.mrf.mxu0 }
 0x1b7   :  { %v1359_v26 = vpop.f32.mrf.mxu3  ;;  %2324 = vst [vmem:[%s3169_s3 + $0x80] sm:$0xff] %v2272_v24   ;;  %v1095_v29 = vpop.f32.mrf.mxu1  ;;  %v963_v30 = vadd.f32 %v3081_v14, %v962_v28  ;;  %v1227_v31 = vadd.f32 %v1226_v25, %v1094_v27 }
 0x1b9   :  { %v1096_v32 = vadd.f32 %v1095_v29, %v963_v30  ;;  %v1360_v35 = vadd.f32 %v1359_v26, %v1227_v31 }
 0x1bb   :  { %v1432_v40 = vmax.f32 %v1360_v35, 0.0 }
 0x1be   :  { %v1228_v33 = vpop.f32.mrf.mxu2  ;;  %v965_v37 = vpop.f32.mrf.mxu0 }
 0x1bf   :  { %v1361_v34 = vpop.f32.mrf.mxu3  ;;  %v1229_v36 = vadd.f32 %v1228_v33, %v1096_v32  ;;  %v1098_v38 = vpop.f32.mrf.mxu1  ;;  %v966_v42 = vadd.f32 %v3081_v14, %v965_v37 }
 0x1c1   :  { %v1362_v39 = vadd.f32 %v1361_v34, %v1229_v36  ;;  %v1099_v46 = vadd.f32 %v1098_v38, %v966_v42 }
 0x1c3   :  { %v1433_v41 = vmax.f32 %v1362_v39, 0.0 }
 0x1c5   :  { %v2277_v43 = vpack.c.bf16 %v1433_v41, %v1432_v40 }
 0x1c6   :  { %v1231_v44 = vpop.f32.mrf.mxu2  ;;  %v967_v47 = vpop.f32.mrf.mxu0 }
 0x1c7   :  { %v1364_v45 = vpop.f32.mrf.mxu3  ;;  %2325 = vst [vmem:[%s3169_s3 + $0x88] sm:$0xff] %v2277_v43   ;;  %v1100_v48 = vpop.f32.mrf.mxu1  ;;  %v968_v49 = vadd.f32 %v3081_v14, %v967_v47  ;;  %v1232_v50 = vadd.f32 %v1231_v44, %v1099_v46 }
 0x1c9   :  { %v1101_v51 = vadd.f32 %v1100_v48, %v968_v49  ;;  %v1365_v54 = vadd.f32 %v1364_v45, %v1232_v50 }
 0x1cb   :  { %v1434_v59 = vmax.f32 %v1365_v54, 0.0 }
 0x1ce   :  { %v1233_v52 = vpop.f32.mrf.mxu2  ;;  %v970_v56 = vpop.f32.mrf.mxu0 }
 0x1cf   :  { %v1366_v53 = vpop.f32.mrf.mxu3  ;;  %v1234_v55 = vadd.f32 %v1233_v52, %v1101_v51  ;;  %v1103_v57 = vpop.f32.mrf.mxu1  ;;  %v971_v61 = vadd.f32 %v3081_v14, %v970_v56 }
 0x1d1   :  { %v1367_v58 = vadd.f32 %v1366_v53, %v1234_v55  ;;  %v1104_v1 = vadd.f32 %v1103_v57, %v971_v61 }
 0x1d3   :  { %v1435_v60 = vmax.f32 %v1367_v58, 0.0 }
 0x1d5   :  { %v2282_v62 = vpack.c.bf16 %v1435_v60, %v1434_v59 }
 0x1d6   :  { %v1236_v63 = vpop.f32.mrf.mxu2  ;;  %v972_v2 = vpop.f32.mrf.mxu0 }
 0x1d7   :  { %v1369_v0 = vpop.f32.mrf.mxu3  ;;  %2326 = vst [vmem:[%s3169_s3 + $0x90] sm:$0xff] %v2282_v62   ;;  %v1105_v3 = vpop.f32.mrf.mxu1  ;;  %v973_v4 = vadd.f32 %v3081_v14, %v972_v2  ;;  %v1237_v5 = vadd.f32 %v1236_v63, %v1104_v1 }
 0x1d9   :  { %v1106_v6 = vadd.f32 %v1105_v3, %v973_v4  ;;  %v1370_v9 = vadd.f32 %v1369_v0, %v1237_v5 }
 0x1db   :  { %v1436_v10 = vmax.f32 %v1370_v9, 0.0 }
 0x1de   :  { %v1238_v7 = vpop.f32.mrf.mxu2  ;;  %v975_v12 = vpop.f32.mrf.mxu0 }
 0x1df   :  { %v1371_v8 = vpop.f32.mrf.mxu3  ;;  %v1239_v11 = vadd.f32 %v1238_v7, %v1106_v6  ;;  %v1108_v13 = vpop.f32.mrf.mxu1  ;;  %v976_v17 = vadd.f32 %v3081_v14, %v975_v12 }
 0x1e1   :  { %v1372_v15 = vadd.f32 %v1371_v8, %v1239_v11  ;;  %v1109_v21 = vadd.f32 %v1108_v13, %v976_v17 }
 0x1e3   :  { %v1437_v16 = vmax.f32 %v1372_v15, 0.0 }
 0x1e5   :  { %v2287_v18 = vpack.c.bf16 %v1437_v16, %v1436_v10 }
 0x1e6   :  { %v1241_v19 = vpop.f32.mrf.mxu2  ;;  %v977_v22 = vpop.f32.mrf.mxu0 }
 0x1e7   :  { %v1374_v20 = vpop.f32.mrf.mxu3  ;;  %2327 = vst [vmem:[%s3169_s3 + $0x98] sm:$0xff] %v2287_v18   ;;  %v1110_v23 = vpop.f32.mrf.mxu1  ;;  %v978_v24 = vadd.f32 %v3081_v14, %v977_v22  ;;  %v1242_v25 = vadd.f32 %v1241_v19, %v1109_v21 }
 0x1e9   :  { %v1111_v26 = vadd.f32 %v1110_v23, %v978_v24  ;;  %v1375_v29 = vadd.f32 %v1374_v20, %v1242_v25 }
 0x1eb   :  { %v1438_v34 = vmax.f32 %v1375_v29, 0.0 }
 0x1ee   :  { %v1243_v27 = vpop.f32.mrf.mxu2  ;;  %v980_v31 = vpop.f32.mrf.mxu0 }
 0x1ef   :  { %v1376_v28 = vpop.f32.mrf.mxu3  ;;  %v1244_v30 = vadd.f32 %v1243_v27, %v1111_v26  ;;  %v1113_v32 = vpop.f32.mrf.mxu1  ;;  %v981_v36 = vadd.f32 %v3081_v14, %v980_v31 }
 0x1f1   :  { %v1377_v33 = vadd.f32 %v1376_v28, %v1244_v30  ;;  %v1114_v40 = vadd.f32 %v1113_v32, %v981_v36 }
 0x1f3   :  { %v1439_v35 = vmax.f32 %v1377_v33, 0.0 }
 0x1f5   :  { %v2292_v37 = vpack.c.bf16 %v1439_v35, %v1438_v34 }
 0x1f6   :  { %v1246_v38 = vpop.f32.mrf.mxu2  ;;  %v982_v41 = vpop.f32.mrf.mxu0 }
 0x1f7   :  { %v1379_v39 = vpop.f32.mrf.mxu3  ;;  %2328 = vst [vmem:[%s3169_s3 + $0xa0] sm:$0xff] %v2292_v37   ;;  %v1115_v42 = vpop.f32.mrf.mxu1  ;;  %v983_v43 = vadd.f32 %v3081_v14, %v982_v41  ;;  %v1247_v44 = vadd.f32 %v1246_v38, %v1114_v40 }
 0x1f9   :  { %v1116_v45 = vadd.f32 %v1115_v42, %v983_v43  ;;  %v1380_v48 = vadd.f32 %v1379_v39, %v1247_v44 }
 0x1fb   :  { %v1440_v53 = vmax.f32 %v1380_v48, 0.0 }
 0x1fe   :  { %v1248_v46 = vpop.f32.mrf.mxu2  ;;  %v985_v50 = vpop.f32.mrf.mxu0 }
 0x1ff   :  { %v1381_v47 = vpop.f32.mrf.mxu3  ;;  %v1249_v49 = vadd.f32 %v1248_v46, %v1116_v45  ;;  %v1118_v51 = vpop.f32.mrf.mxu1  ;;  %v986_v55 = vadd.f32 %v3081_v14, %v985_v50 }
 0x201   :  { %v1382_v52 = vadd.f32 %v1381_v47, %v1249_v49  ;;  %v1119_v59 = vadd.f32 %v1118_v51, %v986_v55 }
 0x203   :  { %v1441_v54 = vmax.f32 %v1382_v52, 0.0 }
 0x205   :  { %v2297_v56 = vpack.c.bf16 %v1441_v54, %v1440_v53 }
 0x206   :  { %v1251_v57 = vpop.f32.mrf.mxu2  ;;  %v987_v60 = vpop.f32.mrf.mxu0 }
 0x207   :  { %v1384_v58 = vpop.f32.mrf.mxu3  ;;  %2329 = vst [vmem:[%s3169_s3 + $0xa8] sm:$0xff] %v2297_v56   ;;  %v1120_v61 = vpop.f32.mrf.mxu1  ;;  %v988_v62 = vadd.f32 %v3081_v14, %v987_v60  ;;  %v1252_v63 = vadd.f32 %v1251_v57, %v1119_v59 }
 0x209   :  { %v1121_v0 = vadd.f32 %v1120_v61, %v988_v62  ;;  %v1385_v3 = vadd.f32 %v1384_v58, %v1252_v63 }
 0x20b   :  { %v1442_v8 = vmax.f32 %v1385_v3, 0.0 }
 0x20e   :  { %v1253_v1 = vpop.f32.mrf.mxu2  ;;  %v990_v5 = vpop.f32.mrf.mxu0 }
 0x20f   :  { %v1386_v2 = vpop.f32.mrf.mxu3  ;;  %v1254_v4 = vadd.f32 %v1253_v1, %v1121_v0  ;;  %v1123_v6 = vpop.f32.mrf.mxu1  ;;  %v991_v11 = vadd.f32 %v3081_v14, %v990_v5 }
 0x211   :  { %v1387_v7 = vadd.f32 %v1386_v2, %v1254_v4  ;;  %v1124_v10 = vadd.f32 %v1123_v6, %v991_v11 }
 0x213   :  { %v1443_v9 = vmax.f32 %v1387_v7, 0.0 }
 0x215   :  { %v2302_v12 = vpack.c.bf16 %v1443_v9, %v1442_v8 }
 0x216   :  { %v1256_v13 = vpop.f32.mrf.mxu2  ;;  %v992_v16 = vpop.f32.mrf.mxu0 }
 0x217   :  { %v1389_v15 = vpop.f32.mrf.mxu3  ;;  %2330 = vst [vmem:[%s3169_s3 + $0xb0] sm:$0xff] %v2302_v12   ;;  %v1125_v17 = vpop.f32.mrf.mxu1  ;;  %v993_v18 = vadd.f32 %v3081_v14, %v992_v16  ;;  %v1257_v19 = vadd.f32 %v1256_v13, %v1124_v10 }
 0x219   :  { %v1126_v20 = vadd.f32 %v1125_v17, %v993_v18  ;;  %v1390_v23 = vadd.f32 %v1389_v15, %v1257_v19 }
 0x21b   :  { %v1444_v29 = vmax.f32 %v1390_v23, 0.0 }
 0x21e   :  { %v1258_v21 = vpop.f32.mrf.mxu2  ;;  %v995_v25 = vpop.f32.mrf.mxu0 }
 0x21f   :  { %v1391_v22 = vpop.f32.mrf.mxu3  ;;  %v1259_v24 = vadd.f32 %v1258_v21, %v1126_v20  ;;  %v1128_v26 = vpop.f32.mrf.mxu1  ;;  %v996_v27 = vadd.f32 %v3081_v14, %v995_v25 }
 0x221   :  { %v1392_v28 = vadd.f32 %v1391_v22, %v1259_v24  ;;  %v1129_v31 = vadd.f32 %v1128_v26, %v996_v27 }
 0x223   :  { %v1445_v30 = vmax.f32 %v1392_v28, 0.0 }
 0x225   :  { %v2307_v32 = vpack.c.bf16 %v1445_v30, %v1444_v29 }
 0x226   :  { %v1261_v33 = vpop.f32.mrf.mxu2  ;;  %v997_v36 = vpop.f32.mrf.mxu0 }
 0x227   :  { %v1394_v34 = vpop.f32.mrf.mxu3  ;;  %2331 = vst [vmem:[%s3169_s3 + $0xb8] sm:$0xff] %v2307_v32   ;;  %v1262_v35 = vadd.f32 %v1261_v33, %v1129_v31  ;;  %v1130_v37 = vpop.f32.mrf.mxu1 }
 0x229   :  { %v1395_v38 = vadd.f32 %v1394_v34, %v1262_v35 }
 0x22b   :  { %v1446_v39 = vmax.f32 %v1395_v38, 0.0 }
 0x22d   :  { %v1495_v40 = vpack.c.bf16 %v1446_v39, %v1446_v39 }
 0x22e   :  { %v1263_v41 = vpop.f32.mrf.mxu2 }
 0x22f   :  { %v1396_v42 = vpop.f32.mrf.mxu3  ;;  %1544 = vst [vmem:[%s3169_s3 + $0xc0] sm:$0xf] %v1495_v40 }

// kernel: topological_ae_forward.9
= control target key start
LH: loop header
LB: loop body
LE: loop exit
PB: predicated region body
PF: predicated region fallthrough
CT: control target
= control target key end

     0   :  { %vm1913_vm8 = vcmask 1040384   ;;  %s4549_s1 = inlined_call_operand.vmem [shape: bf16[256,1568], index: 1, kind: input, shape index: {}]   ;;  %s4550_s0 = inlined_call_operand.vmem [shape: bf16[1,256], index: 0, kind: input, shape index: {}]   ;;  %s4551_s2 = inlined_call_operand.<no memory space> [shape: f32[1], index: 2, kind: input, shape index: {}]   ;;  %s4552_s3 = inlined_call_operand.vmem [shape: f32[1,1568], index: 3, kind: output, shape index: {}]  }
   0x1   :  { %v2311_v0 = vld [vmem:[%s4549_s1 + $0x2d8] sm:$0xf]  ;;  %v2887_v1 = vld [vmem:[%s4549_s1 + $0x308] sm:$0xf0]  ;;  %v2881_v5 = vld [vmem:[%s4549_s1 + $0x2dc] sm:$0xf] }
   0x2   :  { %v2727_v2 = vld [vmem:[%s4549_s1 + $0x618] sm:$0xf]  ;;  %v2312_v3 = vor.u32 %v2887_v1, %v2311_v0  ;;  %v2991_v4 = vld [vmem:[%s4549_s1 + $0x648] sm:$0xf0]  ;;  %v2313_v6 = vld [vmem:[%s4549_s1 + $0x30c] sm:$0xf0] }
   0x3   :  { %v2728_v7 = vor.u32 %v2991_v4, %v2727_v2  ;;  %v2316_v8 = vor.u32 %v2881_v5, %v2313_v6  ;;  %v2985_v9 = vld [vmem:[%s4549_s1 + $0x61c] sm:$0xf]  ;;  %v2729_v10 = vld [vmem:[%s4549_s1 + $0x64c] sm:$0xf0]  ;;  %v2874_v13 = vld [vmem:[%s4549_s1 + $0x2a0] sm:$0xf0] }
   0x4   :  { %v2259_v11 = vld [vmem:[%s4549_s1 + $0x270] sm:$0xf]  ;;  %1304 = vmatpush.bf16.msra.mxu0 %v2312_v3  ;;  %v2732_v12 = vor.u32 %v2985_v9, %v2729_v10  ;;  %v2978_v15 = vld [vmem:[%s4549_s1 + $0x5e0] sm:$0xf0]  ;;  %v2868_v18 = vld [vmem:[%s4549_s1 + $0x274] sm:$0xf] }
   0x5   :  { %v2675_v14 = vld [vmem:[%s4549_s1 + $0x5b0] sm:$0xf]  ;;  %1317 = vmatpush.bf16.msra.mxu1 %v2728_v7  ;;  %1330 = vmatpush.bf16.msra.mxu2 %v2316_v8  ;;  %v2260_v16 = vor.u32 %v2874_v13, %v2259_v11  ;;  %v2261_v19 = vld [vmem:[%s4549_s1 + $0x2a4] sm:$0xf0]  ;;  %v2972_v20 = vld [vmem:[%s4549_s1 + $0x5b4] sm:$0xf] }
   0x6   :  { %v2676_v17 = vor.u32 %v2978_v15, %v2675_v14  ;;  %1343 = vmatpush.bf16.msra.mxu3 %v2732_v12  ;;  %v2264_v21 = vor.u32 %v2868_v18, %v2261_v19  ;;  %v2677_v22 = vld [vmem:[%s4549_s1 + $0x5e4] sm:$0xf0]  ;;  %v2861_v24 = vld [vmem:[%s4549_s1 + $0x238] sm:$0xf0]  ;;  %v2855_v28 = vld [vmem:[%s4549_s1 + $0x20c] sm:$0xf] }
   0x7   :  { %v2207_v23 = vld [vmem:[%s4549_s1 + $0x208] sm:$0xf]  ;;  %v2680_v25 = vor.u32 %v2972_v20, %v2677_v22  ;;  %v2965_v27 = vld [vmem:[%s4549_s1 + $0x578] sm:$0xf0]  ;;  %v2209_v30 = vld [vmem:[%s4549_s1 + $0x23c] sm:$0xf0] }
   0x8   :  { %v2623_v26 = vld [vmem:[%s4549_s1 + $0x548] sm:$0xf]  ;;  %1305 = vmatpush.bf16.msra.mxu0 %v2260_v16  ;;  %v2208_v29 = vor.u32 %v2861_v24, %v2207_v23  ;;  %v2959_v31 = vld [vmem:[%s4549_s1 + $0x54c] sm:$0xf]  ;;  %v2625_v32 = vld [vmem:[%s4549_s1 + $0x57c] sm:$0xf0]  ;;  %v2212_v34 = vor.u32 %v2855_v28, %v2209_v30 }
   0x9   :  { %1318 = vmatpush.bf16.msra.mxu1 %v2676_v17  ;;  %1331 = vmatpush.bf16.msra.mxu2 %v2264_v21  ;;  %v2624_v33 = vor.u32 %v2965_v27, %v2623_v26  ;;  %v2155_v35 = vld [vmem:[%s4549_s1 + $0x1a0] sm:$0xf]  ;;  %v2848_v36 = vld [vmem:[%s4549_s1 + $0x1d0] sm:$0xf0]  ;;  %v2628_v38 = vor.u32 %v2959_v31, %v2625_v32  ;;  %v2842_v40 = vld [vmem:[%s4549_s1 + $0x1a4] sm:$0xf] }
   0xa   :  { %v2571_v37 = vld [vmem:[%s4549_s1 + $0x4e0] sm:$0xf]  ;;  %1344 = vmatpush.bf16.msra.mxu3 %v2680_v25  ;;  %v2952_v39 = vld [vmem:[%s4549_s1 + $0x510] sm:$0xf0]  ;;  %v2157_v41 = vld [vmem:[%s4549_s1 + $0x1d4] sm:$0xf0]  ;;  %v2156_v44 = vor.u32 %v2848_v36, %v2155_v35 }
   0xb   :  { %v2946_v42 = vld [vmem:[%s4549_s1 + $0x4e4] sm:$0xf]  ;;  %v2573_v43 = vld [vmem:[%s4549_s1 + $0x514] sm:$0xf0]  ;;  %v2572_v45 = vor.u32 %v2952_v39, %v2571_v37  ;;  %v2160_v46 = vor.u32 %v2842_v40, %v2157_v41  ;;  %v2835_v48 = vld [vmem:[%s4549_s1 + $0x168] sm:$0xf0] }
   0xc   :  { %1306 = vmatpush.bf16.msra.mxu0 %v2208_v29  ;;  %v2103_v47 = vld [vmem:[%s4549_s1 + $0x138] sm:$0xf]  ;;  %v2576_v50 = vor.u32 %v2946_v42, %v2573_v43  ;;  %v2939_v51 = vld [vmem:[%s4549_s1 + $0x4a8] sm:$0xf0]  ;;  %v2829_v52 = vld [vmem:[%s4549_s1 + $0x13c] sm:$0xf] }
   0xd   :  { %1319 = vmatpush.bf16.msra.mxu1 %v2624_v33  ;;  %1332 = vmatpush.bf16.msra.mxu2 %v2212_v34  ;;  %v2519_v49 = vld [vmem:[%s4549_s1 + $0x478] sm:$0xf]  ;;  %v2105_v53 = vld [vmem:[%s4549_s1 + $0x16c] sm:$0xf0]  ;;  %v2933_v54 = vld [vmem:[%s4549_s1 + $0x47c] sm:$0xf]  ;;  %v2104_v56 = vor.u32 %v2835_v48, %v2103_v47 }
   0xe   :  { %1345 = vmatpush.bf16.msra.mxu3 %v2628_v38  ;;  %v2521_v55 = vld [vmem:[%s4549_s1 + $0x4ac] sm:$0xf0]  ;;  %v2520_v57 = vor.u32 %v2939_v51, %v2519_v49  ;;  %v2108_v58 = vor.u32 %v2829_v52, %v2105_v53  ;;  %v2822_v60 = vld [vmem:[%s4549_s1 + $0x100] sm:$0xf0]  ;;  %v2816_v0 = vld [vmem:[%s4549_s1 + $0xd4] sm:$0xf] }
   0xf   :  { %v2051_v59 = vld [vmem:[%s4549_s1 + $0xd0] sm:$0xf]  ;;  %v2524_v62 = vor.u32 %v2933_v54, %v2521_v55  ;;  %v2926_v63 = vld [vmem:[%s4549_s1 + $0x440] sm:$0xf0]  ;;  %v2053_v1 = vld [vmem:[%s4549_s1 + $0x104] sm:$0xf0] }
  0x10   :  { %1307 = vmatpush.bf16.msra.mxu0 %v2156_v44  ;;  %v2467_v61 = vld [vmem:[%s4549_s1 + $0x410] sm:$0xf]  ;;  %v2920_v2 = vld [vmem:[%s4549_s1 + $0x414] sm:$0xf]  ;;  %v2469_v3 = vld [vmem:[%s4549_s1 + $0x444] sm:$0xf0]  ;;  %v2052_v4 = vor.u32 %v2822_v60, %v2051_v59  ;;  %v2056_v6 = vor.u32 %v2816_v0, %v2053_v1 }
  0x11   :  { %1320 = vmatpush.bf16.msra.mxu1 %v2572_v45  ;;  %1333 = vmatpush.bf16.msra.mxu2 %v2160_v46  ;;  %v2468_v5 = vor.u32 %v2926_v63, %v2467_v61  ;;  %v1999_v7 = vld [vmem:[%s4549_s1 + $0x68] sm:$0xf]  ;;  %v2809_v8 = vld [vmem:[%s4549_s1 + $0x98] sm:$0xf0]  ;;  %v2472_v10 = vor.u32 %v2920_v2, %v2469_v3  ;;  %v2803_v12 = vld [vmem:[%s4549_s1 + $0x6c] sm:$0xf] }
  0x12   :  { %1346 = vmatpush.bf16.msra.mxu3 %v2576_v50  ;;  %v2415_v9 = vld [vmem:[%s4549_s1 + $0x3a8] sm:$0xf]  ;;  %v2913_v11 = vld [vmem:[%s4549_s1 + $0x3d8] sm:$0xf0]  ;;  %v2001_v13 = vld [vmem:[%s4549_s1 + $0x9c] sm:$0xf0]  ;;  %v2000_v17 = vor.u32 %v2809_v8, %v1999_v7 }
  0x13   :  { %v2907_v14 = vld [vmem:[%s4549_s1 + $0x3ac] sm:$0xf]  ;;  %v2417_v15 = vld [vmem:[%s4549_s1 + $0x3dc] sm:$0xf0]  ;;  %v2796_v18 = vld [vmem:[%s4549_s1 + $0x30] sm:$0xf0]  ;;  %v2416_v21 = vor.u32 %v2913_v11, %v2415_v9  ;;  %v2004_v22 = vor.u32 %v2803_v12, %v2001_v13 }
  0x14   :  { %1308 = vmatpush.bf16.msra.mxu0 %v2104_v56  ;;  %v1947_v16 = vld [vmem:[%s4549_s1] sm:$0xf]  ;;  %v2900_v20 = vld [vmem:[%s4549_s1 + $0x370] sm:$0xf0]  ;;  %v2790_v23 = vld [vmem:[%s4549_s1 + $0x4] sm:$0xf]  ;;  %v2420_v26 = vor.u32 %v2907_v14, %v2417_v15 }
  0x15   :  { %1321 = vmatpush.bf16.msra.mxu1 %v2520_v57  ;;  %1334 = vmatpush.bf16.msra.mxu2 %v2108_v58  ;;  %v2363_v19 = vld [vmem:[%s4549_s1 + $0x340] sm:$0xf]  ;;  %v1949_v24 = vld [vmem:[%s4549_s1 + $0x34] sm:$0xf0]  ;;  %v2888_v27 = vld [vmem:[%s4549_s1 + $0x310] sm:$0xf0]  ;;  %v1948_v33 = vor.u32 %v2796_v18, %v1947_v16 }
  0x16   :  { %1347 = vmatpush.bf16.msra.mxu3 %v2524_v62  ;;  %v2319_v25 = vld [vmem:[%s4549_s1 + $0x2e0] sm:$0xf]  ;;  %v2992_v29 = vld [vmem:[%s4549_s1 + $0x650] sm:$0xf0]  ;;  %v2882_v30 = vld [vmem:[%s4549_s1 + $0x2e4] sm:$0xf]  ;;  %v2364_v36 = vor.u32 %v2900_v20, %v2363_v19  ;;  %v1952_v37 = vor.u32 %v2790_v23, %v1949_v24 }
  0x17   :  { %v2735_v28 = vld [vmem:[%s4549_s1 + $0x620] sm:$0xf]  ;;  %v2321_v31 = vld [vmem:[%s4549_s1 + $0x314] sm:$0xf0]  ;;  %v2894_v34 = vld [vmem:[%s4549_s1 + $0x344] sm:$0xf]  ;;  %v2320_v40 = vor.u32 %v2888_v27, %v2319_v25 }
  0x18   :  { %1309 = vmatpush.bf16.msra.mxu0 %v2052_v4  ;;  %v15_v32 = vld [vmem:[%s4550_s0] sm:$0x3]  ;;  %v2365_v35 = vld [vmem:[%s4549_s1 + $0x374] sm:$0xf0]  ;;  %v2986_v38 = vld [vmem:[%s4549_s1 + $0x624] sm:$0xf]  ;;  %v2736_v41 = vor.u32 %v2992_v29, %v2735_v28  ;;  %v2324_v43 = vor.u32 %v2882_v30, %v2321_v31 }
  0x19   :  { %1322 = vmatpush.bf16.msra.mxu1 %v2468_v5  ;;  %1335 = vmatpush.bf16.msra.mxu2 %v2056_v6  ;;  %243 = vst [vmem:[#allocation1] ss:$9 sm:$0xff] %v15_v32  ;;  %v2737_v39 = vld [vmem:[%s4549_s1 + $0x654] sm:$0xf0]  ;;  %v2368_v44 = vor.u32 %v2894_v34, %v2365_v35  ;;  %v2875_v45 = vld [vmem:[%s4549_s1 + $0x2a8] sm:$0xf0] }
  0x1a   :  { %1348 = vmatpush.bf16.msra.mxu3 %v2472_v10  ;;  %v2267_v42 = vld [vmem:[%s4549_s1 + $0x278] sm:$0xf]  ;;  %v2979_v47 = vld [vmem:[%s4549_s1 + $0x5e8] sm:$0xf0]  ;;  %v2740_v48 = vor.u32 %v2986_v38, %v2737_v39  ;;  %v2869_v49 = vld [vmem:[%s4549_s1 + $0x27c] sm:$0xf] }
  0x1b   :  { %v2683_v46 = vld [vmem:[%s4549_s1 + $0x5b8] sm:$0xf]  ;;  %v2269_v50 = vld [vmem:[%s4549_s1 + $0x2ac] sm:$0xf0]  ;;  %v2973_v51 = vld [vmem:[%s4549_s1 + $0x5bc] sm:$0xf]  ;;  %v2268_v53 = vor.u32 %v2875_v45, %v2267_v42 }
  0x1c   :  { %1310 = vmatpush.bf16.msra.mxu0 %v2000_v17  ;;  %v2685_v52 = vld [vmem:[%s4549_s1 + $0x5ec] sm:$0xf0]  ;;  %v2684_v54 = vor.u32 %v2979_v47, %v2683_v46  ;;  %v2862_v56 = vld [vmem:[%s4549_s1 + $0x240] sm:$0xf0]  ;;  %v2272_v57 = vor.u32 %v2869_v49, %v2269_v50  ;;  %v2856_v62 = vld [vmem:[%s4549_s1 + $0x214] sm:$0xf] }
  0x1d   :  { %1323 = vmatpush.bf16.msra.mxu1 %v2416_v21  ;;  %1336 = vmatpush.bf16.msra.mxu2 %v2004_v22  ;;  %v2215_v55 = vld [vmem:[%s4549_s1 + $0x210] sm:$0xf]  ;;  %v2966_v60 = vld [vmem:[%s4549_s1 + $0x580] sm:$0xf0]  ;;  %v2688_v61 = vor.u32 %v2973_v51, %v2685_v52  ;;  %v2217_v63 = vld [vmem:[%s4549_s1 + $0x244] sm:$0xf0] }
  0x1e   :  { %1349 = vmatpush.bf16.msra.mxu3 %v2420_v26  ;;  %v2631_v59 = vld [vmem:[%s4549_s1 + $0x550] sm:$0xf]  ;;  %v2960_v1 = vld [vmem:[%s4549_s1 + $0x554] sm:$0xf]  ;;  %v2633_v2 = vld [vmem:[%s4549_s1 + $0x584] sm:$0xf0]  ;;  %v2216_v3 = vor.u32 %v2862_v56, %v2215_v55  ;;  %v2220_v6 = vor.u32 %v2856_v62, %v2217_v63 }
  0x1f   :  { %v2632_v4 = vor.u32 %v2966_v60, %v2631_v59  ;;  %v2163_v5 = vld [vmem:[%s4549_s1 + $0x1a8] sm:$0xf]  ;;  %v2849_v7 = vld [vmem:[%s4549_s1 + $0x1d8] sm:$0xf0]  ;;  %v2636_v10 = vor.u32 %v2960_v1, %v2633_v2  ;;  %v2843_v11 = vld [vmem:[%s4549_s1 + $0x1ac] sm:$0xf] }
  0x20   :  { %1311 = vmatpush.bf16.msra.mxu0 %v1948_v33  ;;  %v3321_v58 = vld [vmem:[#allocation1] sm:$0xff]  ;;  %v3336_v0 = vld [vmem:[#allocation1 + $0x9] sm:$0xff]  ;;  %v2953_v9 = vld [vmem:[%s4549_s1 + $0x518] sm:$0xf0]  ;;  %v2164_v15 = vor.u32 %v2849_v7, %v2163_v5 }
  0x21   :  { %1324 = vmatpush.bf16.msra.mxu1 %v2364_v36  ;;  %1337 = vmatpush.bf16.msra.mxu2 %v1952_v37  ;;  %v2579_v8 = vld [vmem:[%s4549_s1 + $0x4e8] sm:$0xf]  ;;  %v2165_v12 = vld [vmem:[%s4549_s1 + $0x1dc] sm:$0xf0]  ;;  %v2947_v13 = vld [vmem:[%s4549_s1 + $0x4ec] sm:$0xf] }
  0x22   :  { %1350 = vmatpush.bf16.msra.mxu3 %v2368_v44  ;;  %v2581_v14 = vld [vmem:[%s4549_s1 + $0x51c] sm:$0xf0]  ;;  %v2580_v16 = vor.u32 %v2953_v9, %v2579_v8  ;;  %v2168_v18 = vor.u32 %v2843_v11, %v2165_v12  ;;  %v2836_v19 = vld [vmem:[%s4549_s1 + $0x170] sm:$0xf0]  ;;  %v2830_v23 = vld [vmem:[%s4549_s1 + $0x144] sm:$0xf] }
  0x23   :  { %1312 = vmatmul.bf16.vlgmr.msra.gmra.mxu0 %v3321_v58  ;;  %v2111_v17 = vld [vmem:[%s4549_s1 + $0x140] sm:$0xf]  ;;  %v2940_v21 = vld [vmem:[%s4549_s1 + $0x4b0] sm:$0xf0]  ;;  %v2584_v22 = vor.u32 %v2947_v13, %v2581_v14  ;;  %v2113_v24 = vld [vmem:[%s4549_s1 + $0x174] sm:$0xf0] }
  0x24   :  { %1356 = vmatpush.bf16.msrb.mxu0 %v2320_v40  ;;  %1338 = vmatmul.bf16.vlgmr.msra.gmra.mxu2 %v3321_v58  ;;  %v2527_v20 = vld [vmem:[%s4549_s1 + $0x480] sm:$0xf]  ;;  %v2934_v25 = vld [vmem:[%s4549_s1 + $0x484] sm:$0xf]  ;;  %v2529_v26 = vld [vmem:[%s4549_s1 + $0x4b4] sm:$0xf0]  ;;  %v2112_v27 = vor.u32 %v2836_v19, %v2111_v17  ;;  %v2116_v30 = vor.u32 %v2830_v23, %v2113_v24 }
  0x25   :  { %1369 = vmatpush.bf16.msrb.mxu1 %v2736_v41  ;;  %1382 = vmatpush.bf16.msrb.mxu2 %v2324_v43  ;;  %v2528_v28 = vor.u32 %v2940_v21, %v2527_v20  ;;  %v2059_v29 = vld [vmem:[%s4549_s1 + $0xd8] sm:$0xf]  ;;  %v2823_v31 = vld [vmem:[%s4549_s1 + $0x108] sm:$0xf0]  ;;  %v2532_v34 = vor.u32 %v2934_v25, %v2529_v26  ;;  %v2817_v35 = vld [vmem:[%s4549_s1 + $0xdc] sm:$0xf] }
  0x26   :  { %1395 = vmatpush.bf16.msrb.mxu3 %v2740_v48  ;;  %1325 = vmatmul.bf16.vlgmr.msra.gmra.mxu1 %v3336_v0  ;;  %v2475_v32 = vld [vmem:[%s4549_s1 + $0x418] sm:$0xf]  ;;  %v2927_v33 = vld [vmem:[%s4549_s1 + $0x448] sm:$0xf0]  ;;  %v2061_v36 = vld [vmem:[%s4549_s1 + $0x10c] sm:$0xf0]  ;;  %v2060_v39 = vor.u32 %v2823_v31, %v2059_v29 }
  0x27   :  { %1351 = vmatmul.bf16.vlgmr.msra.gmra.mxu3 %v3336_v0  ;;  %v2921_v37 = vld [vmem:[%s4549_s1 + $0x41c] sm:$0xf]  ;;  %v2477_v38 = vld [vmem:[%s4549_s1 + $0x44c] sm:$0xf0]  ;;  %v2476_v40 = vor.u32 %v2927_v33, %v2475_v32  ;;  %v2064_v42 = vor.u32 %v2817_v35, %v2061_v36  ;;  %v2810_v43 = vld [vmem:[%s4549_s1 + $0xa0] sm:$0xf0] }
  0x28   :  { %1357 = vmatpush.bf16.msrb.mxu0 %v2268_v53  ;;  %v2007_v41 = vld [vmem:[%s4549_s1 + $0x70] sm:$0xf]  ;;  %v2914_v45 = vld [vmem:[%s4549_s1 + $0x3e0] sm:$0xf0]  ;;  %v2480_v46 = vor.u32 %v2921_v37, %v2477_v38  ;;  %v2804_v47 = vld [vmem:[%s4549_s1 + $0x74] sm:$0xf] }
  0x29   :  { %1370 = vmatpush.bf16.msrb.mxu1 %v2684_v54  ;;  %1383 = vmatpush.bf16.msrb.mxu2 %v2272_v57  ;;  %v2423_v44 = vld [vmem:[%s4549_s1 + $0x3b0] sm:$0xf]  ;;  %v2009_v48 = vld [vmem:[%s4549_s1 + $0xa4] sm:$0xf0]  ;;  %v2908_v49 = vld [vmem:[%s4549_s1 + $0x3b4] sm:$0xf]  ;;  %v2008_v51 = vor.u32 %v2810_v43, %v2007_v41 }
  0x2a   :  { %1396 = vmatpush.bf16.msrb.mxu3 %v2688_v61  ;;  %v2425_v50 = vld [vmem:[%s4549_s1 + $0x3e4] sm:$0xf0]  ;;  %v2424_v52 = vor.u32 %v2914_v45, %v2423_v44  ;;  %v2797_v54 = vld [vmem:[%s4549_s1 + $0x38] sm:$0xf0]  ;;  %v2012_v56 = vor.u32 %v2804_v47, %v2009_v48  ;;  %v2791_v59 = vld [vmem:[%s4549_s1 + $0xc] sm:$0xf] }
  0x2b   :  { %v1955_v53 = vld [vmem:[%s4549_s1 + $0x8] sm:$0xf]  ;;  %v2901_v57 = vld [vmem:[%s4549_s1 + $0x378] sm:$0xf0]  ;;  %v1957_v60 = vld [vmem:[%s4549_s1 + $0x3c] sm:$0xf0]  ;;  %v2428_v61 = vor.u32 %v2908_v49, %v2425_v50 }
  0x2c   :  { %1358 = vmatpush.bf16.msrb.mxu0 %v2216_v3  ;;  %v2371_v55 = vld [vmem:[%s4549_s1 + $0x348] sm:$0xf]  ;;  %v2889_v63 = vld [vmem:[%s4549_s1 + $0x318] sm:$0xf0]  ;;  %v2883_v3 = vld [vmem:[%s4549_s1 + $0x2ec] sm:$0xf]  ;;  %v1956_v5 = vor.u32 %v2797_v54, %v1955_v53  ;;  %v1960_v9 = vor.u32 %v2791_v59, %v1957_v60 }
  0x2d   :  { %1371 = vmatpush.bf16.msrb.mxu1 %v2632_v4  ;;  %1384 = vmatpush.bf16.msrb.mxu2 %v2220_v6  ;;  %v2327_v62 = vld [vmem:[%s4549_s1 + $0x2e8] sm:$0xf]  ;;  %v2993_v2 = vld [vmem:[%s4549_s1 + $0x658] sm:$0xf0]  ;;  %v2329_v4 = vld [vmem:[%s4549_s1 + $0x31c] sm:$0xf0]  ;;  %v2372_v6 = vor.u32 %v2901_v57, %v2371_v55 }
  0x2e   :  { %1397 = vmatpush.bf16.msrb.mxu3 %v2636_v10  ;;  %v2743_v1 = vld [vmem:[%s4549_s1 + $0x628] sm:$0xf]  ;;  %v2895_v7 = vld [vmem:[%s4549_s1 + $0x34c] sm:$0xf]  ;;  %v2373_v8 = vld [vmem:[%s4549_s1 + $0x37c] sm:$0xf0]  ;;  %v2328_v10 = vor.u32 %v2889_v63, %v2327_v62  ;;  %v2332_v14 = vor.u32 %v2883_v3, %v2329_v4 }
  0x2f   :  { %v2987_v11 = vld [vmem:[%s4549_s1 + $0x62c] sm:$0xf]  ;;  %v2745_v12 = vld [vmem:[%s4549_s1 + $0x65c] sm:$0xf0]  ;;  %v2744_v13 = vor.u32 %v2993_v2, %v2743_v1  ;;  %v2376_v17 = vor.u32 %v2895_v7, %v2373_v8  ;;  %v2980_v19 = vld [vmem:[%s4549_s1 + $0x5f0] sm:$0xf0] }
  0x30   :  { %1359 = vmatpush.bf16.msrb.mxu0 %v2164_v15  ;;  %v2275_v15 = vld [vmem:[%s4549_s1 + $0x280] sm:$0xf]  ;;  %v2748_v20 = vor.u32 %v2987_v11, %v2745_v12  ;;  %v2870_v21 = vld [vmem:[%s4549_s1 + $0x284] sm:$0xf]  ;;  %v2693_v25 = vld [vmem:[%s4549_s1 + $0x5f4] sm:$0xf0] }
  0x31   :  { %1372 = vmatpush.bf16.msrb.mxu1 %v2580_v16  ;;  %1385 = vmatpush.bf16.msrb.mxu2 %v2168_v18  ;;  %v2876_v16 = vld [vmem:[%s4549_s1 + $0x2b0] sm:$0xf0]  ;;  %v2691_v18 = vld [vmem:[%s4549_s1 + $0x5c0] sm:$0xf]  ;;  %v2974_v24 = vld [vmem:[%s4549_s1 + $0x5c4] sm:$0xf] }
  0x32   :  { %1398 = vmatpush.bf16.msrb.mxu3 %v2584_v22  ;;  %v2277_v22 = vld [vmem:[%s4549_s1 + $0x2b4] sm:$0xf0]  ;;  %v2276_v23 = vor.u32 %v2876_v16, %v2275_v15  ;;  %v2692_v26 = vor.u32 %v2980_v19, %v2691_v18  ;;  %v2967_v31 = vld [vmem:[%s4549_s1 + $0x588] sm:$0xf0]  ;;  %v2696_v32 = vor.u32 %v2974_v24, %v2693_v25  ;;  %v2857_v33 = vld [vmem:[%s4549_s1 + $0x21c] sm:$0xf] }
  0x33   :  { %v2280_v29 = vor.u32 %v2870_v21, %v2277_v22  ;;  %v2961_v36 = vld [vmem:[%s4549_s1 + $0x55c] sm:$0xf]  ;;  %v2641_v37 = vld [vmem:[%s4549_s1 + $0x58c] sm:$0xf0]  ;;  %v2954_v43 = vld [vmem:[%s4549_s1 + $0x520] sm:$0xf0] }
  0x34   :  { %1360 = vmatpush.bf16.msrb.mxu0 %v2112_v27  ;;  %v2223_v27 = vld [vmem:[%s4549_s1 + $0x218] sm:$0xf]  ;;  %v2644_v44 = vor.u32 %v2961_v36, %v2641_v37  ;;  %v2844_v45 = vld [vmem:[%s4549_s1 + $0x1b4] sm:$0xf]  ;;  %v2589_v49 = vld [vmem:[%s4549_s1 + $0x524] sm:$0xf0] }
  0x35   :  { %1373 = vmatpush.bf16.msrb.mxu1 %v2528_v28  ;;  %1386 = vmatpush.bf16.msrb.mxu2 %v2116_v30  ;;  %v2863_v28 = vld [vmem:[%s4549_s1 + $0x248] sm:$0xf0]  ;;  %v2639_v30 = vld [vmem:[%s4549_s1 + $0x558] sm:$0xf]  ;;  %v2948_v48 = vld [vmem:[%s4549_s1 + $0x4f4] sm:$0xf] }
  0x36   :  { %1399 = vmatpush.bf16.msrb.mxu3 %v2532_v34  ;;  %v2225_v34 = vld [vmem:[%s4549_s1 + $0x24c] sm:$0xf0]  ;;  %v2224_v35 = vor.u32 %v2863_v28, %v2223_v27  ;;  %v2640_v38 = vor.u32 %v2967_v31, %v2639_v30  ;;  %v2535_v54 = vld [vmem:[%s4549_s1 + $0x488] sm:$0xf]  ;;  %v2941_v55 = vld [vmem:[%s4549_s1 + $0x4b8] sm:$0xf0] }
  0x37   :  { %v2228_v41 = vor.u32 %v2857_v33, %v2225_v34  ;;  %v2831_v57 = vld [vmem:[%s4549_s1 + $0x14c] sm:$0xf]  ;;  %v2121_v59 = vld [vmem:[%s4549_s1 + $0x17c] sm:$0xf0]  ;;  %v2536_v63 = vor.u32 %v2941_v55, %v2535_v54  ;;  %v2824_v2 = vld [vmem:[%s4549_s1 + $0x110] sm:$0xf0] }
  0x38   :  { %1361 = vmatpush.bf16.msrb.mxu0 %v2060_v39  ;;  %v2171_v39 = vld [vmem:[%s4549_s1 + $0x1b0] sm:$0xf]  ;;  %v2537_v62 = vld [vmem:[%s4549_s1 + $0x4bc] sm:$0xf0]  ;;  %v2124_v3 = vor.u32 %v2831_v57, %v2121_v59  ;;  %v2818_v7 = vld [vmem:[%s4549_s1 + $0xe4] sm:$0xf] }
  0x39   :  { %1374 = vmatpush.bf16.msrb.mxu1 %v2476_v40  ;;  %1387 = vmatpush.bf16.msrb.mxu2 %v2064_v42  ;;  %v2850_v40 = vld [vmem:[%s4549_s1 + $0x1e0] sm:$0xf0]  ;;  %v2587_v42 = vld [vmem:[%s4549_s1 + $0x4f0] sm:$0xf]  ;;  %v2067_v1 = vld [vmem:[%s4549_s1 + $0xe0] sm:$0xf] }
  0x3a   :  { %1400 = vmatpush.bf16.msrb.mxu3 %v2480_v46  ;;  %v2173_v46 = vld [vmem:[%s4549_s1 + $0x1e4] sm:$0xf0]  ;;  %v2172_v47 = vor.u32 %v2850_v40, %v2171_v39  ;;  %v2588_v50 = vor.u32 %v2954_v43, %v2587_v42  ;;  %v2483_v4 = vld [vmem:[%s4549_s1 + $0x420] sm:$0xf]  ;;  %v2069_v8 = vld [vmem:[%s4549_s1 + $0x114] sm:$0xf0] }
  0x3b   :  { %v2176_v53 = vor.u32 %v2844_v45, %v2173_v46  ;;  %v2485_v11 = vld [vmem:[%s4549_s1 + $0x454] sm:$0xf0]  ;;  %v2072_v15 = vor.u32 %v2818_v7, %v2069_v8  ;;  %v2805_v19 = vld [vmem:[%s4549_s1 + $0x7c] sm:$0xf]  ;;  %v1963_v24 = vld [vmem:[%s4549_s1 + $0x10] sm:$0xf] }
  0x3c   :  { %1362 = vmatpush.bf16.msrb.mxu0 %v2008_v51  ;;  %v2119_v51 = vld [vmem:[%s4549_s1 + $0x148] sm:$0xf]  ;;  %v2431_v16 = vld [vmem:[%s4549_s1 + $0x3b8] sm:$0xf]  ;;  %v2909_v21 = vld [vmem:[%s4549_s1 + $0x3bc] sm:$0xf] }
  0x3d   :  { %1375 = vmatpush.bf16.msrb.mxu1 %v2424_v52  ;;  %1388 = vmatpush.bf16.msrb.mxu2 %v2012_v56  ;;  %v2837_v52 = vld [vmem:[%s4549_s1 + $0x178] sm:$0xf0]  ;;  %v2592_v56 = vor.u32 %v2948_v48, %v2589_v49  ;;  %v2798_v25 = vld [vmem:[%s4549_s1 + $0x40] sm:$0xf0]  ;;  %v2379_v27 = vld [vmem:[%s4549_s1 + $0x350] sm:$0xf] }
  0x3e   :  { %1401 = vmatpush.bf16.msrb.mxu3 %v2428_v61  ;;  %v2120_v60 = vor.u32 %v2837_v52, %v2119_v51  ;;  %v2935_v61 = vld [vmem:[%s4549_s1 + $0x48c] sm:$0xf]  ;;  %v2902_v28 = vld [vmem:[%s4549_s1 + $0x380] sm:$0xf0]  ;;  %v1965_v31 = vld [vmem:[%s4549_s1 + $0x44] sm:$0xf0] }
  0x3f   :  { %v2890_v33 = vld [vmem:[%s4549_s1 + $0x320] sm:$0xf0]  ;;  %v2884_v37 = vld [vmem:[%s4549_s1 + $0x2f4] sm:$0xf]  ;;  %v2337_v39 = vld [vmem:[%s4549_s1 + $0x324] sm:$0xf0]  ;;  %v2380_v42 = vor.u32 %v2902_v28, %v2379_v27 }
  0x40   :  { %1363 = vmatpush.bf16.msrb.mxu0 %v1956_v5  ;;  %v2928_v5 = vld [vmem:[%s4549_s1 + $0x450] sm:$0xf0]  ;;  %v2994_v36 = vld [vmem:[%s4549_s1 + $0x660] sm:$0xf0]  ;;  %v2753_v45 = vld [vmem:[%s4549_s1 + $0x664] sm:$0xf0] }
  0x41   :  { %1376 = vmatpush.bf16.msrb.mxu1 %v2372_v6  ;;  %1389 = vmatpush.bf16.msrb.mxu2 %v1960_v9  ;;  %v2540_v6 = vor.u32 %v2935_v61, %v2537_v62  ;;  %v2068_v9 = vor.u32 %v2824_v2, %v2067_v1  ;;  %v2484_v12 = vor.u32 %v2928_v5, %v2483_v4  ;;  %v2896_v40 = vld [vmem:[%s4549_s1 + $0x354] sm:$0xf]  ;;  %v2283_v48 = vld [vmem:[%s4549_s1 + $0x288] sm:$0xf]  ;;  %v2877_v49 = vld [vmem:[%s4549_s1 + $0x2b8] sm:$0xf0] }
  0x42   :  { %1402 = vmatpush.bf16.msrb.mxu3 %v2376_v17  ;;  %v2915_v17 = vld [vmem:[%s4549_s1 + $0x3e8] sm:$0xf0]  ;;  %v2699_v52 = vld [vmem:[%s4549_s1 + $0x5c8] sm:$0xf]  ;;  %v2284_v57 = vor.u32 %v2877_v49, %v2283_v48  ;;  %v2231_v62 = vld [vmem:[%s4549_s1 + $0x220] sm:$0xf] }
  0x43   :  { %1364 = vmatmul.bf16.vlgmr.msrb.gmra.mxu0 %v3321_v58  ;;  %v2871_v55 = vld [vmem:[%s4549_s1 + $0x28c] sm:$0xf]  ;;  %v2647_v2 = vld [vmem:[%s4549_s1 + $0x560] sm:$0xf]  ;;  %v2858_v5 = vld [vmem:[%s4549_s1 + $0x224] sm:$0xf] }
  0x44   :  { %1408 = vmatpush.bf16.msra.mxu0 %v2328_v10  ;;  %1390 = vmatmul.bf16.vlgmr.msrb.gmra.mxu2 %v3321_v58  ;;  %v2922_v10 = vld [vmem:[%s4549_s1 + $0x424] sm:$0xf]  ;;  %v2975_v59 = vld [vmem:[%s4549_s1 + $0x5cc] sm:$0xf]  ;;  %v2812_v48 = vld [vmem:[%s4549_s1 + $0xb0] sm:$0xf0] }
  0x45   :  { %1421 = vmatpush.bf16.msra.mxu1 %v2744_v13  ;;  %1434 = vmatpush.bf16.msra.mxu2 %v2332_v14  ;;  %v2015_v13 = vld [vmem:[%s4549_s1 + $0x78] sm:$0xf]  ;;  %v2811_v14 = vld [vmem:[%s4549_s1 + $0xa8] sm:$0xf0]  ;;  %v2488_v18 = vor.u32 %v2922_v10, %v2485_v11  ;;  %v2962_v8 = vld [vmem:[%s4549_s1 + $0x564] sm:$0xf] }
  0x46   :  { %1447 = vmatpush.bf16.msra.mxu3 %v2748_v20  ;;  %1377 = vmatmul.bf16.vlgmr.msrb.gmra.mxu1 %v3336_v0  ;;  %v2017_v20 = vld [vmem:[%s4549_s1 + $0xac] sm:$0xf0]  ;;  %v2016_v22 = vor.u32 %v2811_v14, %v2015_v13  ;;  %v2179_v11 = vld [vmem:[%s4549_s1 + $0x1b8] sm:$0xf]  ;;  %v2942_v27 = vld [vmem:[%s4549_s1 + $0x4c0] sm:$0xf0] }
  0x47   :  { %1403 = vmatmul.bf16.vlgmr.msrb.gmra.mxu3 %v3336_v0  ;;  %v2020_v30 = vor.u32 %v2805_v19, %v2017_v20  ;;  %v2595_v14 = vld [vmem:[%s4549_s1 + $0x4f8] sm:$0xf]  ;;  %v2949_v20 = vld [vmem:[%s4549_s1 + $0x4fc] sm:$0xf] }
  0x48   :  { %1409 = vmatpush.bf16.msra.mxu0 %v2276_v23  ;;  %v2433_v23 = vld [vmem:[%s4549_s1 + $0x3ec] sm:$0xf0] }
  0x49   :  { %1422 = vmatpush.bf16.msra.mxu1 %v2692_v26  ;;  %1435 = vmatpush.bf16.msra.mxu2 %v2280_v29  ;;  %v2432_v26 = vor.u32 %v2915_v17, %v2431_v16  ;;  %v2792_v29 = vld [vmem:[%s4549_s1 + $0x14] sm:$0xf]  ;;  %v2436_v34 = vor.u32 %v2909_v21, %v2433_v23  ;;  %v2845_v17 = vld [vmem:[%s4549_s1 + $0x1bc] sm:$0xf]  ;;  %v2597_v21 = vld [vmem:[%s4549_s1 + $0x52c] sm:$0xf0] }
  0x4a   :  { %1448 = vmatpush.bf16.msra.mxu3 %v2696_v32  ;;  %v2335_v32 = vld [vmem:[%s4549_s1 + $0x2f0] sm:$0xf]  ;;  %v1968_v46 = vor.u32 %v2792_v29, %v1965_v31  ;;  %v2600_v28 = vor.u32 %v2949_v20, %v2597_v21  ;;  %v2832_v29 = vld [vmem:[%s4549_s1 + $0x154] sm:$0xf]  ;;  %v2878_v21 = vld [vmem:[%s4549_s1 + $0x2c0] sm:$0xf0] }
  0x4b   :  { %v2336_v43 = vor.u32 %v2890_v33, %v2335_v32  ;;  %v2127_v23 = vld [vmem:[%s4549_s1 + $0x150] sm:$0xf]  ;;  %v2936_v32 = vld [vmem:[%s4549_s1 + $0x494] sm:$0xf]  ;;  %v2545_v33 = vld [vmem:[%s4549_s1 + $0x4c4] sm:$0xf0] }
  0x4c   :  { %1410 = vmatpush.bf16.msra.mxu0 %v2224_v35  ;;  %v2751_v35 = vld [vmem:[%s4549_s1 + $0x630] sm:$0xf] }
  0x4d   :  { %1423 = vmatpush.bf16.msra.mxu1 %v2640_v38  ;;  %1436 = vmatpush.bf16.msra.mxu2 %v2228_v41  ;;  %v1964_v38 = vor.u32 %v2798_v25, %v1963_v24  ;;  %v2381_v41 = vld [vmem:[%s4549_s1 + $0x384] sm:$0xf0]  ;;  %v2838_v24 = vld [vmem:[%s4549_s1 + $0x180] sm:$0xf0]  ;;  %v2291_v20 = vld [vmem:[%s4549_s1 + $0x290] sm:$0xf] }
  0x4e   :  { %1449 = vmatpush.bf16.msra.mxu3 %v2644_v44  ;;  %v2988_v44 = vld [vmem:[%s4549_s1 + $0x634] sm:$0xf]  ;;  %v2384_v51 = vor.u32 %v2896_v40, %v2381_v41  ;;  %v2128_v31 = vor.u32 %v2838_v24, %v2127_v23  ;;  %v2548_v40 = vor.u32 %v2936_v32, %v2545_v33  ;;  %v2819_v41 = vld [vmem:[%s4549_s1 + $0xec] sm:$0xf]  ;;  %v2707_v23 = vld [vmem:[%s4549_s1 + $0x5d0] sm:$0xf] }
  0x4f   :  { %v2756_v54 = vor.u32 %v2988_v44, %v2753_v45  ;;  %v2923_v44 = vld [vmem:[%s4549_s1 + $0x42c] sm:$0xf]  ;;  %v2493_v45 = vld [vmem:[%s4549_s1 + $0x45c] sm:$0xf0]  ;;  %v2982_v24 = vld [vmem:[%s4549_s1 + $0x600] sm:$0xf0] }
  0x50   :  { %1411 = vmatpush.bf16.msra.mxu0 %v2172_v47  ;;  %v2752_v47 = vor.u32 %v2994_v36, %v2751_v35  ;;  %v2075_v35 = vld [vmem:[%s4549_s1 + $0xe8] sm:$0xf]  ;;  %v2825_v36 = vld [vmem:[%s4549_s1 + $0x118] sm:$0xf0]  ;;  %v2708_v32 = vor.u32 %v2982_v24, %v2707_v23  ;;  %v1979_v23 = vld [vmem:[%s4549_s1 + $0x20] sm:$0xf] }
  0x51   :  { %1424 = vmatpush.bf16.msra.mxu1 %v2588_v50  ;;  %1437 = vmatpush.bf16.msra.mxu2 %v2176_v53  ;;  %v2340_v50 = vor.u32 %v2884_v37, %v2337_v39  ;;  %v2981_v53 = vld [vmem:[%s4549_s1 + $0x5f8] sm:$0xf0]  ;;  %v2239_v33 = vld [vmem:[%s4549_s1 + $0x228] sm:$0xf]  ;;  %v2807_v24 = vld [vmem:[%s4549_s1 + $0x8c] sm:$0xf] }
  0x52   :  { %1450 = vmatpush.bf16.msra.mxu3 %v2592_v56  ;;  %v2285_v56 = vld [vmem:[%s4549_s1 + $0x2bc] sm:$0xf0]  ;;  %v2700_v61 = vor.u32 %v2981_v53, %v2699_v52  ;;  %v2929_v39 = vld [vmem:[%s4549_s1 + $0x458] sm:$0xf0]  ;;  %v2496_v52 = vor.u32 %v2923_v44, %v2493_v45  ;;  %v2806_v53 = vld [vmem:[%s4549_s1 + $0x84] sm:$0xf] }
  0x53   :  { %v2288_v1 = vor.u32 %v2871_v55, %v2285_v56  ;;  %v2910_v55 = vld [vmem:[%s4549_s1 + $0x3c4] sm:$0xf]  ;;  %v2187_v45 = vld [vmem:[%s4549_s1 + $0x1c0] sm:$0xf] }
  0x54   :  { %1412 = vmatpush.bf16.msra.mxu0 %v2120_v60  ;;  %v2701_v60 = vld [vmem:[%s4549_s1 + $0x5fc] sm:$0xf0] }
  0x55   :  { %1425 = vmatpush.bf16.msra.mxu1 %v2536_v63  ;;  %1438 = vmatpush.bf16.msra.mxu2 %v2124_v3  ;;  %v2864_v63 = vld [vmem:[%s4549_s1 + $0x250] sm:$0xf0]  ;;  %v2704_v4 = vor.u32 %v2975_v59, %v2701_v60  ;;  %v1971_v59 = vld [vmem:[%s4549_s1 + $0x18] sm:$0xf]  ;;  %v2799_v60 = vld [vmem:[%s4549_s1 + $0x48] sm:$0xf0] }
  0x56   :  { %1451 = vmatpush.bf16.msra.mxu3 %v2540_v6  ;;  %v2968_v3 = vld [vmem:[%s4549_s1 + $0x590] sm:$0xf0]  ;;  %v2233_v6 = vld [vmem:[%s4549_s1 + $0x254] sm:$0xf0]  ;;  %v2232_v7 = vor.u32 %v2864_v63, %v2231_v62  ;;  %v2903_v63 = vld [vmem:[%s4549_s1 + $0x388] sm:$0xf0] }
  0x57   :  { %v2648_v10 = vor.u32 %v2968_v3, %v2647_v2  ;;  %v2236_v13 = vor.u32 %v2858_v5, %v2233_v6  ;;  %v2387_v62 = vld [vmem:[%s4549_s1 + $0x358] sm:$0xf]  ;;  %v1973_v3 = vld [vmem:[%s4549_s1 + $0x4c] sm:$0xf0]  ;;  %v2891_v5 = vld [vmem:[%s4549_s1 + $0x328] sm:$0xf0] }
  0x58   :  { %1413 = vmatpush.bf16.msra.mxu0 %v2068_v9  ;;  %v2649_v9 = vld [vmem:[%s4549_s1 + $0x594] sm:$0xf0] }
  0x59   :  { %1426 = vmatpush.bf16.msra.mxu1 %v2484_v12  ;;  %1439 = vmatpush.bf16.msra.mxu2 %v2072_v15  ;;  %v2851_v12 = vld [vmem:[%s4549_s1 + $0x1e8] sm:$0xf0]  ;;  %v2652_v16 = vor.u32 %v2962_v8, %v2649_v9  ;;  %v2897_v9 = vld [vmem:[%s4549_s1 + $0x35c] sm:$0xf] }
  0x5a   :  { %1452 = vmatpush.bf16.msra.mxu3 %v2488_v18  ;;  %v2955_v15 = vld [vmem:[%s4549_s1 + $0x528] sm:$0xf0]  ;;  %v2181_v18 = vld [vmem:[%s4549_s1 + $0x1ec] sm:$0xf0]  ;;  %v2180_v19 = vor.u32 %v2851_v12, %v2179_v11  ;;  %v2885_v12 = vld [vmem:[%s4549_s1 + $0x2fc] sm:$0xf] }
  0x5b   :  { %v2184_v25 = vor.u32 %v2845_v17, %v2181_v18  ;;  %v2995_v8 = vld [vmem:[%s4549_s1 + $0x668] sm:$0xf0]  ;;  %v2389_v11 = vld [vmem:[%s4549_s1 + $0x38c] sm:$0xf0] }
  0x5c   :  { %1414 = vmatpush.bf16.msra.mxu0 %v2016_v22  ;;  %v2596_v22 = vor.u32 %v2955_v15, %v2595_v14  ;;  %v2388_v14 = vor.u32 %v2903_v63, %v2387_v62  ;;  %v2761_v17 = vld [vmem:[%s4549_s1 + $0x66c] sm:$0xf0]  ;;  %v2833_v62 = vld [vmem:[%s4549_s1 + $0x15c] sm:$0xf] }
  0x5d   :  { %1427 = vmatpush.bf16.msra.mxu1 %v2432_v26  ;;  %1440 = vmatpush.bf16.msra.mxu2 %v2020_v30  ;;  %v2543_v26 = vld [vmem:[%s4549_s1 + $0x490] sm:$0xf]  ;;  %v2129_v30 = vld [vmem:[%s4549_s1 + $0x184] sm:$0xf0] }
  0x5e   :  { %1453 = vmatpush.bf16.msra.mxu3 %v2436_v34  ;;  %v2544_v34 = vor.u32 %v2942_v27, %v2543_v26  ;;  %v2132_v37 = vor.u32 %v2832_v29, %v2129_v30  ;;  %v2872_v27 = vld [vmem:[%s4549_s1 + $0x294] sm:$0xf]  ;;  %v2292_v29 = vor.u32 %v2878_v21, %v2291_v20  ;;  %v2137_v63 = vld [vmem:[%s4549_s1 + $0x18c] sm:$0xf0]  ;;  %v2917_v20 = vld [vmem:[%s4549_s1 + $0x3f8] sm:$0xf0] }
  0x5f   :  { %v2976_v30 = vld [vmem:[%s4549_s1 + $0x5d4] sm:$0xf] }
  0x60   :  { %1415 = vmatpush.bf16.msra.mxu0 %v1964_v38  ;;  %v2491_v38 = vld [vmem:[%s4549_s1 + $0x428] sm:$0xf] }
  0x61   :  { %1428 = vmatpush.bf16.msra.mxu1 %v2380_v42  ;;  %1441 = vmatpush.bf16.msra.mxu2 %v1968_v46  ;;  %v2077_v42 = vld [vmem:[%s4549_s1 + $0x11c] sm:$0xf0]  ;;  %v2492_v46 = vor.u32 %v2929_v39, %v2491_v38  ;;  %v2859_v39 = vld [vmem:[%s4549_s1 + $0x22c] sm:$0xf] }
  0x62   :  { %1454 = vmatpush.bf16.msra.mxu3 %v2384_v51  ;;  %v2080_v49 = vor.u32 %v2819_v41, %v2077_v42  ;;  %v2916_v51 = vld [vmem:[%s4549_s1 + $0x3f0] sm:$0xf0]  ;;  %v2963_v42 = vld [vmem:[%s4549_s1 + $0x56c] sm:$0xf] }
  0x63   :  { %1416 = vmatmul.bf16.vlgmr.msra.gmra.mxu0 %v3321_v58 }
  0x64   :  { %1460 = vmatpush.bf16.msrb.mxu0 %v2336_v43  ;;  %1442 = vmatmul.bf16.vlgmr.msra.gmra.mxu2 %v3321_v58  ;;  %v2076_v43 = vor.u32 %v2825_v36, %v2075_v35  ;;  %v2655_v35 = vld [vmem:[%s4549_s1 + $0x568] sm:$0xf]  ;;  %v2969_v36 = vld [vmem:[%s4549_s1 + $0x598] sm:$0xf0] }
  0x65   :  { %1473 = vmatpush.bf16.msrb.mxu1 %v2752_v47  ;;  %1486 = vmatpush.bf16.msrb.mxu2 %v2340_v50  ;;  %v2023_v47 = vld [vmem:[%s4549_s1 + $0x80] sm:$0xf]  ;;  %v2656_v44 = vor.u32 %v2969_v36, %v2655_v35  ;;  %v2892_v35 = vld [vmem:[%s4549_s1 + $0x330] sm:$0xf0] }
  0x66   :  { %1499 = vmatpush.bf16.msrb.mxu3 %v2756_v54  ;;  %1429 = vmatmul.bf16.vlgmr.msra.gmra.mxu1 %v3336_v0  ;;  %v2439_v50 = vld [vmem:[%s4549_s1 + $0x3c0] sm:$0xf]  ;;  %v2025_v54 = vld [vmem:[%s4549_s1 + $0xb4] sm:$0xf0]  ;;  %v2024_v56 = vor.u32 %v2812_v48, %v2023_v47  ;;  %v2956_v47 = vld [vmem:[%s4549_s1 + $0x530] sm:$0xf0] }
  0x67   :  { %1455 = vmatmul.bf16.vlgmr.msra.gmra.mxu3 %v3336_v0  ;;  %v2028_v2 = vor.u32 %v2806_v53, %v2025_v54  ;;  %v2605_v53 = vld [vmem:[%s4549_s1 + $0x534] sm:$0xf0]  ;;  %v2767_v36 = vld [vmem:[%s4549_s1 + $0x640] sm:$0xf] }
  0x68   :  { %1461 = vmatpush.bf16.msrb.mxu0 %v2284_v57  ;;  %v2441_v57 = vld [vmem:[%s4549_s1 + $0x3f4] sm:$0xf0] }
  0x69   :  { %1474 = vmatpush.bf16.msrb.mxu1 %v2700_v61  ;;  %1487 = vmatpush.bf16.msrb.mxu2 %v2288_v1  ;;  %v2440_v61 = vor.u32 %v2916_v51, %v2439_v50  ;;  %v2793_v1 = vld [vmem:[%s4549_s1 + $0x1c] sm:$0xf]  ;;  %v2444_v6 = vor.u32 %v2910_v55, %v2441_v57  ;;  %v2846_v50 = vld [vmem:[%s4549_s1 + $0x1c4] sm:$0xf]  ;;  %v2189_v51 = vld [vmem:[%s4549_s1 + $0x1f4] sm:$0xf0] }
  0x6a   :  { %1500 = vmatpush.bf16.msrb.mxu3 %v2704_v4  ;;  %v2343_v4 = vld [vmem:[%s4549_s1 + $0x2f8] sm:$0xf]  ;;  %v1976_v18 = vor.u32 %v2793_v1, %v1973_v3  ;;  %v2553_v3 = vld [vmem:[%s4549_s1 + $0x4cc] sm:$0xf0] }
  0x6b   :  { %v2344_v15 = vor.u32 %v2891_v5, %v2343_v4  ;;  %v2135_v55 = vld [vmem:[%s4549_s1 + $0x158] sm:$0xf]  ;;  %v2083_v5 = vld [vmem:[%s4549_s1 + $0xf0] sm:$0xf] }
  0x6c   :  { %1462 = vmatpush.bf16.msrb.mxu0 %v2232_v7  ;;  %v2759_v7 = vld [vmem:[%s4549_s1 + $0x638] sm:$0xf] }
  0x6d   :  { %1475 = vmatpush.bf16.msrb.mxu1 %v2648_v10  ;;  %1488 = vmatpush.bf16.msrb.mxu2 %v2236_v13  ;;  %v1972_v10 = vor.u32 %v2799_v60, %v1971_v59  ;;  %v2345_v13 = vld [vmem:[%s4549_s1 + $0x32c] sm:$0xf0]  ;;  %v2551_v57 = vld [vmem:[%s4549_s1 + $0x498] sm:$0xf]  ;;  %v2943_v59 = vld [vmem:[%s4549_s1 + $0x4c8] sm:$0xf0]  ;;  %v2192_v60 = vor.u32 %v2846_v50, %v2189_v51 }
  0x6e   :  { %1501 = vmatpush.bf16.msrb.mxu3 %v2652_v16  ;;  %v2989_v16 = vld [vmem:[%s4549_s1 + $0x63c] sm:$0xf]  ;;  %v2552_v4 = vor.u32 %v2943_v59, %v2551_v57  ;;  %v2299_v51 = vld [vmem:[%s4549_s1 + $0x298] sm:$0xf]  ;;  %v2301_v59 = vld [vmem:[%s4549_s1 + $0x2cc] sm:$0xf0] }
  0x6f   :  { %v2764_v26 = vor.u32 %v2989_v16, %v2761_v17  ;;  %v2031_v17 = vld [vmem:[%s4549_s1 + $0x88] sm:$0xf]  ;;  %v2873_v57 = vld [vmem:[%s4549_s1 + $0x29c] sm:$0xf] }
  0x70   :  { %1463 = vmatpush.bf16.msrb.mxu0 %v2180_v19  ;;  %v2760_v19 = vor.u32 %v2995_v8, %v2759_v7  ;;  %v2499_v7 = vld [vmem:[%s4549_s1 + $0x430] sm:$0xf]  ;;  %v2930_v8 = vld [vmem:[%s4549_s1 + $0x460] sm:$0xf0] }
  0x71   :  { %1476 = vmatpush.bf16.msrb.mxu1 %v2596_v22  ;;  %1489 = vmatpush.bf16.msrb.mxu2 %v2184_v25  ;;  %v2392_v22 = vor.u32 %v2897_v9, %v2389_v11  ;;  %v2348_v25 = vor.u32 %v2885_v12, %v2345_v13  ;;  %v2140_v9 = vor.u32 %v2833_v62, %v2137_v63  ;;  %v2820_v11 = vld [vmem:[%s4549_s1 + $0xf4] sm:$0xf]  ;;  %v2085_v12 = vld [vmem:[%s4549_s1 + $0x124] sm:$0xf0]  ;;  %v2717_v62 = vld [vmem:[%s4549_s1 + $0x60c] sm:$0xf0] }
  0x72   :  { %1502 = vmatpush.bf16.msrb.mxu3 %v2600_v28  ;;  %v2293_v28 = vld [vmem:[%s4549_s1 + $0x2c4] sm:$0xf0]  ;;  %v2500_v16 = vor.u32 %v2930_v8, %v2499_v7  ;;  %v2088_v21 = vor.u32 %v2820_v11, %v2085_v12  ;;  %v2860_v8 = vld [vmem:[%s4549_s1 + $0x234] sm:$0xf] }
  0x73   :  { %v2964_v11 = vld [vmem:[%s4549_s1 + $0x574] sm:$0xf]  ;;  %v2665_v12 = vld [vmem:[%s4549_s1 + $0x5a4] sm:$0xf0] }
  0x74   :  { %1464 = vmatpush.bf16.msrb.mxu0 %v2128_v31  ;;  %v2709_v31 = vld [vmem:[%s4549_s1 + $0x604] sm:$0xf0] }
  0x75   :  { %1477 = vmatpush.bf16.msrb.mxu1 %v2544_v34  ;;  %1490 = vmatpush.bf16.msrb.mxu2 %v2132_v37  ;;  %v2865_v34 = vld [vmem:[%s4549_s1 + $0x258] sm:$0xf0]  ;;  %v2296_v37 = vor.u32 %v2872_v27, %v2293_v28  ;;  %v2712_v38 = vor.u32 %v2976_v30, %v2709_v31  ;;  %v2800_v27 = vld [vmem:[%s4549_s1 + $0x50] sm:$0xf0]  ;;  %v2911_v28 = vld [vmem:[%s4549_s1 + $0x3cc] sm:$0xf] }
  0x76   :  { %1503 = vmatpush.bf16.msrb.mxu3 %v2548_v40  ;;  %v2241_v40 = vld [vmem:[%s4549_s1 + $0x25c] sm:$0xf0]  ;;  %v2240_v41 = vor.u32 %v2865_v34, %v2239_v33 }
  0x77   :  { %v2244_v48 = vor.u32 %v2859_v39, %v2241_v40  ;;  %v2395_v31 = vld [vmem:[%s4549_s1 + $0x360] sm:$0xf]  ;;  %v2794_v39 = vld [vmem:[%s4549_s1 + $0x24] sm:$0xf]  ;;  %v1981_v40 = vld [vmem:[%s4549_s1 + $0x54] sm:$0xf0] }
  0x78   :  { %1465 = vmatpush.bf16.msrb.mxu0 %v2076_v43  ;;  %v2657_v43 = vld [vmem:[%s4549_s1 + $0x59c] sm:$0xf0]  ;;  %v1984_v50 = vor.u32 %v2794_v39, %v1981_v40  ;;  %v2938_v39 = vld [vmem:[%s4549_s1 + $0x4a4] sm:$0xf]  ;;  %v2561_v40 = vld [vmem:[%s4549_s1 + $0x4d4] sm:$0xf0] }
  0x79   :  { %1478 = vmatpush.bf16.msrb.mxu1 %v2492_v46  ;;  %1491 = vmatpush.bf16.msrb.mxu2 %v2080_v49  ;;  %v2603_v46 = vld [vmem:[%s4549_s1 + $0x500] sm:$0xf]  ;;  %v2660_v49 = vor.u32 %v2963_v42, %v2657_v43  ;;  %v1980_v42 = vor.u32 %v2800_v27, %v1979_v23  ;;  %v2397_v43 = vld [vmem:[%s4549_s1 + $0x394] sm:$0xf0] }
  0x7a   :  { %1504 = vmatpush.bf16.msrb.mxu3 %v2496_v52  ;;  %v2950_v52 = vld [vmem:[%s4549_s1 + $0x504] sm:$0xf]  ;;  %v2604_v54 = vor.u32 %v2956_v47, %v2603_v46  ;;  %v2351_v33 = vld [vmem:[%s4549_s1 + $0x300] sm:$0xf] }
  0x7b   :  { %v2352_v46 = vor.u32 %v2892_v35, %v2351_v33  ;;  %v2990_v47 = vld [vmem:[%s4549_s1 + $0x644] sm:$0xf]  ;;  %v2143_v27 = vld [vmem:[%s4549_s1 + $0x160] sm:$0xf] }
  0x7c   :  { %1466 = vmatpush.bf16.msrb.mxu0 %v2024_v56  ;;  %v2839_v56 = vld [vmem:[%s4549_s1 + $0x188] sm:$0xf0]  ;;  %v2834_v33 = vld [vmem:[%s4549_s1 + $0x164] sm:$0xf] }
  0x7d   :  { %1479 = vmatpush.bf16.msrb.mxu1 %v2440_v61  ;;  %1492 = vmatpush.bf16.msrb.mxu2 %v2028_v2  ;;  %v2608_v61 = vor.u32 %v2950_v52, %v2605_v53  ;;  %v2136_v1 = vor.u32 %v2839_v56, %v2135_v55  ;;  %v2937_v2 = vld [vmem:[%s4549_s1 + $0x49c] sm:$0xf]  ;;  %v2715_v52 = vld [vmem:[%s4549_s1 + $0x5d8] sm:$0xf]  ;;  %v2983_v53 = vld [vmem:[%s4549_s1 + $0x608] sm:$0xf0] }
  0x7e   :  { %1505 = vmatpush.bf16.msrb.mxu3 %v2444_v6  ;;  %v2826_v6 = vld [vmem:[%s4549_s1 + $0x120] sm:$0xf0]  ;;  %v2716_v63 = vor.u32 %v2983_v53, %v2715_v52  ;;  %v2509_v52 = vld [vmem:[%s4549_s1 + $0x46c] sm:$0xf0] }
  0x7f   :  { %v2084_v13 = vor.u32 %v2826_v6, %v2083_v5  ;;  %v2304_v5 = vor.u32 %v2873_v57, %v2301_v59  ;;  %v4115_v6 = vld [vmem:[#allocation1] sm:$0xff] }
  0x80   :  { %1467 = vmatpush.bf16.msrb.mxu0 %v1972_v10  ;;  %v2556_v10 = vor.u32 %v2937_v2, %v2553_v3  ;;  %v2866_v2 = vld [vmem:[%s4549_s1 + $0x260] sm:$0xf0]  ;;  %v2663_v3 = vld [vmem:[%s4549_s1 + $0x570] sm:$0xf] }
  0x81   :  { %1480 = vmatpush.bf16.msrb.mxu1 %v2388_v14  ;;  %1493 = vmatpush.bf16.msrb.mxu2 %v1976_v18  ;;  %v2924_v14 = vld [vmem:[%s4549_s1 + $0x434] sm:$0xf]  ;;  %v2813_v18 = vld [vmem:[%s4549_s1 + $0xb8] sm:$0xf0] }
  0x82   :  { %1506 = vmatpush.bf16.msrb.mxu3 %v2392_v22 }
  0x83   :  { %1468 = vmatmul.bf16.vlgmr.msrb.gmra.mxu0 %v3321_v58 }
  0x84   :  { %1512 = vmatpush.bf16.msra.mxu0 %v2344_v15  ;;  %1494 = vmatmul.bf16.vlgmr.msrb.gmra.mxu2 %v3321_v58  ;;  %v2852_v58 = vld [vmem:[%s4549_s1 + $0x1f0] sm:$0xf0]  ;;  %v2501_v15 = vld [vmem:[%s4549_s1 + $0x464] sm:$0xf0] }
  0x85   :  { %1525 = vmatpush.bf16.msra.mxu1 %v2760_v19  ;;  %1538 = vmatpush.bf16.msra.mxu2 %v2348_v25  ;;  %v2447_v19 = vld [vmem:[%s4549_s1 + $0x3c8] sm:$0xf]  ;;  %v2504_v22 = vor.u32 %v2924_v14, %v2501_v15  ;;  %v2033_v25 = vld [vmem:[%s4549_s1 + $0xbc] sm:$0xf0] }
  0x86   :  { %1551 = vmatpush.bf16.msra.mxu3 %v2764_v26  ;;  %1481 = vmatmul.bf16.vlgmr.msrb.gmra.mxu1 %v3336_v0  ;;  %v2032_v26 = vor.u32 %v2813_v18, %v2031_v17  ;;  %v2448_v30 = vor.u32 %v2917_v20, %v2447_v19  ;;  %v2036_v34 = vor.u32 %v2807_v24, %v2033_v25  ;;  %v4131_v14 = vld [vmem:[#allocation1 + $0x9] sm:$0xff]  ;;  %v2957_v18 = vld [vmem:[%s4549_s1 + $0x538] sm:$0xf0]  ;;  %v2613_v25 = vld [vmem:[%s4549_s1 + $0x53c] sm:$0xf0] }
  0x87   :  { %1507 = vmatmul.bf16.vlgmr.msrb.gmra.mxu3 %v3336_v0  ;;  %v2188_v0 = vor.u32 %v2852_v58, %v2187_v45  ;;  %v2353_v45 = vld [vmem:[%s4549_s1 + $0x334] sm:$0xf0]  ;;  %v2195_v15 = vld [vmem:[%s4549_s1 + $0x1c8] sm:$0xf]  ;;  %v2668_v20 = vor.u32 %v2964_v11, %v2665_v12  ;;  %v2951_v24 = vld [vmem:[%s4549_s1 + $0x50c] sm:$0xf] }
  0x88   :  { %1513 = vmatpush.bf16.msra.mxu0 %v2292_v29  ;;  %v2449_v29 = vld [vmem:[%s4549_s1 + $0x3fc] sm:$0xf0]  ;;  %v2611_v17 = vld [vmem:[%s4549_s1 + $0x508] sm:$0xf] }
  0x89   :  { %1526 = vmatpush.bf16.msra.mxu1 %v2708_v32  ;;  %1539 = vmatpush.bf16.msra.mxu2 %v2296_v37  ;;  %v2904_v32 = vld [vmem:[%s4549_s1 + $0x390] sm:$0xf0] }
  0x8a   :  { %1552 = vmatpush.bf16.msra.mxu3 %v2712_v38  ;;  %v2996_v37 = vld [vmem:[%s4549_s1 + $0x670] sm:$0xf0]  ;;  %v2452_v38 = vor.u32 %v2911_v28, %v2449_v29  ;;  %v2396_v58 = vor.u32 %v2904_v32, %v2395_v31  ;;  %v2559_v29 = vld [vmem:[%s4549_s1 + $0x4a0] sm:$0xf]  ;;  %v2616_v32 = vor.u32 %v2951_v24, %v2613_v25  ;;  %v2795_v24 = vld [vmem:[%s4549_s1 + $0x2c] sm:$0xf] }
  0x8b   :  { %v2840_v28 = vld [vmem:[%s4549_s1 + $0x190] sm:$0xf0]  ;;  %v1989_v25 = vld [vmem:[%s4549_s1 + $0x5c] sm:$0xf0] }
  0x8c   :  { %1514 = vmatpush.bf16.msra.mxu0 %v2240_v41  ;;  %v2898_v41 = vld [vmem:[%s4549_s1 + $0x364] sm:$0xf]  ;;  %v2144_v35 = vor.u32 %v2840_v28, %v2143_v27  ;;  %v2899_v27 = vld [vmem:[%s4549_s1 + $0x36c] sm:$0xf]  ;;  %v2405_v28 = vld [vmem:[%s4549_s1 + $0x39c] sm:$0xf0] }
  0x8d   :  { %1527 = vmatpush.bf16.msra.mxu1 %v2656_v44  ;;  %1540 = vmatpush.bf16.msra.mxu2 %v2244_v48  ;;  %v2886_v44 = vld [vmem:[%s4549_s1 + $0x304] sm:$0xf]  ;;  %v2769_v48 = vld [vmem:[%s4549_s1 + $0x674] sm:$0xf0] }
  0x8e   :  { %1553 = vmatpush.bf16.msra.mxu3 %v2660_v49  ;;  %v2768_v49 = vor.u32 %v2996_v37, %v2767_v36  ;;  %v2356_v55 = vor.u32 %v2886_v44, %v2353_v45  ;;  %v2772_v56 = vor.u32 %v2990_v47, %v2769_v48  ;;  %v4180_v36 = vstv %s4551_s2  ;;  %v2507_v45 = vld [vmem:[%s4549_s1 + $0x438] sm:$0xf] }
  0x8f   :  { %v2564_v48 = vor.u32 %v2938_v39, %v2561_v40  ;;  %v2723_v39 = vld [vmem:[%s4549_s1 + $0x5e0] sm:$0xf]  ;;  %v2984_v40 = vld [vmem:[%s4549_s1 + $0x610] sm:$0xf0] }
  0x90   :  { %1515 = vmatpush.bf16.msra.mxu0 %v2188_v0  ;;  %v2879_v0 = vld [vmem:[%s4549_s1 + $0x2c8] sm:$0xf0] }
  0x91   :  { %1528 = vmatpush.bf16.msra.mxu1 %v2604_v54  ;;  %1541 = vmatpush.bf16.msra.mxu2 %v2192_v60  ;;  %v2400_v54 = vor.u32 %v2898_v41, %v2397_v43  ;;  %v2300_v60 = vor.u32 %v2879_v0, %v2299_v51  ;;  %v2827_v43 = vld [vmem:[%s4549_s1 + $0x128] sm:$0xf0]  ;;  %v2925_v0 = vld [vmem:[%s4549_s1 + $0x43c] sm:$0xf] }
  0x92   :  { %1554 = vmatpush.bf16.msra.mxu3 %v2608_v61  ;;  %v2977_v61 = vld [vmem:[%s4549_s1 + $0x5dc] sm:$0xf] }
  0x93   :  { %v2720_v7 = vor.u32 %v2977_v61, %v2717_v62  ;;  %v2918_v61 = vld [vmem:[%s4549_s1 + $0x400] sm:$0xf0] }
  0x94   :  { %1516 = vmatpush.bf16.msra.mxu0 %v2136_v1  ;;  %v2247_v1 = vld [vmem:[%s4549_s1 + $0x230] sm:$0xf] }
  0x95   :  { %1529 = vmatpush.bf16.msra.mxu1 %v2552_v4  ;;  %1542 = vmatpush.bf16.msra.mxu2 %v2140_v9  ;;  %v2970_v4 = vld [vmem:[%s4549_s1 + $0x5a0] sm:$0xf0]  ;;  %v2249_v9 = vld [vmem:[%s4549_s1 + $0x264] sm:$0xf0] }
  0x96   :  { %1555 = vmatpush.bf16.msra.mxu3 %v2556_v10  ;;  %v2248_v10 = vor.u32 %v2866_v2, %v2247_v1  ;;  %v2252_v19 = vor.u32 %v2860_v8, %v2249_v9  ;;  %v2512_v1 = vor.u32 %v2925_v0, %v2509_v52  ;;  %v2808_v2 = vld [vmem:[%s4549_s1 + $0x94] sm:$0xf]  ;;  %v2457_v9 = vld [vmem:[%s4549_s1 + $0x404] sm:$0xf0]  ;;  %v2203_v52 = vld [vmem:[%s4549_s1 + $0x1d0] sm:$0xf] }
  0x97   :  { %v2912_v8 = vld [vmem:[%s4549_s1 + $0x3d4] sm:$0xf] }
  0x98   :  { %1517 = vmatpush.bf16.msra.mxu0 %v2084_v13  ;;  %v2664_v13 = vor.u32 %v2970_v4, %v2663_v3  ;;  %v2041_v3 = vld [vmem:[%s4549_s1 + $0xc4] sm:$0xf0] }
  0x99   :  { %1530 = vmatpush.bf16.msra.mxu1 %v2500_v16  ;;  %1543 = vmatpush.bf16.msra.mxu2 %v2088_v21  ;;  %v2853_v16 = vld [vmem:[%s4549_s1 + $0x1f8] sm:$0xf0]  ;;  %v2847_v21 = vld [vmem:[%s4549_s1 + $0x1cc] sm:$0xf] }
  0x9a   :  { %1556 = vmatpush.bf16.msra.mxu3 %v2504_v22  ;;  %v2197_v22 = vld [vmem:[%s4549_s1 + $0x1fc] sm:$0xf0]  ;;  %v2196_v23 = vor.u32 %v2853_v16, %v2195_v15  ;;  %v2905_v15 = vld [vmem:[%s4549_s1 + $0x398] sm:$0xf0]  ;;  %v2359_v16 = vld [vmem:[%s4549_s1 + $0x308] sm:$0xf] }
  0x9b   :  { %v2200_v31 = vor.u32 %v2847_v21, %v2197_v22  ;;  %v2044_v21 = vor.u32 %v2808_v2, %v2041_v3 }
  0x9c   :  { %1518 = vmatpush.bf16.msra.mxu0 %v2032_v26  ;;  %v2612_v26 = vor.u32 %v2957_v18, %v2611_v17  ;;  %v2893_v18 = vld [vmem:[%s4549_s1 + $0x338] sm:$0xf0] }
  0x9d   :  { %1531 = vmatpush.bf16.msra.mxu1 %v2448_v30  ;;  %1544 = vmatpush.bf16.msra.mxu2 %v2036_v34  ;;  %v2944_v30 = vld [vmem:[%s4549_s1 + $0x4d0] sm:$0xf0]  ;;  %v2145_v34 = vld [vmem:[%s4549_s1 + $0x194] sm:$0xf0] }
  0x9e   :  { %1557 = vmatpush.bf16.msra.mxu3 %v2452_v38  ;;  %v2560_v41 = vor.u32 %v2944_v30, %v2559_v29 }
  0xa0   :  { %1519 = vmatpush.bf16.msra.mxu0 %v1980_v42  ;;  %v1313_v37 = vpop.f32.mrf.mxu0  ;;  %v2091_v42 = vld [vmem:[%s4549_s1 + $0xf8] sm:$0xf] }
  0xa1   :  { %1532 = vmatpush.bf16.msra.mxu1 %v2396_v58  ;;  %1545 = vmatpush.bf16.msra.mxu2 %v1984_v50  ;;  %v1314_v44 = vadd.f32 %v1313_v37, %v4180_v36  ;;  %v2931_v58 = vld [vmem:[%s4549_s1 + $0x468] sm:$0xf0]  ;;  %v2093_v50 = vld [vmem:[%s4549_s1 + $0x12c] sm:$0xf0]  ;;  %v2092_v51 = vor.u32 %v2827_v43, %v2091_v42  ;;  %v2880_v37 = vld [vmem:[%s4549_s1 + $0x2d0] sm:$0xf0] }
  0xa2   :  { %1558 = vmatpush.bf16.msra.mxu3 %v2400_v54  ;;  %v2508_v53 = vor.u32 %v2931_v58, %v2507_v45  ;;  %v2255_v45 = vld [vmem:[%s4549_s1 + $0x238] sm:$0xf]  ;;  %v2867_v58 = vld [vmem:[%s4549_s1 + $0x268] sm:$0xf0] }
  0xa3   :  { %1520 = vmatmul.bf16.vlgmr.msra.gmra.mxu0 %v4115_v6  ;;  %v1326_v38 = vpop.f32.mrf.mxu1 }
  0xa4   :  { %1564 = vmatpush.bf16.msrb.mxu0 %v2352_v46  ;;  %1546 = vmatmul.bf16.vlgmr.msra.gmra.mxu2 %v4115_v6  ;;  %v2148_v46 = vor.u32 %v2834_v33, %v2145_v34  ;;  %v1327_v47 = vadd.f32 %v1326_v38, %v1314_v44  ;;  %v1992_v38 = vor.u32 %v2795_v24, %v1989_v25 }
  0xa5   :  { %1577 = vmatpush.bf16.msrb.mxu1 %v2768_v49  ;;  %1590 = vmatpush.bf16.msrb.mxu2 %v2356_v55  ;;  %v2821_v49 = vld [vmem:[%s4549_s1 + $0xfc] sm:$0xf]  ;;  %v2039_v55 = vld [vmem:[%s4549_s1 + $0x90] sm:$0xf]  ;;  %v2724_v44 = vor.u32 %v2984_v40, %v2723_v39  ;;  %v2919_v39 = vld [vmem:[%s4549_s1 + $0x408] sm:$0xf0] }
  0xa6   :  { %1603 = vmatpush.bf16.msrb.mxu3 %v2772_v56  ;;  %1533 = vmatmul.bf16.vlgmr.msra.gmra.mxu1 %v4131_v14  ;;  %v2814_v56 = vld [vmem:[%s4549_s1 + $0xc0] sm:$0xf0]  ;;  %v2777_v57 = vmul.f32 -1.442695, %v1327_v47  ;;  %v2096_v62 = vor.u32 %v2821_v49, %v2093_v50  ;;  %v2671_v47 = vld [vmem:[%s4549_s1 + $0x578] sm:$0xf]  ;;  %v2256_v50 = vor.u32 %v2867_v58, %v2255_v45 }
  0xa7   :  { %1559 = vmatmul.bf16.vlgmr.msra.gmra.mxu3 %v4131_v14  ;;  %v1339_v54 = vpop.f32.mrf.mxu2  ;;  %v2040_v4 = vor.u32 %v2814_v56, %v2039_v55  ;;  %v2619_v55 = vld [vmem:[%s4549_s1 + $0x510] sm:$0xf]  ;;  %v2958_v56 = vld [vmem:[%s4549_s1 + $0x540] sm:$0xf0] }
  0xa8   :  { %1565 = vmatpush.bf16.msrb.mxu0 %v2300_v60  ;;  %v1340_v59 = vadd.f32 %v1339_v54, %v4180_v36  ;;  %v2455_v60 = vld [vmem:[%s4549_s1 + $0x3d0] sm:$0xf]  ;;  %2998 = vpow2.f32 %v2777_v57  ;;  %v2151_v57 = vld [vmem:[%s4549_s1 + $0x168] sm:$0xf] }
  0xa9   :  { %1578 = vmatpush.bf16.msrb.mxu1 %v2716_v63  ;;  %1591 = vmatpush.bf16.msrb.mxu2 %v2304_v5  ;;  %v1987_v63 = vld [vmem:[%s4549_s1 + $0x28] sm:$0xf]  ;;  %v2456_v11 = vor.u32 %v2918_v61, %v2455_v60 }
  0xaa   :  { %1604 = vmatpush.bf16.msrb.mxu3 %v2720_v7  ;;  %v1352_v5 = vpop.f32.mrf.mxu3  ;;  %v2801_v7 = vld [vmem:[%s4549_s1 + $0x58] sm:$0xf0] }
  0xab   :  { %v1353_v12 = vadd.f32 %v1352_v5, %v1340_v59  ;;  %v1328_v17 = vpop.f32.mrf.mxu1  ;;  %v2841_v59 = vld [vmem:[%s4549_s1 + $0x198] sm:$0xf0] }
  0xac   :  { %1566 = vmatpush.bf16.msrb.mxu0 %v2248_v10  ;;  %v1315_v10 = vpop.f32.mrf.mxu0  ;;  %v2828_v17 = vld [vmem:[%s4549_s1 + $0x130] sm:$0xf0] }
  0xad   :  { %1579 = vmatpush.bf16.msrb.mxu1 %v2664_v13  ;;  %1592 = vmatpush.bf16.msrb.mxu2 %v2252_v19  ;;  %v2403_v13 = vld [vmem:[%s4549_s1 + $0x368] sm:$0xf]  ;;  %v2778_v22 = vmul.f32 -1.442695, %v1353_v12 }
  0xae   :  { %1605 = vmatpush.bf16.msrb.mxu3 %v2668_v20  ;;  %v2775_v19 = vld [vmem:[%s4549_s1 + $0x648] sm:$0xf]  ;;  %v2997_v20 = vld [vmem:[%s4549_s1 + $0x678] sm:$0xf0]  ;;  %v2999_v29 = vpop.eup %2998  ;;  %v2404_v30 = vor.u32 %v2905_v15, %v2403_v13 }
  0xaf   :  { %3000 = vpow2.f32 %v2778_v22  ;;  %v4274_v33 = vadd.f32 1.0, %v2999_v29  ;;  %v2776_v34 = vor.u32 %v2997_v20, %v2775_v19  ;;  %v2932_v22 = vld [vmem:[%s4549_s1 + $0x470] sm:$0xf0] }
  0xb0   :  { %1567 = vmatpush.bf16.msrb.mxu0 %v2196_v23  ;;  %v2460_v23 = vor.u32 %v2912_v8, %v2457_v9 }
  0xb1   :  { %1580 = vmatpush.bf16.msrb.mxu1 %v2612_v26  ;;  %1593 = vmatpush.bf16.msrb.mxu2 %v2200_v31  ;;  %v1988_v26 = vor.u32 %v2801_v7, %v1987_v63  ;;  %v2360_v31 = vor.u32 %v2893_v18, %v2359_v16  ;;  %3002 = vrcp.f32 %v4274_v33  ;;  %v2945_v63 = vld [vmem:[%s4549_s1 + $0x4d8] sm:$0xf0]  ;;  %vm1699_vm0 = vweird.f32 %v4274_v33 }
  0xb2   :  { %1606 = vmatpush.bf16.msrb.mxu3 %v2616_v32  ;;  %v1341_v32 = vpop.f32.mrf.mxu2  ;;  %v1354_v42 = vpop.f32.mrf.mxu3  ;;  %v1703_v9 = vand.u32 2147483647, %v4274_v33  ;;  %v1705_v15 = vand.u32 2147483648, %v4274_v33 }
  0xb4   :  { %1568 = vmatpush.bf16.msrb.mxu0 %v2144_v35  ;;  %v2307_v35 = vld [vmem:[%s4549_s1 + $0x2a0] sm:$0xf]  ;;  %vm4376_vm6 = vcmp.eq.f32.partialorder %v1703_v9, 8.507059e+37 }
  0xb5   :  { %1581 = vmatpush.bf16.msrb.mxu1 %v2560_v41  ;;  %1594 = vmatpush.bf16.msrb.mxu2 %v2148_v46  ;;  %v2408_v41 = vor.u32 %v2899_v27, %v2405_v28  ;;  %v2308_v43 = vor.u32 %v2880_v37, %v2307_v35  ;;  %v3001_v46 = vpop.eup %3000  ;;  %v2047_v27 = vld [vmem:[%s4549_s1 + $0x98] sm:$0xf] }
  0xb6   :  { %1607 = vmatpush.bf16.msrb.mxu3 %v2564_v48  ;;  %v2971_v48 = vld [vmem:[%s4549_s1 + $0x5a8] sm:$0xf0]  ;;  %v4302_v49 = vadd.f32 1.0, %v3001_v46 }
  0xb7   :  { %v2672_v0 = vor.u32 %v2971_v48, %v2671_v47  ;;  %v1995_v48 = vld [vmem:[%s4549_s1 + $0x30] sm:$0xf] }
  0xb8   :  { %1569 = vmatpush.bf16.msrb.mxu0 %v2092_v51  ;;  %v4306_v51 = vpop.eup %3002  ;;  %3004 = vrcp.f32 %v4302_v49  ;;  %vm1714_vm2 = vweird.f32 %v4302_v49  ;;  %v1718_v12 = vand.u32 2147483647, %v4302_v49  ;;  %v1720_v13 = vand.u32 2147483648, %v4302_v49 }
  0xb9   :  { %1582 = vmatpush.bf16.msrb.mxu1 %v2508_v53  ;;  %1595 = vmatpush.bf16.msrb.mxu2 %v2096_v62  ;;  %v2854_v53 = vld [vmem:[%s4549_s1 + $0x200] sm:$0xf0]  ;;  %v1695_v54 = vmul.f32 %v4306_v51, %v4274_v33  ;;  %v2567_v62 = vld [vmem:[%s4549_s1 + $0x4a8] sm:$0xf]  ;;  %vm1700_vm1 = vweird.f32 %v4306_v51  ;;  %v2815_v33 = vld [vmem:[%s4549_s1 + $0xc8] sm:$0xf0] }
  0xba   :  { %1608 = vmatpush.bf16.msrb.mxu3 %v2512_v1  ;;  %v2204_v61 = vor.u32 %v2854_v53, %v2203_v52  ;;  %v2620_v1 = vor.u32 %v2958_v56, %v2619_v55  ;;  %v2568_v5 = vor.u32 %v2945_v63, %v2567_v62  ;;  %vm4363_vm4 = vmor %vm1699_vm0, %vm1700_vm1  ;;  %v1721_v29 = vor.u32 1.1754944e-38, %v1720_v13  ;;  %v2906_v52 = vld [vmem:[%s4549_s1 + $0x3a0] sm:$0xf0] }
  0xbb   :  { %v1696_v60 = vsub.f32 1.0, %v1695_v54  ;;  %vm1719_vm7 = vcmp.eq.f32.partialorder %v1718_v12, 8.507059e+37  ;;  %vm1915_vm1 = vcmask 1042434  }
  0xbc   :  { %1570 = vmatpush.bf16.msrb.mxu0 %v2040_v4  ;;  %v2152_v4 = vor.u32 %v2841_v59, %v2151_v57 }
  0xbd   :  { %1583 = vmatpush.bf16.msrb.mxu1 %v2456_v11  ;;  %1596 = vmatpush.bf16.msrb.mxu2 %v2044_v21  ;;  %v1697_v2 = vmul.f32 %v4306_v51, %v1696_v60  ;;  %v2099_v11 = vld [vmem:[%s4549_s1 + $0x100] sm:$0xf] }
  0xbe   :  { %1609 = vmatpush.bf16.msrb.mxu3 %v2460_v23  ;;  %v3005_v3 = vpop.eup %3004  ;;  %v2515_v21 = vld [vmem:[%s4549_s1 + $0x440] sm:$0xf] }
  0xbf   :  { %v1710_v8 = vmul.f32 %v3005_v3, %v4302_v49  ;;  %vm1715_vm3 = vweird.f32 %v3005_v3  ;;  %v1698_v19 = vadd.f32 %v4306_v51, %v1697_v2  ;;  %v2516_v32 = vor.u32 %v2932_v22, %v2515_v21  ;;  %v2802_v49 = vld [vmem:[%s4549_s1 + $0x60] sm:$0xf0] }
  0xc0   :  { %1571 = vmatpush.bf16.msrb.mxu0 %v1988_v26  ;;  %v1365_v7 = vpop.f32.mrf.mxu0  ;;  %v2100_v26 = vor.u32 %v2828_v17, %v2099_v11  ;;  %vm4372_vm5 = vmor %vm1714_vm2, %vm1715_vm3  ;;  %v1996_v56 = vor.u32 %v2802_v49, %v1995_v48  ;;  %vm1917_vm2 = vcmask 1041408  }
  0xc1   :  { %1584 = vmatpush.bf16.msrb.mxu1 %v2404_v30  ;;  %1597 = vmatpush.bf16.msrb.mxu2 %v1992_v38  ;;  %v1366_v10 = vadd.f32 %v1365_v7, %v4180_v36  ;;  %v1711_v18 = vsub.f32 1.0, %v1710_v8  ;;  %v1702_v35 = vsel %vm4363_vm4, %v4306_v51, %v1698_v19  ;;  %v2463_v38 = vld [vmem:[%s4549_s1 + $0x3d8] sm:$0xf] }
  0xc2   :  { %1610 = vmatpush.bf16.msrb.mxu3 %v2408_v41  ;;  %v2464_v47 = vor.u32 %v2919_v39, %v2463_v38 }
  0xc3   :  { %1572 = vmatmul.bf16.vlgmr.msrb.gmra.mxu0 %v4115_v6  ;;  %v1378_v16 = vpop.f32.mrf.mxu1  ;;  %v1712_v24 = vmul.f32 %v3005_v3, %v1711_v18 }
  0xc4   :  { %1616 = vmatpush.bf16.msra.mxu0 %v2360_v31  ;;  %1585 = vmatmul.bf16.vlgmr.msrb.gmra.mxu1 %v4131_v14  ;;  %v1379_v20 = vadd.f32 %v1378_v16, %v1366_v10  ;;  %v1706_v31 = vor.u32 1.1754944e-38, %v1705_v15 }
  0xc5   :  { %1629 = vmatpush.bf16.msra.mxu1 %v2776_v34  ;;  %1598 = vmatmul.bf16.vlgmr.msrb.gmra.mxu2 %v4115_v6  ;;  %v1713_v34 = vadd.f32 %v3005_v3, %v1712_v24 }
  0xc6   :  { %1611 = vmatmul.bf16.vlgmr.msrb.gmra.mxu3 %v4131_v14  ;;  %v2779_v25 = vmul.f32 -1.442695, %v1379_v20  ;;  %v1707_v58 = vsel %vm4376_vm6, %v1706_v31, %v1702_v35 }
  0xc7   :  { %v1391_v37 = vpop.f32.mrf.mxu2  ;;  %v1717_v42 = vsel %vm4372_vm5, %v3005_v3, %v1713_v34 }
  0xc8   :  { %1617 = vmatpush.bf16.msra.mxu0 %v2308_v43  ;;  %3006 = vpow2.f32 %v2779_v25  ;;  %v1392_v40 = vadd.f32 %v1391_v37, %v4180_v36  ;;  %v1367_v41 = vpop.f32.mrf.mxu0  ;;  %v1722_v45 = vsel %vm1719_vm7, %v1721_v29, %v1717_v42 }
  0xc9   :  { %1630 = vmatpush.bf16.msra.mxu1 %v2724_v44  ;;  %v2048_v44 = vor.u32 %v2815_v33, %v2047_v27  ;;  %v1902_v51 = vrot.slane %v1722_v45, 7 }
  0xca   :  { %v1404_v43 = vpop.f32.mrf.mxu3 }
  0xcb   :  { %v1405_v46 = vadd.f32 %v1404_v43, %v1392_v40  ;;  %v1914_v55 = vsel %vm1913_vm8, %v1707_v58, %v1902_v51 }
  0xcc   :  { %1618 = vmatpush.bf16.msra.mxu0 %v2256_v50  ;;  %v1380_v50 = vpop.f32.mrf.mxu1 }
  0xcd   :  { %1631 = vmatpush.bf16.msra.mxu1 %v2672_v0  ;;  %v2411_v0 = vld [vmem:[%s4549_s1 + $0x370] sm:$0xf]  ;;  %v2780_v53 = vmul.f32 -1.442695, %v1405_v46 }
  0xce   :  { %v3007_v54 = vpop.eup %3006  ;;  %v2412_v59 = vor.u32 %v2906_v52, %v2411_v0 }
  0xcf   :  { %v1683_v57 = vadd.f32 1.0, %v3007_v54  ;;  %3008 = vpow2.f32 %v2780_v53  ;;  %v1393_v60 = vpop.f32.mrf.mxu2 }
  0xd0   :  { %1619 = vmatpush.bf16.msra.mxu0 %v2204_v61 }
  0xd1   :  { %1632 = vmatpush.bf16.msra.mxu1 %v2620_v1  ;;  %3010 = vrcp.f32 %v1683_v57  ;;  %vm1729_vm9 = vweird.f32 %v1683_v57  ;;  %v1735_v7 = vand.u32 2147483648, %v1683_v57 }
  0xd2   :  { %v1406_v61 = vpop.f32.mrf.mxu3 }
  0xd3   :  { %v1736_v12 = vor.u32 1.1754944e-38, %v1735_v7 }
  0xd4   :  { %1620 = vmatpush.bf16.msra.mxu0 %v2152_v4 }
  0xd5   :  { %1633 = vmatpush.bf16.msra.mxu1 %v2568_v5  ;;  %v3009_v62 = vpop.eup %3008  ;;  %v1733_v5 = vand.u32 2147483647, %v1683_v57 }
  0xd6   :  { %v1684_v63 = vadd.f32 1.0, %v3009_v62 }
  0xd7   :  { %v3011_v1 = vpop.eup %3010  ;;  %vm1734_vm12 = vcmp.eq.f32.partialorder %v1733_v5, 8.507059e+37 }
  0xd8   :  { %1621 = vmatpush.bf16.msra.mxu0 %v2100_v26  ;;  %v1725_v2 = vmul.f32 %v3011_v1, %v1683_v57  ;;  %3012 = vrcp.f32 %v1684_v63  ;;  %vm1730_vm10 = vweird.f32 %v3011_v1  ;;  %vm1744_vm13 = vweird.f32 %v1684_v63 }
  0xd9   :  { %1634 = vmatpush.bf16.msra.mxu1 %v2516_v32  ;;  %vm1731_vm11 = vmor %vm1729_vm9, %vm1730_vm10  ;;  %v1748_v15 = vand.u32 2147483647, %v1684_v63 }
  0xda   :  { %v1726_v3 = vsub.f32 1.0, %v1725_v2 }
  0xdb   :  { %vm1749_vm0 = vcmp.eq.f32.partialorder %v1748_v15, 8.507059e+37 }
  0xdc   :  { %1622 = vmatpush.bf16.msra.mxu0 %v2048_v44  ;;  %v1727_v4 = vmul.f32 %v3011_v1, %v1726_v3 }
  0xdd   :  { %1635 = vmatpush.bf16.msra.mxu1 %v2464_v47 }
  0xde   :  { %v3013_v8 = vpop.eup %3012  ;;  %v1728_v9 = vadd.f32 %v3011_v1, %v1727_v4 }
  0xdf   :  { %v1740_v10 = vmul.f32 %v3013_v8, %v1684_v63  ;;  %vm1745_vm14 = vweird.f32 %v3013_v8 }
  0xe0   :  { %1623 = vmatpush.bf16.msra.mxu0 %v1996_v56  ;;  %v1417_v11 = vpop.f32.mrf.mxu0  ;;  %v1732_v13 = vsel %vm1731_vm11, %v3011_v1, %v1728_v9  ;;  %vm1746_vm15 = vmor %vm1744_vm13, %vm1745_vm14 }
  0xe1   :  { %1636 = vmatpush.bf16.msra.mxu1 %v2412_v59  ;;  %v1737_v18 = vsel %vm1734_vm12, %v1736_v12, %v1732_v13  ;;  %v1418_v24 = vadd.f32 %v1417_v11, %v4180_v36 }
  0xe2   :  { %v1903_v22 = vrot.slane %v1737_v18, 6 }
  0xe3   :  { %1624 = vmatmul.bf16.vlgmr.msra.gmra.mxu0 %v4115_v6  ;;  %v1750_v6 = vand.u32 2147483648, %v1684_v63  ;;  %v1430_v16 = vpop.f32.mrf.mxu1 }
  0xe4   :  { %1637 = vmatmul.bf16.vlgmr.msra.gmra.mxu1 %v4131_v14  ;;  %v1741_v14 = vsub.f32 1.0, %v1740_v10  ;;  %v1431_v32 = vadd.f32 %v1430_v16, %v1418_v24 }
  0xe5   :  { %v1751_v19 = vor.u32 1.1754944e-38, %v1750_v6 }
  0xe6   :  { %v1742_v17 = vmul.f32 %v3013_v8, %v1741_v14  ;;  %v2781_v37 = vmul.f32 -1.442695, %v1431_v32 }
  0xe7   :  { %v1443_v21 = vpop.f32.mrf.mxu2 }
  0xe8   :  { %v1743_v20 = vadd.f32 %v3013_v8, %v1742_v17  ;;  %v1419_v26 = vpop.f32.mrf.mxu0  ;;  %v1444_v28 = vadd.f32 %v1443_v21, %v4180_v36  ;;  %3014 = vpow2.f32 %v2781_v37 }
  0xea   :  { %v1747_v23 = vsel %vm1746_vm15, %v3013_v8, %v1743_v20  ;;  %v1456_v25 = vpop.f32.mrf.mxu3 }
  0xeb   :  { %v1752_v27 = vsel %vm1749_vm0, %v1751_v19, %v1747_v23  ;;  %v1432_v30 = vpop.f32.mrf.mxu1  ;;  %v1457_v34 = vadd.f32 %v1456_v25, %v1444_v28 }
  0xec   :  { %v1904_v29 = vrot.slane %v1752_v27, 5 }
  0xed   :  { %v2782_v39 = vmul.f32 -1.442695, %v1457_v34 }
  0xee   :  { %v1916_v31 = vsel %vm1915_vm1, %v1903_v22, %v1904_v29  ;;  %v3015_v40 = vpop.eup %3014 }
  0xef   :  { %v4415_v33 = vsel %vm1917_vm2, %v1914_v55, %v1916_v31  ;;  %v1445_v35 = vpop.f32.mrf.mxu2  ;;  %3016 = vpow2.f32 %v2782_v39  ;;  %v1685_v42 = vadd.f32 1.0, %v3015_v40 }
  0xf1   :  { %3018 = vrcp.f32 %v1685_v42  ;;  %vm1759_vm3 = vweird.f32 %v1685_v42  ;;  %v1763_v8 = vand.u32 2147483647, %v1685_v42  ;;  %v1765_v11 = vand.u32 2147483648, %v1685_v42 }
  0xf2   :  { %v1458_v38 = vpop.f32.mrf.mxu3 }
  0xf3   :  { %vm4433_vm12 = vcmp.eq.f32.partialorder %v1763_v8, 8.507059e+37  ;;  %v1766_v22 = vor.u32 1.1754944e-38, %v1765_v11 }
  0xf5   :  { %v3017_v41 = vpop.eup %3016 }
  0xf6   :  { %v1686_v44 = vadd.f32 1.0, %v3017_v41 }
  0xf7   :  { %v4419_v0 = vpop.eup %3018 }
  0xf8   :  { %3020 = vrcp.f32 %v1686_v44  ;;  %v1755_v56 = vmul.f32 %v4419_v0, %v1685_v42  ;;  %vm1760_vm4 = vweird.f32 %v4419_v0  ;;  %vm1774_vm5 = vweird.f32 %v1686_v44 }
  0xf9   :  { %v1778_v12 = vand.u32 2147483647, %v1686_v44  ;;  %v1780_v6 = vand.u32 2147483648, %v1686_v44  ;;  %vm4425_vm7 = vmor %vm1759_vm3, %vm1760_vm4 }
  0xfa   :  { %v1756_v63 = vsub.f32 1.0, %v1755_v56 }
  0xfb   :  { %vm4437_vm13 = vcmp.eq.f32.partialorder %v1778_v12, 8.507059e+37  ;;  %v1781_v24 = vor.u32 1.1754944e-38, %v1780_v6 }
  0xfc   :  { %v1757_v3 = vmul.f32 %v4419_v0, %v1756_v63 }
  0xfe   :  { %v3021_v53 = vpop.eup %3020  ;;  %v1758_v10 = vadd.f32 %v4419_v0, %v1757_v3 }
  0xff   :  { %v1770_v59 = vmul.f32 %v3021_v53, %v1686_v44  ;;  %vm1775_vm6 = vweird.f32 %v3021_v53 }
 0x100   :  { %v1469_v43 = vpop.f32.mrf.mxu0  ;;  %vm4429_vm11 = vmor %vm1774_vm5, %vm1775_vm6  ;;  %v1762_v27 = vsel %vm4425_vm7, %v4419_v0, %v1758_v10  ;;  %vm1919_vm5 = vcmask 1044484   ;;  %vm1921_vm6 = vcmask 1046534   ;;  %vm1923_vm7 = vcmask 1045508  }
 0x101   :  { %v1470_v45 = vadd.f32 %v1469_v43, %v4180_v36  ;;  %v1771_v1 = vsub.f32 1.0, %v1770_v59  ;;  %v1767_v40 = vsel %vm4433_vm12, %v1766_v22, %v1762_v27 }
 0x103   :  { %v1482_v58 = vpop.f32.mrf.mxu1  ;;  %v1772_v5 = vmul.f32 %v3021_v53, %v1771_v1 }
 0x104   :  { %v1483_v46 = vadd.f32 %v1482_v58, %v1470_v45 }
 0x105   :  { %v1773_v14 = vadd.f32 %v3021_v53, %v1772_v5 }
 0x106   :  { %v2783_v47 = vmul.f32 -1.442695, %v1483_v46 }
 0x107   :  { %v1495_v48 = vpop.f32.mrf.mxu2  ;;  %v1777_v28 = vsel %vm4429_vm11, %v3021_v53, %v1773_v14 }
 0x108   :  { %v1496_v49 = vadd.f32 %v1495_v48, %v4180_v36  ;;  %3022 = vpow2.f32 %v2783_v47  ;;  %v1471_v51 = vpop.f32.mrf.mxu0  ;;  %v1782_v41 = vsel %vm4437_vm13, %v1781_v24, %v1777_v28  ;;  %v1905_v47 = vrot.slane %v1767_v40, 4 }
 0x109   :  { %v1906_v48 = vrot.slane %v1782_v41, 3 }
 0x10a   :  { %v1508_v50 = vpop.f32.mrf.mxu3 }
 0x10b   :  { %v1509_v52 = vadd.f32 %v1508_v50, %v1496_v49  ;;  %v1484_v54 = vpop.f32.mrf.mxu1  ;;  %v1920_v53 = vsel %vm1919_vm5, %v1905_v47, %v1906_v48 }
 0x10d   :  { %v2784_v55 = vmul.f32 -1.442695, %v1509_v52 }
 0x10e   :  { %v3023_v57 = vpop.eup %3022 }
 0x10f   :  { %3024 = vpow2.f32 %v2784_v55  ;;  %v1687_v60 = vadd.f32 1.0, %v3023_v57  ;;  %v1497_v61 = vpop.f32.mrf.mxu2 }
 0x111   :  { %3026 = vrcp.f32 %v1687_v60  ;;  %vm1789_vm9 = vweird.f32 %v1687_v60  ;;  %v1793_v17 = vand.u32 2147483647, %v1687_v60  ;;  %v1795_v18 = vand.u32 2147483648, %v1687_v60 }
 0x112   :  { %v1510_v62 = vpop.f32.mrf.mxu3 }
 0x113   :  { %vm1794_vm15 = vcmp.eq.f32.partialorder %v1793_v17, 8.507059e+37  ;;  %v1796_v31 = vor.u32 1.1754944e-38, %v1795_v18 }
 0x115   :  { %v3025_v2 = vpop.eup %3024 }
 0x116   :  { %v1688_v4 = vadd.f32 1.0, %v3025_v2 }
 0x117   :  { %v3027_v7 = vpop.eup %3026 }
 0x118   :  { %3028 = vrcp.f32 %v1688_v4  ;;  %v1785_v9 = vmul.f32 %v3027_v7, %v1687_v60  ;;  %vm1790_vm10 = vweird.f32 %v3027_v7  ;;  %vm1804_vm0 = vweird.f32 %v1688_v4 }
 0x119   :  { %vm4441_vm14 = vmor %vm1789_vm9, %vm1790_vm10  ;;  %v1810_v32 = vand.u32 2147483648, %v1688_v4  ;;  %v1808_v37 = vand.u32 2147483647, %v1688_v4  ;;  %vm1925_vm9 = vcmask 1043456  }
 0x11a   :  { %v1786_v15 = vsub.f32 1.0, %v1785_v9 }
 0x11b   :  { %v1811_v43 = vor.u32 1.1754944e-38, %v1810_v32  ;;  %vm1809_vm4 = vcmp.eq.f32.partialorder %v1808_v37, 8.507059e+37 }
 0x11c   :  { %v1787_v19 = vmul.f32 %v3027_v7, %v1786_v15 }
 0x11e   :  { %v3029_v20 = vpop.eup %3028  ;;  %v1788_v29 = vadd.f32 %v3027_v7, %v1787_v19 }
 0x11f   :  { %v1800_v30 = vmul.f32 %v3029_v20, %v1688_v4  ;;  %vm1805_vm1 = vweird.f32 %v3029_v20 }
 0x120   :  { %v1521_v26 = vpop.f32.mrf.mxu0  ;;  %v1792_v34 = vsel %vm4441_vm14, %v3027_v7, %v1788_v29  ;;  %vm1806_vm3 = vmor %vm1804_vm0, %vm1805_vm1 }
 0x121   :  { %v1801_v35 = vsub.f32 1.0, %v1800_v30  ;;  %v1797_v42 = vsel %vm1794_vm15, %v1796_v31, %v1792_v34  ;;  %v1522_v2 = vadd.f32 %v1521_v26, %v4180_v36 }
 0x122   :  { %v1907_v49 = vrot.slane %v1797_v42, 2 }
 0x123   :  { %v1534_v38 = vpop.f32.mrf.mxu1  ;;  %v1802_v39 = vmul.f32 %v3029_v20, %v1801_v35 }
 0x124   :  { %v1535_v10 = vadd.f32 %v1534_v38, %v1522_v2 }
 0x125   :  { %v1803_v44 = vadd.f32 %v3029_v20, %v1802_v39 }
 0x126   :  { %v2785_v13 = vmul.f32 -1.442695, %v1535_v10 }
 0x127   :  { %v1547_v45 = vpop.f32.mrf.mxu2  ;;  %v1807_v50 = vsel %vm1806_vm3, %v3029_v20, %v1803_v44 }
 0x128   :  { %v1523_v46 = vpop.f32.mrf.mxu0  ;;  %v1812_v51 = vsel %vm1809_vm4, %v1811_v43, %v1807_v50  ;;  %v1548_v62 = vadd.f32 %v1547_v45, %v4180_v36 }
 0x129   :  { %v1908_v0 = vrot.slane %v1812_v51, 1 }
 0x12a   :  { %v1560_v58 = vpop.f32.mrf.mxu3 }
 0x12b   :  { %v1536_v52 = vpop.f32.mrf.mxu1  ;;  %v1922_v54 = vsel %vm1921_vm6, %v1907_v49, %v1908_v0  ;;  %v1561_v1 = vadd.f32 %v1560_v58, %v1548_v62 }
 0x12c   :  { %v1924_v55 = vsel %vm1923_vm7, %v1920_v53, %v1922_v54 }
 0x12d   :  { %v1926_v56 = vsel %vm1925_vm9, %v4415_v33, %v1924_v55  ;;  %v2786_v9 = vmul.f32 -1.442695, %v1561_v1 }
 0x12e   :  { %1935 = vst [vmem:[%s4552_s3] sm:$0xff] %v1926_v56 }
 0x12f   :  { %v1549_v57 = vpop.f32.mrf.mxu2  ;;  %3030 = vpow2.f32 %v2786_v9 }
 0x132   :  { %v1562_v59 = vpop.f32.mrf.mxu3 }
 0x135   :  { %v3031_v16 = vpop.eup %3030 }
 0x136   :  { %v1690_v18 = vadd.f32 1.0, %v3031_v16 }
 0x138   :  { %vm1834_vm10 = vweird.f32 %v1690_v18  ;;  %v1838_v47 = vand.u32 2147483647, %v1690_v18  ;;  %v1840_v48 = vand.u32 2147483648, %v1690_v18 }
 0x13a   :  { %v1841_v57 = vor.u32 1.1754944e-38, %v1840_v48  ;;  %vm1839_vm5 = vcmp.eq.f32.partialorder %v1838_v47, 8.507059e+37 }
 0x140   :  { %v1573_v60 = vpop.f32.mrf.mxu0 }
 0x141   :  { %v1586_v61 = vpop.f32.mrf.mxu1  ;;  %v1574_v63 = vadd.f32 %v1573_v60, %v4180_v36 }
 0x143   :  { %v1587_v3 = vadd.f32 %v1586_v61, %v1574_v63 }
 0x145   :  { %v2787_v12 = vmul.f32 -1.442695, %v1587_v3 }
 0x147   :  { %3032 = vpow2.f32 %v2787_v12 }
 0x148   :  { %v1575_v4 = vpop.f32.mrf.mxu0  ;;  %v1599_v5 = vpop.f32.mrf.mxu2 }
 0x149   :  { %v1588_v7 = vpop.f32.mrf.mxu1  ;;  %v1600_v33 = vadd.f32 %v1599_v5, %v4180_v36  ;;  %v1612_v8 = vpop.f32.mrf.mxu3 }
 0x14b   :  { %v1613_v11 = vadd.f32 %v1612_v8, %v1600_v33 }
 0x14d   :  { %v2788_v6 = vmul.f32 -1.442695, %v1613_v11  ;;  %v3033_v17 = vpop.eup %3032 }
 0x14e   :  { %v4464_v21 = vadd.f32 1.0, %v3033_v17 }
 0x14f   :  { %3034 = vpow2.f32 %v2788_v6 }
 0x150   :  { %v1601_v14 = vpop.f32.mrf.mxu2  ;;  %3036 = vpow2.f32 %v2785_v13  ;;  %vm1849_vm12 = vweird.f32 %v4464_v21  ;;  %v1855_v53 = vand.u32 2147483648, %v4464_v21  ;;  %v1853_v55 = vand.u32 2147483647, %v4464_v21 }
 0x151   :  { %v1614_v15 = vpop.f32.mrf.mxu3  ;;  %3038 = vrcp.f32 %v1690_v18 }
 0x152   :  { %3040 = vrcp.f32 %v4464_v21  ;;  %v1856_v4 = vor.u32 1.1754944e-38, %v1855_v53  ;;  %vm1854_vm9 = vcmp.eq.f32.partialorder %v1853_v55, 8.507059e+37 }
 0x155   :  { %v3035_v19 = vpop.eup %3034 }
 0x156   :  { %v3037_v20 = vpop.eup %3036  ;;  %v4466_v22 = vadd.f32 1.0, %v3035_v19 }
 0x157   :  { %v4468_v23 = vadd.f32 1.0, %v3037_v20  ;;  %v3039_v28 = vpop.eup %3038 }
 0x158   :  { %3042 = vrcp.f32 %v4466_v22  ;;  %v4474_v30 = vpop.eup %3040  ;;  %v1830_v31 = vmul.f32 %v3039_v28, %v1690_v18  ;;  %vm1835_vm11 = vweird.f32 %v3039_v28  ;;  %vm1864_vm0 = vweird.f32 %v4466_v22 }
 0x159   :  { %3044 = vrcp.f32 %v4468_v23  ;;  %vm1850_vm13 = vweird.f32 %v4474_v30  ;;  %vm4493_vm14 = vmor %vm1834_vm10, %vm1835_vm11  ;;  %vm1819_vm15 = vweird.f32 %v4468_v23  ;;  %v1825_v52 = vand.u32 2147483648, %v4468_v23 }
 0x15a   :  { %v1831_v38 = vsub.f32 1.0, %v1830_v31  ;;  %vm4508_vm4 = vmor %vm1849_vm12, %vm1850_vm13  ;;  %v1868_v60 = vand.u32 2147483647, %v4466_v22  ;;  %v1870_v61 = vand.u32 2147483648, %v4466_v22  ;;  %v1823_v3 = vand.u32 2147483647, %v4468_v23 }
 0x15b   :  { %v1826_v33 = vor.u32 1.1754944e-38, %v1825_v52 }
 0x15c   :  { %v1832_v44 = vmul.f32 %v3039_v28, %v1831_v38  ;;  %vm1869_vm10 = vcmp.eq.f32.partialorder %v1868_v60, 8.507059e+37  ;;  %v1871_v11 = vor.u32 1.1754944e-38, %v1870_v61  ;;  %vm1824_vm12 = vcmp.eq.f32.partialorder %v1823_v3, 8.507059e+37 }
 0x15e   :  { %v4476_v32 = vpop.eup %3042  ;;  %v1833_v49 = vadd.f32 %v3039_v28, %v1832_v44 }
 0x15f   :  { %v4478_v35 = vpop.eup %3044  ;;  %v1860_v39 = vmul.f32 %v4476_v32, %v4466_v22  ;;  %vm1865_vm1 = vweird.f32 %v4476_v32 }
 0x160   :  { %v1625_v24 = vpop.f32.mrf.mxu0  ;;  %v1815_v40 = vmul.f32 %v4478_v35, %v4468_v23  ;;  %vm1820_vm3 = vweird.f32 %v4478_v35  ;;  %v1837_v62 = vsel %vm4493_vm14, %v3039_v28, %v1833_v49  ;;  %vm4522_vm6 = vmor %vm1864_vm0, %vm1865_vm1  ;;  %vm1929_vm0 = vcmask 1043459  }
 0x161   :  { %v1626_v25 = vadd.f32 %v1625_v24, %v4180_v36  ;;  %v1638_v26 = vpop.f32.mrf.mxu1  ;;  %v1845_v36 = vmul.f32 %v4474_v30, %v4464_v21  ;;  %v1861_v45 = vsub.f32 1.0, %v1860_v39  ;;  %vm4528_vm7 = vmor %vm1819_vm15, %vm1820_vm3  ;;  %v1842_v10 = vsel %vm1839_vm5, %v1841_v57, %v1837_v62 }
 0x162   :  { %v1816_v58 = vsub.f32 1.0, %v1815_v40  ;;  %v1909_v18 = vrot.slane %v1842_v10, 7  ;;  %v1936_v21 = vlaneseq  ;;  %vm1931_vm1 = vcmask 1042432  }
 0x163   :  { %v1639_v27 = vadd.f32 %v1638_v26, %v1626_v25  ;;  %v1846_v42 = vsub.f32 1.0, %v1845_v36  ;;  %v1862_v50 = vmul.f32 %v4476_v32, %v1861_v45 }
 0x164   :  { %v1817_v0 = vmul.f32 %v4478_v35, %v1816_v58  ;;  %vm1938_vm3 = vcmp.lt.s32.totalorder %v1936_v21, 544 }
 0x165   :  { %v2789_v29 = vmul.f32 -1.442695, %v1639_v27  ;;  %v1847_v46 = vmul.f32 %v4474_v30, %v1846_v42  ;;  %v1863_v63 = vadd.f32 %v4476_v32, %v1862_v50 }
 0x166   :  { %v1818_v2 = vadd.f32 %v4478_v35, %v1817_v0 }
 0x167   :  { %3046 = vpow2.f32 %v2789_v29  ;;  %v1848_v54 = vadd.f32 %v4474_v30, %v1847_v46  ;;  %v1867_v6 = vsel %vm4522_vm6, %v4476_v32, %v1863_v63 }
 0x168   :  { %v1627_v34 = vpop.f32.mrf.mxu0  ;;  %v1822_v15 = vsel %vm4528_vm7, %v4478_v35, %v1818_v2  ;;  %v1872_v19 = vsel %vm1869_vm10, %v1871_v11, %v1867_v6 }
 0x169   :  { %v1640_v37 = vpop.f32.mrf.mxu1  ;;  %v1852_v8 = vsel %vm4508_vm4, %v4474_v30, %v1848_v54  ;;  %v1827_v22 = vsel %vm1824_vm12, %v1826_v33, %v1822_v15  ;;  %v1911_v26 = vrot.slane %v1872_v19, 5 }
 0x16a   :  { %v1857_v16 = vsel %vm1854_vm9, %v1856_v4, %v1852_v8  ;;  %v1927_v28 = vsel %vm1913_vm8, %v1827_v22, %v1909_v18 }
 0x16b   :  { %v1910_v23 = vrot.slane %v1857_v16, 6 }
 0x16d   :  { %v3047_v41 = vpop.eup %3046  ;;  %v1928_v29 = vsel %vm1917_vm2, %v1927_v28, %v1910_v23 }
 0x16e   :  { %v4486_v43 = vadd.f32 1.0, %v3047_v41 }
 0x170   :  { %3048 = vrcp.f32 %v4486_v43  ;;  %v1885_v12 = vand.u32 2147483648, %v4486_v43  ;;  %v1883_v14 = vand.u32 2147483647, %v4486_v43  ;;  %vm1879_vm13 = vweird.f32 %v4486_v43 }
 0x172   :  { %v1886_v20 = vor.u32 1.1754944e-38, %v1885_v12  ;;  %vm1884_vm15 = vcmp.eq.f32.partialorder %v1883_v14, 8.507059e+37 }
 0x176   :  { %v3049_v56 = vpop.eup %3048 }
 0x177   :  { %v1875_v1 = vmul.f32 %v3049_v56, %v4486_v43  ;;  %vm1880_vm11 = vweird.f32 %v3049_v56 }
 0x178   :  { %vm1881_vm14 = vmor %vm1879_vm13, %vm1880_vm11 }
 0x179   :  { %v1876_v9 = vsub.f32 1.0, %v1875_v1 }
 0x17b   :  { %v1877_v13 = vmul.f32 %v3049_v56, %v1876_v9 }
 0x17d   :  { %v1878_v17 = vadd.f32 %v3049_v56, %v1877_v13 }
 0x17f   :  { %v1882_v24 = vsel %vm1881_vm14, %v3049_v56, %v1878_v17 }
 0x180   :  { %v1887_v25 = vsel %vm1884_vm15, %v1886_v20, %v1882_v24 }
 0x181   :  { %v1912_v27 = vrot.slane %v1887_v25, 4 }
 0x183   :  { %v1930_v30 = vsel %vm1929_vm0, %v1911_v26, %v1912_v27 }
 0x184   :  { %v1932_v31 = vsel %vm1931_vm1, %v1928_v29, %v1930_v30 }
 0x185   :  { %1940 = vst.msk [vmem:[%s4552_s3 + $0x8] sm:$0x1f] %vm1938_vm3, %v1932_v31 }

</bundles_post_ra>
